<compile_context>
chip_gen: v7x
topology: tpu7x:2x2x1
jax: 0.10.0
libtpu: 0.0.40
codegen_flags: <defaults>
</compile_context>

<pallas_src>
import functools

import jax
import jax.numpy as jnp
from jax import lax
from jax.experimental import pallas as pl
from jax.experimental.pallas import tpu as pltpu

C3, C4, C5 = 64, 160, 400              # regnet_x_400mf block2/3/4 channel counts
C3P, C4P, C5P = 128, 256, 512          # zero-padded (multiple-of-128) channel counts
OUT_CHANNELS = 64
VMEM_LIMIT = 32 * 1024 * 1024          # safe on v5e (128M phys) / v6e (128M) / v7x (64M)


def _round_up(x, m):
    return (x + m - 1) // m * m


# ---------------------------------------------------------------------------
# Kernel 1: M-tiled GEMM + bias (stand-in backbone 1x1 convs), bf16 in / f32 acc
# ---------------------------------------------------------------------------
def _gemm_bias_kernel(x_ref, w_ref, b_ref, o_ref):
    acc = jnp.dot(x_ref[...], w_ref[...], preferred_element_type=jnp.float32)
    o_ref[...] = (acc + b_ref[...]).astype(o_ref.dtype)


def gemm_bias(x2d, w, b, out_dtype=jnp.bfloat16, tile_m=512):
    """out = x2d @ w + b, tiled over rows.  x2d:(M,K) bf16, w:(K,N) bf16, b:(1,N) f32."""
    M, K = x2d.shape
    _, N = w.shape
    assert K % 128 == 0 and N % 128 == 0, "K/N must be pre-padded to multiples of 128"
    tm = min(tile_m, _round_up(M, 8))
    Mp = _round_up(M, tm)
    if Mp != M:
        x2d = jnp.pad(x2d, ((0, Mp - M), (0, 0)))
    bytes_acc = Mp * K * 2 + K * N * 2 + N * 4 + Mp * N * jnp.dtype(out_dtype).itemsize
    out = pl.pallas_call(
        _gemm_bias_kernel,
        out_shape=jax.ShapeDtypeStruct((Mp, N), out_dtype),
        grid=(Mp // tm,),
        in_specs=[
            pl.BlockSpec((tm, K), lambda i: (i, 0)),
            pl.BlockSpec((K, N), lambda i: (0, 0)),
            pl.BlockSpec((1, N), lambda i: (0, 0)),
        ],
        out_specs=pl.BlockSpec((tm, N), lambda i: (i, 0)),
        compiler_params=pltpu.CompilerParams(
            dimension_semantics=("parallel",), vmem_limit_bytes=VMEM_LIMIT),
        cost_estimate=pl.CostEstimate(flops=2 * Mp * K * N, transcendentals=0,
                                      bytes_accessed=bytes_acc),
    )(x2d, w, b)
    return out[:M] if Mp != M else out


# ---------------------------------------------------------------------------
# Kernel 2: fused FPN level = lateral 1x1 conv + bias (+ residual) + 3x3 merge conv
# The 64-wide intermediate stays in a VMEM scratch; the 3x3 conv is 9 shifted GEMMs
# on a row-padded copy, with per-row masks handling the left/right image borders.
# ---------------------------------------------------------------------------
def _fpn_level_kernel(W, P, has_res, *refs):
    if has_res:
        x_ref, latw_ref, latb_ref, mrgw_ref, mrgb_ref, r_ref, o_ref, pad_ref = refs
    else:
        x_ref, latw_ref, latb_ref, mrgw_ref, mrgb_ref, o_ref, pad_ref = refs
    HW, C = o_ref.shape

    # Lateral 1x1 conv (bf16 MXU, f32 accumulate) + bias (+ upsampled top-down residual).
    lat = jnp.dot(x_ref[...], latw_ref[...], preferred_element_type=jnp.float32)
    lat = lat + latb_ref[...]
    if has_res:
        lat = lat + r_ref[...]

    # Stage into a zero-row-padded VMEM scratch so vertical (dy) shifts read zeros.
    pad_ref[...] = jnp.zeros_like(pad_ref)
    pad_ref[P:P + HW, :] = lat.astype(pad_ref.dtype)

    # 3x3 merge conv: 9 shifted, border-masked GEMMs accumulated in f32.
    col = lax.broadcasted_iota(jnp.int32, (HW, 1), 0) % W      # w coordinate per row
    left_ok = col > 0
    right_ok = col < (W - 1)
    acc = jnp.zeros((HW, C), jnp.float32)
    taps = [(dy, dx) for dy in (-1, 0, 1) for dx in (-1, 0, 1)]
    for t, (dy, dx) in enumerate(taps):
        start = P + dy * W + dx                                # static offset
        tap = pad_ref[start:start + HW, :]
        if dx == -1:
            tap = jnp.where(left_ok, tap, jnp.zeros_like(tap))
        elif dx == 1:
            tap = jnp.where(right_ok, tap, jnp.zeros_like(tap))
        acc = acc + jnp.dot(tap, mrgw_ref[t * C:(t + 1) * C, :],
                            preferred_element_type=jnp.float32)
    o_ref[...] = acc + mrgb_ref[...]


def fpn_level(c_feat, latw, latb, mrgw, mrgb, residual=None):
    """c_feat:(B,H,W,Cp) bf16 -> fused lateral+merge output (B,H,W,out_channels) f32."""
    B, H, W, Cp = c_feat.shape
    HW = H * W
    C = mrgw.shape[1]
    assert HW % 8 == 0, "per-image row count must be a multiple of 8 (use H=W>=128 input)"
    P = _round_up(W + 1, 8)                                    # top/bottom zero-row pad
    x2d = c_feat.reshape(B * HW, Cp).astype(jnp.bfloat16)

    inputs = [x2d, latw, latb, mrgw, mrgb]
    in_specs = [
        pl.BlockSpec((HW, Cp), lambda b: (b, 0)),
        pl.BlockSpec(latw.shape, lambda b: (0, 0)),
        pl.BlockSpec(latb.shape, lambda b: (0, 0)),
        pl.BlockSpec(mrgw.shape, lambda b: (0, 0)),
        pl.BlockSpec(mrgb.shape, lambda b: (0, 0)),
    ]
    has_res = residual is not None
    if has_res:
        r2d = residual.reshape(B * HW, C).astype(jnp.float32)
        inputs.append(r2d)
        in_specs.append(pl.BlockSpec((HW, C), lambda b: (b, 0)))

    flops = B * (2 * HW * Cp * C + 9 * 2 * HW * C * C)
    bytes_acc = (x2d.size * 2 + latw.size * 2 + mrgw.size * 2 +
                 (latb.size + mrgb.size) * 4 +
                 B * HW * C * 4 * (2 if has_res else 1))

    out = pl.pallas_call(
        functools.partial(_fpn_level_kernel, W, P, has_res),
        out_shape=jax.ShapeDtypeStruct((B * HW, C), jnp.float32),
        grid=(B,),
        in_specs=in_specs,
        out_specs=pl.BlockSpec((HW, C), lambda b: (b, 0)),
        scratch_shapes=[pltpu.VMEM((HW + 2 * P, C), jnp.bfloat16)],
        compiler_params=pltpu.CompilerParams(
            dimension_semantics=("parallel",), vmem_limit_bytes=VMEM_LIMIT),
        cost_estimate=pl.CostEstimate(flops=flops, transcendentals=0,
                                      bytes_accessed=bytes_acc),
    )(*inputs)
    return out.reshape(B, H, W, C)


# ---------------------------------------------------------------------------
# XLA-side glue (layout only): space-to-depth, nearest 2x upsample, weight padding
# ---------------------------------------------------------------------------
def space_to_depth(x, r):
    B, H, W, C = x.shape
    x = x.reshape(B, H // r, r, W // r, r, C)
    x = jnp.transpose(x, (0, 1, 3, 2, 4, 5))
    return x.reshape(B, H // r, W // r, r * r * C)


def nearest_up2(x):
    # F.interpolate(..., mode='nearest', size=2*W) on square feature maps.
    return jnp.repeat(jnp.repeat(x, 2, axis=1), 2, axis=2)


def _pad_grouped_weight(w, groups, cin, cinp, coutp):
    # (groups*cin, cout) -> zero-padded (groups*cinp, coutp), matching the channel
    # interleaving produced by space_to_depth on channel-padded features.
    cout = w.shape[1]
    w = w.reshape(groups, cin, cout)
    w = jnp.pad(w, ((0, 0), (0, cinp - cin), (0, coutp - cout)))
    return w.reshape(groups * cinp, coutp)


def init_params(key):
    ks = iter(jax.random.split(key, 32))

    def rnd(shape, scale=0.05):
        return scale * jax.random.normal(next(ks), shape, dtype=jnp.float32)

    p = {}
    # Stand-in backbone stages (space-to-depth + 1x1 conv); weights K/N zero-padded to
    # multiples of 128 once at init (review: pad MXU K, lane-dense intermediate stores).
    p["bb3_w"] = _pad_grouped_weight(rnd((64 * 3, C3)), 64, 3, 4, C3P).astype(jnp.bfloat16)
    p["bb3_b"] = jnp.pad(rnd((C3,)), (0, C3P - C3)).reshape(1, C3P)
    p["bb4_w"] = _pad_grouped_weight(rnd((4 * C3, C4)), 4, C3, C3P, C4P).astype(jnp.bfloat16)
    p["bb4_b"] = jnp.pad(rnd((C4,)), (0, C4P - C4)).reshape(1, C4P)
    p["bb5_w"] = _pad_grouped_weight(rnd((4 * C4, C5)), 4, C4, C4P, C5P).astype(jnp.bfloat16)
    p["bb5_b"] = jnp.pad(rnd((C5,)), (0, C5P - C5)).reshape(1, C5P)
    # FPN lateral 1x1 convs (zero-padded K rows) and 3x3 merge convs (HWIO, tap-major).
    for lvl, (c, cp) in {3: (C3, C3P), 4: (C4, C4P), 5: (C5, C5P)}.items():
        p[f"lat{lvl}_w"] = jnp.pad(rnd((c, OUT_CHANNELS)),
                                   ((0, cp - c), (0, 0))).astype(jnp.bfloat16)
        p[f"lat{lvl}_b"] = rnd((OUT_CHANNELS,)).reshape(1, OUT_CHANNELS)
        p[f"mrg{lvl}_w"] = rnd((3, 3, OUT_CHANNELS, OUT_CHANNELS)).reshape(
            9 * OUT_CHANNELS, OUT_CHANNELS).astype(jnp.bfloat16)
        p[f"mrg{lvl}_b"] = rnd((OUT_CHANNELS,)).reshape(1, OUT_CHANNELS)
    return p


# ---------------------------------------------------------------------------
# Forward pass (mirrors DetectorBackboneWithFPN.forward)
# ---------------------------------------------------------------------------
def detector_backbone_with_fpn_forward(params, images_nchw):
    x = jnp.transpose(images_nchw, (0, 2, 3, 1)).astype(jnp.float32)   # NCHW -> NHWC
    x = jnp.pad(x, ((0, 0), (0, 0), (0, 0), (0, 1)))                   # 3 -> 4 channels

    def backbone_stage(feat, r, w, b):
        B, H, W, _ = feat.shape
        s = space_to_depth(feat, r)
        x2d = s.reshape(B * (H // r) * (W // r), s.shape[-1]).astype(jnp.bfloat16)
        y2d = gemm_bias(x2d, w, b)                                     # bf16, lane-dense
        return y2d.reshape(B, H // r, W // r, w.shape[1])

    c3 = backbone_stage(x, 8, params["bb3_w"], params["bb3_b"])        # (B,H/8, W/8, 128)
    c4 = backbone_stage(c3, 2, params["bb4_w"], params["bb4_b"])       # (B,H/16,W/16,256)
    c5 = backbone_stage(c4, 2, params["bb5_w"], params["bb5_b"])       # (B,H/32,W/32,512)

    # FPN top-down path, one fused Pallas kernel per level.
    p5 = fpn_level(c5, params["lat5_w"], params["lat5_b"],
                   params["mrg5_w"], params["mrg5_b"])
    p4 = fpn_level(c4, params["lat4_w"], params["lat4_b"],
                   params["mrg4_w"], params["mrg4_b"], residual=nearest_up2(p5))
    p3 = fpn_level(c3, params["lat3_w"], params["lat3_b"],
                   params["mrg3_w"], params["mrg3_b"], residual=nearest_up2(p4))

    to_nchw = lambda t: jnp.transpose(t, (0, 3, 1, 2))
    return {"p3": to_nchw(p3), "p4": to_nchw(p4), "p5": to_nchw(p5)}


FPN_STRIDES = {"p3": 8, "p4": 16, "p5": 32}


if __name__ == "__main__":
    key = jax.random.PRNGKey(0)
    k_img, k_par = jax.random.split(key)

    # Small input consistent with the module: (B, 3, H, W), H=W multiple of 32
    # (>=128 so every FPN level has >=8 spatial positions per image).
    images = jax.random.normal(k_img, (2, 3, 128, 128), dtype=jnp.float32)
    params = init_params(k_par)

    fwd = jax.jit(detector_backbone_with_fpn_forward)
    feats = fwd(params, images)
    jax.block_until_ready(feats)

    expected = {
        "p3": (2, OUT_CHANNELS, 128 // 8, 128 // 8),
        "p4": (2, OUT_CHANNELS, 128 // 16, 128 // 16),
        "p5": (2, OUT_CHANNELS, 128 // 32, 128 // 32),
    }
    for name, shp in expected.items():
        assert feats[name].shape == shp, (name, feats[name].shape, shp)
        assert feats[name].dtype == jnp.float32

    print("KERNEL_OK")
</pallas_src>

<mosaic_0001>
module attributes {stable_mosaic.version = 11 : i64} {
  func.func @_gemm_bias_kernel(%arg0: i32, %arg1: memref<512x256xbf16, #tpu.memory_space<vmem>>, %arg2: memref<256x128xbf16, #tpu.memory_space<vmem>>, %arg3: memref<1x128xf32, #tpu.memory_space<vmem>>, %arg4: memref<512x128xbf16, #tpu.memory_space<vmem>>) attributes {dimension_semantics = [#tpu.dimension_semantics<parallel>], iteration_bounds = array<i64: 1>, scalar_prefetch = 0 : i64, scratch_operands = 0 : i64, tpu.core_type = #tpu.core_type<tc>, window_params = [{transform_indices = @transform_0, window_bounds = array<i64: 512, 256>}, {pipeline_mode = #tpu.pipeline_mode<synchronous>, transform_indices = @transform_1, window_bounds = array<i64: 256, 128>}, {pipeline_mode = #tpu.pipeline_mode<synchronous>, transform_indices = @transform_2, window_bounds = array<i64: 1, 128>}, {transform_indices = @transform_3, window_bounds = array<i64: 512, 128>}]} {
    %c0 = arith.constant 0 : index
    %c0_0 = arith.constant 0 : index
    %0 = vector.load %arg1[%c0, %c0_0] : memref<512x256xbf16, #tpu.memory_space<vmem>>, vector<512x256xbf16>
    %c0_1 = arith.constant 0 : index
    %c0_2 = arith.constant 0 : index
    %1 = vector.load %arg2[%c0_1, %c0_2] : memref<256x128xbf16, #tpu.memory_space<vmem>>, vector<256x128xbf16>
    %cst = arith.constant dense<0.000000e+00> : vector<512x128xf32>
    %2 = tpu.matmul %0, %1, %cst {dimension_numbers = #tpu.dot_dimension_numbers<[1], [0], [0], [1], [0, 0, 1, 1], [], []>} : vector<512x256xbf16>, vector<256x128xbf16>, vector<512x128xf32> -> vector<512x128xf32>
    %c0_3 = arith.constant 0 : index
    %c0_4 = arith.constant 0 : index
    %3 = vector.load %arg3[%c0_3, %c0_4] : memref<1x128xf32, #tpu.memory_space<vmem>>, vector<1x128xf32>
    %4 = vector.broadcast %3 : vector<1x128xf32> to vector<512x128xf32>
    %5 = arith.addf %2, %4 : vector<512x128xf32>
    %6 = arith.truncf %5 : vector<512x128xf32> to vector<512x128xbf16>
    %c0_5 = arith.constant 0 : index
    %c0_6 = arith.constant 0 : index
    %7 = vector.load %arg4[%c0_5, %c0_6] : memref<512x128xbf16, #tpu.memory_space<vmem>>, vector<512x128xbf16>
    tpu.vector_store %arg4[%c0_5, %c0_6], %6 {strides = array<i32>} : memref<512x128xbf16, #tpu.memory_space<vmem>>, vector<512x128xbf16>,
    return
  }
  func.func @transform_0(%arg0: i32) -> (i32, i32) {
    %c0_i32 = arith.constant 0 : i32
    %c0_i32_0 = arith.constant 0 : i32
    return %arg0, %c0_i32 : i32, i32
  }
  func.func @transform_1(%arg0: i32) -> (i32, i32) {
    %c0_i32 = arith.constant 0 : i32
    %c0_i32_0 = arith.constant 0 : i32
    %c0_i32_1 = arith.constant 0 : i32
    return %c0_i32, %c0_i32_0 : i32, i32
  }
  func.func @transform_2(%arg0: i32) -> (i32, i32) {
    %c0_i32 = arith.constant 0 : i32
    %c0_i32_0 = arith.constant 0 : i32
    %c0_i32_1 = arith.constant 0 : i32
    return %c0_i32, %c0_i32_0 : i32, i32
  }
  func.func @transform_3(%arg0: i32) -> (i32, i32) {
    %c0_i32 = arith.constant 0 : i32
    %c0_i32_0 = arith.constant 0 : i32
    return %arg0, %c0_i32 : i32, i32
  }
}

module attributes {stable_mosaic.version = 11 : i64} {
  func.func @_gemm_bias_kernel(%arg0: i32, %arg1: memref<128x512xbf16, #tpu.memory_space<vmem>>, %arg2: memref<512x256xbf16, #tpu.memory_space<vmem>>, %arg3: memref<1x256xf32, #tpu.memory_space<vmem>>, %arg4: memref<128x256xbf16, #tpu.memory_space<vmem>>) attributes {dimension_semantics = [#tpu.dimension_semantics<parallel>], iteration_bounds = array<i64: 1>, scalar_prefetch = 0 : i64, scratch_operands = 0 : i64, tpu.core_type = #tpu.core_type<tc>, window_params = [{transform_indices = @transform_0, window_bounds = array<i64: 128, 512>}, {pipeline_mode = #tpu.pipeline_mode<synchronous>, transform_indices = @transform_1, window_bounds = array<i64: 512, 256>}, {pipeline_mode = #tpu.pipeline_mode<synchronous>, transform_indices = @transform_2, window_bounds = array<i64: 1, 256>}, {transform_indices = @transform_3, window_bounds = array<i64: 128, 256>}]} {
    %c0 = arith.constant 0 : index
    %c0_0 = arith.constant 0 : index
    %0 = vector.load %arg1[%c0, %c0_0] : memref<128x512xbf16, #tpu.memory_space<vmem>>, vector<128x512xbf16>
    %c0_1 = arith.constant 0 : index
    %c0_2 = arith.constant 0 : index
    %1 = vector.load %arg2[%c0_1, %c0_2] : memref<512x256xbf16, #tpu.memory_space<vmem>>, vector<512x256xbf16>
    %cst = arith.constant dense<0.000000e+00> : vector<128x256xf32>
    %2 = tpu.matmul %0, %1, %cst {dimension_numbers = #tpu.dot_dimension_numbers<[1], [0], [0], [1], [0, 0, 1, 1], [], []>} : vector<128x512xbf16>, vector<512x256xbf16>, vector<128x256xf32> -> vector<128x256xf32>
    %c0_3 = arith.constant 0 : index
    %c0_4 = arith.constant 0 : index
    %3 = vector.load %arg3[%c0_3, %c0_4] : memref<1x256xf32, #tpu.memory_space<vmem>>, vector<1x256xf32>
    %4 = vector.broadcast %3 : vector<1x256xf32> to vector<128x256xf32>
    %5 = arith.addf %2, %4 : vector<128x256xf32>
    %6 = arith.truncf %5 : vector<128x256xf32> to vector<128x256xbf16>
    %c0_5 = arith.constant 0 : index
    %c0_6 = arith.constant 0 : index
    %7 = vector.load %arg4[%c0_5, %c0_6] : memref<128x256xbf16, #tpu.memory_space<vmem>>, vector<128x256xbf16>
    tpu.vector_store %arg4[%c0_5, %c0_6], %6 {strides = array<i32>} : memref<128x256xbf16, #tpu.memory_space<vmem>>, vector<128x256xbf16>,
    return
  }
  func.func @transform_0(%arg0: i32) -> (i32, i32) {
    %c0_i32 = arith.constant 0 : i32
    %c0_i32_0 = arith.constant 0 : i32
    return %arg0, %c0_i32 : i32, i32
  }
  func.func @transform_1(%arg0: i32) -> (i32, i32) {
    %c0_i32 = arith.constant 0 : i32
    %c0_i32_0 = arith.constant 0 : i32
    %c0_i32_1 = arith.constant 0 : i32
    return %c0_i32, %c0_i32_0 : i32, i32
  }
  func.func @transform_2(%arg0: i32) -> (i32, i32) {
    %c0_i32 = arith.constant 0 : i32
    %c0_i32_0 = arith.constant 0 : i32
    %c0_i32_1 = arith.constant 0 : i32
    return %c0_i32, %c0_i32_0 : i32, i32
  }
  func.func @transform_3(%arg0: i32) -> (i32, i32) {
    %c0_i32 = arith.constant 0 : i32
    %c0_i32_0 = arith.constant 0 : i32
    return %arg0, %c0_i32 : i32, i32
  }
}

module attributes {stable_mosaic.version = 11 : i64} {
  func.func @_gemm_bias_kernel(%arg0: i32, %arg1: memref<32x1024xbf16, #tpu.memory_space<vmem>>, %arg2: memref<1024x512xbf16, #tpu.memory_space<vmem>>, %arg3: memref<1x512xf32, #tpu.memory_space<vmem>>, %arg4: memref<32x512xbf16, #tpu.memory_space<vmem>>) attributes {dimension_semantics = [#tpu.dimension_semantics<parallel>], iteration_bounds = array<i64: 1>, scalar_prefetch = 0 : i64, scratch_operands = 0 : i64, tpu.core_type = #tpu.core_type<tc>, window_params = [{transform_indices = @transform_0, window_bounds = array<i64: 32, 1024>}, {pipeline_mode = #tpu.pipeline_mode<synchronous>, transform_indices = @transform_1, window_bounds = array<i64: 1024, 512>}, {pipeline_mode = #tpu.pipeline_mode<synchronous>, transform_indices = @transform_2, window_bounds = array<i64: 1, 512>}, {transform_indices = @transform_3, window_bounds = array<i64: 32, 512>}]} {
    %c0 = arith.constant 0 : index
    %c0_0 = arith.constant 0 : index
    %0 = vector.load %arg1[%c0, %c0_0] : memref<32x1024xbf16, #tpu.memory_space<vmem>>, vector<32x1024xbf16>
    %c0_1 = arith.constant 0 : index
    %c0_2 = arith.constant 0 : index
    %1 = vector.load %arg2[%c0_1, %c0_2] : memref<1024x512xbf16, #tpu.memory_space<vmem>>, vector<1024x512xbf16>
    %cst = arith.constant dense<0.000000e+00> : vector<32x512xf32>
    %2 = tpu.matmul %0, %1, %cst {dimension_numbers = #tpu.dot_dimension_numbers<[1], [0], [0], [1], [0, 0, 1, 1], [], []>} : vector<32x1024xbf16>, vector<1024x512xbf16>, vector<32x512xf32> -> vector<32x512xf32>
    %c0_3 = arith.constant 0 : index
    %c0_4 = arith.constant 0 : index
    %3 = vector.load %arg3[%c0_3, %c0_4] : memref<1x512xf32, #tpu.memory_space<vmem>>, vector<1x512xf32>
    %4 = vector.broadcast %3 : vector<1x512xf32> to vector<32x512xf32>
    %5 = arith.addf %2, %4 : vector<32x512xf32>
    %6 = arith.truncf %5 : vector<32x512xf32> to vector<32x512xbf16>
    %c0_5 = arith.constant 0 : index
    %c0_6 = arith.constant 0 : index
    %7 = vector.load %arg4[%c0_5, %c0_6] : memref<32x512xbf16, #tpu.memory_space<vmem>>, vector<32x512xbf16>
    tpu.vector_store %arg4[%c0_5, %c0_6], %6 {strides = array<i32>} : memref<32x512xbf16, #tpu.memory_space<vmem>>, vector<32x512xbf16>,
    return
  }
  func.func @transform_0(%arg0: i32) -> (i32, i32) {
    %c0_i32 = arith.constant 0 : i32
    %c0_i32_0 = arith.constant 0 : i32
    return %arg0, %c0_i32 : i32, i32
  }
  func.func @transform_1(%arg0: i32) -> (i32, i32) {
    %c0_i32 = arith.constant 0 : i32
    %c0_i32_0 = arith.constant 0 : i32
    %c0_i32_1 = arith.constant 0 : i32
    return %c0_i32, %c0_i32_0 : i32, i32
  }
  func.func @transform_2(%arg0: i32) -> (i32, i32) {
    %c0_i32 = arith.constant 0 : i32
    %c0_i32_0 = arith.constant 0 : i32
    %c0_i32_1 = arith.constant 0 : i32
    return %c0_i32, %c0_i32_0 : i32, i32
  }
  func.func @transform_3(%arg0: i32) -> (i32, i32) {
    %c0_i32 = arith.constant 0 : i32
    %c0_i32_0 = arith.constant 0 : i32
    return %arg0, %c0_i32 : i32, i32
  }
}

module attributes {stable_mosaic.version = 11 : i64} {
  func.func @_fpn_level_kernel(%arg0: i32, %arg1: memref<16x512xbf16, #tpu.memory_space<vmem>>, %arg2: memref<512x64xbf16, #tpu.memory_space<vmem>>, %arg3: memref<1x64xf32, #tpu.memory_space<vmem>>, %arg4: memref<576x64xbf16, #tpu.memory_space<vmem>>, %arg5: memref<1x64xf32, #tpu.memory_space<vmem>>, %arg6: memref<16x64xf32, #tpu.memory_space<vmem>>, %arg7: memref<32x64xbf16, #tpu.memory_space<vmem>>) attributes {dimension_semantics = [#tpu.dimension_semantics<parallel>], iteration_bounds = array<i64: 2>, scalar_prefetch = 0 : i64, scratch_operands = 1 : i64, tpu.core_type = #tpu.core_type<tc>, window_params = [{transform_indices = @transform_0, window_bounds = array<i64: 16, 512>}, {pipeline_mode = #tpu.pipeline_mode<synchronous>, transform_indices = @transform_1, window_bounds = array<i64: 512, 64>}, {pipeline_mode = #tpu.pipeline_mode<synchronous>, transform_indices = @transform_2, window_bounds = array<i64: 1, 64>}, {pipeline_mode = #tpu.pipeline_mode<synchronous>, transform_indices = @transform_3, window_bounds = array<i64: 576, 64>}, {pipeline_mode = #tpu.pipeline_mode<synchronous>, transform_indices = @transform_4, window_bounds = array<i64: 1, 64>}, {transform_indices = @transform_5, window_bounds = array<i64: 16, 64>}]} {
    %c0 = arith.constant 0 : index
    %c0_0 = arith.constant 0 : index
    %0 = vector.load %arg1[%c0, %c0_0] : memref<16x512xbf16, #tpu.memory_space<vmem>>, vector<16x512xbf16>
    %c0_1 = arith.constant 0 : index
    %c0_2 = arith.constant 0 : index
    %1 = vector.load %arg2[%c0_1, %c0_2] : memref<512x64xbf16, #tpu.memory_space<vmem>>, vector<512x64xbf16>
    %cst = arith.constant dense<0.000000e+00> : vector<16x64xf32>
    %2 = tpu.matmul %0, %1, %cst {dimension_numbers = #tpu.dot_dimension_numbers<[1], [0], [0], [1], [0, 0, 1, 1], [], []>} : vector<16x512xbf16>, vector<512x64xbf16>, vector<16x64xf32> -> vector<16x64xf32>
    %c0_3 = arith.constant 0 : index
    %c0_4 = arith.constant 0 : index
    %3 = vector.load %arg3[%c0_3, %c0_4] : memref<1x64xf32, #tpu.memory_space<vmem>>, vector<1x64xf32>
    %4 = vector.broadcast %3 : vector<1x64xf32> to vector<16x64xf32>
    %5 = arith.addf %2, %4 : vector<16x64xf32>
    %cst_5 = arith.constant 0.000000e+00 : bf16
    %6 = vector.broadcast %cst_5 : bf16 to vector<32x64xbf16>
    %c0_6 = arith.constant 0 : index
    %c0_7 = arith.constant 0 : index
    %7 = vector.load %arg7[%c0_6, %c0_7] : memref<32x64xbf16, #tpu.memory_space<vmem>>, vector<32x64xbf16>
    tpu.vector_store %arg7[%c0_6, %c0_7], %6 {strides = array<i32>} : memref<32x64xbf16, #tpu.memory_space<vmem>>, vector<32x64xbf16>,
    %8 = arith.truncf %5 : vector<16x64xf32> to vector<16x64xbf16>
    %c8 = arith.constant 8 : index
    %c0_8 = arith.constant 0 : index
    %9 = vector.load %arg7[%c8, %c0_8] : memref<32x64xbf16, #tpu.memory_space<vmem>>, vector<16x64xbf16>
    tpu.vector_store %arg7[%c8, %c0_8], %8 {strides = array<i32>} : memref<32x64xbf16, #tpu.memory_space<vmem>>, vector<16x64xbf16>,
    %10 = tpu.iota {dimensions = array<i32: 0>} : vector<16x1xi32>
    %c4_i32 = arith.constant 4 : i32
    %c0_i32 = arith.constant 0 : i32
    %11 = arith.cmpi eq, %c4_i32, %c0_i32 : i32
    %c1_i32 = arith.constant 1 : i32
    %12 = arith.select %11, %c1_i32, %c4_i32 : i32
    %13 = vector.broadcast %12 : i32 to vector<16x1xi32>
    %14 = arith.remsi %10, %13 : vector<16x1xi32>
    %c0_i32_9 = arith.constant 0 : i32
    %15 = vector.broadcast %c0_i32_9 : i32 to vector<16x1xi32>
    %16 = arith.cmpi ne, %14, %15 : vector<16x1xi32>
    %c0_i32_10 = arith.constant 0 : i32
    %17 = vector.broadcast %c0_i32_10 : i32 to vector<16x1xi32>
    %18 = arith.cmpi slt, %14, %17 : vector<16x1xi32>
    %c0_i32_11 = arith.constant 0 : i32
    %19 = arith.cmpi slt, %12, %c0_i32_11 : i32
    %20 = vector.broadcast %19 : i1 to vector<16x1xi1>
    %21 = vector.broadcast %20 : vector<16x1xi1> to vector<16x1xi1>
    %22 = arith.xori %18, %21 : vector<16x1xi1>
    %23 = arith.andi %22, %16 : vector<16x1xi1>
    %24 = vector.broadcast %12 : i32 to vector<16x1xi32>
    %25 = arith.addi %14, %24 : vector<16x1xi32>
    %26 = arith.select %23, %25, %14 : vector<16x1xi1>, vector<16x1xi32>
    %c0_i32_12 = arith.constant 0 : i32
    %27 = vector.broadcast %c0_i32_12 : i32 to vector<16x1xi32>
    %28 = arith.cmpi sgt, %26, %27 : vector<16x1xi32>
    %c3_i32 = arith.constant 3 : i32
    %29 = vector.broadcast %c3_i32 : i32 to vector<16x1xi32>
    %30 = arith.cmpi slt, %26, %29 : vector<16x1xi32>
    %cst_13 = arith.constant 0.000000e+00 : f32
    %31 = vector.broadcast %cst_13 : f32 to vector<16x64xf32>
    %c3 = arith.constant 3 : index
    %c0_14 = arith.constant 0 : index
    %32 = vector.load %arg7[%c3, %c0_14] : memref<32x64xbf16, #tpu.memory_space<vmem>>, vector<16x64xbf16>
    %cst_15 = arith.constant 0.000000e+00 : bf16
    %33 = vector.broadcast %cst_15 : bf16 to vector<16x64xbf16>
    %34 = vector.shape_cast %28 : vector<16x1xi1> to vector<16x1xi1>
    %35 = vector.broadcast %34 : vector<16x1xi1> to vector<16x64xi1>
    %36 = arith.select %35, %32, %33 : vector<16x64xi1>, vector<16x64xbf16>
    %c0_16 = arith.constant 0 : index
    %c0_17 = arith.constant 0 : index
    %37 = vector.load %arg4[%c0_16, %c0_17] : memref<576x64xbf16, #tpu.memory_space<vmem>>, vector<64x64xbf16>
    %cst_18 = arith.constant dense<0.000000e+00> : vector<16x64xf32>
    %38 = tpu.matmul %36, %37, %cst_18 {dimension_numbers = #tpu.dot_dimension_numbers<[1], [0], [0], [1], [0, 0, 1, 1], [], []>} : vector<16x64xbf16>, vector<64x64xbf16>, vector<16x64xf32> -> vector<16x64xf32>
    %39 = arith.addf %31, %38 : vector<16x64xf32>
    %c4 = arith.constant 4 : index
    %c0_19 = arith.constant 0 : index
    %40 = vector.load %arg7[%c4, %c0_19] : memref<32x64xbf16, #tpu.memory_space<vmem>>, vector<16x64xbf16>
    %c64 = arith.constant 64 : index
    %c0_20 = arith.constant 0 : index
    %41 = vector.load %arg4[%c64, %c0_20] : memref<576x64xbf16, #tpu.memory_space<vmem>>, vector<64x64xbf16>
    %cst_21 = arith.constant dense<0.000000e+00> : vector<16x64xf32>
    %42 = tpu.matmul %40, %41, %cst_21 {dimension_numbers = #tpu.dot_dimension_numbers<[1], [0], [0], [1], [0, 0, 1, 1], [], []>} : vector<16x64xbf16>, vector<64x64xbf16>, vector<16x64xf32> -> vector<16x64xf32>
    %43 = arith.addf %39, %42 : vector<16x64xf32>
    %c5 = arith.constant 5 : index
    %c0_22 = arith.constant 0 : index
    %44 = vector.load %arg7[%c5, %c0_22] : memref<32x64xbf16, #tpu.memory_space<vmem>>, vector<16x64xbf16>
    %cst_23 = arith.constant 0.000000e+00 : bf16
    %45 = vector.broadcast %cst_23 : bf16 to vector<16x64xbf16>
    %46 = vector.shape_cast %30 : vector<16x1xi1> to vector<16x1xi1>
    %47 = vector.broadcast %46 : vector<16x1xi1> to vector<16x64xi1>
    %48 = arith.select %47, %44, %45 : vector<16x64xi1>, vector<16x64xbf16>
    %c128 = arith.constant 128 : index
    %c0_24 = arith.constant 0 : index
    %49 = vector.load %arg4[%c128, %c0_24] : memref<576x64xbf16, #tpu.memory_space<vmem>>, vector<64x64xbf16>
    %cst_25 = arith.constant dense<0.000000e+00> : vector<16x64xf32>
    %50 = tpu.matmul %48, %49, %cst_25 {dimension_numbers = #tpu.dot_dimension_numbers<[1], [0], [0], [1], [0, 0, 1, 1], [], []>} : vector<16x64xbf16>, vector<64x64xbf16>, vector<16x64xf32> -> vector<16x64xf32>
    %51 = arith.addf %43, %50 : vector<16x64xf32>
    %c7 = arith.constant 7 : index
    %c0_26 = arith.constant 0 : index
    %52 = vector.load %arg7[%c7, %c0_26] : memref<32x64xbf16, #tpu.memory_space<vmem>>, vector<16x64xbf16>
    %cst_27 = arith.constant 0.000000e+00 : bf16
    %53 = vector.broadcast %cst_27 : bf16 to vector<16x64xbf16>
    %54 = vector.shape_cast %28 : vector<16x1xi1> to vector<16x1xi1>
    %55 = vector.broadcast %54 : vector<16x1xi1> to vector<16x64xi1>
    %56 = arith.select %55, %52, %53 : vector<16x64xi1>, vector<16x64xbf16>
    %c192 = arith.constant 192 : index
    %c0_28 = arith.constant 0 : index
    %57 = vector.load %arg4[%c192, %c0_28] : memref<576x64xbf16, #tpu.memory_space<vmem>>, vector<64x64xbf16>
    %cst_29 = arith.constant dense<0.000000e+00> : vector<16x64xf32>
    %58 = tpu.matmul %56, %57, %cst_29 {dimension_numbers = #tpu.dot_dimension_numbers<[1], [0], [0], [1], [0, 0, 1, 1], [], []>} : vector<16x64xbf16>, vector<64x64xbf16>, vector<16x64xf32> -> vector<16x64xf32>
    %59 = arith.addf %51, %58 : vector<16x64xf32>
    %c8_30 = arith.constant 8 : index
    %c0_31 = arith.constant 0 : index
    %60 = vector.load %arg7[%c8_30, %c0_31] : memref<32x64xbf16, #tpu.memory_space<vmem>>, vector<16x64xbf16>
    %c256 = arith.constant 256 : index
    %c0_32 = arith.constant 0 : index
    %61 = vector.load %arg4[%c256, %c0_32] : memref<576x64xbf16, #tpu.memory_space<vmem>>, vector<64x64xbf16>
    %cst_33 = arith.constant dense<0.000000e+00> : vector<16x64xf32>
    %62 = tpu.matmul %60, %61, %cst_33 {dimension_numbers = #tpu.dot_dimension_numbers<[1], [0], [0], [1], [0, 0, 1, 1], [], []>} : vector<16x64xbf16>, vector<64x64xbf16>, vector<16x64xf32> -> vector<16x64xf32>
    %63 = arith.addf %59, %62 : vector<16x64xf32>
    %c9 = arith.constant 9 : index
    %c0_34 = arith.constant 0 : index
    %64 = vector.load %arg7[%c9, %c0_34] : memref<32x64xbf16, #tpu.memory_space<vmem>>, vector<16x64xbf16>
    %cst_35 = arith.constant 0.000000e+00 : bf16
    %65 = vector.broadcast %cst_35 : bf16 to vector<16x64xbf16>
    %66 = vector.shape_cast %30 : vector<16x1xi1> to vector<16x1xi1>
    %67 = vector.broadcast %66 : vector<16x1xi1> to vector<16x64xi1>
    %68 = arith.select %67, %64, %65 : vector<16x64xi1>, vector<16x64xbf16>
    %c320 = arith.constant 320 : index
    %c0_36 = arith.constant 0 : index
    %69 = vector.load %arg4[%c320, %c0_36] : memref<576x64xbf16, #tpu.memory_space<vmem>>, vector<64x64xbf16>
    %cst_37 = arith.constant dense<0.000000e+00> : vector<16x64xf32>
    %70 = tpu.matmul %68, %69, %cst_37 {dimension_numbers = #tpu.dot_dimension_numbers<[1], [0], [0], [1], [0, 0, 1, 1], [], []>} : vector<16x64xbf16>, vector<64x64xbf16>, vector<16x64xf32> -> vector<16x64xf32>
    %71 = arith.addf %63, %70 : vector<16x64xf32>
    %c11 = arith.constant 11 : index
    %c0_38 = arith.constant 0 : index
    %72 = vector.load %arg7[%c11, %c0_38] : memref<32x64xbf16, #tpu.memory_space<vmem>>, vector<16x64xbf16>
    %cst_39 = arith.constant 0.000000e+00 : bf16
    %73 = vector.broadcast %cst_39 : bf16 to vector<16x64xbf16>
    %74 = vector.shape_cast %28 : vector<16x1xi1> to vector<16x1xi1>
    %75 = vector.broadcast %74 : vector<16x1xi1> to vector<16x64xi1>
    %76 = arith.select %75, %72, %73 : vector<16x64xi1>, vector<16x64xbf16>
    %c384 = arith.constant 384 : index
    %c0_40 = arith.constant 0 : index
    %77 = vector.load %arg4[%c384, %c0_40] : memref<576x64xbf16, #tpu.memory_space<vmem>>, vector<64x64xbf16>
    %cst_41 = arith.constant dense<0.000000e+00> : vector<16x64xf32>
    %78 = tpu.matmul %76, %77, %cst_41 {dimension_numbers = #tpu.dot_dimension_numbers<[1], [0], [0], [1], [0, 0, 1, 1], [], []>} : vector<16x64xbf16>, vector<64x64xbf16>, vector<16x64xf32> -> vector<16x64xf32>
    %79 = arith.addf %71, %78 : vector<16x64xf32>
    %c12 = arith.constant 12 : index
    %c0_42 = arith.constant 0 : index
    %80 = vector.load %arg7[%c12, %c0_42] : memref<32x64xbf16, #tpu.memory_space<vmem>>, vector<16x64xbf16>
    %c448 = arith.constant 448 : index
    %c0_43 = arith.constant 0 : index
    %81 = vector.load %arg4[%c448, %c0_43] : memref<576x64xbf16, #tpu.memory_space<vmem>>, vector<64x64xbf16>
    %cst_44 = arith.constant dense<0.000000e+00> : vector<16x64xf32>
    %82 = tpu.matmul %80, %81, %cst_44 {dimension_numbers = #tpu.dot_dimension_numbers<[1], [0], [0], [1], [0, 0, 1, 1], [], []>} : vector<16x64xbf16>, vector<64x64xbf16>, vector<16x64xf32> -> vector<16x64xf32>
    %83 = arith.addf %79, %82 : vector<16x64xf32>
    %c13 = arith.constant 13 : index
    %c0_45 = arith.constant 0 : index
    %84 = vector.load %arg7[%c13, %c0_45] : memref<32x64xbf16, #tpu.memory_space<vmem>>, vector<16x64xbf16>
    %cst_46 = arith.constant 0.000000e+00 : bf16
    %85 = vector.broadcast %cst_46 : bf16 to vector<16x64xbf16>
    %86 = vector.shape_cast %30 : vector<16x1xi1> to vector<16x1xi1>
    %87 = vector.broadcast %86 : vector<16x1xi1> to vector<16x64xi1>
    %88 = arith.select %87, %84, %85 : vector<16x64xi1>, vector<16x64xbf16>
    %c512 = arith.constant 512 : index
    %c0_47 = arith.constant 0 : index
    %89 = vector.load %arg4[%c512, %c0_47] : memref<576x64xbf16, #tpu.memory_space<vmem>>, vector<64x64xbf16>
    %cst_48 = arith.constant dense<0.000000e+00> : vector<16x64xf32>
    %90 = tpu.matmul %88, %89, %cst_48 {dimension_numbers = #tpu.dot_dimension_numbers<[1], [0], [0], [1], [0, 0, 1, 1], [], []>} : vector<16x64xbf16>, vector<64x64xbf16>, vector<16x64xf32> -> vector<16x64xf32>
    %91 = arith.addf %83, %90 : vector<16x64xf32>
    %c0_49 = arith.constant 0 : index
    %c0_50 = arith.constant 0 : index
    %92 = vector.load %arg5[%c0_49, %c0_50] : memref<1x64xf32, #tpu.memory_space<vmem>>, vector<1x64xf32>
    %93 = vector.broadcast %92 : vector<1x64xf32> to vector<16x64xf32>
    %94 = arith.addf %91, %93 : vector<16x64xf32>
    %c0_51 = arith.constant 0 : index
    %c0_52 = arith.constant 0 : index
    %95 = vector.load %arg6[%c0_51, %c0_52] : memref<16x64xf32, #tpu.memory_space<vmem>>, vector<16x64xf32>
    tpu.vector_store %arg6[%c0_51, %c0_52], %94 {strides = array<i32>} : memref<16x64xf32, #tpu.memory_space<vmem>>, vector<16x64xf32>,
    return
  }
  func.func @transform_0(%arg0: i32) -> (i32, i32) {
    %c0_i32 = arith.constant 0 : i32
    %c0_i32_0 = arith.constant 0 : i32
    return %arg0, %c0_i32 : i32, i32
  }
  func.func @transform_1(%arg0: i32) -> (i32, i32) {
    %c0_i32 = arith.constant 0 : i32
    %c0_i32_0 = arith.constant 0 : i32
    %c0_i32_1 = arith.constant 0 : i32
    return %c0_i32, %c0_i32_0 : i32, i32
  }
  func.func @transform_2(%arg0: i32) -> (i32, i32) {
    %c0_i32 = arith.constant 0 : i32
    %c0_i32_0 = arith.constant 0 : i32
    %c0_i32_1 = arith.constant 0 : i32
    return %c0_i32, %c0_i32_0 : i32, i32
  }
  func.func @transform_3(%arg0: i32) -> (i32, i32) {
    %c0_i32 = arith.constant 0 : i32
    %c0_i32_0 = arith.constant 0 : i32
    %c0_i32_1 = arith.constant 0 : i32
    return %c0_i32, %c0_i32_0 : i32, i32
  }
  func.func @transform_4(%arg0: i32) -> (i32, i32) {
    %c0_i32 = arith.constant 0 : i32
    %c0_i32_0 = arith.constant 0 : i32
    %c0_i32_1 = arith.constant 0 : i32
    return %c0_i32, %c0_i32_0 : i32, i32
  }
  func.func @transform_5(%arg0: i32) -> (i32, i32) {
    %c0_i32 = arith.constant 0 : i32
    %c0_i32_0 = arith.constant 0 : i32
    return %arg0, %c0_i32 : i32, i32
  }
}

module attributes {stable_mosaic.version = 11 : i64} {
  func.func @_fpn_level_kernel(%arg0: i32, %arg1: memref<64x256xbf16, #tpu.memory_space<vmem>>, %arg2: memref<256x64xbf16, #tpu.memory_space<vmem>>, %arg3: memref<1x64xf32, #tpu.memory_space<vmem>>, %arg4: memref<576x64xbf16, #tpu.memory_space<vmem>>, %arg5: memref<1x64xf32, #tpu.memory_space<vmem>>, %arg6: memref<64x64xf32, #tpu.memory_space<vmem>>, %arg7: memref<64x64xf32, #tpu.memory_space<vmem>>, %arg8: memref<96x64xbf16, #tpu.memory_space<vmem>>) attributes {dimension_semantics = [#tpu.dimension_semantics<parallel>], iteration_bounds = array<i64: 2>, scalar_prefetch = 0 : i64, scratch_operands = 1 : i64, tpu.core_type = #tpu.core_type<tc>, window_params = [{transform_indices = @transform_0, window_bounds = array<i64: 64, 256>}, {pipeline_mode = #tpu.pipeline_mode<synchronous>, transform_indices = @transform_1, window_bounds = array<i64: 256, 64>}, {pipeline_mode = #tpu.pipeline_mode<synchronous>, transform_indices = @transform_2, window_bounds = array<i64: 1, 64>}, {pipeline_mode = #tpu.pipeline_mode<synchronous>, transform_indices = @transform_3, window_bounds = array<i64: 576, 64>}, {pipeline_mode = #tpu.pipeline_mode<synchronous>, transform_indices = @transform_4, window_bounds = array<i64: 1, 64>}, {transform_indices = @transform_5, window_bounds = array<i64: 64, 64>}, {transform_indices = @transform_6, window_bounds = array<i64: 64, 64>}]} {
    %c0 = arith.constant 0 : index
    %c0_0 = arith.constant 0 : index
    %0 = vector.load %arg1[%c0, %c0_0] : memref<64x256xbf16, #tpu.memory_space<vmem>>, vector<64x256xbf16>
    %c0_1 = arith.constant 0 : index
    %c0_2 = arith.constant 0 : index
    %1 = vector.load %arg2[%c0_1, %c0_2] : memref<256x64xbf16, #tpu.memory_space<vmem>>, vector<256x64xbf16>
    %cst = arith.constant dense<0.000000e+00> : vector<64x64xf32>
    %2 = tpu.matmul %0, %1, %cst {dimension_numbers = #tpu.dot_dimension_numbers<[1], [0], [0], [1], [0, 0, 1, 1], [], []>} : vector<64x256xbf16>, vector<256x64xbf16>, vector<64x64xf32> -> vector<64x64xf32>
    %c0_3 = arith.constant 0 : index
    %c0_4 = arith.constant 0 : index
    %3 = vector.load %arg3[%c0_3, %c0_4] : memref<1x64xf32, #tpu.memory_space<vmem>>, vector<1x64xf32>
    %4 = vector.broadcast %3 : vector<1x64xf32> to vector<64x64xf32>
    %5 = arith.addf %2, %4 : vector<64x64xf32>
    %c0_5 = arith.constant 0 : index
    %c0_6 = arith.constant 0 : index
    %6 = vector.load %arg6[%c0_5, %c0_6] : memref<64x64xf32, #tpu.memory_space<vmem>>, vector<64x64xf32>
    %7 = arith.addf %5, %6 : vector<64x64xf32>
    %cst_7 = arith.constant 0.000000e+00 : bf16
    %8 = vector.broadcast %cst_7 : bf16 to vector<96x64xbf16>
    %c0_8 = arith.constant 0 : index
    %c0_9 = arith.constant 0 : index
    %9 = vector.load %arg8[%c0_8, %c0_9] : memref<96x64xbf16, #tpu.memory_space<vmem>>, vector<96x64xbf16>
    tpu.vector_store %arg8[%c0_8, %c0_9], %8 {strides = array<i32>} : memref<96x64xbf16, #tpu.memory_space<vmem>>, vector<96x64xbf16>,
    %10 = arith.truncf %7 : vector<64x64xf32> to vector<64x64xbf16>
    %c16 = arith.constant 16 : index
    %c0_10 = arith.constant 0 : index
    %11 = vector.load %arg8[%c16, %c0_10] : memref<96x64xbf16, #tpu.memory_space<vmem>>, vector<64x64xbf16>
    tpu.vector_store %arg8[%c16, %c0_10], %10 {strides = array<i32>} : memref<96x64xbf16, #tpu.memory_space<vmem>>, vector<64x64xbf16>,
    %12 = tpu.iota {dimensions = array<i32: 0>} : vector<64x1xi32>
    %c8_i32 = arith.constant 8 : i32
    %c0_i32 = arith.constant 0 : i32
    %13 = arith.cmpi eq, %c8_i32, %c0_i32 : i32
    %c1_i32 = arith.constant 1 : i32
    %14 = arith.select %13, %c1_i32, %c8_i32 : i32
    %15 = vector.broadcast %14 : i32 to vector<64x1xi32>
    %16 = arith.remsi %12, %15 : vector<64x1xi32>
    %c0_i32_11 = arith.constant 0 : i32
    %17 = vector.broadcast %c0_i32_11 : i32 to vector<64x1xi32>
    %18 = arith.cmpi ne, %16, %17 : vector<64x1xi32>
    %c0_i32_12 = arith.constant 0 : i32
    %19 = vector.broadcast %c0_i32_12 : i32 to vector<64x1xi32>
    %20 = arith.cmpi slt, %16, %19 : vector<64x1xi32>
    %c0_i32_13 = arith.constant 0 : i32
    %21 = arith.cmpi slt, %14, %c0_i32_13 : i32
    %22 = vector.broadcast %21 : i1 to vector<64x1xi1>
    %23 = vector.broadcast %22 : vector<64x1xi1> to vector<64x1xi1>
    %24 = arith.xori %20, %23 : vector<64x1xi1>
    %25 = arith.andi %24, %18 : vector<64x1xi1>
    %26 = vector.broadcast %14 : i32 to vector<64x1xi32>
    %27 = arith.addi %16, %26 : vector<64x1xi32>
    %28 = arith.select %25, %27, %16 : vector<64x1xi1>, vector<64x1xi32>
    %c0_i32_14 = arith.constant 0 : i32
    %29 = vector.broadcast %c0_i32_14 : i32 to vector<64x1xi32>
    %30 = arith.cmpi sgt, %28, %29 : vector<64x1xi32>
    %c7_i32 = arith.constant 7 : i32
    %31 = vector.broadcast %c7_i32 : i32 to vector<64x1xi32>
    %32 = arith.cmpi slt, %28, %31 : vector<64x1xi32>
    %cst_15 = arith.constant 0.000000e+00 : f32
    %33 = vector.broadcast %cst_15 : f32 to vector<64x64xf32>
    %c7 = arith.constant 7 : index
    %c0_16 = arith.constant 0 : index
    %34 = vector.load %arg8[%c7, %c0_16] : memref<96x64xbf16, #tpu.memory_space<vmem>>, vector<64x64xbf16>
    %cst_17 = arith.constant 0.000000e+00 : bf16
    %35 = vector.broadcast %cst_17 : bf16 to vector<64x64xbf16>
    %36 = vector.shape_cast %30 : vector<64x1xi1> to vector<64x1xi1>
    %37 = vector.broadcast %36 : vector<64x1xi1> to vector<64x64xi1>
    %38 = arith.select %37, %34, %35 : vector<64x64xi1>, vector<64x64xbf16>
    %c0_18 = arith.constant 0 : index
    %c0_19 = arith.constant 0 : index
    %39 = vector.load %arg4[%c0_18, %c0_19] : memref<576x64xbf16, #tpu.memory_space<vmem>>, vector<64x64xbf16>
    %cst_20 = arith.constant dense<0.000000e+00> : vector<64x64xf32>
    %40 = tpu.matmul %38, %39, %cst_20 {dimension_numbers = #tpu.dot_dimension_numbers<[1], [0], [0], [1], [0, 0, 1, 1], [], []>} : vector<64x64xbf16>, vector<64x64xbf16>, vector<64x64xf32> -> vector<64x64xf32>
    %41 = arith.addf %33, %40 : vector<64x64xf32>
    %c8 = arith.constant 8 : index
    %c0_21 = arith.constant 0 : index
    %42 = vector.load %arg8[%c8, %c0_21] : memref<96x64xbf16, #tpu.memory_space<vmem>>, vector<64x64xbf16>
    %c64 = arith.constant 64 : index
    %c0_22 = arith.constant 0 : index
    %43 = vector.load %arg4[%c64, %c0_22] : memref<576x64xbf16, #tpu.memory_space<vmem>>, vector<64x64xbf16>
    %cst_23 = arith.constant dense<0.000000e+00> : vector<64x64xf32>
    %44 = tpu.matmul %42, %43, %cst_23 {dimension_numbers = #tpu.dot_dimension_numbers<[1], [0], [0], [1], [0, 0, 1, 1], [], []>} : vector<64x64xbf16>, vector<64x64xbf16>, vector<64x64xf32> -> vector<64x64xf32>
    %45 = arith.addf %41, %44 : vector<64x64xf32>
    %c9 = arith.constant 9 : index
    %c0_24 = arith.constant 0 : index
    %46 = vector.load %arg8[%c9, %c0_24] : memref<96x64xbf16, #tpu.memory_space<vmem>>, vector<64x64xbf16>
    %cst_25 = arith.constant 0.000000e+00 : bf16
    %47 = vector.broadcast %cst_25 : bf16 to vector<64x64xbf16>
    %48 = vector.shape_cast %32 : vector<64x1xi1> to vector<64x1xi1>
    %49 = vector.broadcast %48 : vector<64x1xi1> to vector<64x64xi1>
    %50 = arith.select %49, %46, %47 : vector<64x64xi1>, vector<64x64xbf16>
    %c128 = arith.constant 128 : index
    %c0_26 = arith.constant 0 : index
    %51 = vector.load %arg4[%c128, %c0_26] : memref<576x64xbf16, #tpu.memory_space<vmem>>, vector<64x64xbf16>
    %cst_27 = arith.constant dense<0.000000e+00> : vector<64x64xf32>
    %52 = tpu.matmul %50, %51, %cst_27 {dimension_numbers = #tpu.dot_dimension_numbers<[1], [0], [0], [1], [0, 0, 1, 1], [], []>} : vector<64x64xbf16>, vector<64x64xbf16>, vector<64x64xf32> -> vector<64x64xf32>
    %53 = arith.addf %45, %52 : vector<64x64xf32>
    %c15 = arith.constant 15 : index
    %c0_28 = arith.constant 0 : index
    %54 = vector.load %arg8[%c15, %c0_28] : memref<96x64xbf16, #tpu.memory_space<vmem>>, vector<64x64xbf16>
    %cst_29 = arith.constant 0.000000e+00 : bf16
    %55 = vector.broadcast %cst_29 : bf16 to vector<64x64xbf16>
    %56 = vector.shape_cast %30 : vector<64x1xi1> to vector<64x1xi1>
    %57 = vector.broadcast %56 : vector<64x1xi1> to vector<64x64xi1>
    %58 = arith.select %57, %54, %55 : vector<64x64xi1>, vector<64x64xbf16>
    %c192 = arith.constant 192 : index
    %c0_30 = arith.constant 0 : index
    %59 = vector.load %arg4[%c192, %c0_30] : memref<576x64xbf16, #tpu.memory_space<vmem>>, vector<64x64xbf16>
    %cst_31 = arith.constant dense<0.000000e+00> : vector<64x64xf32>
    %60 = tpu.matmul %58, %59, %cst_31 {dimension_numbers = #tpu.dot_dimension_numbers<[1], [0], [0], [1], [0, 0, 1, 1], [], []>} : vector<64x64xbf16>, vector<64x64xbf16>, vector<64x64xf32> -> vector<64x64xf32>
    %61 = arith.addf %53, %60 : vector<64x64xf32>
    %c16_32 = arith.constant 16 : index
    %c0_33 = arith.constant 0 : index
    %62 = vector.load %arg8[%c16_32, %c0_33] : memref<96x64xbf16, #tpu.memory_space<vmem>>, vector<64x64xbf16>
    %c256 = arith.constant 256 : index
    %c0_34 = arith.constant 0 : index
    %63 = vector.load %arg4[%c256, %c0_34] : memref<576x64xbf16, #tpu.memory_space<vmem>>, vector<64x64xbf16>
    %cst_35 = arith.constant dense<0.000000e+00> : vector<64x64xf32>
    %64 = tpu.matmul %62, %63, %cst_35 {dimension_numbers = #tpu.dot_dimension_numbers<[1], [0], [0], [1], [0, 0, 1, 1], [], []>} : vector<64x64xbf16>, vector<64x64xbf16>, vector<64x64xf32> -> vector<64x64xf32>
    %65 = arith.addf %61, %64 : vector<64x64xf32>
    %c17 = arith.constant 17 : index
    %c0_36 = arith.constant 0 : index
    %66 = vector.load %arg8[%c17, %c0_36] : memref<96x64xbf16, #tpu.memory_space<vmem>>, vector<64x64xbf16>
    %cst_37 = arith.constant 0.000000e+00 : bf16
    %67 = vector.broadcast %cst_37 : bf16 to vector<64x64xbf16>
    %68 = vector.shape_cast %32 : vector<64x1xi1> to vector<64x1xi1>
    %69 = vector.broadcast %68 : vector<64x1xi1> to vector<64x64xi1>
    %70 = arith.select %69, %66, %67 : vector<64x64xi1>, vector<64x64xbf16>
    %c320 = arith.constant 320 : index
    %c0_38 = arith.constant 0 : index
    %71 = vector.load %arg4[%c320, %c0_38] : memref<576x64xbf16, #tpu.memory_space<vmem>>, vector<64x64xbf16>
    %cst_39 = arith.constant dense<0.000000e+00> : vector<64x64xf32>
    %72 = tpu.matmul %70, %71, %cst_39 {dimension_numbers = #tpu.dot_dimension_numbers<[1], [0], [0], [1], [0, 0, 1, 1], [], []>} : vector<64x64xbf16>, vector<64x64xbf16>, vector<64x64xf32> -> vector<64x64xf32>
    %73 = arith.addf %65, %72 : vector<64x64xf32>
    %c23 = arith.constant 23 : index
    %c0_40 = arith.constant 0 : index
    %74 = vector.load %arg8[%c23, %c0_40] : memref<96x64xbf16, #tpu.memory_space<vmem>>, vector<64x64xbf16>
    %cst_41 = arith.constant 0.000000e+00 : bf16
    %75 = vector.broadcast %cst_41 : bf16 to vector<64x64xbf16>
    %76 = vector.shape_cast %30 : vector<64x1xi1> to vector<64x1xi1>
    %77 = vector.broadcast %76 : vector<64x1xi1> to vector<64x64xi1>
    %78 = arith.select %77, %74, %75 : vector<64x64xi1>, vector<64x64xbf16>
    %c384 = arith.constant 384 : index
    %c0_42 = arith.constant 0 : index
    %79 = vector.load %arg4[%c384, %c0_42] : memref<576x64xbf16, #tpu.memory_space<vmem>>, vector<64x64xbf16>
    %cst_43 = arith.constant dense<0.000000e+00> : vector<64x64xf32>
    %80 = tpu.matmul %78, %79, %cst_43 {dimension_numbers = #tpu.dot_dimension_numbers<[1], [0], [0], [1], [0, 0, 1, 1], [], []>} : vector<64x64xbf16>, vector<64x64xbf16>, vector<64x64xf32> -> vector<64x64xf32>
    %81 = arith.addf %73, %80 : vector<64x64xf32>
    %c24 = arith.constant 24 : index
    %c0_44 = arith.constant 0 : index
    %82 = vector.load %arg8[%c24, %c0_44] : memref<96x64xbf16, #tpu.memory_space<vmem>>, vector<64x64xbf16>
    %c448 = arith.constant 448 : index
    %c0_45 = arith.constant 0 : index
    %83 = vector.load %arg4[%c448, %c0_45] : memref<576x64xbf16, #tpu.memory_space<vmem>>, vector<64x64xbf16>
    %cst_46 = arith.constant dense<0.000000e+00> : vector<64x64xf32>
    %84 = tpu.matmul %82, %83, %cst_46 {dimension_numbers = #tpu.dot_dimension_numbers<[1], [0], [0], [1], [0, 0, 1, 1], [], []>} : vector<64x64xbf16>, vector<64x64xbf16>, vector<64x64xf32> -> vector<64x64xf32>
    %85 = arith.addf %81, %84 : vector<64x64xf32>
    %c25 = arith.constant 25 : index
    %c0_47 = arith.constant 0 : index
    %86 = vector.load %arg8[%c25, %c0_47] : memref<96x64xbf16, #tpu.memory_space<vmem>>, vector<64x64xbf16>
    %cst_48 = arith.constant 0.000000e+00 : bf16
    %87 = vector.broadcast %cst_48 : bf16 to vector<64x64xbf16>
    %88 = vector.shape_cast %32 : vector<64x1xi1> to vector<64x1xi1>
    %89 = vector.broadcast %88 : vector<64x1xi1> to vector<64x64xi1>
    %90 = arith.select %89, %86, %87 : vector<64x64xi1>, vector<64x64xbf16>
    %c512 = arith.constant 512 : index
    %c0_49 = arith.constant 0 : index
    %91 = vector.load %arg4[%c512, %c0_49] : memref<576x64xbf16, #tpu.memory_space<vmem>>, vector<64x64xbf16>
    %cst_50 = arith.constant dense<0.000000e+00> : vector<64x64xf32>
    %92 = tpu.matmul %90, %91, %cst_50 {dimension_numbers = #tpu.dot_dimension_numbers<[1], [0], [0], [1], [0, 0, 1, 1], [], []>} : vector<64x64xbf16>, vector<64x64xbf16>, vector<64x64xf32> -> vector<64x64xf32>
    %93 = arith.addf %85, %92 : vector<64x64xf32>
    %c0_51 = arith.constant 0 : index
    %c0_52 = arith.constant 0 : index
    %94 = vector.load %arg5[%c0_51, %c0_52] : memref<1x64xf32, #tpu.memory_space<vmem>>, vector<1x64xf32>
    %95 = vector.broadcast %94 : vector<1x64xf32> to vector<64x64xf32>
    %96 = arith.addf %93, %95 : vector<64x64xf32>
    %c0_53 = arith.constant 0 : index
    %c0_54 = arith.constant 0 : index
    %97 = vector.load %arg7[%c0_53, %c0_54] : memref<64x64xf32, #tpu.memory_space<vmem>>, vector<64x64xf32>
    tpu.vector_store %arg7[%c0_53, %c0_54], %96 {strides = array<i32>} : memref<64x64xf32, #tpu.memory_space<vmem>>, vector<64x64xf32>,
    return
  }
  func.func @transform_0(%arg0: i32) -> (i32, i32) {
    %c0_i32 = arith.constant 0 : i32
    %c0_i32_0 = arith.constant 0 : i32
    return %arg0, %c0_i32 : i32, i32
  }
  func.func @transform_1(%arg0: i32) -> (i32, i32) {
    %c0_i32 = arith.constant 0 : i32
    %c0_i32_0 = arith.constant 0 : i32
    %c0_i32_1 = arith.constant 0 : i32
    return %c0_i32, %c0_i32_0 : i32, i32
  }
  func.func @transform_2(%arg0: i32) -> (i32, i32) {
    %c0_i32 = arith.constant 0 : i32
    %c0_i32_0 = arith.constant 0 : i32
    %c0_i32_1 = arith.constant 0 : i32
    return %c0_i32, %c0_i32_0 : i32, i32
  }
  func.func @transform_3(%arg0: i32) -> (i32, i32) {
    %c0_i32 = arith.constant 0 : i32
    %c0_i32_0 = arith.constant 0 : i32
    %c0_i32_1 = arith.constant 0 : i32
    return %c0_i32, %c0_i32_0 : i32, i32
  }
  func.func @transform_4(%arg0: i32) -> (i32, i32) {
    %c0_i32 = arith.constant 0 : i32
    %c0_i32_0 = arith.constant 0 : i32
    %c0_i32_1 = arith.constant 0 : i32
    return %c0_i32, %c0_i32_0 : i32, i32
  }
  func.func @transform_5(%arg0: i32) -> (i32, i32) {
    %c0_i32 = arith.constant 0 : i32
    %c0_i32_0 = arith.constant 0 : i32
    return %arg0, %c0_i32 : i32, i32
  }
  func.func @transform_6(%arg0: i32) -> (i32, i32) {
    %c0_i32 = arith.constant 0 : i32
    %c0_i32_0 = arith.constant 0 : i32
    return %arg0, %c0_i32 : i32, i32
  }
}

module attributes {stable_mosaic.version = 11 : i64} {
  func.func @_fpn_level_kernel(%arg0: i32, %arg1: memref<256x128xbf16, #tpu.memory_space<vmem>>, %arg2: memref<128x64xbf16, #tpu.memory_space<vmem>>, %arg3: memref<1x64xf32, #tpu.memory_space<vmem>>, %arg4: memref<576x64xbf16, #tpu.memory_space<vmem>>, %arg5: memref<1x64xf32, #tpu.memory_space<vmem>>, %arg6: memref<256x64xf32, #tpu.memory_space<vmem>>, %arg7: memref<256x64xf32, #tpu.memory_space<vmem>>, %arg8: memref<304x64xbf16, #tpu.memory_space<vmem>>) attributes {dimension_semantics = [#tpu.dimension_semantics<parallel>], iteration_bounds = array<i64: 2>, scalar_prefetch = 0 : i64, scratch_operands = 1 : i64, tpu.core_type = #tpu.core_type<tc>, window_params = [{transform_indices = @transform_0, window_bounds = array<i64: 256, 128>}, {pipeline_mode = #tpu.pipeline_mode<synchronous>, transform_indices = @transform_1, window_bounds = array<i64: 128, 64>}, {pipeline_mode = #tpu.pipeline_mode<synchronous>, transform_indices = @transform_2, window_bounds = array<i64: 1, 64>}, {pipeline_mode = #tpu.pipeline_mode<synchronous>, transform_indices = @transform_3, window_bounds = array<i64: 576, 64>}, {pipeline_mode = #tpu.pipeline_mode<synchronous>, transform_indices = @transform_4, window_bounds = array<i64: 1, 64>}, {transform_indices = @transform_5, window_bounds = array<i64: 256, 64>}, {transform_indices = @transform_6, window_bounds = array<i64: 256, 64>}]} {
    %c0 = arith.constant 0 : index
    %c0_0 = arith.constant 0 : index
    %0 = vector.load %arg1[%c0, %c0_0] : memref<256x128xbf16, #tpu.memory_space<vmem>>, vector<256x128xbf16>
    %c0_1 = arith.constant 0 : index
    %c0_2 = arith.constant 0 : index
    %1 = vector.load %arg2[%c0_1, %c0_2] : memref<128x64xbf16, #tpu.memory_space<vmem>>, vector<128x64xbf16>
    %cst = arith.constant dense<0.000000e+00> : vector<256x64xf32>
    %2 = tpu.matmul %0, %1, %cst {dimension_numbers = #tpu.dot_dimension_numbers<[1], [0], [0], [1], [0, 0, 1, 1], [], []>} : vector<256x128xbf16>, vector<128x64xbf16>, vector<256x64xf32> -> vector<256x64xf32>
    %c0_3 = arith.constant 0 : index
    %c0_4 = arith.constant 0 : index
    %3 = vector.load %arg3[%c0_3, %c0_4] : memref<1x64xf32, #tpu.memory_space<vmem>>, vector<1x64xf32>
    %4 = vector.broadcast %3 : vector<1x64xf32> to vector<256x64xf32>
    %5 = arith.addf %2, %4 : vector<256x64xf32>
    %c0_5 = arith.constant 0 : index
    %c0_6 = arith.constant 0 : index
    %6 = vector.load %arg6[%c0_5, %c0_6] : memref<256x64xf32, #tpu.memory_space<vmem>>, vector<256x64xf32>
    %7 = arith.addf %5, %6 : vector<256x64xf32>
    %cst_7 = arith.constant 0.000000e+00 : bf16
    %8 = vector.broadcast %cst_7 : bf16 to vector<304x64xbf16>
    %c0_8 = arith.constant 0 : index
    %c0_9 = arith.constant 0 : index
    %9 = vector.load %arg8[%c0_8, %c0_9] : memref<304x64xbf16, #tpu.memory_space<vmem>>, vector<304x64xbf16>
    tpu.vector_store %arg8[%c0_8, %c0_9], %8 {strides = array<i32>} : memref<304x64xbf16, #tpu.memory_space<vmem>>, vector<304x64xbf16>,
    %10 = arith.truncf %7 : vector<256x64xf32> to vector<256x64xbf16>
    %c24 = arith.constant 24 : index
    %c0_10 = arith.constant 0 : index
    %11 = vector.load %arg8[%c24, %c0_10] : memref<304x64xbf16, #tpu.memory_space<vmem>>, vector<256x64xbf16>
    tpu.vector_store %arg8[%c24, %c0_10], %10 {strides = array<i32>} : memref<304x64xbf16, #tpu.memory_space<vmem>>, vector<256x64xbf16>,
    %12 = tpu.iota {dimensions = array<i32: 0>} : vector<256x1xi32>
    %c16_i32 = arith.constant 16 : i32
    %c0_i32 = arith.constant 0 : i32
    %13 = arith.cmpi eq, %c16_i32, %c0_i32 : i32
    %c1_i32 = arith.constant 1 : i32
    %14 = arith.select %13, %c1_i32, %c16_i32 : i32
    %15 = vector.broadcast %14 : i32 to vector<256x1xi32>
    %16 = arith.remsi %12, %15 : vector<256x1xi32>
    %c0_i32_11 = arith.constant 0 : i32
    %17 = vector.broadcast %c0_i32_11 : i32 to vector<256x1xi32>
    %18 = arith.cmpi ne, %16, %17 : vector<256x1xi32>
    %c0_i32_12 = arith.constant 0 : i32
    %19 = vector.broadcast %c0_i32_12 : i32 to vector<256x1xi32>
    %20 = arith.cmpi slt, %16, %19 : vector<256x1xi32>
    %c0_i32_13 = arith.constant 0 : i32
    %21 = arith.cmpi slt, %14, %c0_i32_13 : i32
    %22 = vector.broadcast %21 : i1 to vector<256x1xi1>
    %23 = vector.broadcast %22 : vector<256x1xi1> to vector<256x1xi1>
    %24 = arith.xori %20, %23 : vector<256x1xi1>
    %25 = arith.andi %24, %18 : vector<256x1xi1>
    %26 = vector.broadcast %14 : i32 to vector<256x1xi32>
    %27 = arith.addi %16, %26 : vector<256x1xi32>
    %28 = arith.select %25, %27, %16 : vector<256x1xi1>, vector<256x1xi32>
    %c0_i32_14 = arith.constant 0 : i32
    %29 = vector.broadcast %c0_i32_14 : i32 to vector<256x1xi32>
    %30 = arith.cmpi sgt, %28, %29 : vector<256x1xi32>
    %c15_i32 = arith.constant 15 : i32
    %31 = vector.broadcast %c15_i32 : i32 to vector<256x1xi32>
    %32 = arith.cmpi slt, %28, %31 : vector<256x1xi32>
    %cst_15 = arith.constant 0.000000e+00 : f32
    %33 = vector.broadcast %cst_15 : f32 to vector<256x64xf32>
    %c7 = arith.constant 7 : index
    %c0_16 = arith.constant 0 : index
    %34 = vector.load %arg8[%c7, %c0_16] : memref<304x64xbf16, #tpu.memory_space<vmem>>, vector<256x64xbf16>
    %cst_17 = arith.constant 0.000000e+00 : bf16
    %35 = vector.broadcast %cst_17 : bf16 to vector<256x64xbf16>
    %36 = vector.shape_cast %30 : vector<256x1xi1> to vector<256x1xi1>
    %37 = vector.broadcast %36 : vector<256x1xi1> to vector<256x64xi1>
    %38 = arith.select %37, %34, %35 : vector<256x64xi1>, vector<256x64xbf16>
    %c0_18 = arith.constant 0 : index
    %c0_19 = arith.constant 0 : index
    %39 = vector.load %arg4[%c0_18, %c0_19] : memref<576x64xbf16, #tpu.memory_space<vmem>>, vector<64x64xbf16>
    %cst_20 = arith.constant dense<0.000000e+00> : vector<256x64xf32>
    %40 = tpu.matmul %38, %39, %cst_20 {dimension_numbers = #tpu.dot_dimension_numbers<[1], [0], [0], [1], [0, 0, 1, 1], [], []>} : vector<256x64xbf16>, vector<64x64xbf16>, vector<256x64xf32> -> vector<256x64xf32>
    %41 = arith.addf %33, %40 : vector<256x64xf32>
    %c8 = arith.constant 8 : index
    %c0_21 = arith.constant 0 : index
    %42 = vector.load %arg8[%c8, %c0_21] : memref<304x64xbf16, #tpu.memory_space<vmem>>, vector<256x64xbf16>
    %c64 = arith.constant 64 : index
    %c0_22 = arith.constant 0 : index
    %43 = vector.load %arg4[%c64, %c0_22] : memref<576x64xbf16, #tpu.memory_space<vmem>>, vector<64x64xbf16>
    %cst_23 = arith.constant dense<0.000000e+00> : vector<256x64xf32>
    %44 = tpu.matmul %42, %43, %cst_23 {dimension_numbers = #tpu.dot_dimension_numbers<[1], [0], [0], [1], [0, 0, 1, 1], [], []>} : vector<256x64xbf16>, vector<64x64xbf16>, vector<256x64xf32> -> vector<256x64xf32>
    %45 = arith.addf %41, %44 : vector<256x64xf32>
    %c9 = arith.constant 9 : index
    %c0_24 = arith.constant 0 : index
    %46 = vector.load %arg8[%c9, %c0_24] : memref<304x64xbf16, #tpu.memory_space<vmem>>, vector<256x64xbf16>
    %cst_25 = arith.constant 0.000000e+00 : bf16
    %47 = vector.broadcast %cst_25 : bf16 to vector<256x64xbf16>
    %48 = vector.shape_cast %32 : vector<256x1xi1> to vector<256x1xi1>
    %49 = vector.broadcast %48 : vector<256x1xi1> to vector<256x64xi1>
    %50 = arith.select %49, %46, %47 : vector<256x64xi1>, vector<256x64xbf16>
    %c128 = arith.constant 128 : index
    %c0_26 = arith.constant 0 : index
    %51 = vector.load %arg4[%c128, %c0_26] : memref<576x64xbf16, #tpu.memory_space<vmem>>, vector<64x64xbf16>
    %cst_27 = arith.constant dense<0.000000e+00> : vector<256x64xf32>
    %52 = tpu.matmul %50, %51, %cst_27 {dimension_numbers = #tpu.dot_dimension_numbers<[1], [0], [0], [1], [0, 0, 1, 1], [], []>} : vector<256x64xbf16>, vector<64x64xbf16>, vector<256x64xf32> -> vector<256x64xf32>
    %53 = arith.addf %45, %52 : vector<256x64xf32>
    %c23 = arith.constant 23 : index
    %c0_28 = arith.constant 0 : index
    %54 = vector.load %arg8[%c23, %c0_28] : memref<304x64xbf16, #tpu.memory_space<vmem>>, vector<256x64xbf16>
    %cst_29 = arith.constant 0.000000e+00 : bf16
    %55 = vector.broadcast %cst_29 : bf16 to vector<256x64xbf16>
    %56 = vector.shape_cast %30 : vector<256x1xi1> to vector<256x1xi1>
    %57 = vector.broadcast %56 : vector<256x1xi1> to vector<256x64xi1>
    %58 = arith.select %57, %54, %55 : vector<256x64xi1>, vector<256x64xbf16>
    %c192 = arith.constant 192 : index
    %c0_30 = arith.constant 0 : index
    %59 = vector.load %arg4[%c192, %c0_30] : memref<576x64xbf16, #tpu.memory_space<vmem>>, vector<64x64xbf16>
    %cst_31 = arith.constant dense<0.000000e+00> : vector<256x64xf32>
    %60 = tpu.matmul %58, %59, %cst_31 {dimension_numbers = #tpu.dot_dimension_numbers<[1], [0], [0], [1], [0, 0, 1, 1], [], []>} : vector<256x64xbf16>, vector<64x64xbf16>, vector<256x64xf32> -> vector<256x64xf32>
    %61 = arith.addf %53, %60 : vector<256x64xf32>
    %c24_32 = arith.constant 24 : index
    %c0_33 = arith.constant 0 : index
    %62 = vector.load %arg8[%c24_32, %c0_33] : memref<304x64xbf16, #tpu.memory_space<vmem>>, vector<256x64xbf16>
    %c256 = arith.constant 256 : index
    %c0_34 = arith.constant 0 : index
    %63 = vector.load %arg4[%c256, %c0_34] : memref<576x64xbf16, #tpu.memory_space<vmem>>, vector<64x64xbf16>
    %cst_35 = arith.constant dense<0.000000e+00> : vector<256x64xf32>
    %64 = tpu.matmul %62, %63, %cst_35 {dimension_numbers = #tpu.dot_dimension_numbers<[1], [0], [0], [1], [0, 0, 1, 1], [], []>} : vector<256x64xbf16>, vector<64x64xbf16>, vector<256x64xf32> -> vector<256x64xf32>
    %65 = arith.addf %61, %64 : vector<256x64xf32>
    %c25 = arith.constant 25 : index
    %c0_36 = arith.constant 0 : index
    %66 = vector.load %arg8[%c25, %c0_36] : memref<304x64xbf16, #tpu.memory_space<vmem>>, vector<256x64xbf16>
    %cst_37 = arith.constant 0.000000e+00 : bf16
    %67 = vector.broadcast %cst_37 : bf16 to vector<256x64xbf16>
    %68 = vector.shape_cast %32 : vector<256x1xi1> to vector<256x1xi1>
    %69 = vector.broadcast %68 : vector<256x1xi1> to vector<256x64xi1>
    %70 = arith.select %69, %66, %67 : vector<256x64xi1>, vector<256x64xbf16>
    %c320 = arith.constant 320 : index
    %c0_38 = arith.constant 0 : index
    %71 = vector.load %arg4[%c320, %c0_38] : memref<576x64xbf16, #tpu.memory_space<vmem>>, vector<64x64xbf16>
    %cst_39 = arith.constant dense<0.000000e+00> : vector<256x64xf32>
    %72 = tpu.matmul %70, %71, %cst_39 {dimension_numbers = #tpu.dot_dimension_numbers<[1], [0], [0], [1], [0, 0, 1, 1], [], []>} : vector<256x64xbf16>, vector<64x64xbf16>, vector<256x64xf32> -> vector<256x64xf32>
    %73 = arith.addf %65, %72 : vector<256x64xf32>
    %c39 = arith.constant 39 : index
    %c0_40 = arith.constant 0 : index
    %74 = vector.load %arg8[%c39, %c0_40] : memref<304x64xbf16, #tpu.memory_space<vmem>>, vector<256x64xbf16>
    %cst_41 = arith.constant 0.000000e+00 : bf16
    %75 = vector.broadcast %cst_41 : bf16 to vector<256x64xbf16>
    %76 = vector.shape_cast %30 : vector<256x1xi1> to vector<256x1xi1>
    %77 = vector.broadcast %76 : vector<256x1xi1> to vector<256x64xi1>
    %78 = arith.select %77, %74, %75 : vector<256x64xi1>, vector<256x64xbf16>
    %c384 = arith.constant 384 : index
    %c0_42 = arith.constant 0 : index
    %79 = vector.load %arg4[%c384, %c0_42] : memref<576x64xbf16, #tpu.memory_space<vmem>>, vector<64x64xbf16>
    %cst_43 = arith.constant dense<0.000000e+00> : vector<256x64xf32>
    %80 = tpu.matmul %78, %79, %cst_43 {dimension_numbers = #tpu.dot_dimension_numbers<[1], [0], [0], [1], [0, 0, 1, 1], [], []>} : vector<256x64xbf16>, vector<64x64xbf16>, vector<256x64xf32> -> vector<256x64xf32>
    %81 = arith.addf %73, %80 : vector<256x64xf32>
    %c40 = arith.constant 40 : index
    %c0_44 = arith.constant 0 : index
    %82 = vector.load %arg8[%c40, %c0_44] : memref<304x64xbf16, #tpu.memory_space<vmem>>, vector<256x64xbf16>
    %c448 = arith.constant 448 : index
    %c0_45 = arith.constant 0 : index
    %83 = vector.load %arg4[%c448, %c0_45] : memref<576x64xbf16, #tpu.memory_space<vmem>>, vector<64x64xbf16>
    %cst_46 = arith.constant dense<0.000000e+00> : vector<256x64xf32>
    %84 = tpu.matmul %82, %83, %cst_46 {dimension_numbers = #tpu.dot_dimension_numbers<[1], [0], [0], [1], [0, 0, 1, 1], [], []>} : vector<256x64xbf16>, vector<64x64xbf16>, vector<256x64xf32> -> vector<256x64xf32>
    %85 = arith.addf %81, %84 : vector<256x64xf32>
    %c41 = arith.constant 41 : index
    %c0_47 = arith.constant 0 : index
    %86 = vector.load %arg8[%c41, %c0_47] : memref<304x64xbf16, #tpu.memory_space<vmem>>, vector<256x64xbf16>
    %cst_48 = arith.constant 0.000000e+00 : bf16
    %87 = vector.broadcast %cst_48 : bf16 to vector<256x64xbf16>
    %88 = vector.shape_cast %32 : vector<256x1xi1> to vector<256x1xi1>
    %89 = vector.broadcast %88 : vector<256x1xi1> to vector<256x64xi1>
    %90 = arith.select %89, %86, %87 : vector<256x64xi1>, vector<256x64xbf16>
    %c512 = arith.constant 512 : index
    %c0_49 = arith.constant 0 : index
    %91 = vector.load %arg4[%c512, %c0_49] : memref<576x64xbf16, #tpu.memory_space<vmem>>, vector<64x64xbf16>
    %cst_50 = arith.constant dense<0.000000e+00> : vector<256x64xf32>
    %92 = tpu.matmul %90, %91, %cst_50 {dimension_numbers = #tpu.dot_dimension_numbers<[1], [0], [0], [1], [0, 0, 1, 1], [], []>} : vector<256x64xbf16>, vector<64x64xbf16>, vector<256x64xf32> -> vector<256x64xf32>
    %93 = arith.addf %85, %92 : vector<256x64xf32>
    %c0_51 = arith.constant 0 : index
    %c0_52 = arith.constant 0 : index
    %94 = vector.load %arg5[%c0_51, %c0_52] : memref<1x64xf32, #tpu.memory_space<vmem>>, vector<1x64xf32>
    %95 = vector.broadcast %94 : vector<1x64xf32> to vector<256x64xf32>
    %96 = arith.addf %93, %95 : vector<256x64xf32>
    %c0_53 = arith.constant 0 : index
    %c0_54 = arith.constant 0 : index
    %97 = vector.load %arg7[%c0_53, %c0_54] : memref<256x64xf32, #tpu.memory_space<vmem>>, vector<256x64xf32>
    tpu.vector_store %arg7[%c0_53, %c0_54], %96 {strides = array<i32>} : memref<256x64xf32, #tpu.memory_space<vmem>>, vector<256x64xf32>,
    return
  }
  func.func @transform_0(%arg0: i32) -> (i32, i32) {
    %c0_i32 = arith.constant 0 : i32
    %c0_i32_0 = arith.constant 0 : i32
    return %arg0, %c0_i32 : i32, i32
  }
  func.func @transform_1(%arg0: i32) -> (i32, i32) {
    %c0_i32 = arith.constant 0 : i32
    %c0_i32_0 = arith.constant 0 : i32
    %c0_i32_1 = arith.constant 0 : i32
    return %c0_i32, %c0_i32_0 : i32, i32
  }
  func.func @transform_2(%arg0: i32) -> (i32, i32) {
    %c0_i32 = arith.constant 0 : i32
    %c0_i32_0 = arith.constant 0 : i32
    %c0_i32_1 = arith.constant 0 : i32
    return %c0_i32, %c0_i32_0 : i32, i32
  }
  func.func @transform_3(%arg0: i32) -> (i32, i32) {
    %c0_i32 = arith.constant 0 : i32
    %c0_i32_0 = arith.constant 0 : i32
    %c0_i32_1 = arith.constant 0 : i32
    return %c0_i32, %c0_i32_0 : i32, i32
  }
  func.func @transform_4(%arg0: i32) -> (i32, i32) {
    %c0_i32 = arith.constant 0 : i32
    %c0_i32_0 = arith.constant 0 : i32
    %c0_i32_1 = arith.constant 0 : i32
    return %c0_i32, %c0_i32_0 : i32, i32
  }
  func.func @transform_5(%arg0: i32) -> (i32, i32) {
    %c0_i32 = arith.constant 0 : i32
    %c0_i32_0 = arith.constant 0 : i32
    return %arg0, %c0_i32 : i32, i32
  }
  func.func @transform_6(%arg0: i32) -> (i32, i32) {
    %c0_i32 = arith.constant 0 : i32
    %c0_i32_0 = arith.constant 0 : i32
    return %arg0, %c0_i32 : i32, i32
  }
}

</mosaic_0001>

<bundles_post_ra>
// kernel: detector_backbone_with_fpn_forward.6
= control target key start
LH: loop header
LB: loop body
LE: loop exit
PB: predicated region body
PF: predicated region fallthrough
CT: control target
= control target key end

     0   :  { %v1692_v0 = vmov 0   ;;  %s2150_s1 = inlined_call_operand.vmem [shape: bf16[256,128], index: 1, kind: input, shape index: {}]   ;;  %s2151_s0 = inlined_call_operand.vmem [shape: bf16[512,256], index: 0, kind: input, shape index: {}]   ;;  %s2152_s2 = inlined_call_operand.vmem [shape: f32[1,128], index: 2, kind: input, shape index: {}]   ;;  %s2153_s3 = inlined_call_operand.vmem [shape: bf16[512,128], index: 3, kind: output, shape index: {}]  }
   0x1   :  { %534 = vmatprep.subr.bf16.mxu0 %v1692_v0  ;;  %1547 = vmatprep.subr.bf16.mxu1 %v1692_v0  ;;  %v1580_v1 = vld [vmem:[%s2150_s1] sm:$0xff]   ;;  %v1581_v2 = vld [vmem:[%s2150_s1 + $0x8] sm:$0xff]   ;;  %v1582_v3 = vld [vmem:[%s2150_s1 + $0x10] sm:$0xff]  }
   0x2   :  { %535 = vmatpush1.bf16.msra.mxu0 %v1580_v1  ;;  %1563 = vmatpush1.bf16.msra.mxu1 %v1580_v1  ;;  %v1583_v4 = vld [vmem:[%s2150_s1 + $0x18] sm:$0xff]   ;;  %v1584_v5 = vld [vmem:[%s2150_s1 + $0x20] sm:$0xff]   ;;  %v1585_v7 = vld [vmem:[%s2150_s1 + $0x28] sm:$0xff]  }
   0x3   :  { %536 = vmatprep.subr.bf16.mxu0 %v1692_v0  ;;  %1548 = vmatprep.subr.bf16.mxu1 %v1692_v0  ;;  %v1598_v6 = vld [vmem:[%s2151_s0 + $0x4] ss:$8 sps:$4 sm:$0xff]   ;;  %v1586_v9 = vld [vmem:[%s2150_s1 + $0x30] sm:$0xff]   ;;  %v1587_v10 = vld [vmem:[%s2150_s1 + $0x38] sm:$0xff]  }
   0x4   :  { %v1601_v8 = vld [vmem:[%s2151_s0 + $0x104] ss:$8 sps:$4 sm:$0xff]   ;;  %566 = vmatprep.mubr.bf16.mxu0 %v1598_v6  ;;  %v1590_v13 = vld [vmem:[%s2150_s1 + $0x50] sm:$0xff]   ;;  %v1591_v14 = vld [vmem:[%s2150_s1 + $0x58] sm:$0xff]  }
   0x5   :  { %694 = vmatprep.mubr.bf16.mxu1 %v1601_v8  ;;  %v1588_v11 = vld [vmem:[%s2150_s1 + $0x40] sm:$0xff]   ;;  %v1589_v12 = vld [vmem:[%s2150_s1 + $0x48] sm:$0xff]   ;;  %v1594_v17 = vld [vmem:[%s2150_s1 + $0x70] sm:$0xff]  }
   0x6   :  { %537 = vmatpush1.bf16.msra.mxu0 %v1581_v2  ;;  %1564 = vmatpush1.bf16.msra.mxu1 %v1581_v2  ;;  %v1592_v15 = vld [vmem:[%s2150_s1 + $0x60] sm:$0xff]   ;;  %v1593_v16 = vld [vmem:[%s2150_s1 + $0x68] sm:$0xff]   ;;  %v1595_v18 = vld [vmem:[%s2150_s1 + $0x78] sm:$0xff]  }
   0x7   :  { %538 = vmatprep.subr.bf16.mxu0 %v1692_v0  ;;  %1549 = vmatprep.subr.bf16.mxu1 %v1692_v0  ;;  %v1596_v19 = vld [vmem:[%s2151_s0] ss:$8 sps:$4 sm:$0xff]   ;;  %v1602_v21 = vld [vmem:[%s2151_s0 + $0x14] ss:$8 sps:$4 sm:$0xff]   ;;  %v1606_v23 = vld [vmem:[%s2151_s0 + $0x10] ss:$8 sps:$4 sm:$0xff]  }
   0x8   :  { %v1599_v20 = vld [vmem:[%s2151_s0 + $0x100] ss:$8 sps:$4 sm:$0xff]   ;;  %v1604_v22 = vld [vmem:[%s2151_s0 + $0x114] ss:$8 sps:$4 sm:$0xff]   ;;  %v1607_v24 = vld [vmem:[%s2151_s0 + $0x110] ss:$8 sps:$4 sm:$0xff]  }
   0x9   :  { %v1608_v25 = vld [vmem:[%s2151_s0 + $0x24] ss:$8 sps:$4 sm:$0xff]   ;;  %v1612_v27 = vld [vmem:[%s2151_s0 + $0x20] ss:$8 sps:$4 sm:$0xff]   ;;  %v1614_v29 = vld [vmem:[%s2151_s0 + $0x34] ss:$8 sps:$4 sm:$0xff]  }
   0xa   :  { %539 = vmatpush1.bf16.msra.mxu0 %v1582_v3  ;;  %1565 = vmatpush1.bf16.msra.mxu1 %v1582_v3  ;;  %v1610_v26 = vld [vmem:[%s2151_s0 + $0x124] ss:$8 sps:$4 sm:$0xff]   ;;  %v1613_v28 = vld [vmem:[%s2151_s0 + $0x120] ss:$8 sps:$4 sm:$0xff]   ;;  %v1616_v30 = vld [vmem:[%s2151_s0 + $0x134] ss:$8 sps:$4 sm:$0xff]  }
   0xb   :  { %540 = vmatprep.subr.bf16.mxu0 %v1692_v0  ;;  %1550 = vmatprep.subr.bf16.mxu1 %v1692_v0  ;;  %v1618_v31 = vld [vmem:[%s2151_s0 + $0x30] ss:$8 sps:$4 sm:$0xff]   ;;  %v1620_v33 = vld [vmem:[%s2151_s0 + $0x44] ss:$8 sps:$4 sm:$0xff]   ;;  %v1624_v35 = vld [vmem:[%s2151_s0 + $0x40] ss:$8 sps:$4 sm:$0xff]  }
   0xc   :  { %v1619_v32 = vld [vmem:[%s2151_s0 + $0x130] ss:$8 sps:$4 sm:$0xff]   ;;  %v1622_v34 = vld [vmem:[%s2151_s0 + $0x144] ss:$8 sps:$4 sm:$0xff]   ;;  %v1625_v36 = vld [vmem:[%s2151_s0 + $0x140] ss:$8 sps:$4 sm:$0xff]  }
   0xd   :  { %v1626_v37 = vld [vmem:[%s2151_s0 + $0x54] ss:$8 sps:$4 sm:$0xff]   ;;  %v1630_v39 = vld [vmem:[%s2151_s0 + $0x50] ss:$8 sps:$4 sm:$0xff]   ;;  %v1632_v41 = vld [vmem:[%s2151_s0 + $0x64] ss:$8 sps:$4 sm:$0xff]  }
   0xe   :  { %541 = vmatpush1.bf16.msra.mxu0 %v1583_v4  ;;  %1566 = vmatpush1.bf16.msra.mxu1 %v1583_v4  ;;  %v1628_v38 = vld [vmem:[%s2151_s0 + $0x154] ss:$8 sps:$4 sm:$0xff]   ;;  %v1631_v40 = vld [vmem:[%s2151_s0 + $0x150] ss:$8 sps:$4 sm:$0xff]   ;;  %v1634_v42 = vld [vmem:[%s2151_s0 + $0x164] ss:$8 sps:$4 sm:$0xff]  }
   0xf   :  { %542 = vmatprep.subr.bf16.mxu0 %v1692_v0  ;;  %1551 = vmatprep.subr.bf16.mxu1 %v1692_v0  ;;  %v1636_v43 = vld [vmem:[%s2151_s0 + $0x60] ss:$8 sps:$4 sm:$0xff]   ;;  %v1638_v45 = vld [vmem:[%s2151_s0 + $0x74] ss:$8 sps:$4 sm:$0xff]   ;;  %v1642_v47 = vld [vmem:[%s2151_s0 + $0x70] ss:$8 sps:$4 sm:$0xff]  }
  0x10   :  { %v1637_v44 = vld [vmem:[%s2151_s0 + $0x160] ss:$8 sps:$4 sm:$0xff]   ;;  %v1640_v46 = vld [vmem:[%s2151_s0 + $0x174] ss:$8 sps:$4 sm:$0xff]   ;;  %v1643_v48 = vld [vmem:[%s2151_s0 + $0x170] ss:$8 sps:$4 sm:$0xff]  }
  0x11   :  { %v1644_v49 = vld [vmem:[%s2151_s0 + $0x84] ss:$8 sps:$4 sm:$0xff]   ;;  %v1648_v51 = vld [vmem:[%s2151_s0 + $0x80] ss:$8 sps:$4 sm:$0xff]   ;;  %v1650_v53 = vld [vmem:[%s2151_s0 + $0x94] ss:$8 sps:$4 sm:$0xff]  }
  0x12   :  { %543 = vmatpush1.bf16.msra.mxu0 %v1584_v5  ;;  %1567 = vmatpush1.bf16.msra.mxu1 %v1584_v5  ;;  %v1646_v50 = vld [vmem:[%s2151_s0 + $0x184] ss:$8 sps:$4 sm:$0xff]   ;;  %v1649_v52 = vld [vmem:[%s2151_s0 + $0x180] ss:$8 sps:$4 sm:$0xff]   ;;  %v1652_v54 = vld [vmem:[%s2151_s0 + $0x194] ss:$8 sps:$4 sm:$0xff]  }
  0x13   :  { %544 = vmatprep.subr.bf16.mxu0 %v1692_v0  ;;  %1552 = vmatprep.subr.bf16.mxu1 %v1692_v0  ;;  %v1654_v55 = vld [vmem:[%s2151_s0 + $0x90] ss:$8 sps:$4 sm:$0xff]   ;;  %v1656_v57 = vld [vmem:[%s2151_s0 + $0xa4] ss:$8 sps:$4 sm:$0xff]   ;;  %v1660_v59 = vld [vmem:[%s2151_s0 + $0xa0] ss:$8 sps:$4 sm:$0xff]  }
  0x14   :  { %v1655_v56 = vld [vmem:[%s2151_s0 + $0x190] ss:$8 sps:$4 sm:$0xff]   ;;  %v1658_v58 = vld [vmem:[%s2151_s0 + $0x1a4] ss:$8 sps:$4 sm:$0xff]   ;;  %v1661_v60 = vld [vmem:[%s2151_s0 + $0x1a0] ss:$8 sps:$4 sm:$0xff]  }
  0x15   :  { %v1662_v61 = vld [vmem:[%s2151_s0 + $0xb4] ss:$8 sps:$4 sm:$0xff]   ;;  %v1666_v63 = vld [vmem:[%s2151_s0 + $0xb0] ss:$8 sps:$4 sm:$0xff]   ;;  %v1668_v1 = vld [vmem:[%s2151_s0 + $0xc4] ss:$8 sps:$4 sm:$0xff]  }
  0x16   :  { %545 = vmatpush1.bf16.msra.mxu0 %v1585_v7  ;;  %1568 = vmatpush1.bf16.msra.mxu1 %v1585_v7  ;;  %v1664_v62 = vld [vmem:[%s2151_s0 + $0x1b4] ss:$8 sps:$4 sm:$0xff]   ;;  %v1670_v2 = vld [vmem:[%s2151_s0 + $0x1c4] ss:$8 sps:$4 sm:$0xff]   ;;  %v1672_v3 = vld [vmem:[%s2151_s0 + $0xc0] ss:$8 sps:$4 sm:$0xff]  }
  0x17   :  { %546 = vmatprep.subr.bf16.mxu0 %v1692_v0  ;;  %1553 = vmatprep.subr.bf16.mxu1 %v1692_v0  ;;  %v1673_v4 = vld [vmem:[%s2151_s0 + $0x1c0] ss:$8 sps:$4 sm:$0xff]   ;;  %v1674_v5 = vld [vmem:[%s2151_s0 + $0xd4] ss:$8 sps:$4 sm:$0xff]   ;;  %v1678_v7 = vld [vmem:[%s2151_s0 + $0xd0] ss:$8 sps:$4 sm:$0xff]  }
  0x18   :  { %v1676_v6 = vld [vmem:[%s2151_s0 + $0x1d4] ss:$8 sps:$4 sm:$0xff]   ;;  %v1679_v8 = vld [vmem:[%s2151_s0 + $0x1d0] ss:$8 sps:$4 sm:$0xff]  }
  0x1a   :  { %547 = vmatpush1.bf16.msra.mxu0 %v1586_v9  ;;  %1569 = vmatpush1.bf16.msra.mxu1 %v1586_v9  ;;  %v1680_v9 = vld [vmem:[%s2151_s0 + $0xe4] ss:$8 sps:$4 sm:$0xff]  }
  0x1b   :  { %548 = vmatprep.subr.bf16.mxu0 %v1692_v0  ;;  %1554 = vmatprep.subr.bf16.mxu1 %v1692_v0 }
  0x1e   :  { %549 = vmatpush1.bf16.msra.mxu0 %v1587_v10  ;;  %1570 = vmatpush1.bf16.msra.mxu1 %v1587_v10  ;;  %v1682_v10 = vld [vmem:[%s2151_s0 + $0x1e4] ss:$8 sps:$4 sm:$0xff]  }
  0x1f   :  { %550 = vmatprep.subr.bf16.mxu0 %v1692_v0  ;;  %1555 = vmatprep.subr.bf16.mxu1 %v1692_v0 }
  0x22   :  { %551 = vmatpush1.bf16.msra.mxu0 %v1588_v11  ;;  %1571 = vmatpush1.bf16.msra.mxu1 %v1588_v11  ;;  %v1684_v11 = vld [vmem:[%s2151_s0 + $0xe0] ss:$8 sps:$4 sm:$0xff]  }
  0x23   :  { %552 = vmatprep.subr.bf16.mxu0 %v1692_v0  ;;  %1556 = vmatprep.subr.bf16.mxu1 %v1692_v0 }
  0x26   :  { %553 = vmatpush1.bf16.msra.mxu0 %v1589_v12  ;;  %1572 = vmatpush1.bf16.msra.mxu1 %v1589_v12  ;;  %v1685_v12 = vld [vmem:[%s2151_s0 + $0x1e0] ss:$8 sps:$4 sm:$0xff]  }
  0x27   :  { %554 = vmatprep.subr.bf16.mxu0 %v1692_v0  ;;  %1557 = vmatprep.subr.bf16.mxu1 %v1692_v0 }
  0x2a   :  { %555 = vmatpush1.bf16.msra.mxu0 %v1590_v13  ;;  %1573 = vmatpush1.bf16.msra.mxu1 %v1590_v13  ;;  %v1686_v13 = vld [vmem:[%s2151_s0 + $0xf4] ss:$8 sps:$4 sm:$0xff]  }
  0x2b   :  { %556 = vmatprep.subr.bf16.mxu0 %v1692_v0  ;;  %1558 = vmatprep.subr.bf16.mxu1 %v1692_v0 }
  0x2e   :  { %557 = vmatpush1.bf16.msra.mxu0 %v1591_v14  ;;  %1574 = vmatpush1.bf16.msra.mxu1 %v1591_v14  ;;  %v1688_v14 = vld [vmem:[%s2151_s0 + $0x1f4] ss:$8 sps:$4 sm:$0xff]  }
  0x2f   :  { %558 = vmatprep.subr.bf16.mxu0 %v1692_v0  ;;  %1559 = vmatprep.subr.bf16.mxu1 %v1692_v0 }
  0x32   :  { %559 = vmatpush1.bf16.msra.mxu0 %v1592_v15  ;;  %1575 = vmatpush1.bf16.msra.mxu1 %v1592_v15  ;;  %v1690_v15 = vld [vmem:[%s2151_s0 + $0xf0] ss:$8 sps:$4 sm:$0xff]  }
  0x33   :  { %560 = vmatprep.subr.bf16.mxu0 %v1692_v0  ;;  %1560 = vmatprep.subr.bf16.mxu1 %v1692_v0 }
  0x36   :  { %561 = vmatpush1.bf16.msra.mxu0 %v1593_v16  ;;  %1576 = vmatpush1.bf16.msra.mxu1 %v1593_v16  ;;  %v1691_v16 = vld [vmem:[%s2151_s0 + $0x1f0] ss:$8 sps:$4 sm:$0xff]  }
  0x37   :  { %562 = vmatprep.subr.bf16.mxu0 %v1692_v0  ;;  %1561 = vmatprep.subr.bf16.mxu1 %v1692_v0 }
  0x3a   :  { %563 = vmatpush1.bf16.msra.mxu0 %v1594_v17  ;;  %1577 = vmatpush1.bf16.msra.mxu1 %v1594_v17  ;;  %v1988_v17 = vld [vmem:[%s2152_s2] ss:$0 sm:$0xff] }
  0x3b   :  { %564 = vmatprep.subr.bf16.mxu0 %v1692_v0  ;;  %1562 = vmatprep.subr.bf16.mxu1 %v1692_v0  ;;  %v1667_v0 = vld [vmem:[%s2151_s0 + $0x1b0] ss:$8 sps:$4 sm:$0xff]  }
  0x3e   :  { %565 = vmatpush1.bf16.msra.mxu0 %v1595_v18  ;;  %1578 = vmatpush1.bf16.msra.mxu1 %v1595_v18 }
  0x41   :  { %567 = vmatmul.mubr.bf16.vlgmr.msra.gmra.mrb[0].mxu0 %v1596_v19  ;;  %695 = vmatmul.mubr.bf16.vlgmr.msra.gmra.mrb[0].mxu1 %v1599_v20 }
  0x42   :  { %574 = vmatprep.mubr.bf16.mxu0 %v1602_v21  ;;  %702 = vmatprep.mubr.bf16.mxu1 %v1604_v22 }
  0x49   :  { %575 = vmatmul.mubr.bf16.gmra.mrb[4].mxu0 %v1606_v23  ;;  %703 = vmatmul.mubr.bf16.gmra.mrb[4].mxu1 %v1607_v24 }
  0x4a   :  { %582 = vmatprep.mubr.bf16.mxu0 %v1608_v25  ;;  %710 = vmatprep.mubr.bf16.mxu1 %v1610_v26 }
  0x51   :  { %583 = vmatmul.mubr.bf16.gmra.mrb[8].mxu0 %v1612_v27  ;;  %711 = vmatmul.mubr.bf16.gmra.mrb[8].mxu1 %v1613_v28 }
  0x52   :  { %590 = vmatprep.mubr.bf16.mxu0 %v1614_v29  ;;  %718 = vmatprep.mubr.bf16.mxu1 %v1616_v30 }
  0x59   :  { %591 = vmatmul.mubr.bf16.gmra.mrb[12].mxu0 %v1618_v31  ;;  %719 = vmatmul.mubr.bf16.gmra.mrb[12].mxu1 %v1619_v32 }
  0x5a   :  { %598 = vmatprep.mubr.bf16.mxu0 %v1620_v33  ;;  %726 = vmatprep.mubr.bf16.mxu1 %v1622_v34 }
  0x61   :  { %599 = vmatmul.mubr.bf16.gmra.mrb[16].mxu0 %v1624_v35  ;;  %727 = vmatmul.mubr.bf16.gmra.mrb[16].mxu1 %v1625_v36 }
  0x62   :  { %606 = vmatprep.mubr.bf16.mxu0 %v1626_v37  ;;  %734 = vmatprep.mubr.bf16.mxu1 %v1628_v38 }
  0x69   :  { %607 = vmatmul.mubr.bf16.gmra.mrb[20].mxu0 %v1630_v39  ;;  %735 = vmatmul.mubr.bf16.gmra.mrb[20].mxu1 %v1631_v40 }
  0x6a   :  { %614 = vmatprep.mubr.bf16.mxu0 %v1632_v41  ;;  %742 = vmatprep.mubr.bf16.mxu1 %v1634_v42 }
  0x71   :  { %615 = vmatmul.mubr.bf16.gmra.mrb[24].mxu0 %v1636_v43  ;;  %743 = vmatmul.mubr.bf16.gmra.mrb[24].mxu1 %v1637_v44 }
  0x72   :  { %622 = vmatprep.mubr.bf16.mxu0 %v1638_v45  ;;  %750 = vmatprep.mubr.bf16.mxu1 %v1640_v46 }
  0x79   :  { %623 = vmatmul.mubr.bf16.gmra.mrb[28].mxu0 %v1642_v47  ;;  %751 = vmatmul.mubr.bf16.gmra.mrb[28].mxu1 %v1643_v48 }
  0x7a   :  { %630 = vmatprep.mubr.bf16.mxu0 %v1644_v49  ;;  %758 = vmatprep.mubr.bf16.mxu1 %v1646_v50 }
  0x81   :  { %631 = vmatmul.mubr.bf16.gmra.mrb[32].mxu0 %v1648_v51  ;;  %759 = vmatmul.mubr.bf16.gmra.mrb[32].mxu1 %v1649_v52 }
  0x82   :  { %638 = vmatprep.mubr.bf16.mxu0 %v1650_v53  ;;  %766 = vmatprep.mubr.bf16.mxu1 %v1652_v54 }
  0x89   :  { %639 = vmatmul.mubr.bf16.gmra.mrb[36].mxu0 %v1654_v55  ;;  %767 = vmatmul.mubr.bf16.gmra.mrb[36].mxu1 %v1655_v56 }
  0x8a   :  { %646 = vmatprep.mubr.bf16.mxu0 %v1656_v57  ;;  %774 = vmatprep.mubr.bf16.mxu1 %v1658_v58 }
  0x91   :  { %647 = vmatmul.mubr.bf16.gmra.mrb[40].mxu0 %v1660_v59  ;;  %775 = vmatmul.mubr.bf16.gmra.mrb[40].mxu1 %v1661_v60 }
  0x92   :  { %654 = vmatprep.mubr.bf16.mxu0 %v1662_v61  ;;  %782 = vmatprep.mubr.bf16.mxu1 %v1664_v62 }
  0x99   :  { %655 = vmatmul.mubr.bf16.gmra.mrb[44].mxu0 %v1666_v63  ;;  %783 = vmatmul.mubr.bf16.gmra.mrb[44].mxu1 %v1667_v0 }
  0x9a   :  { %662 = vmatprep.mubr.bf16.mxu0 %v1668_v1  ;;  %790 = vmatprep.mubr.bf16.mxu1 %v1670_v2 }
  0xa1   :  { %663 = vmatmul.mubr.bf16.gmra.mrb[48].mxu0 %v1672_v3  ;;  %791 = vmatmul.mubr.bf16.gmra.mrb[48].mxu1 %v1673_v4 }
  0xa2   :  { %670 = vmatprep.mubr.bf16.mxu0 %v1674_v5  ;;  %798 = vmatprep.mubr.bf16.mxu1 %v1676_v6 }
  0xa9   :  { %671 = vmatmul.mubr.bf16.gmra.mrb[52].mxu0 %v1678_v7  ;;  %799 = vmatmul.mubr.bf16.gmra.mrb[52].mxu1 %v1679_v8 }
  0xaa   :  { %678 = vmatprep.mubr.bf16.mxu0 %v1680_v9  ;;  %806 = vmatprep.mubr.bf16.mxu1 %v1682_v10 }
  0xb1   :  { %679 = vmatmul.mubr.bf16.gmra.mrb[56].mxu0 %v1684_v11  ;;  %807 = vmatmul.mubr.bf16.gmra.mrb[56].mxu1 %v1685_v12 }
  0xb2   :  { %686 = vmatprep.mubr.bf16.mxu0 %v1686_v13  ;;  %814 = vmatprep.mubr.bf16.mxu1 %v1688_v14 }
  0xb9   :  { %687 = vmatmul.mubr.bf16.gmra.mrb[60].mxu0 %v1690_v15  ;;  %815 = vmatmul.mubr.bf16.gmra.mrb[60].mxu1 %v1691_v16 }
 0x114   :  { %v568_v18 = vpop.f32.mrb[0].mxu0  ;;  %v696_v19 = vpop.f32.mrb[0].mxu1 }
 0x115   :  { %v570_v20 = vpop.f32.mrb[1].mxu0  ;;  %v698_v21 = vpop.f32.mrb[1].mxu1  ;;  %v569_v24 = vadd.f32 %v1988_v17, %v568_v18  ;;  %v697_v25 = vadd.f32 %v1988_v17, %v696_v19 }
 0x116   :  { %v571_v22 = vpop.f32.mrb[2].mxu0  ;;  %v699_v23 = vpop.f32.mrb[2].mxu1 }
 0x117   :  { %v572_v26 = vadd.f32 %v1988_v17, %v571_v22  ;;  %v700_v27 = vadd.f32 %v1988_v17, %v699_v23  ;;  %v573_v28 = vpop.f32.mrb[3].mxu0  ;;  %v701_v29 = vpop.f32.mrb[3].mxu1 }
 0x119   :  { %v1359_v30 = vpack.c.bf16 %v572_v26, %v569_v24  ;;  %v1439_v31 = vpack.c.bf16 %v700_v27, %v697_v25 }
 0x11b   :  { %1360 = vst [vmem:[%s2153_s3] sm:$0xff] %v1359_v30   ;;  %1531 = vst [vmem:[%s2153_s3 + $0x80] sm:$0xff] %v1439_v31  }
 0x11c   :  { %v576_v32 = vpop.f32.mrb[4].mxu0  ;;  %v704_v33 = vpop.f32.mrb[4].mxu1 }
 0x11d   :  { %v578_v34 = vpop.f32.mrb[5].mxu0  ;;  %v706_v35 = vpop.f32.mrb[5].mxu1  ;;  %v577_v38 = vadd.f32 %v1988_v17, %v576_v32  ;;  %v705_v39 = vadd.f32 %v1988_v17, %v704_v33 }
 0x11e   :  { %v579_v36 = vpop.f32.mrb[6].mxu0  ;;  %v707_v37 = vpop.f32.mrb[6].mxu1 }
 0x11f   :  { %v580_v40 = vadd.f32 %v1988_v17, %v579_v36  ;;  %v708_v41 = vadd.f32 %v1988_v17, %v707_v37  ;;  %v581_v42 = vpop.f32.mrb[7].mxu0  ;;  %v709_v43 = vpop.f32.mrb[7].mxu1 }
 0x121   :  { %v1364_v44 = vpack.c.bf16 %v580_v40, %v577_v38  ;;  %v1444_v45 = vpack.c.bf16 %v708_v41, %v705_v39 }
 0x123   :  { %1516 = vst [vmem:[%s2153_s3 + $0x8] sm:$0xff] %v1364_v44   ;;  %1532 = vst [vmem:[%s2153_s3 + $0x88] sm:$0xff] %v1444_v45  }
 0x124   :  { %v584_v46 = vpop.f32.mrb[8].mxu0  ;;  %v712_v47 = vpop.f32.mrb[8].mxu1 }
 0x125   :  { %v586_v48 = vpop.f32.mrb[9].mxu0  ;;  %v714_v49 = vpop.f32.mrb[9].mxu1  ;;  %v585_v52 = vadd.f32 %v1988_v17, %v584_v46  ;;  %v713_v53 = vadd.f32 %v1988_v17, %v712_v47 }
 0x126   :  { %v587_v50 = vpop.f32.mrb[10].mxu0  ;;  %v715_v51 = vpop.f32.mrb[10].mxu1 }
 0x127   :  { %v588_v54 = vadd.f32 %v1988_v17, %v587_v50  ;;  %v716_v55 = vadd.f32 %v1988_v17, %v715_v51  ;;  %v589_v56 = vpop.f32.mrb[11].mxu0  ;;  %v717_v57 = vpop.f32.mrb[11].mxu1 }
 0x129   :  { %v1369_v58 = vpack.c.bf16 %v588_v54, %v585_v52  ;;  %v1449_v59 = vpack.c.bf16 %v716_v55, %v713_v53 }
 0x12b   :  { %1517 = vst [vmem:[%s2153_s3 + $0x10] sm:$0xff] %v1369_v58   ;;  %1533 = vst [vmem:[%s2153_s3 + $0x90] sm:$0xff] %v1449_v59  }
 0x12c   :  { %v592_v60 = vpop.f32.mrb[12].mxu0  ;;  %v720_v61 = vpop.f32.mrb[12].mxu1 }
 0x12d   :  { %v594_v62 = vpop.f32.mrb[13].mxu0  ;;  %v722_v63 = vpop.f32.mrb[13].mxu1  ;;  %v593_v2 = vadd.f32 %v1988_v17, %v592_v60  ;;  %v721_v3 = vadd.f32 %v1988_v17, %v720_v61 }
 0x12e   :  { %v595_v0 = vpop.f32.mrb[14].mxu0  ;;  %v723_v1 = vpop.f32.mrb[14].mxu1 }
 0x12f   :  { %v596_v4 = vadd.f32 %v1988_v17, %v595_v0  ;;  %v724_v5 = vadd.f32 %v1988_v17, %v723_v1  ;;  %v597_v6 = vpop.f32.mrb[15].mxu0  ;;  %v725_v7 = vpop.f32.mrb[15].mxu1 }
 0x131   :  { %v1374_v8 = vpack.c.bf16 %v596_v4, %v593_v2  ;;  %v1454_v9 = vpack.c.bf16 %v724_v5, %v721_v3 }
 0x133   :  { %1518 = vst [vmem:[%s2153_s3 + $0x18] sm:$0xff] %v1374_v8   ;;  %1534 = vst [vmem:[%s2153_s3 + $0x98] sm:$0xff] %v1454_v9  }
 0x134   :  { %v600_v10 = vpop.f32.mrb[16].mxu0  ;;  %v728_v11 = vpop.f32.mrb[16].mxu1 }
 0x135   :  { %v602_v12 = vpop.f32.mrb[17].mxu0  ;;  %v730_v13 = vpop.f32.mrb[17].mxu1  ;;  %v601_v16 = vadd.f32 %v1988_v17, %v600_v10  ;;  %v729_v18 = vadd.f32 %v1988_v17, %v728_v11 }
 0x136   :  { %v603_v14 = vpop.f32.mrb[18].mxu0  ;;  %v731_v15 = vpop.f32.mrb[18].mxu1 }
 0x137   :  { %v604_v19 = vadd.f32 %v1988_v17, %v603_v14  ;;  %v732_v20 = vadd.f32 %v1988_v17, %v731_v15  ;;  %v605_v21 = vpop.f32.mrb[19].mxu0  ;;  %v733_v22 = vpop.f32.mrb[19].mxu1 }
 0x139   :  { %v1379_v23 = vpack.c.bf16 %v604_v19, %v601_v16  ;;  %v1459_v24 = vpack.c.bf16 %v732_v20, %v729_v18 }
 0x13b   :  { %1519 = vst [vmem:[%s2153_s3 + $0x20] sm:$0xff] %v1379_v23   ;;  %1535 = vst [vmem:[%s2153_s3 + $0xa0] sm:$0xff] %v1459_v24  }
 0x13c   :  { %v608_v25 = vpop.f32.mrb[20].mxu0  ;;  %v736_v26 = vpop.f32.mrb[20].mxu1 }
 0x13d   :  { %v610_v27 = vpop.f32.mrb[21].mxu0  ;;  %v738_v28 = vpop.f32.mrb[21].mxu1  ;;  %v609_v31 = vadd.f32 %v1988_v17, %v608_v25  ;;  %v737_v32 = vadd.f32 %v1988_v17, %v736_v26 }
 0x13e   :  { %v611_v29 = vpop.f32.mrb[22].mxu0  ;;  %v739_v30 = vpop.f32.mrb[22].mxu1 }
 0x13f   :  { %v612_v33 = vadd.f32 %v1988_v17, %v611_v29  ;;  %v740_v34 = vadd.f32 %v1988_v17, %v739_v30  ;;  %v613_v35 = vpop.f32.mrb[23].mxu0  ;;  %v741_v36 = vpop.f32.mrb[23].mxu1 }
 0x141   :  { %v1384_v37 = vpack.c.bf16 %v612_v33, %v609_v31  ;;  %v1464_v38 = vpack.c.bf16 %v740_v34, %v737_v32 }
 0x143   :  { %1520 = vst [vmem:[%s2153_s3 + $0x28] sm:$0xff] %v1384_v37   ;;  %1536 = vst [vmem:[%s2153_s3 + $0xa8] sm:$0xff] %v1464_v38  }
 0x144   :  { %v616_v39 = vpop.f32.mrb[24].mxu0  ;;  %v744_v40 = vpop.f32.mrb[24].mxu1 }
 0x145   :  { %v618_v41 = vpop.f32.mrb[25].mxu0  ;;  %v746_v42 = vpop.f32.mrb[25].mxu1  ;;  %v617_v45 = vadd.f32 %v1988_v17, %v616_v39  ;;  %v745_v46 = vadd.f32 %v1988_v17, %v744_v40 }
 0x146   :  { %v619_v43 = vpop.f32.mrb[26].mxu0  ;;  %v747_v44 = vpop.f32.mrb[26].mxu1 }
 0x147   :  { %v620_v47 = vadd.f32 %v1988_v17, %v619_v43  ;;  %v748_v48 = vadd.f32 %v1988_v17, %v747_v44  ;;  %v621_v49 = vpop.f32.mrb[27].mxu0  ;;  %v749_v50 = vpop.f32.mrb[27].mxu1 }
 0x149   :  { %v1389_v51 = vpack.c.bf16 %v620_v47, %v617_v45  ;;  %v1469_v52 = vpack.c.bf16 %v748_v48, %v745_v46 }
 0x14b   :  { %1521 = vst [vmem:[%s2153_s3 + $0x30] sm:$0xff] %v1389_v51   ;;  %1537 = vst [vmem:[%s2153_s3 + $0xb0] sm:$0xff] %v1469_v52  }
 0x14c   :  { %v624_v53 = vpop.f32.mrb[28].mxu0  ;;  %v752_v54 = vpop.f32.mrb[28].mxu1 }
 0x14d   :  { %v626_v55 = vpop.f32.mrb[29].mxu0  ;;  %v754_v56 = vpop.f32.mrb[29].mxu1  ;;  %v625_v59 = vadd.f32 %v1988_v17, %v624_v53  ;;  %v753_v60 = vadd.f32 %v1988_v17, %v752_v54 }
 0x14e   :  { %v627_v57 = vpop.f32.mrb[30].mxu0  ;;  %v755_v58 = vpop.f32.mrb[30].mxu1 }
 0x14f   :  { %v628_v61 = vadd.f32 %v1988_v17, %v627_v57  ;;  %v756_v62 = vadd.f32 %v1988_v17, %v755_v58  ;;  %v629_v63 = vpop.f32.mrb[31].mxu0  ;;  %v757_v0 = vpop.f32.mrb[31].mxu1 }
 0x151   :  { %v1394_v1 = vpack.c.bf16 %v628_v61, %v625_v59  ;;  %v1474_v2 = vpack.c.bf16 %v756_v62, %v753_v60 }
 0x153   :  { %1522 = vst [vmem:[%s2153_s3 + $0x38] sm:$0xff] %v1394_v1   ;;  %1538 = vst [vmem:[%s2153_s3 + $0xb8] sm:$0xff] %v1474_v2  }
 0x154   :  { %v632_v3 = vpop.f32.mrb[32].mxu0  ;;  %v760_v4 = vpop.f32.mrb[32].mxu1 }
 0x155   :  { %v634_v5 = vpop.f32.mrb[33].mxu0  ;;  %v762_v6 = vpop.f32.mrb[33].mxu1  ;;  %v633_v9 = vadd.f32 %v1988_v17, %v632_v3  ;;  %v761_v10 = vadd.f32 %v1988_v17, %v760_v4 }
 0x156   :  { %v635_v7 = vpop.f32.mrb[34].mxu0  ;;  %v763_v8 = vpop.f32.mrb[34].mxu1 }
 0x157   :  { %v636_v11 = vadd.f32 %v1988_v17, %v635_v7  ;;  %v764_v12 = vadd.f32 %v1988_v17, %v763_v8  ;;  %v637_v13 = vpop.f32.mrb[35].mxu0  ;;  %v765_v14 = vpop.f32.mrb[35].mxu1 }
 0x159   :  { %v1399_v15 = vpack.c.bf16 %v636_v11, %v633_v9  ;;  %v1479_v16 = vpack.c.bf16 %v764_v12, %v761_v10 }
 0x15b   :  { %1523 = vst [vmem:[%s2153_s3 + $0x40] sm:$0xff] %v1399_v15   ;;  %1539 = vst [vmem:[%s2153_s3 + $0xc0] sm:$0xff] %v1479_v16  }
 0x15c   :  { %v640_v18 = vpop.f32.mrb[36].mxu0  ;;  %v768_v19 = vpop.f32.mrb[36].mxu1 }
 0x15d   :  { %v642_v20 = vpop.f32.mrb[37].mxu0  ;;  %v770_v21 = vpop.f32.mrb[37].mxu1  ;;  %v641_v24 = vadd.f32 %v1988_v17, %v640_v18  ;;  %v769_v25 = vadd.f32 %v1988_v17, %v768_v19 }
 0x15e   :  { %v643_v22 = vpop.f32.mrb[38].mxu0  ;;  %v771_v23 = vpop.f32.mrb[38].mxu1 }
 0x15f   :  { %v644_v26 = vadd.f32 %v1988_v17, %v643_v22  ;;  %v772_v27 = vadd.f32 %v1988_v17, %v771_v23  ;;  %v645_v28 = vpop.f32.mrb[39].mxu0  ;;  %v773_v29 = vpop.f32.mrb[39].mxu1 }
 0x161   :  { %v1404_v30 = vpack.c.bf16 %v644_v26, %v641_v24  ;;  %v1484_v31 = vpack.c.bf16 %v772_v27, %v769_v25 }
 0x163   :  { %1524 = vst [vmem:[%s2153_s3 + $0x48] sm:$0xff] %v1404_v30   ;;  %1540 = vst [vmem:[%s2153_s3 + $0xc8] sm:$0xff] %v1484_v31  }
 0x164   :  { %v648_v32 = vpop.f32.mrb[40].mxu0  ;;  %v776_v33 = vpop.f32.mrb[40].mxu1 }
 0x165   :  { %v650_v34 = vpop.f32.mrb[41].mxu0  ;;  %v778_v35 = vpop.f32.mrb[41].mxu1  ;;  %v649_v38 = vadd.f32 %v1988_v17, %v648_v32  ;;  %v777_v39 = vadd.f32 %v1988_v17, %v776_v33 }
 0x166   :  { %v651_v36 = vpop.f32.mrb[42].mxu0  ;;  %v779_v37 = vpop.f32.mrb[42].mxu1 }
 0x167   :  { %v652_v40 = vadd.f32 %v1988_v17, %v651_v36  ;;  %v780_v41 = vadd.f32 %v1988_v17, %v779_v37  ;;  %v653_v42 = vpop.f32.mrb[43].mxu0  ;;  %v781_v43 = vpop.f32.mrb[43].mxu1 }
 0x169   :  { %v1409_v44 = vpack.c.bf16 %v652_v40, %v649_v38  ;;  %v1489_v45 = vpack.c.bf16 %v780_v41, %v777_v39 }
 0x16b   :  { %1525 = vst [vmem:[%s2153_s3 + $0x50] sm:$0xff] %v1409_v44   ;;  %1541 = vst [vmem:[%s2153_s3 + $0xd0] sm:$0xff] %v1489_v45  }
 0x16c   :  { %v656_v46 = vpop.f32.mrb[44].mxu0  ;;  %v784_v47 = vpop.f32.mrb[44].mxu1 }
 0x16d   :  { %v658_v48 = vpop.f32.mrb[45].mxu0  ;;  %v786_v49 = vpop.f32.mrb[45].mxu1  ;;  %v657_v52 = vadd.f32 %v1988_v17, %v656_v46  ;;  %v785_v53 = vadd.f32 %v1988_v17, %v784_v47 }
 0x16e   :  { %v659_v50 = vpop.f32.mrb[46].mxu0  ;;  %v787_v51 = vpop.f32.mrb[46].mxu1 }
 0x16f   :  { %v660_v54 = vadd.f32 %v1988_v17, %v659_v50  ;;  %v788_v55 = vadd.f32 %v1988_v17, %v787_v51  ;;  %v661_v56 = vpop.f32.mrb[47].mxu0  ;;  %v789_v57 = vpop.f32.mrb[47].mxu1 }
 0x171   :  { %v1414_v58 = vpack.c.bf16 %v660_v54, %v657_v52  ;;  %v1494_v59 = vpack.c.bf16 %v788_v55, %v785_v53 }
 0x173   :  { %1526 = vst [vmem:[%s2153_s3 + $0x58] sm:$0xff] %v1414_v58   ;;  %1542 = vst [vmem:[%s2153_s3 + $0xd8] sm:$0xff] %v1494_v59  }
 0x174   :  { %v664_v60 = vpop.f32.mrb[48].mxu0  ;;  %v792_v61 = vpop.f32.mrb[48].mxu1 }
 0x175   :  { %v666_v62 = vpop.f32.mrb[49].mxu0  ;;  %v794_v63 = vpop.f32.mrb[49].mxu1  ;;  %v665_v2 = vadd.f32 %v1988_v17, %v664_v60  ;;  %v793_v3 = vadd.f32 %v1988_v17, %v792_v61 }
 0x176   :  { %v667_v0 = vpop.f32.mrb[50].mxu0  ;;  %v795_v1 = vpop.f32.mrb[50].mxu1 }
 0x177   :  { %v668_v4 = vadd.f32 %v1988_v17, %v667_v0  ;;  %v796_v5 = vadd.f32 %v1988_v17, %v795_v1  ;;  %v669_v6 = vpop.f32.mrb[51].mxu0  ;;  %v797_v7 = vpop.f32.mrb[51].mxu1 }
 0x179   :  { %v1419_v8 = vpack.c.bf16 %v668_v4, %v665_v2  ;;  %v1499_v9 = vpack.c.bf16 %v796_v5, %v793_v3 }
 0x17b   :  { %1527 = vst [vmem:[%s2153_s3 + $0x60] sm:$0xff] %v1419_v8   ;;  %1543 = vst [vmem:[%s2153_s3 + $0xe0] sm:$0xff] %v1499_v9  }
 0x17c   :  { %v672_v10 = vpop.f32.mrb[52].mxu0  ;;  %v800_v11 = vpop.f32.mrb[52].mxu1 }
 0x17d   :  { %v674_v12 = vpop.f32.mrb[53].mxu0  ;;  %v802_v13 = vpop.f32.mrb[53].mxu1  ;;  %v673_v16 = vadd.f32 %v1988_v17, %v672_v10  ;;  %v801_v18 = vadd.f32 %v1988_v17, %v800_v11 }
 0x17e   :  { %v675_v14 = vpop.f32.mrb[54].mxu0  ;;  %v803_v15 = vpop.f32.mrb[54].mxu1 }
 0x17f   :  { %v676_v19 = vadd.f32 %v1988_v17, %v675_v14  ;;  %v804_v20 = vadd.f32 %v1988_v17, %v803_v15  ;;  %v677_v21 = vpop.f32.mrb[55].mxu0  ;;  %v805_v22 = vpop.f32.mrb[55].mxu1 }
 0x181   :  { %v1424_v23 = vpack.c.bf16 %v676_v19, %v673_v16  ;;  %v1504_v24 = vpack.c.bf16 %v804_v20, %v801_v18 }
 0x183   :  { %1528 = vst [vmem:[%s2153_s3 + $0x68] sm:$0xff] %v1424_v23   ;;  %1544 = vst [vmem:[%s2153_s3 + $0xe8] sm:$0xff] %v1504_v24  }
 0x184   :  { %v680_v25 = vpop.f32.mrb[56].mxu0  ;;  %v808_v26 = vpop.f32.mrb[56].mxu1 }
 0x185   :  { %v682_v27 = vpop.f32.mrb[57].mxu0  ;;  %v810_v28 = vpop.f32.mrb[57].mxu1  ;;  %v681_v31 = vadd.f32 %v1988_v17, %v680_v25  ;;  %v809_v32 = vadd.f32 %v1988_v17, %v808_v26 }
 0x186   :  { %v683_v29 = vpop.f32.mrb[58].mxu0  ;;  %v811_v30 = vpop.f32.mrb[58].mxu1 }
 0x187   :  { %v684_v33 = vadd.f32 %v1988_v17, %v683_v29  ;;  %v812_v34 = vadd.f32 %v1988_v17, %v811_v30  ;;  %v685_v35 = vpop.f32.mrb[59].mxu0  ;;  %v813_v36 = vpop.f32.mrb[59].mxu1 }
 0x189   :  { %v1429_v37 = vpack.c.bf16 %v684_v33, %v681_v31  ;;  %v1509_v38 = vpack.c.bf16 %v812_v34, %v809_v32 }
 0x18b   :  { %1529 = vst [vmem:[%s2153_s3 + $0x70] sm:$0xff] %v1429_v37   ;;  %1545 = vst [vmem:[%s2153_s3 + $0xf0] sm:$0xff] %v1509_v38  }
 0x18c   :  { %v688_v39 = vpop.f32.mrb[60].mxu0  ;;  %v816_v40 = vpop.f32.mrb[60].mxu1 }
 0x18d   :  { %v690_v41 = vpop.f32.mrb[61].mxu0  ;;  %v818_v42 = vpop.f32.mrb[61].mxu1  ;;  %v689_v45 = vadd.f32 %v1988_v17, %v688_v39  ;;  %v817_v46 = vadd.f32 %v1988_v17, %v816_v40 }
 0x18e   :  { %v691_v43 = vpop.f32.mrb[62].mxu0  ;;  %v819_v44 = vpop.f32.mrb[62].mxu1 }
 0x18f   :  { %v692_v47 = vadd.f32 %v1988_v17, %v691_v43  ;;  %v820_v48 = vadd.f32 %v1988_v17, %v819_v44  ;;  %v693_v49 = vpop.f32.mrb[63].mxu0  ;;  %v821_v50 = vpop.f32.mrb[63].mxu1 }
 0x191   :  { %v1434_v51 = vpack.c.bf16 %v692_v47, %v689_v45  ;;  %v1514_v52 = vpack.c.bf16 %v820_v48, %v817_v46 }
 0x193   :  { %1530 = vst [vmem:[%s2153_s3 + $0x78] sm:$0xff] %v1434_v51   ;;  %1546 = vst [vmem:[%s2153_s3 + $0xf8] sm:$0xff] %v1514_v52  }

// kernel: detector_backbone_with_fpn_forward.7
= control target key start
LH: loop header
LB: loop body
LE: loop exit
PB: predicated region body
PF: predicated region fallthrough
CT: control target
= control target key end

     0   :  { %s1675_s1 = inlined_call_operand.vmem [shape: bf16[512,256], index: 1, kind: input, shape index: {}]   ;;  %s1676_s0 = inlined_call_operand.vmem [shape: bf16[128,512], index: 0, kind: input, shape index: {}]   ;;  %s1677_s2 = inlined_call_operand.vmem [shape: f32[1,256], index: 2, kind: input, shape index: {}]   ;;  %s1678_s3 = inlined_call_operand.vmem [shape: bf16[128,256], index: 3, kind: output, shape index: {}]  }
   0x1   :  { %v1136_v0 = vld [vmem:[%s1675_s1 + $0x4] ss:$8 sps:$4 sm:$0xff]   ;;  %v1140_v2 = vld [vmem:[%s1675_s1] ss:$8 sps:$4 sm:$0xff]   ;;  %v1142_v4 = vld [vmem:[%s1675_s1 + $0x14] ss:$8 sps:$4 sm:$0xff]  }
   0x2   :  { %v1138_v1 = vld [vmem:[%s1675_s1 + $0x104] ss:$8 sps:$4 sm:$0xff]   ;;  %602 = vmatprep.subr.bf16.mxu1 %v1136_v0  ;;  %v1141_v3 = vld [vmem:[%s1675_s1 + $0x100] ss:$8 sps:$4 sm:$0xff]   ;;  %v1144_v5 = vld [vmem:[%s1675_s1 + $0x114] ss:$8 sps:$4 sm:$0xff]  }
   0x3   :  { %715 = vmatprep.subr.bf16.mxu0 %v1138_v1  ;;  %603 = vmatpush1.bf16.msra.mxu1 %v1140_v2  ;;  %v1146_v6 = vld [vmem:[%s1675_s1 + $0x10] ss:$8 sps:$4 sm:$0xff]   ;;  %v1148_v8 = vld [vmem:[%s1675_s1 + $0x24] ss:$8 sps:$4 sm:$0xff]   ;;  %v1152_v10 = vld [vmem:[%s1675_s1 + $0x20] ss:$8 sps:$4 sm:$0xff]  }
   0x4   :  { %716 = vmatpush1.bf16.msra.mxu0 %v1141_v3  ;;  %604 = vmatprep.subr.bf16.mxu1 %v1142_v4  ;;  %v1147_v7 = vld [vmem:[%s1675_s1 + $0x110] ss:$8 sps:$4 sm:$0xff]   ;;  %v1150_v9 = vld [vmem:[%s1675_s1 + $0x124] ss:$8 sps:$4 sm:$0xff]   ;;  %v1153_v11 = vld [vmem:[%s1675_s1 + $0x120] ss:$8 sps:$4 sm:$0xff]  }
   0x5   :  { %717 = vmatprep.subr.bf16.mxu0 %v1144_v5  ;;  %v1154_v12 = vld [vmem:[%s1675_s1 + $0x34] ss:$8 sps:$4 sm:$0xff]   ;;  %v1158_v14 = vld [vmem:[%s1675_s1 + $0x30] ss:$8 sps:$4 sm:$0xff]   ;;  %v1160_v16 = vld [vmem:[%s1675_s1 + $0x44] ss:$8 sps:$4 sm:$0xff]  }
   0x6   :  { %v1156_v13 = vld [vmem:[%s1675_s1 + $0x134] ss:$8 sps:$4 sm:$0xff]   ;;  %v1159_v15 = vld [vmem:[%s1675_s1 + $0x130] ss:$8 sps:$4 sm:$0xff]   ;;  %v1162_v17 = vld [vmem:[%s1675_s1 + $0x144] ss:$8 sps:$4 sm:$0xff]  }
   0x7   :  { %605 = vmatpush1.bf16.msra.mxu1 %v1146_v6  ;;  %v1164_v18 = vld [vmem:[%s1675_s1 + $0x40] ss:$8 sps:$4 sm:$0xff]   ;;  %v1166_v20 = vld [vmem:[%s1675_s1 + $0x54] ss:$8 sps:$4 sm:$0xff]   ;;  %v1170_v22 = vld [vmem:[%s1675_s1 + $0x50] ss:$8 sps:$4 sm:$0xff]  }
   0x8   :  { %718 = vmatpush1.bf16.msra.mxu0 %v1147_v7  ;;  %606 = vmatprep.subr.bf16.mxu1 %v1148_v8  ;;  %v1165_v19 = vld [vmem:[%s1675_s1 + $0x140] ss:$8 sps:$4 sm:$0xff]   ;;  %v1168_v21 = vld [vmem:[%s1675_s1 + $0x154] ss:$8 sps:$4 sm:$0xff]   ;;  %v1171_v23 = vld [vmem:[%s1675_s1 + $0x150] ss:$8 sps:$4 sm:$0xff]  }
   0x9   :  { %719 = vmatprep.subr.bf16.mxu0 %v1150_v9  ;;  %v1172_v24 = vld [vmem:[%s1675_s1 + $0x64] ss:$8 sps:$4 sm:$0xff]   ;;  %v1176_v26 = vld [vmem:[%s1675_s1 + $0x60] ss:$8 sps:$4 sm:$0xff]   ;;  %v1178_v28 = vld [vmem:[%s1675_s1 + $0x74] ss:$8 sps:$4 sm:$0xff]  }
   0xa   :  { %v1174_v25 = vld [vmem:[%s1675_s1 + $0x164] ss:$8 sps:$4 sm:$0xff]   ;;  %v1177_v27 = vld [vmem:[%s1675_s1 + $0x160] ss:$8 sps:$4 sm:$0xff]   ;;  %v1180_v29 = vld [vmem:[%s1675_s1 + $0x174] ss:$8 sps:$4 sm:$0xff]  }
   0xb   :  { %607 = vmatpush1.bf16.msra.mxu1 %v1152_v10  ;;  %v1182_v30 = vld [vmem:[%s1675_s1 + $0x70] ss:$8 sps:$4 sm:$0xff]   ;;  %v1184_v32 = vld [vmem:[%s1675_s1 + $0x84] ss:$8 sps:$4 sm:$0xff]   ;;  %v1188_v34 = vld [vmem:[%s1675_s1 + $0x80] ss:$8 sps:$4 sm:$0xff]  }
   0xc   :  { %720 = vmatpush1.bf16.msra.mxu0 %v1153_v11  ;;  %608 = vmatprep.subr.bf16.mxu1 %v1154_v12  ;;  %v1183_v31 = vld [vmem:[%s1675_s1 + $0x170] ss:$8 sps:$4 sm:$0xff]   ;;  %v1186_v33 = vld [vmem:[%s1675_s1 + $0x184] ss:$8 sps:$4 sm:$0xff]   ;;  %v1189_v35 = vld [vmem:[%s1675_s1 + $0x180] ss:$8 sps:$4 sm:$0xff]  }
   0xd   :  { %721 = vmatprep.subr.bf16.mxu0 %v1156_v13  ;;  %v1190_v36 = vld [vmem:[%s1675_s1 + $0x94] ss:$8 sps:$4 sm:$0xff]   ;;  %v1194_v38 = vld [vmem:[%s1675_s1 + $0x90] ss:$8 sps:$4 sm:$0xff]   ;;  %v1196_v40 = vld [vmem:[%s1675_s1 + $0xa4] ss:$8 sps:$4 sm:$0xff]  }
   0xe   :  { %v1192_v37 = vld [vmem:[%s1675_s1 + $0x194] ss:$8 sps:$4 sm:$0xff]   ;;  %v1195_v39 = vld [vmem:[%s1675_s1 + $0x190] ss:$8 sps:$4 sm:$0xff]   ;;  %v1198_v41 = vld [vmem:[%s1675_s1 + $0x1a4] ss:$8 sps:$4 sm:$0xff]  }
   0xf   :  { %609 = vmatpush1.bf16.msra.mxu1 %v1158_v14  ;;  %v1200_v42 = vld [vmem:[%s1675_s1 + $0xa0] ss:$8 sps:$4 sm:$0xff]   ;;  %v1202_v44 = vld [vmem:[%s1675_s1 + $0xb4] ss:$8 sps:$4 sm:$0xff]   ;;  %v1206_v46 = vld [vmem:[%s1675_s1 + $0xb0] ss:$8 sps:$4 sm:$0xff]  }
  0x10   :  { %722 = vmatpush1.bf16.msra.mxu0 %v1159_v15  ;;  %610 = vmatprep.subr.bf16.mxu1 %v1160_v16  ;;  %v1201_v43 = vld [vmem:[%s1675_s1 + $0x1a0] ss:$8 sps:$4 sm:$0xff]   ;;  %v1204_v45 = vld [vmem:[%s1675_s1 + $0x1b4] ss:$8 sps:$4 sm:$0xff]   ;;  %v1207_v47 = vld [vmem:[%s1675_s1 + $0x1b0] ss:$8 sps:$4 sm:$0xff]  }
  0x11   :  { %723 = vmatprep.subr.bf16.mxu0 %v1162_v17  ;;  %v1208_v48 = vld [vmem:[%s1675_s1 + $0xc4] ss:$8 sps:$4 sm:$0xff]   ;;  %v1212_v52 = vld [vmem:[%s1675_s1 + $0xc0] ss:$8 sps:$4 sm:$0xff]   ;;  %v1214_v54 = vld [vmem:[%s1675_s1 + $0xd4] ss:$8 sps:$4 sm:$0xff]  }
  0x12   :  { %v1234_v49 = vld [vmem:[%s1676_s0 + $0x4] ss:$16 sps:$4 sm:$0xff]   ;;  %v1237_v51 = vld [vmem:[%s1676_s0 + $0xc] ss:$16 sps:$4 sm:$0xff]   ;;  %v1213_v53 = vld [vmem:[%s1675_s1 + $0x1c0] ss:$8 sps:$4 sm:$0xff]  }
  0x13   :  { %611 = vmatpush1.bf16.msra.mxu1 %v1164_v18  ;;  %v1210_v50 = vld [vmem:[%s1675_s1 + $0x1c4] ss:$8 sps:$4 sm:$0xff]   ;;  %634 = vmatprep.mubr.bf16.mxu1 %v1234_v49  ;;  %v1216_v55 = vld [vmem:[%s1675_s1 + $0x1d4] ss:$8 sps:$4 sm:$0xff]   ;;  %v1218_v56 = vld [vmem:[%s1675_s1 + $0xd0] ss:$8 sps:$4 sm:$0xff]  }
  0x14   :  { %724 = vmatpush1.bf16.msra.mxu0 %v1165_v19  ;;  %612 = vmatprep.subr.bf16.mxu1 %v1166_v20  ;;  %v1219_v57 = vld [vmem:[%s1675_s1 + $0x1d0] ss:$8 sps:$4 sm:$0xff]   ;;  %v1220_v58 = vld [vmem:[%s1675_s1 + $0xe4] ss:$8 sps:$4 sm:$0xff]   ;;  %v1224_v60 = vld [vmem:[%s1675_s1 + $0xe0] ss:$8 sps:$4 sm:$0xff]  }
  0x15   :  { %725 = vmatprep.subr.bf16.mxu0 %v1168_v21  ;;  %747 = vmatprep.mubr.bf16.mxu0 %v1237_v51  ;;  %v1222_v59 = vld [vmem:[%s1675_s1 + $0x1e4] ss:$8 sps:$4 sm:$0xff]   ;;  %v1225_v61 = vld [vmem:[%s1675_s1 + $0x1e0] ss:$8 sps:$4 sm:$0xff]   ;;  %v1226_v62 = vld [vmem:[%s1675_s1 + $0xf4] ss:$8 sps:$4 sm:$0xff]  }
  0x16   :  { %v1228_v63 = vld [vmem:[%s1675_s1 + $0x1f4] ss:$8 sps:$4 sm:$0xff]   ;;  %v1230_v0 = vld [vmem:[%s1675_s1 + $0xf0] ss:$8 sps:$4 sm:$0xff]  }
  0x17   :  { %613 = vmatpush1.bf16.msra.mxu1 %v1170_v22  ;;  %v1231_v1 = vld [vmem:[%s1675_s1 + $0x1f0] ss:$8 sps:$4 sm:$0xff]   ;;  %v1238_v4 = vld [vmem:[%s1676_s0 + $0x24] ss:$16 sps:$4 sm:$0xff]   ;;  %v1240_v5 = vld [vmem:[%s1676_s0 + $0x2c] ss:$16 sps:$4 sm:$0xff]  }
  0x18   :  { %726 = vmatpush1.bf16.msra.mxu0 %v1171_v23  ;;  %614 = vmatprep.subr.bf16.mxu1 %v1172_v24  ;;  %v1232_v2 = vld [vmem:[%s1676_s0] ss:$16 sps:$4 sm:$0xff]   ;;  %v1235_v3 = vld [vmem:[%s1676_s0 + $0x8] ss:$16 sps:$4 sm:$0xff]   ;;  %v1244_v8 = vld [vmem:[%s1676_s0 + $0x44] ss:$16 sps:$4 sm:$0xff]  }
  0x19   :  { %727 = vmatprep.subr.bf16.mxu0 %v1174_v25  ;;  %v1242_v6 = vld [vmem:[%s1676_s0 + $0x20] ss:$16 sps:$4 sm:$0xff]   ;;  %v1243_v7 = vld [vmem:[%s1676_s0 + $0x28] ss:$16 sps:$4 sm:$0xff]   ;;  %v1246_v9 = vld [vmem:[%s1676_s0 + $0x4c] ss:$16 sps:$4 sm:$0xff]  }
  0x1a   :  { %v1248_v10 = vld [vmem:[%s1676_s0 + $0x40] ss:$16 sps:$4 sm:$0xff]   ;;  %v1249_v11 = vld [vmem:[%s1676_s0 + $0x48] ss:$16 sps:$4 sm:$0xff]   ;;  %v1250_v12 = vld [vmem:[%s1676_s0 + $0x64] ss:$16 sps:$4 sm:$0xff]  }
  0x1b   :  { %615 = vmatpush1.bf16.msra.mxu1 %v1176_v26  ;;  %v1252_v13 = vld [vmem:[%s1676_s0 + $0x6c] ss:$16 sps:$4 sm:$0xff]   ;;  %v1254_v14 = vld [vmem:[%s1676_s0 + $0x60] ss:$16 sps:$4 sm:$0xff]   ;;  %v1255_v15 = vld [vmem:[%s1676_s0 + $0x68] ss:$16 sps:$4 sm:$0xff]  }
  0x1c   :  { %728 = vmatpush1.bf16.msra.mxu0 %v1177_v27  ;;  %616 = vmatprep.subr.bf16.mxu1 %v1178_v28  ;;  %v1256_v16 = vld [vmem:[%s1676_s0 + $0x84] ss:$16 sps:$4 sm:$0xff]   ;;  %v1258_v17 = vld [vmem:[%s1676_s0 + $0x8c] ss:$16 sps:$4 sm:$0xff]   ;;  %v1260_v18 = vld [vmem:[%s1676_s0 + $0x80] ss:$16 sps:$4 sm:$0xff]  }
  0x1d   :  { %729 = vmatprep.subr.bf16.mxu0 %v1180_v29  ;;  %v1261_v19 = vld [vmem:[%s1676_s0 + $0x88] ss:$16 sps:$4 sm:$0xff]   ;;  %v1262_v20 = vld [vmem:[%s1676_s0 + $0xa4] ss:$16 sps:$4 sm:$0xff]   ;;  %v1264_v21 = vld [vmem:[%s1676_s0 + $0xac] ss:$16 sps:$4 sm:$0xff]  }
  0x1e   :  { %v1266_v22 = vld [vmem:[%s1676_s0 + $0xa0] ss:$16 sps:$4 sm:$0xff]   ;;  %v1267_v23 = vld [vmem:[%s1676_s0 + $0xa8] ss:$16 sps:$4 sm:$0xff]   ;;  %v1268_v24 = vld [vmem:[%s1676_s0 + $0xc4] ss:$16 sps:$4 sm:$0xff]  }
  0x1f   :  { %617 = vmatpush1.bf16.msra.mxu1 %v1182_v30  ;;  %v1270_v25 = vld [vmem:[%s1676_s0 + $0xcc] ss:$16 sps:$4 sm:$0xff]   ;;  %v1272_v26 = vld [vmem:[%s1676_s0 + $0xc0] ss:$16 sps:$4 sm:$0xff]   ;;  %v1273_v27 = vld [vmem:[%s1676_s0 + $0xc8] ss:$16 sps:$4 sm:$0xff]  }
  0x20   :  { %730 = vmatpush1.bf16.msra.mxu0 %v1183_v31  ;;  %618 = vmatprep.subr.bf16.mxu1 %v1184_v32  ;;  %v1274_v28 = vld [vmem:[%s1676_s0 + $0xe4] ss:$16 sps:$4 sm:$0xff]   ;;  %v1276_v29 = vld [vmem:[%s1676_s0 + $0xec] ss:$16 sps:$4 sm:$0xff]   ;;  %v1278_v30 = vld [vmem:[%s1676_s0 + $0xe0] ss:$16 sps:$4 sm:$0xff]   ;;  %v112_v32 = vlaneseq }
  0x21   :  { %731 = vmatprep.subr.bf16.mxu0 %v1186_v33  ;;  %v1279_v31 = vld [vmem:[%s1676_s0 + $0xe8] ss:$16 sps:$4 sm:$0xff]  }
  0x22   :  { %v113_v33 = vshrl.u32 %v112_v32, 7 }
  0x23   :  { %619 = vmatpush1.bf16.msra.mxu1 %v1188_v34 }
  0x24   :  { %732 = vmatpush1.bf16.msra.mxu0 %v1189_v35  ;;  %620 = vmatprep.subr.bf16.mxu1 %v1190_v36  ;;  %v114_v34 = vsub.s32 0, %v113_v33  ;;  %v110_v35 = vld [vmem:[%s1677_s2] sm:$0x3]  ;;  %v118_v36 = vsub.s32 1, %v113_v33 }
  0x25   :  { %733 = vmatprep.subr.bf16.mxu0 %v1192_v37 }
  0x26   :  { %v1591_v37 = vrot.slane %v110_v35, %v114_v34 }
  0x27   :  { %621 = vmatpush1.bf16.msra.mxu1 %v1194_v38  ;;  %v1593_v38 = vrot.slane %v110_v35, %v118_v36 }
  0x28   :  { %734 = vmatpush1.bf16.msra.mxu0 %v1195_v39  ;;  %622 = vmatprep.subr.bf16.mxu1 %v1196_v40 }
  0x29   :  { %735 = vmatprep.subr.bf16.mxu0 %v1198_v41 }
  0x2b   :  { %623 = vmatpush1.bf16.msra.mxu1 %v1200_v42 }
  0x2c   :  { %736 = vmatpush1.bf16.msra.mxu0 %v1201_v43  ;;  %624 = vmatprep.subr.bf16.mxu1 %v1202_v44 }
  0x2d   :  { %737 = vmatprep.subr.bf16.mxu0 %v1204_v45 }
  0x2f   :  { %625 = vmatpush1.bf16.msra.mxu1 %v1206_v46 }
  0x30   :  { %738 = vmatpush1.bf16.msra.mxu0 %v1207_v47  ;;  %626 = vmatprep.subr.bf16.mxu1 %v1208_v48 }
  0x31   :  { %739 = vmatprep.subr.bf16.mxu0 %v1210_v50 }
  0x33   :  { %627 = vmatpush1.bf16.msra.mxu1 %v1212_v52 }
  0x34   :  { %740 = vmatpush1.bf16.msra.mxu0 %v1213_v53  ;;  %628 = vmatprep.subr.bf16.mxu1 %v1214_v54 }
  0x35   :  { %741 = vmatprep.subr.bf16.mxu0 %v1216_v55 }
  0x37   :  { %629 = vmatpush1.bf16.msra.mxu1 %v1218_v56 }
  0x38   :  { %742 = vmatpush1.bf16.msra.mxu0 %v1219_v57  ;;  %630 = vmatprep.subr.bf16.mxu1 %v1220_v58 }
  0x39   :  { %743 = vmatprep.subr.bf16.mxu0 %v1222_v59 }
  0x3b   :  { %631 = vmatpush1.bf16.msra.mxu1 %v1224_v60 }
  0x3c   :  { %744 = vmatpush1.bf16.msra.mxu0 %v1225_v61  ;;  %632 = vmatprep.subr.bf16.mxu1 %v1226_v62 }
  0x3d   :  { %745 = vmatprep.subr.bf16.mxu0 %v1228_v63 }
  0x3f   :  { %633 = vmatpush1.bf16.msra.mxu1 %v1230_v0 }
  0x40   :  { %746 = vmatpush1.bf16.msra.mxu0 %v1231_v1 }
  0x42   :  { %635 = vmatmul.mubr.bf16.vlgmr.msra.gmra.mrb[0].mxu1 %v1232_v2 }
  0x43   :  { %748 = vmatmul.mubr.bf16.vlgmr.msra.gmra.mrb[0].mxu0 %v1235_v3  ;;  %644 = vmatprep.mubr.bf16.mxu1 %v1238_v4 }
  0x44   :  { %757 = vmatprep.mubr.bf16.mxu0 %v1240_v5 }
  0x4a   :  { %645 = vmatmul.mubr.bf16.gmra.mrb[4].mxu1 %v1242_v6 }
  0x4b   :  { %758 = vmatmul.mubr.bf16.gmra.mrb[4].mxu0 %v1243_v7  ;;  %654 = vmatprep.mubr.bf16.mxu1 %v1244_v8 }
  0x4c   :  { %767 = vmatprep.mubr.bf16.mxu0 %v1246_v9 }
  0x52   :  { %655 = vmatmul.mubr.bf16.gmra.mrb[8].mxu1 %v1248_v10 }
  0x53   :  { %768 = vmatmul.mubr.bf16.gmra.mrb[8].mxu0 %v1249_v11  ;;  %664 = vmatprep.mubr.bf16.mxu1 %v1250_v12 }
  0x54   :  { %777 = vmatprep.mubr.bf16.mxu0 %v1252_v13 }
  0x5a   :  { %665 = vmatmul.mubr.bf16.gmra.mrb[12].mxu1 %v1254_v14 }
  0x5b   :  { %778 = vmatmul.mubr.bf16.gmra.mrb[12].mxu0 %v1255_v15  ;;  %674 = vmatprep.mubr.bf16.mxu1 %v1256_v16 }
  0x5c   :  { %787 = vmatprep.mubr.bf16.mxu0 %v1258_v17 }
  0x62   :  { %675 = vmatmul.mubr.bf16.gmra.mrb[16].mxu1 %v1260_v18 }
  0x63   :  { %788 = vmatmul.mubr.bf16.gmra.mrb[16].mxu0 %v1261_v19  ;;  %684 = vmatprep.mubr.bf16.mxu1 %v1262_v20 }
  0x64   :  { %797 = vmatprep.mubr.bf16.mxu0 %v1264_v21 }
  0x6a   :  { %685 = vmatmul.mubr.bf16.gmra.mrb[20].mxu1 %v1266_v22 }
  0x6b   :  { %798 = vmatmul.mubr.bf16.gmra.mrb[20].mxu0 %v1267_v23  ;;  %694 = vmatprep.mubr.bf16.mxu1 %v1268_v24 }
  0x6c   :  { %807 = vmatprep.mubr.bf16.mxu0 %v1270_v25 }
  0x72   :  { %695 = vmatmul.mubr.bf16.gmra.mrb[24].mxu1 %v1272_v26 }
  0x73   :  { %808 = vmatmul.mubr.bf16.gmra.mrb[24].mxu0 %v1273_v27  ;;  %704 = vmatprep.mubr.bf16.mxu1 %v1274_v28 }
  0x74   :  { %817 = vmatprep.mubr.bf16.mxu0 %v1276_v29 }
  0x7a   :  { %705 = vmatmul.mubr.bf16.gmra.mrb[28].mxu1 %v1278_v30 }
  0x7b   :  { %818 = vmatmul.mubr.bf16.gmra.mrb[28].mxu0 %v1279_v31 }
 0x115   :  { %v636_v39 = vpop.f32.mrb[0].mxu1 }
 0x116   :  { %v749_v40 = vpop.f32.mrb[0].mxu0  ;;  %v637_v41 = vadd.f32 %v636_v39, %v1591_v37  ;;  %v638_v42 = vpop.f32.mrb[1].mxu1 }
 0x117   :  { %v751_v43 = vpop.f32.mrb[1].mxu0  ;;  %v639_v44 = vadd.f32 %v638_v42, %v1593_v38  ;;  %v640_v45 = vpop.f32.mrb[2].mxu1 }
 0x118   :  { %v753_v46 = vpop.f32.mrb[2].mxu0  ;;  %v750_v47 = vadd.f32 %v749_v40, %v637_v41  ;;  %v641_v48 = vadd.f32 %v640_v45, %v1591_v37  ;;  %v642_v49 = vpop.f32.mrb[3].mxu1 }
 0x119   :  { %v755_v50 = vpop.f32.mrb[3].mxu0  ;;  %v752_v51 = vadd.f32 %v751_v43, %v639_v44  ;;  %v643_v52 = vadd.f32 %v642_v49, %v1593_v38 }
 0x11a   :  { %v754_v53 = vadd.f32 %v753_v46, %v641_v48 }
 0x11b   :  { %v1056_v54 = vpack.c.bf16 %v752_v51, %v750_v47  ;;  %v756_v55 = vadd.f32 %v755_v50, %v643_v52 }
 0x11d   :  { %924 = vst [vmem:[%s1678_s3] sm:$0xff] %v1056_v54  ;;  %v1057_v56 = vpack.c.bf16 %v756_v55, %v754_v53  ;;  %v646_v57 = vpop.f32.mrb[4].mxu1 }
 0x11e   :  { %v759_v58 = vpop.f32.mrb[4].mxu0  ;;  %v647_v59 = vadd.f32 %v646_v57, %v1591_v37  ;;  %v648_v60 = vpop.f32.mrb[5].mxu1 }
 0x11f   :  { %v761_v61 = vpop.f32.mrb[5].mxu0  ;;  %925 = vst [vmem:[%s1678_s3 + $0x8] sm:$0xff] %v1057_v56  ;;  %v649_v62 = vadd.f32 %v648_v60, %v1593_v38  ;;  %v650_v63 = vpop.f32.mrb[6].mxu1 }
 0x120   :  { %v763_v0 = vpop.f32.mrb[6].mxu0  ;;  %v760_v1 = vadd.f32 %v759_v58, %v647_v59  ;;  %v651_v2 = vadd.f32 %v650_v63, %v1591_v37  ;;  %v652_v3 = vpop.f32.mrb[7].mxu1 }
 0x121   :  { %v765_v4 = vpop.f32.mrb[7].mxu0  ;;  %v762_v5 = vadd.f32 %v761_v61, %v649_v62  ;;  %v653_v6 = vadd.f32 %v652_v3, %v1593_v38 }
 0x122   :  { %v764_v7 = vadd.f32 %v763_v0, %v651_v2 }
 0x123   :  { %v1058_v8 = vpack.c.bf16 %v762_v5, %v760_v1  ;;  %v766_v9 = vadd.f32 %v765_v4, %v653_v6 }
 0x125   :  { %926 = vst [vmem:[%s1678_s3 + $0x10] sm:$0xff] %v1058_v8  ;;  %v1059_v10 = vpack.c.bf16 %v766_v9, %v764_v7  ;;  %v656_v11 = vpop.f32.mrb[8].mxu1 }
 0x126   :  { %v769_v12 = vpop.f32.mrb[8].mxu0  ;;  %v657_v13 = vadd.f32 %v656_v11, %v1591_v37  ;;  %v658_v14 = vpop.f32.mrb[9].mxu1 }
 0x127   :  { %v771_v15 = vpop.f32.mrb[9].mxu0  ;;  %927 = vst [vmem:[%s1678_s3 + $0x18] sm:$0xff] %v1059_v10  ;;  %v659_v16 = vadd.f32 %v658_v14, %v1593_v38  ;;  %v660_v17 = vpop.f32.mrb[10].mxu1 }
 0x128   :  { %v773_v18 = vpop.f32.mrb[10].mxu0  ;;  %v770_v19 = vadd.f32 %v769_v12, %v657_v13  ;;  %v661_v20 = vadd.f32 %v660_v17, %v1591_v37  ;;  %v662_v21 = vpop.f32.mrb[11].mxu1 }
 0x129   :  { %v775_v22 = vpop.f32.mrb[11].mxu0  ;;  %v772_v23 = vadd.f32 %v771_v15, %v659_v16  ;;  %v663_v24 = vadd.f32 %v662_v21, %v1593_v38 }
 0x12a   :  { %v774_v25 = vadd.f32 %v773_v18, %v661_v20 }
 0x12b   :  { %v1060_v26 = vpack.c.bf16 %v772_v23, %v770_v19  ;;  %v776_v27 = vadd.f32 %v775_v22, %v663_v24 }
 0x12d   :  { %928 = vst [vmem:[%s1678_s3 + $0x20] sm:$0xff] %v1060_v26  ;;  %v1061_v28 = vpack.c.bf16 %v776_v27, %v774_v25  ;;  %v666_v29 = vpop.f32.mrb[12].mxu1 }
 0x12e   :  { %v779_v30 = vpop.f32.mrb[12].mxu0  ;;  %v667_v31 = vadd.f32 %v666_v29, %v1591_v37  ;;  %v668_v32 = vpop.f32.mrb[13].mxu1 }
 0x12f   :  { %v781_v33 = vpop.f32.mrb[13].mxu0  ;;  %929 = vst [vmem:[%s1678_s3 + $0x28] sm:$0xff] %v1061_v28  ;;  %v669_v34 = vadd.f32 %v668_v32, %v1593_v38  ;;  %v670_v35 = vpop.f32.mrb[14].mxu1 }
 0x130   :  { %v783_v36 = vpop.f32.mrb[14].mxu0  ;;  %v780_v39 = vadd.f32 %v779_v30, %v667_v31  ;;  %v671_v40 = vadd.f32 %v670_v35, %v1591_v37  ;;  %v672_v41 = vpop.f32.mrb[15].mxu1 }
 0x131   :  { %v785_v42 = vpop.f32.mrb[15].mxu0  ;;  %v782_v43 = vadd.f32 %v781_v33, %v669_v34  ;;  %v673_v44 = vadd.f32 %v672_v41, %v1593_v38 }
 0x132   :  { %v784_v45 = vadd.f32 %v783_v36, %v671_v40 }
 0x133   :  { %v1062_v46 = vpack.c.bf16 %v782_v43, %v780_v39  ;;  %v786_v47 = vadd.f32 %v785_v42, %v673_v44 }
 0x135   :  { %930 = vst [vmem:[%s1678_s3 + $0x30] sm:$0xff] %v1062_v46  ;;  %v1063_v48 = vpack.c.bf16 %v786_v47, %v784_v45  ;;  %v676_v49 = vpop.f32.mrb[16].mxu1 }
 0x136   :  { %v789_v50 = vpop.f32.mrb[16].mxu0  ;;  %v677_v51 = vadd.f32 %v676_v49, %v1591_v37  ;;  %v678_v52 = vpop.f32.mrb[17].mxu1 }
 0x137   :  { %v791_v53 = vpop.f32.mrb[17].mxu0  ;;  %931 = vst [vmem:[%s1678_s3 + $0x38] sm:$0xff] %v1063_v48  ;;  %v679_v54 = vadd.f32 %v678_v52, %v1593_v38  ;;  %v680_v55 = vpop.f32.mrb[18].mxu1 }
 0x138   :  { %v793_v56 = vpop.f32.mrb[18].mxu0  ;;  %v790_v57 = vadd.f32 %v789_v50, %v677_v51  ;;  %v681_v58 = vadd.f32 %v680_v55, %v1591_v37  ;;  %v682_v59 = vpop.f32.mrb[19].mxu1 }
 0x139   :  { %v795_v60 = vpop.f32.mrb[19].mxu0  ;;  %v792_v61 = vadd.f32 %v791_v53, %v679_v54  ;;  %v683_v62 = vadd.f32 %v682_v59, %v1593_v38 }
 0x13a   :  { %v794_v63 = vadd.f32 %v793_v56, %v681_v58 }
 0x13b   :  { %v1064_v0 = vpack.c.bf16 %v792_v61, %v790_v57  ;;  %v796_v1 = vadd.f32 %v795_v60, %v683_v62 }
 0x13d   :  { %932 = vst [vmem:[%s1678_s3 + $0x40] sm:$0xff] %v1064_v0  ;;  %v1065_v2 = vpack.c.bf16 %v796_v1, %v794_v63  ;;  %v686_v3 = vpop.f32.mrb[20].mxu1 }
 0x13e   :  { %v799_v4 = vpop.f32.mrb[20].mxu0  ;;  %v687_v5 = vadd.f32 %v686_v3, %v1591_v37  ;;  %v688_v6 = vpop.f32.mrb[21].mxu1 }
 0x13f   :  { %v801_v7 = vpop.f32.mrb[21].mxu0  ;;  %933 = vst [vmem:[%s1678_s3 + $0x48] sm:$0xff] %v1065_v2  ;;  %v689_v8 = vadd.f32 %v688_v6, %v1593_v38  ;;  %v690_v9 = vpop.f32.mrb[22].mxu1 }
 0x140   :  { %v803_v10 = vpop.f32.mrb[22].mxu0  ;;  %v800_v11 = vadd.f32 %v799_v4, %v687_v5  ;;  %v691_v12 = vadd.f32 %v690_v9, %v1591_v37  ;;  %v692_v13 = vpop.f32.mrb[23].mxu1 }
 0x141   :  { %v805_v14 = vpop.f32.mrb[23].mxu0  ;;  %v802_v15 = vadd.f32 %v801_v7, %v689_v8  ;;  %v693_v16 = vadd.f32 %v692_v13, %v1593_v38 }
 0x142   :  { %v804_v17 = vadd.f32 %v803_v10, %v691_v12 }
 0x143   :  { %v1066_v18 = vpack.c.bf16 %v802_v15, %v800_v11  ;;  %v806_v19 = vadd.f32 %v805_v14, %v693_v16 }
 0x145   :  { %934 = vst [vmem:[%s1678_s3 + $0x50] sm:$0xff] %v1066_v18  ;;  %v1067_v20 = vpack.c.bf16 %v806_v19, %v804_v17  ;;  %v696_v21 = vpop.f32.mrb[24].mxu1 }
 0x146   :  { %v809_v22 = vpop.f32.mrb[24].mxu0  ;;  %v697_v23 = vadd.f32 %v696_v21, %v1591_v37  ;;  %v698_v24 = vpop.f32.mrb[25].mxu1 }
 0x147   :  { %v811_v25 = vpop.f32.mrb[25].mxu0  ;;  %935 = vst [vmem:[%s1678_s3 + $0x58] sm:$0xff] %v1067_v20  ;;  %v699_v26 = vadd.f32 %v698_v24, %v1593_v38  ;;  %v700_v27 = vpop.f32.mrb[26].mxu1 }
 0x148   :  { %v813_v28 = vpop.f32.mrb[26].mxu0  ;;  %v810_v29 = vadd.f32 %v809_v22, %v697_v23  ;;  %v701_v30 = vadd.f32 %v700_v27, %v1591_v37  ;;  %v702_v31 = vpop.f32.mrb[27].mxu1 }
 0x149   :  { %v815_v32 = vpop.f32.mrb[27].mxu0  ;;  %v812_v33 = vadd.f32 %v811_v25, %v699_v26  ;;  %v703_v34 = vadd.f32 %v702_v31, %v1593_v38 }
 0x14a   :  { %v814_v35 = vadd.f32 %v813_v28, %v701_v30 }
 0x14b   :  { %v1068_v36 = vpack.c.bf16 %v812_v33, %v810_v29  ;;  %v816_v39 = vadd.f32 %v815_v32, %v703_v34 }
 0x14d   :  { %936 = vst [vmem:[%s1678_s3 + $0x60] sm:$0xff] %v1068_v36  ;;  %v1069_v40 = vpack.c.bf16 %v816_v39, %v814_v35  ;;  %v706_v41 = vpop.f32.mrb[28].mxu1 }
 0x14e   :  { %v819_v42 = vpop.f32.mrb[28].mxu0  ;;  %v707_v43 = vadd.f32 %v706_v41, %v1591_v37  ;;  %v708_v44 = vpop.f32.mrb[29].mxu1 }
 0x14f   :  { %v821_v45 = vpop.f32.mrb[29].mxu0  ;;  %937 = vst [vmem:[%s1678_s3 + $0x68] sm:$0xff] %v1069_v40  ;;  %v709_v46 = vadd.f32 %v708_v44, %v1593_v38  ;;  %v710_v47 = vpop.f32.mrb[30].mxu1 }
 0x150   :  { %v823_v48 = vpop.f32.mrb[30].mxu0  ;;  %v820_v49 = vadd.f32 %v819_v42, %v707_v43  ;;  %v711_v50 = vadd.f32 %v710_v47, %v1591_v37  ;;  %v712_v51 = vpop.f32.mrb[31].mxu1 }
 0x151   :  { %v825_v52 = vpop.f32.mrb[31].mxu0  ;;  %v822_v53 = vadd.f32 %v821_v45, %v709_v46  ;;  %v713_v54 = vadd.f32 %v712_v51, %v1593_v38 }
 0x152   :  { %v824_v55 = vadd.f32 %v823_v48, %v711_v50 }
 0x153   :  { %v1070_v56 = vpack.c.bf16 %v822_v53, %v820_v49  ;;  %v826_v57 = vadd.f32 %v825_v52, %v713_v54 }
 0x155   :  { %938 = vst [vmem:[%s1678_s3 + $0x70] sm:$0xff] %v1070_v56  ;;  %v1071_v58 = vpack.c.bf16 %v826_v57, %v824_v55 }
 0x157   :  { %939 = vst [vmem:[%s1678_s3 + $0x78] sm:$0xff] %v1071_v58 }

// kernel: detector_backbone_with_fpn_forward.8
= control target key start
LH: loop header
LB: loop body
LE: loop exit
PB: predicated region body
PF: predicated region fallthrough
CT: control target
= control target key end

     0   :  { %s3775_s1 = inlined_call_operand.vmem [shape: bf16[1024,512], index: 1, kind: input, shape index: {}]   ;;  %s3776_s0 = inlined_call_operand.vmem [shape: bf16[32,1024], index: 0, kind: input, shape index: {}]   ;;  %s3777_s2 = inlined_call_operand.vmem [shape: f32[1,512], index: 2, kind: input, shape index: {}]   ;;  %s3778_s3 = inlined_call_operand.vmem [shape: bf16[32,512], index: 3, kind: output, shape index: {}]  }
   0x1   :  { %v2504_v0 = vld [vmem:[%s3775_s1 + $0x4] ss:$16 sps:$4 sm:$0xff]   ;;  %v2506_v1 = vld [vmem:[%s3775_s1 + $0xc] ss:$16 sps:$4 sm:$0xff]   ;;  %v2508_v2 = vld [vmem:[%s3775_s1] ss:$16 sps:$4 sm:$0xff]  }
   0x2   :  { %1668 = vmatprep.subr.bf16.mxu0 %v2504_v0  ;;  %v2509_v3 = vld [vmem:[%s3775_s1 + $0x8] ss:$16 sps:$4 sm:$0xff]   ;;  %1880 = vmatprep.subr.bf16.mxu1 %v2506_v1  ;;  %v2510_v4 = vld [vmem:[%s3775_s1 + $0x24] ss:$16 sps:$4 sm:$0xff]   ;;  %v2512_v5 = vld [vmem:[%s3775_s1 + $0x2c] ss:$16 sps:$4 sm:$0xff]  }
   0x3   :  { %1669 = vmatpush1.bf16.msra.mxu0 %v2508_v2  ;;  %1881 = vmatpush1.bf16.msra.mxu1 %v2509_v3  ;;  %v2514_v6 = vld [vmem:[%s3775_s1 + $0x20] ss:$16 sps:$4 sm:$0xff]   ;;  %v2515_v7 = vld [vmem:[%s3775_s1 + $0x28] ss:$16 sps:$4 sm:$0xff]   ;;  %v2516_v8 = vld [vmem:[%s3775_s1 + $0x44] ss:$16 sps:$4 sm:$0xff]  }
   0x4   :  { %1670 = vmatprep.subr.bf16.mxu0 %v2510_v4  ;;  %1882 = vmatprep.subr.bf16.mxu1 %v2512_v5  ;;  %v2518_v9 = vld [vmem:[%s3775_s1 + $0x4c] ss:$16 sps:$4 sm:$0xff]   ;;  %v2520_v10 = vld [vmem:[%s3775_s1 + $0x40] ss:$16 sps:$4 sm:$0xff]   ;;  %v2521_v11 = vld [vmem:[%s3775_s1 + $0x48] ss:$16 sps:$4 sm:$0xff]  }
   0x5   :  { %v2522_v12 = vld [vmem:[%s3775_s1 + $0x64] ss:$16 sps:$4 sm:$0xff]   ;;  %v2524_v13 = vld [vmem:[%s3775_s1 + $0x6c] ss:$16 sps:$4 sm:$0xff]   ;;  %v2526_v14 = vld [vmem:[%s3775_s1 + $0x60] ss:$16 sps:$4 sm:$0xff]  }
   0x6   :  { %v2527_v15 = vld [vmem:[%s3775_s1 + $0x68] ss:$16 sps:$4 sm:$0xff]   ;;  %v2528_v16 = vld [vmem:[%s3775_s1 + $0x84] ss:$16 sps:$4 sm:$0xff]   ;;  %v2530_v17 = vld [vmem:[%s3775_s1 + $0x8c] ss:$16 sps:$4 sm:$0xff]  }
   0x7   :  { %1671 = vmatpush1.bf16.msra.mxu0 %v2514_v6  ;;  %1883 = vmatpush1.bf16.msra.mxu1 %v2515_v7  ;;  %v2532_v18 = vld [vmem:[%s3775_s1 + $0x80] ss:$16 sps:$4 sm:$0xff]   ;;  %v2533_v19 = vld [vmem:[%s3775_s1 + $0x88] ss:$16 sps:$4 sm:$0xff]   ;;  %v2534_v20 = vld [vmem:[%s3775_s1 + $0xa4] ss:$16 sps:$4 sm:$0xff]  }
   0x8   :  { %1672 = vmatprep.subr.bf16.mxu0 %v2516_v8  ;;  %1884 = vmatprep.subr.bf16.mxu1 %v2518_v9  ;;  %v2536_v21 = vld [vmem:[%s3775_s1 + $0xac] ss:$16 sps:$4 sm:$0xff]   ;;  %v2538_v22 = vld [vmem:[%s3775_s1 + $0xa0] ss:$16 sps:$4 sm:$0xff]   ;;  %v2539_v23 = vld [vmem:[%s3775_s1 + $0xa8] ss:$16 sps:$4 sm:$0xff]  }
   0x9   :  { %v2540_v24 = vld [vmem:[%s3775_s1 + $0xc4] ss:$16 sps:$4 sm:$0xff]   ;;  %v2542_v25 = vld [vmem:[%s3775_s1 + $0xcc] ss:$16 sps:$4 sm:$0xff]   ;;  %v2544_v26 = vld [vmem:[%s3775_s1 + $0xc0] ss:$16 sps:$4 sm:$0xff]  }
   0xa   :  { %v2545_v27 = vld [vmem:[%s3775_s1 + $0xc8] ss:$16 sps:$4 sm:$0xff]   ;;  %v2546_v28 = vld [vmem:[%s3775_s1 + $0xe4] ss:$16 sps:$4 sm:$0xff]   ;;  %v2548_v29 = vld [vmem:[%s3775_s1 + $0xec] ss:$16 sps:$4 sm:$0xff]  }
   0xb   :  { %1673 = vmatpush1.bf16.msra.mxu0 %v2520_v10  ;;  %1885 = vmatpush1.bf16.msra.mxu1 %v2521_v11  ;;  %v2550_v30 = vld [vmem:[%s3775_s1 + $0xe0] ss:$16 sps:$4 sm:$0xff]   ;;  %v2551_v31 = vld [vmem:[%s3775_s1 + $0xe8] ss:$16 sps:$4 sm:$0xff]   ;;  %v2552_v32 = vld [vmem:[%s3775_s1 + $0x104] ss:$16 sps:$4 sm:$0xff]  }
   0xc   :  { %1674 = vmatprep.subr.bf16.mxu0 %v2522_v12  ;;  %1886 = vmatprep.subr.bf16.mxu1 %v2524_v13  ;;  %v2554_v33 = vld [vmem:[%s3775_s1 + $0x10c] ss:$16 sps:$4 sm:$0xff]   ;;  %v2556_v34 = vld [vmem:[%s3775_s1 + $0x100] ss:$16 sps:$4 sm:$0xff]   ;;  %v2557_v35 = vld [vmem:[%s3775_s1 + $0x108] ss:$16 sps:$4 sm:$0xff]  }
   0xd   :  { %v2558_v36 = vld [vmem:[%s3775_s1 + $0x124] ss:$16 sps:$4 sm:$0xff]   ;;  %v2560_v37 = vld [vmem:[%s3775_s1 + $0x12c] ss:$16 sps:$4 sm:$0xff]   ;;  %v2562_v38 = vld [vmem:[%s3775_s1 + $0x120] ss:$16 sps:$4 sm:$0xff]  }
   0xe   :  { %v2563_v39 = vld [vmem:[%s3775_s1 + $0x128] ss:$16 sps:$4 sm:$0xff]   ;;  %v2564_v40 = vld [vmem:[%s3775_s1 + $0x144] ss:$16 sps:$4 sm:$0xff]   ;;  %v2566_v41 = vld [vmem:[%s3775_s1 + $0x14c] ss:$16 sps:$4 sm:$0xff]  }
   0xf   :  { %1675 = vmatpush1.bf16.msra.mxu0 %v2526_v14  ;;  %1887 = vmatpush1.bf16.msra.mxu1 %v2527_v15  ;;  %v2568_v42 = vld [vmem:[%s3775_s1 + $0x140] ss:$16 sps:$4 sm:$0xff]   ;;  %v2569_v43 = vld [vmem:[%s3775_s1 + $0x148] ss:$16 sps:$4 sm:$0xff]   ;;  %v2570_v44 = vld [vmem:[%s3775_s1 + $0x164] ss:$16 sps:$4 sm:$0xff]  }
  0x10   :  { %1676 = vmatprep.subr.bf16.mxu0 %v2528_v16  ;;  %1888 = vmatprep.subr.bf16.mxu1 %v2530_v17  ;;  %v2572_v45 = vld [vmem:[%s3775_s1 + $0x16c] ss:$16 sps:$4 sm:$0xff]   ;;  %v14_v46 = vld [vmem:[%s3776_s0] sm:$0xff]  ;;  %v2575_v49 = vld [vmem:[%s3775_s1 + $0x168] ss:$16 sps:$4 sm:$0xff]  }
  0x11   :  { %v18_v47 = vld [vmem:[%s3776_s0 + $0x20] sm:$0xff]  ;;  %v2578_v52 = vld [vmem:[%s3775_s1 + $0x18c] ss:$16 sps:$4 sm:$0xff]   ;;  %v2581_v54 = vld [vmem:[%s3775_s1 + $0x188] ss:$16 sps:$4 sm:$0xff]  }
  0x12   :  { %v2574_v48 = vld [vmem:[%s3775_s1 + $0x160] ss:$16 sps:$4 sm:$0xff]   ;;  %v2153_v50 = vcombine.high %v14_v46, %v18_v47  ;;  %v2576_v51 = vld [vmem:[%s3775_s1 + $0x184] ss:$16 sps:$4 sm:$0xff]   ;;  %v2584_v56 = vld [vmem:[%s3775_s1 + $0x1ac] ss:$16 sps:$4 sm:$0xff]   ;;  %v2152_v5 = vcombine.low %v14_v46, %v18_v47 }
  0x13   :  { %1677 = vmatpush1.bf16.msra.mxu0 %v2532_v18  ;;  %1889 = vmatpush1.bf16.msra.mxu1 %v2533_v19  ;;  %v2580_v53 = vld [vmem:[%s3775_s1 + $0x180] ss:$16 sps:$4 sm:$0xff]   ;;  %v2582_v55 = vld [vmem:[%s3775_s1 + $0x1a4] ss:$16 sps:$4 sm:$0xff]   ;;  %v2587_v58 = vld [vmem:[%s3775_s1 + $0x1a8] ss:$16 sps:$4 sm:$0xff]  }
  0x14   :  { %1678 = vmatprep.subr.bf16.mxu0 %v2534_v20  ;;  %1890 = vmatprep.subr.bf16.mxu1 %v2536_v21  ;;  %v2586_v57 = vld [vmem:[%s3775_s1 + $0x1a0] ss:$16 sps:$4 sm:$0xff]   ;;  %v2588_v59 = vld [vmem:[%s3775_s1 + $0x1c4] ss:$16 sps:$4 sm:$0xff]   ;;  %v2590_v60 = vld [vmem:[%s3775_s1 + $0x1cc] ss:$16 sps:$4 sm:$0xff]  }
  0x15   :  { %1700 = vmatprep.mubr.bf16.mxu0 %v2153_v50  ;;  %1912 = vmatprep.mubr.bf16.mxu1 %v2153_v50  ;;  %v2592_v61 = vld [vmem:[%s3775_s1 + $0x1c0] ss:$16 sps:$4 sm:$0xff]   ;;  %v2593_v62 = vld [vmem:[%s3775_s1 + $0x1c8] ss:$16 sps:$4 sm:$0xff]   ;;  %v2594_v63 = vld [vmem:[%s3775_s1 + $0x1e4] ss:$16 sps:$4 sm:$0xff]  }
  0x16   :  { %v2596_v0 = vld [vmem:[%s3775_s1 + $0x1ec] ss:$16 sps:$4 sm:$0xff]   ;;  %v2598_v1 = vld [vmem:[%s3775_s1 + $0x1e0] ss:$16 sps:$4 sm:$0xff]   ;;  %v2599_v2 = vld [vmem:[%s3775_s1 + $0x1e8] ss:$16 sps:$4 sm:$0xff]  }
  0x17   :  { %1679 = vmatpush1.bf16.msra.mxu0 %v2538_v22  ;;  %1891 = vmatpush1.bf16.msra.mxu1 %v2539_v23  ;;  %v2602_v3 = vld [vmem:[%s3775_s1 + $0x204] ss:$16 sps:$4 sm:$0xff]   ;;  %v2605_v4 = vld [vmem:[%s3775_s1 + $0x20c] ss:$16 sps:$4 sm:$0xff]   ;;  %v2600_v6 = vld [vmem:[%s3775_s1 + $0x200] ss:$16 sps:$4 sm:$0xff]  }
  0x18   :  { %1680 = vmatprep.subr.bf16.mxu0 %v2540_v24  ;;  %1892 = vmatprep.subr.bf16.mxu1 %v2542_v25  ;;  %v2603_v7 = vld [vmem:[%s3775_s1 + $0x208] ss:$16 sps:$4 sm:$0xff]   ;;  %v2608_v8 = vld [vmem:[%s3775_s1 + $0x224] ss:$16 sps:$4 sm:$0xff]   ;;  %v2611_v9 = vld [vmem:[%s3775_s1 + $0x22c] ss:$16 sps:$4 sm:$0xff]  }
  0x19   :  { %v2606_v10 = vld [vmem:[%s3775_s1 + $0x220] ss:$16 sps:$4 sm:$0xff]   ;;  %v2609_v11 = vld [vmem:[%s3775_s1 + $0x228] ss:$16 sps:$4 sm:$0xff]   ;;  %v2614_v12 = vld [vmem:[%s3775_s1 + $0x244] ss:$16 sps:$4 sm:$0xff]  }
  0x1a   :  { %v2617_v13 = vld [vmem:[%s3775_s1 + $0x24c] ss:$16 sps:$4 sm:$0xff]   ;;  %v2612_v14 = vld [vmem:[%s3775_s1 + $0x240] ss:$16 sps:$4 sm:$0xff]   ;;  %v2615_v15 = vld [vmem:[%s3775_s1 + $0x248] ss:$16 sps:$4 sm:$0xff]  }
  0x1b   :  { %1681 = vmatpush1.bf16.msra.mxu0 %v2544_v26  ;;  %1893 = vmatpush1.bf16.msra.mxu1 %v2545_v27  ;;  %v2620_v16 = vld [vmem:[%s3775_s1 + $0x264] ss:$16 sps:$4 sm:$0xff]   ;;  %v2623_v17 = vld [vmem:[%s3775_s1 + $0x26c] ss:$16 sps:$4 sm:$0xff]   ;;  %v2618_v18 = vld [vmem:[%s3775_s1 + $0x260] ss:$16 sps:$4 sm:$0xff]  }
  0x1c   :  { %1682 = vmatprep.subr.bf16.mxu0 %v2546_v28  ;;  %1894 = vmatprep.subr.bf16.mxu1 %v2548_v29  ;;  %v2621_v19 = vld [vmem:[%s3775_s1 + $0x268] ss:$16 sps:$4 sm:$0xff]   ;;  %v2626_v20 = vld [vmem:[%s3775_s1 + $0x284] ss:$16 sps:$4 sm:$0xff]   ;;  %v2629_v21 = vld [vmem:[%s3775_s1 + $0x28c] ss:$16 sps:$4 sm:$0xff]  }
  0x1d   :  { %v2624_v22 = vld [vmem:[%s3775_s1 + $0x280] ss:$16 sps:$4 sm:$0xff]   ;;  %v2627_v23 = vld [vmem:[%s3775_s1 + $0x288] ss:$16 sps:$4 sm:$0xff]   ;;  %v2632_v24 = vld [vmem:[%s3775_s1 + $0x2a4] ss:$16 sps:$4 sm:$0xff]  }
  0x1e   :  { %v2635_v25 = vld [vmem:[%s3775_s1 + $0x2ac] ss:$16 sps:$4 sm:$0xff]   ;;  %v22_v26 = vld [vmem:[%s3776_s0 + $0x40] sm:$0xff]  ;;  %v2651_v46 = vld [vmem:[%s3775_s1 + $0x308] ss:$16 sps:$4 sm:$0xff]  }
  0x1f   :  { %1683 = vmatpush1.bf16.msra.mxu0 %v2550_v30  ;;  %1895 = vmatpush1.bf16.msra.mxu1 %v2551_v31  ;;  %v26_v27 = vld [vmem:[%s3776_s0 + $0x60] sm:$0xff]  ;;  %v2633_v30 = vld [vmem:[%s3775_s1 + $0x2a8] ss:$16 sps:$4 sm:$0xff]  }
  0x20   :  { %1684 = vmatprep.subr.bf16.mxu0 %v2552_v32  ;;  %1896 = vmatprep.subr.bf16.mxu1 %v2554_v33  ;;  %v2161_v28 = vcombine.high %v22_v26, %v26_v27  ;;  %v2630_v29 = vld [vmem:[%s3775_s1 + $0x2a0] ss:$16 sps:$4 sm:$0xff]   ;;  %v2160_v31 = vcombine.low %v22_v26, %v26_v27  ;;  %v2638_v32 = vld [vmem:[%s3775_s1 + $0x2c4] ss:$16 sps:$4 sm:$0xff]   ;;  %v2641_v33 = vld [vmem:[%s3775_s1 + $0x2cc] ss:$16 sps:$4 sm:$0xff]  }
  0x21   :  { %v2656_v47 = vld [vmem:[%s3775_s1 + $0x324] ss:$16 sps:$4 sm:$0xff]   ;;  %v2657_v50 = vld [vmem:[%s3775_s1 + $0x328] ss:$16 sps:$4 sm:$0xff]  }
  0x22   :  { %v3362_v27 = vld [vmem:[%s3776_s0 + $0x30] sm:$0xff] }
  0x23   :  { %1685 = vmatpush1.bf16.msra.mxu0 %v2556_v34  ;;  %1897 = vmatpush1.bf16.msra.mxu1 %v2557_v35  ;;  %v3193_v34 = vld [vmem:[%s3776_s0 + $0x8] sm:$0xff] }
  0x24   :  { %1686 = vmatprep.subr.bf16.mxu0 %v2558_v36  ;;  %1898 = vmatprep.subr.bf16.mxu1 %v2560_v37  ;;  %v3198_v35 = vld [vmem:[%s3776_s0 + $0x28] sm:$0xff]  ;;  %v2636_v36 = vld [vmem:[%s3775_s1 + $0x2c0] ss:$16 sps:$4 sm:$0xff]  }
  0x25   :  { %v2639_v37 = vld [vmem:[%s3775_s1 + $0x2c8] ss:$16 sps:$4 sm:$0xff]  }
  0x27   :  { %1687 = vmatpush1.bf16.msra.mxu0 %v2562_v38  ;;  %1899 = vmatpush1.bf16.msra.mxu1 %v2563_v39  ;;  %v2155_v38 = vcombine.high %v3193_v34, %v3198_v35  ;;  %v2644_v39 = vld [vmem:[%s3775_s1 + $0x2e4] ss:$16 sps:$4 sm:$0xff]  }
  0x28   :  { %1688 = vmatprep.subr.bf16.mxu0 %v2564_v40  ;;  %1900 = vmatprep.subr.bf16.mxu1 %v2566_v41  ;;  %v2647_v40 = vld [vmem:[%s3775_s1 + $0x2ec] ss:$16 sps:$4 sm:$0xff]   ;;  %v2642_v41 = vld [vmem:[%s3775_s1 + $0x2e0] ss:$16 sps:$4 sm:$0xff]  }
  0x2b   :  { %1689 = vmatpush1.bf16.msra.mxu0 %v2568_v42  ;;  %1901 = vmatpush1.bf16.msra.mxu1 %v2569_v43  ;;  %v2645_v42 = vld [vmem:[%s3775_s1 + $0x2e8] ss:$16 sps:$4 sm:$0xff]   ;;  %v2650_v43 = vld [vmem:[%s3775_s1 + $0x304] ss:$16 sps:$4 sm:$0xff]  }
  0x2c   :  { %1690 = vmatprep.subr.bf16.mxu0 %v2570_v44  ;;  %1902 = vmatprep.subr.bf16.mxu1 %v2572_v45  ;;  %v2653_v44 = vld [vmem:[%s3775_s1 + $0x30c] ss:$16 sps:$4 sm:$0xff]   ;;  %v2648_v45 = vld [vmem:[%s3775_s1 + $0x300] ss:$16 sps:$4 sm:$0xff]  }
  0x2f   :  { %1691 = vmatpush1.bf16.msra.mxu0 %v2574_v48  ;;  %1903 = vmatpush1.bf16.msra.mxu1 %v2575_v49  ;;  %v2659_v48 = vld [vmem:[%s3775_s1 + $0x32c] ss:$16 sps:$4 sm:$0xff]   ;;  %v2654_v49 = vld [vmem:[%s3775_s1 + $0x320] ss:$16 sps:$4 sm:$0xff]  }
  0x30   :  { %1692 = vmatprep.subr.bf16.mxu0 %v2576_v51  ;;  %1904 = vmatprep.subr.bf16.mxu1 %v2578_v52  ;;  %v2662_v51 = vld [vmem:[%s3775_s1 + $0x344] ss:$16 sps:$4 sm:$0xff]   ;;  %v2665_v52 = vld [vmem:[%s3775_s1 + $0x34c] ss:$16 sps:$4 sm:$0xff]  }
  0x33   :  { %1693 = vmatpush1.bf16.msra.mxu0 %v2580_v53  ;;  %1905 = vmatpush1.bf16.msra.mxu1 %v2581_v54  ;;  %v2660_v53 = vld [vmem:[%s3775_s1 + $0x340] ss:$16 sps:$4 sm:$0xff]   ;;  %v2663_v54 = vld [vmem:[%s3775_s1 + $0x348] ss:$16 sps:$4 sm:$0xff]  }
  0x34   :  { %1694 = vmatprep.subr.bf16.mxu0 %v2582_v55  ;;  %1906 = vmatprep.subr.bf16.mxu1 %v2584_v56  ;;  %v2668_v55 = vld [vmem:[%s3775_s1 + $0x364] ss:$16 sps:$4 sm:$0xff]   ;;  %v2671_v56 = vld [vmem:[%s3775_s1 + $0x36c] ss:$16 sps:$4 sm:$0xff]  }
  0x37   :  { %1695 = vmatpush1.bf16.msra.mxu0 %v2586_v57  ;;  %1907 = vmatpush1.bf16.msra.mxu1 %v2587_v58  ;;  %v2666_v57 = vld [vmem:[%s3775_s1 + $0x360] ss:$16 sps:$4 sm:$0xff]   ;;  %v2669_v58 = vld [vmem:[%s3775_s1 + $0x368] ss:$16 sps:$4 sm:$0xff]  }
  0x38   :  { %1696 = vmatprep.subr.bf16.mxu0 %v2588_v59  ;;  %1908 = vmatprep.subr.bf16.mxu1 %v2590_v60  ;;  %v2674_v59 = vld [vmem:[%s3775_s1 + $0x384] ss:$16 sps:$4 sm:$0xff]   ;;  %v2677_v60 = vld [vmem:[%s3775_s1 + $0x38c] ss:$16 sps:$4 sm:$0xff]  }
  0x3b   :  { %1697 = vmatpush1.bf16.msra.mxu0 %v2592_v61  ;;  %1909 = vmatpush1.bf16.msra.mxu1 %v2593_v62  ;;  %v2672_v61 = vld [vmem:[%s3775_s1 + $0x380] ss:$16 sps:$4 sm:$0xff]   ;;  %v2675_v62 = vld [vmem:[%s3775_s1 + $0x388] ss:$16 sps:$4 sm:$0xff]  }
  0x3c   :  { %1698 = vmatprep.subr.bf16.mxu0 %v2594_v63  ;;  %1910 = vmatprep.subr.bf16.mxu1 %v2596_v0  ;;  %v2680_v63 = vld [vmem:[%s3775_s1 + $0x3a4] ss:$16 sps:$4 sm:$0xff]   ;;  %v2683_v0 = vld [vmem:[%s3775_s1 + $0x3ac] ss:$16 sps:$4 sm:$0xff]  }
  0x3f   :  { %1699 = vmatpush1.bf16.msra.mxu0 %v2598_v1  ;;  %1911 = vmatpush1.bf16.msra.mxu1 %v2599_v2  ;;  %v2678_v1 = vld [vmem:[%s3775_s1 + $0x3a0] ss:$16 sps:$4 sm:$0xff]   ;;  %v2681_v2 = vld [vmem:[%s3775_s1 + $0x3a8] ss:$16 sps:$4 sm:$0xff]  }
  0x40   :  { %1721 = vmatprep.subr.bf16.mxu0 %v2602_v3  ;;  %1933 = vmatprep.subr.bf16.mxu1 %v2605_v4  ;;  %v2686_v3 = vld [vmem:[%s3775_s1 + $0x3c4] ss:$16 sps:$4 sm:$0xff]   ;;  %v2689_v4 = vld [vmem:[%s3775_s1 + $0x3cc] ss:$16 sps:$4 sm:$0xff]  }
  0x42   :  { %1701 = vmatmul.mubr.bf16.vlgmr.msra.gmra.mrb[0].mxu0 %v2152_v5  ;;  %1913 = vmatmul.mubr.bf16.vlgmr.msra.gmra.mrb[0].mxu1 %v2152_v5  ;;  %v2684_v5 = vld [vmem:[%s3775_s1 + $0x3c0] ss:$16 sps:$4 sm:$0xff]  }
  0x43   :  { %1722 = vmatpush1.bf16.msra.mxu0 %v2600_v6  ;;  %1934 = vmatpush1.bf16.msra.mxu1 %v2603_v7  ;;  %v2687_v6 = vld [vmem:[%s3775_s1 + $0x3c8] ss:$16 sps:$4 sm:$0xff]   ;;  %v2692_v7 = vld [vmem:[%s3775_s1 + $0x3e4] ss:$16 sps:$4 sm:$0xff]  }
  0x44   :  { %1723 = vmatprep.subr.bf16.mxu0 %v2608_v8  ;;  %1935 = vmatprep.subr.bf16.mxu1 %v2611_v9  ;;  %v2695_v8 = vld [vmem:[%s3775_s1 + $0x3ec] ss:$16 sps:$4 sm:$0xff]   ;;  %v2690_v9 = vld [vmem:[%s3775_s1 + $0x3e0] ss:$16 sps:$4 sm:$0xff]  }
  0x45   :  { %1710 = vmatprep.mubr.bf16.mxu0 %v2161_v28  ;;  %1922 = vmatprep.mubr.bf16.mxu1 %v2161_v28  ;;  %v2708_v28 = vld [vmem:[%s3775_s1 + $0x440] ss:$16 sps:$4 sm:$0xff]  }
  0x47   :  { %1724 = vmatpush1.bf16.msra.mxu0 %v2606_v10  ;;  %1936 = vmatpush1.bf16.msra.mxu1 %v2609_v11  ;;  %v2693_v10 = vld [vmem:[%s3775_s1 + $0x3e8] ss:$16 sps:$4 sm:$0xff]   ;;  %v2698_v11 = vld [vmem:[%s3775_s1 + $0x404] ss:$16 sps:$4 sm:$0xff]  }
  0x48   :  { %1725 = vmatprep.subr.bf16.mxu0 %v2614_v12  ;;  %1937 = vmatprep.subr.bf16.mxu1 %v2617_v13  ;;  %v2701_v12 = vld [vmem:[%s3775_s1 + $0x40c] ss:$16 sps:$4 sm:$0xff]   ;;  %v2696_v13 = vld [vmem:[%s3775_s1 + $0x400] ss:$16 sps:$4 sm:$0xff]  }
  0x4a   :  { %1711 = vmatmul.mubr.bf16.gmra.mrb[4].mxu0 %v2160_v31  ;;  %1923 = vmatmul.mubr.bf16.gmra.mrb[4].mxu1 %v2160_v31  ;;  %v2719_v31 = vld [vmem:[%s3775_s1 + $0x46c] ss:$16 sps:$4 sm:$0xff]  }
  0x4b   :  { %1726 = vmatpush1.bf16.msra.mxu0 %v2612_v14  ;;  %1938 = vmatpush1.bf16.msra.mxu1 %v2615_v15  ;;  %v2699_v14 = vld [vmem:[%s3775_s1 + $0x408] ss:$16 sps:$4 sm:$0xff]   ;;  %v2154_v15 = vcombine.low %v3193_v34, %v3198_v35  ;;  %v2722_v35 = vld [vmem:[%s3775_s1 + $0x484] ss:$16 sps:$4 sm:$0xff]  }
  0x4c   :  { %1727 = vmatprep.subr.bf16.mxu0 %v2620_v16  ;;  %1939 = vmatprep.subr.bf16.mxu1 %v2623_v17  ;;  %v23_v16 = vld [vmem:[%s3776_s0 + $0x48] sm:$0xff] }
  0x4d   :  { %1753 = vmatprep.mubr.bf16.mxu0 %v2155_v38  ;;  %1965 = vmatprep.mubr.bf16.mxu1 %v2155_v38  ;;  %v27_v17 = vld [vmem:[%s3776_s0 + $0x68] sm:$0xff] }
  0x4e   :  { %v2162_v26 = vcombine.low %v23_v16, %v27_v17  ;;  %v2717_v34 = vld [vmem:[%s3775_s1 + $0x468] ss:$16 sps:$4 sm:$0xff]  }
  0x4f   :  { %1728 = vmatpush1.bf16.msra.mxu0 %v2618_v18  ;;  %1940 = vmatpush1.bf16.msra.mxu1 %v2621_v19  ;;  %v2704_v18 = vld [vmem:[%s3775_s1 + $0x424] ss:$16 sps:$4 sm:$0xff]   ;;  %v2707_v19 = vld [vmem:[%s3775_s1 + $0x42c] ss:$16 sps:$4 sm:$0xff]   ;;  %v2723_v38 = vld [vmem:[%s3775_s1 + $0x488] ss:$16 sps:$4 sm:$0xff]  }
  0x50   :  { %1729 = vmatprep.subr.bf16.mxu0 %v2626_v20  ;;  %1941 = vmatprep.subr.bf16.mxu1 %v2629_v21  ;;  %v2163_v20 = vcombine.high %v23_v16, %v27_v17  ;;  %v2702_v21 = vld [vmem:[%s3775_s1 + $0x420] ss:$16 sps:$4 sm:$0xff]   ;;  %v2791_v16 = vld [vmem:[%s3775_s1 + $0x5ec] ss:$16 sps:$4 sm:$0xff]  }
  0x51   :  { %v2786_v17 = vld [vmem:[%s3775_s1 + $0x5e0] ss:$16 sps:$4 sm:$0xff]  }
  0x53   :  { %1730 = vmatpush1.bf16.msra.mxu0 %v2624_v22  ;;  %1942 = vmatpush1.bf16.msra.mxu1 %v2627_v23  ;;  %v2705_v22 = vld [vmem:[%s3775_s1 + $0x428] ss:$16 sps:$4 sm:$0xff]   ;;  %v2710_v23 = vld [vmem:[%s3775_s1 + $0x444] ss:$16 sps:$4 sm:$0xff]  }
  0x54   :  { %1731 = vmatprep.subr.bf16.mxu0 %v2632_v24  ;;  %1943 = vmatprep.subr.bf16.mxu1 %v2635_v25  ;;  %v2713_v24 = vld [vmem:[%s3775_s1 + $0x44c] ss:$16 sps:$4 sm:$0xff]   ;;  %v3357_v25 = vld [vmem:[%s3776_s0 + $0x10] sm:$0xff] }
  0x57   :  { %1732 = vmatpush1.bf16.msra.mxu0 %v2630_v29  ;;  %1944 = vmatpush1.bf16.msra.mxu1 %v2633_v30  ;;  %v2711_v29 = vld [vmem:[%s3775_s1 + $0x448] ss:$16 sps:$4 sm:$0xff]   ;;  %v2716_v30 = vld [vmem:[%s3775_s1 + $0x464] ss:$16 sps:$4 sm:$0xff]  }
  0x58   :  { %1733 = vmatprep.subr.bf16.mxu0 %v2638_v32  ;;  %1945 = vmatprep.subr.bf16.mxu1 %v2641_v33  ;;  %v2157_v32 = vcombine.high %v3357_v25, %v3362_v27  ;;  %v2714_v33 = vld [vmem:[%s3775_s1 + $0x460] ss:$16 sps:$4 sm:$0xff]  }
  0x5b   :  { %1734 = vmatpush1.bf16.msra.mxu0 %v2636_v36  ;;  %1946 = vmatpush1.bf16.msra.mxu1 %v2639_v37  ;;  %v2725_v36 = vld [vmem:[%s3775_s1 + $0x48c] ss:$16 sps:$4 sm:$0xff]   ;;  %v2720_v37 = vld [vmem:[%s3775_s1 + $0x480] ss:$16 sps:$4 sm:$0xff]  }
  0x5c   :  { %1735 = vmatprep.subr.bf16.mxu0 %v2644_v39  ;;  %1947 = vmatprep.subr.bf16.mxu1 %v2647_v40  ;;  %v2728_v39 = vld [vmem:[%s3775_s1 + $0x4a4] ss:$16 sps:$4 sm:$0xff]   ;;  %v2731_v40 = vld [vmem:[%s3775_s1 + $0x4ac] ss:$16 sps:$4 sm:$0xff]  }
  0x5f   :  { %1736 = vmatpush1.bf16.msra.mxu0 %v2642_v41  ;;  %1948 = vmatpush1.bf16.msra.mxu1 %v2645_v42  ;;  %v2726_v41 = vld [vmem:[%s3775_s1 + $0x4a0] ss:$16 sps:$4 sm:$0xff]   ;;  %v2729_v42 = vld [vmem:[%s3775_s1 + $0x4a8] ss:$16 sps:$4 sm:$0xff]  }
  0x60   :  { %1737 = vmatprep.subr.bf16.mxu0 %v2650_v43  ;;  %1949 = vmatprep.subr.bf16.mxu1 %v2653_v44  ;;  %v2734_v43 = vld [vmem:[%s3775_s1 + $0x4c4] ss:$16 sps:$4 sm:$0xff]   ;;  %v2737_v44 = vld [vmem:[%s3775_s1 + $0x4cc] ss:$16 sps:$4 sm:$0xff]  }
  0x63   :  { %1738 = vmatpush1.bf16.msra.mxu0 %v2648_v45  ;;  %1950 = vmatpush1.bf16.msra.mxu1 %v2651_v46  ;;  %v2732_v45 = vld [vmem:[%s3775_s1 + $0x4c0] ss:$16 sps:$4 sm:$0xff]   ;;  %v2735_v46 = vld [vmem:[%s3775_s1 + $0x4c8] ss:$16 sps:$4 sm:$0xff]  }
  0x64   :  { %1739 = vmatprep.subr.bf16.mxu0 %v2656_v47  ;;  %1951 = vmatprep.subr.bf16.mxu1 %v2659_v48  ;;  %v2740_v47 = vld [vmem:[%s3775_s1 + $0x4e4] ss:$16 sps:$4 sm:$0xff]   ;;  %v2743_v48 = vld [vmem:[%s3775_s1 + $0x4ec] ss:$16 sps:$4 sm:$0xff]  }
  0x67   :  { %1740 = vmatpush1.bf16.msra.mxu0 %v2654_v49  ;;  %1952 = vmatpush1.bf16.msra.mxu1 %v2657_v50  ;;  %v2738_v49 = vld [vmem:[%s3775_s1 + $0x4e0] ss:$16 sps:$4 sm:$0xff]   ;;  %v2741_v50 = vld [vmem:[%s3775_s1 + $0x4e8] ss:$16 sps:$4 sm:$0xff]  }
  0x68   :  { %1741 = vmatprep.subr.bf16.mxu0 %v2662_v51  ;;  %1953 = vmatprep.subr.bf16.mxu1 %v2665_v52  ;;  %v2746_v51 = vld [vmem:[%s3775_s1 + $0x504] ss:$16 sps:$4 sm:$0xff]   ;;  %v2749_v52 = vld [vmem:[%s3775_s1 + $0x50c] ss:$16 sps:$4 sm:$0xff]  }
  0x6b   :  { %1742 = vmatpush1.bf16.msra.mxu0 %v2660_v53  ;;  %1954 = vmatpush1.bf16.msra.mxu1 %v2663_v54  ;;  %v2744_v53 = vld [vmem:[%s3775_s1 + $0x500] ss:$16 sps:$4 sm:$0xff]   ;;  %v2747_v54 = vld [vmem:[%s3775_s1 + $0x508] ss:$16 sps:$4 sm:$0xff]  }
  0x6c   :  { %1743 = vmatprep.subr.bf16.mxu0 %v2668_v55  ;;  %1955 = vmatprep.subr.bf16.mxu1 %v2671_v56  ;;  %v2752_v55 = vld [vmem:[%s3775_s1 + $0x524] ss:$16 sps:$4 sm:$0xff]   ;;  %v2755_v56 = vld [vmem:[%s3775_s1 + $0x52c] ss:$16 sps:$4 sm:$0xff]  }
  0x6f   :  { %1744 = vmatpush1.bf16.msra.mxu0 %v2666_v57  ;;  %1956 = vmatpush1.bf16.msra.mxu1 %v2669_v58  ;;  %v2750_v57 = vld [vmem:[%s3775_s1 + $0x520] ss:$16 sps:$4 sm:$0xff]   ;;  %v2753_v58 = vld [vmem:[%s3775_s1 + $0x528] ss:$16 sps:$4 sm:$0xff]  }
  0x70   :  { %1745 = vmatprep.subr.bf16.mxu0 %v2674_v59  ;;  %1957 = vmatprep.subr.bf16.mxu1 %v2677_v60  ;;  %v2758_v59 = vld [vmem:[%s3775_s1 + $0x544] ss:$16 sps:$4 sm:$0xff]   ;;  %v2761_v60 = vld [vmem:[%s3775_s1 + $0x54c] ss:$16 sps:$4 sm:$0xff]  }
  0x73   :  { %1746 = vmatpush1.bf16.msra.mxu0 %v2672_v61  ;;  %1958 = vmatpush1.bf16.msra.mxu1 %v2675_v62  ;;  %v2756_v61 = vld [vmem:[%s3775_s1 + $0x540] ss:$16 sps:$4 sm:$0xff]   ;;  %v2759_v62 = vld [vmem:[%s3775_s1 + $0x548] ss:$16 sps:$4 sm:$0xff]  }
  0x74   :  { %1747 = vmatprep.subr.bf16.mxu0 %v2680_v63  ;;  %1959 = vmatprep.subr.bf16.mxu1 %v2683_v0  ;;  %v2764_v63 = vld [vmem:[%s3775_s1 + $0x564] ss:$16 sps:$4 sm:$0xff]   ;;  %v2767_v0 = vld [vmem:[%s3775_s1 + $0x56c] ss:$16 sps:$4 sm:$0xff]  }
  0x77   :  { %1748 = vmatpush1.bf16.msra.mxu0 %v2678_v1  ;;  %1960 = vmatpush1.bf16.msra.mxu1 %v2681_v2  ;;  %v2762_v1 = vld [vmem:[%s3775_s1 + $0x560] ss:$16 sps:$4 sm:$0xff]   ;;  %v2765_v2 = vld [vmem:[%s3775_s1 + $0x568] ss:$16 sps:$4 sm:$0xff]  }
  0x78   :  { %1749 = vmatprep.subr.bf16.mxu0 %v2686_v3  ;;  %1961 = vmatprep.subr.bf16.mxu1 %v2689_v4  ;;  %v2770_v3 = vld [vmem:[%s3775_s1 + $0x584] ss:$16 sps:$4 sm:$0xff]   ;;  %v2773_v4 = vld [vmem:[%s3775_s1 + $0x58c] ss:$16 sps:$4 sm:$0xff]  }
  0x7b   :  { %1750 = vmatpush1.bf16.msra.mxu0 %v2684_v5  ;;  %1962 = vmatpush1.bf16.msra.mxu1 %v2687_v6  ;;  %v2768_v5 = vld [vmem:[%s3775_s1 + $0x580] ss:$16 sps:$4 sm:$0xff]   ;;  %v2771_v6 = vld [vmem:[%s3775_s1 + $0x588] ss:$16 sps:$4 sm:$0xff]  }
  0x7c   :  { %1751 = vmatprep.subr.bf16.mxu0 %v2692_v7  ;;  %1963 = vmatprep.subr.bf16.mxu1 %v2695_v8  ;;  %v2776_v7 = vld [vmem:[%s3775_s1 + $0x5a4] ss:$16 sps:$4 sm:$0xff]   ;;  %v2779_v8 = vld [vmem:[%s3775_s1 + $0x5ac] ss:$16 sps:$4 sm:$0xff]  }
  0x7f   :  { %1752 = vmatpush1.bf16.msra.mxu0 %v2690_v9  ;;  %1964 = vmatpush1.bf16.msra.mxu1 %v2693_v10  ;;  %v2774_v9 = vld [vmem:[%s3775_s1 + $0x5a0] ss:$16 sps:$4 sm:$0xff]   ;;  %v2777_v10 = vld [vmem:[%s3775_s1 + $0x5a8] ss:$16 sps:$4 sm:$0xff]  }
  0x80   :  { %1774 = vmatprep.subr.bf16.mxu0 %v2698_v11  ;;  %1986 = vmatprep.subr.bf16.mxu1 %v2701_v12  ;;  %v2782_v11 = vld [vmem:[%s3775_s1 + $0x5c4] ss:$16 sps:$4 sm:$0xff]   ;;  %v2785_v12 = vld [vmem:[%s3775_s1 + $0x5cc] ss:$16 sps:$4 sm:$0xff]  }
  0x82   :  { %1754 = vmatmul.mubr.bf16.vlgmr.msra.gmra.mrb[0].mxu0 %v2154_v15  ;;  %1966 = vmatmul.mubr.bf16.vlgmr.msra.gmra.mrb[0].mxu1 %v2154_v15  ;;  %v2788_v15 = vld [vmem:[%s3775_s1 + $0x5e4] ss:$16 sps:$4 sm:$0xff]  }
  0x83   :  { %1775 = vmatpush1.bf16.msra.mxu0 %v2696_v13  ;;  %1987 = vmatpush1.bf16.msra.mxu1 %v2699_v14  ;;  %v2780_v13 = vld [vmem:[%s3775_s1 + $0x5c0] ss:$16 sps:$4 sm:$0xff]   ;;  %v2783_v14 = vld [vmem:[%s3775_s1 + $0x5c8] ss:$16 sps:$4 sm:$0xff]  }
  0x84   :  { %1776 = vmatprep.subr.bf16.mxu0 %v2704_v18  ;;  %1988 = vmatprep.subr.bf16.mxu1 %v2707_v19  ;;  %v2789_v18 = vld [vmem:[%s3775_s1 + $0x5e8] ss:$16 sps:$4 sm:$0xff]   ;;  %v2794_v19 = vld [vmem:[%s3775_s1 + $0x604] ss:$16 sps:$4 sm:$0xff]  }
  0x85   :  { %1763 = vmatprep.mubr.bf16.mxu0 %v2163_v20  ;;  %1975 = vmatprep.mubr.bf16.mxu1 %v2163_v20  ;;  %v2797_v20 = vld [vmem:[%s3775_s1 + $0x60c] ss:$16 sps:$4 sm:$0xff]  }
  0x87   :  { %1777 = vmatpush1.bf16.msra.mxu0 %v2702_v21  ;;  %1989 = vmatpush1.bf16.msra.mxu1 %v2705_v22  ;;  %v2156_v21 = vcombine.low %v3357_v25, %v3362_v27  ;;  %v24_v22 = vld [vmem:[%s3776_s0 + $0x50] sm:$0xff]  ;;  %v2803_v27 = vld [vmem:[%s3775_s1 + $0x62c] ss:$16 sps:$4 sm:$0xff]  }
  0x88   :  { %1778 = vmatprep.subr.bf16.mxu0 %v2710_v23  ;;  %1990 = vmatprep.subr.bf16.mxu1 %v2713_v24  ;;  %v28_v23 = vld [vmem:[%s3776_s0 + $0x70] sm:$0xff] }
  0x89   :  { %v2792_v24 = vld [vmem:[%s3775_s1 + $0x600] ss:$16 sps:$4 sm:$0xff]   ;;  %v2800_v25 = vld [vmem:[%s3775_s1 + $0x624] ss:$16 sps:$4 sm:$0xff]  }
  0x8a   :  { %1764 = vmatmul.mubr.bf16.gmra.mrb[4].mxu0 %v2162_v26  ;;  %1976 = vmatmul.mubr.bf16.gmra.mrb[4].mxu1 %v2162_v26  ;;  %v2795_v26 = vld [vmem:[%s3775_s1 + $0x608] ss:$16 sps:$4 sm:$0xff]  }
  0x8b   :  { %1779 = vmatpush1.bf16.msra.mxu0 %v2708_v28  ;;  %1991 = vmatpush1.bf16.msra.mxu1 %v2711_v29  ;;  %v2165_v28 = vcombine.high %v24_v22, %v28_v23  ;;  %v2798_v29 = vld [vmem:[%s3775_s1 + $0x620] ss:$16 sps:$4 sm:$0xff]  }
  0x8c   :  { %1780 = vmatprep.subr.bf16.mxu0 %v2716_v30  ;;  %1992 = vmatprep.subr.bf16.mxu1 %v2719_v31  ;;  %v2801_v30 = vld [vmem:[%s3775_s1 + $0x628] ss:$16 sps:$4 sm:$0xff]   ;;  %v2806_v31 = vld [vmem:[%s3775_s1 + $0x644] ss:$16 sps:$4 sm:$0xff]  }
  0x8d   :  { %1806 = vmatprep.mubr.bf16.mxu0 %v2157_v32  ;;  %2018 = vmatprep.mubr.bf16.mxu1 %v2157_v32  ;;  %v2809_v32 = vld [vmem:[%s3775_s1 + $0x64c] ss:$16 sps:$4 sm:$0xff]  }
  0x8f   :  { %1781 = vmatpush1.bf16.msra.mxu0 %v2714_v33  ;;  %1993 = vmatpush1.bf16.msra.mxu1 %v2717_v34  ;;  %v2164_v33 = vcombine.low %v24_v22, %v28_v23  ;;  %v3569_v34 = vld [vmem:[%s3776_s0 + $0x18] sm:$0xff]  ;;  %v2884_v23 = vld [vmem:[%s3775_s1 + $0x7e4] ss:$16 sps:$4 sm:$0xff]  }
  0x90   :  { %1782 = vmatprep.subr.bf16.mxu0 %v2722_v35  ;;  %1994 = vmatprep.subr.bf16.mxu1 %v2725_v36  ;;  %v3574_v35 = vld [vmem:[%s3776_s0 + $0x38] sm:$0xff]  ;;  %v2804_v36 = vld [vmem:[%s3775_s1 + $0x640] ss:$16 sps:$4 sm:$0xff]  }
  0x91   :  { %v2879_v22 = vld [vmem:[%s3775_s1 + $0x7c8] ss:$16 sps:$4 sm:$0xff]  }
  0x93   :  { %1783 = vmatpush1.bf16.msra.mxu0 %v2720_v37  ;;  %1995 = vmatpush1.bf16.msra.mxu1 %v2723_v38  ;;  %v2807_v37 = vld [vmem:[%s3775_s1 + $0x648] ss:$16 sps:$4 sm:$0xff]   ;;  %v2812_v38 = vld [vmem:[%s3775_s1 + $0x664] ss:$16 sps:$4 sm:$0xff]  }
  0x94   :  { %1784 = vmatprep.subr.bf16.mxu0 %v2728_v39  ;;  %1996 = vmatprep.subr.bf16.mxu1 %v2731_v40  ;;  %v2815_v39 = vld [vmem:[%s3775_s1 + $0x66c] ss:$16 sps:$4 sm:$0xff]   ;;  %v2159_v40 = vcombine.high %v3569_v34, %v3574_v35 }
  0x97   :  { %1785 = vmatpush1.bf16.msra.mxu0 %v2726_v41  ;;  %1997 = vmatpush1.bf16.msra.mxu1 %v2729_v42  ;;  %v2810_v41 = vld [vmem:[%s3775_s1 + $0x660] ss:$16 sps:$4 sm:$0xff]   ;;  %v2813_v42 = vld [vmem:[%s3775_s1 + $0x668] ss:$16 sps:$4 sm:$0xff]  }
  0x98   :  { %1786 = vmatprep.subr.bf16.mxu0 %v2734_v43  ;;  %1998 = vmatprep.subr.bf16.mxu1 %v2737_v44  ;;  %v2818_v43 = vld [vmem:[%s3775_s1 + $0x684] ss:$16 sps:$4 sm:$0xff]   ;;  %v2821_v44 = vld [vmem:[%s3775_s1 + $0x68c] ss:$16 sps:$4 sm:$0xff]  }
  0x9b   :  { %1787 = vmatpush1.bf16.msra.mxu0 %v2732_v45  ;;  %1999 = vmatpush1.bf16.msra.mxu1 %v2735_v46  ;;  %v2816_v45 = vld [vmem:[%s3775_s1 + $0x680] ss:$16 sps:$4 sm:$0xff]   ;;  %v2819_v46 = vld [vmem:[%s3775_s1 + $0x688] ss:$16 sps:$4 sm:$0xff]  }
  0x9c   :  { %1788 = vmatprep.subr.bf16.mxu0 %v2740_v47  ;;  %2000 = vmatprep.subr.bf16.mxu1 %v2743_v48  ;;  %v2824_v47 = vld [vmem:[%s3775_s1 + $0x6a4] ss:$16 sps:$4 sm:$0xff]   ;;  %v2827_v48 = vld [vmem:[%s3775_s1 + $0x6ac] ss:$16 sps:$4 sm:$0xff]  }
  0x9f   :  { %1789 = vmatpush1.bf16.msra.mxu0 %v2738_v49  ;;  %2001 = vmatpush1.bf16.msra.mxu1 %v2741_v50  ;;  %v2822_v49 = vld [vmem:[%s3775_s1 + $0x6a0] ss:$16 sps:$4 sm:$0xff]   ;;  %v2825_v50 = vld [vmem:[%s3775_s1 + $0x6a8] ss:$16 sps:$4 sm:$0xff]  }
  0xa0   :  { %1790 = vmatprep.subr.bf16.mxu0 %v2746_v51  ;;  %2002 = vmatprep.subr.bf16.mxu1 %v2749_v52  ;;  %v2830_v51 = vld [vmem:[%s3775_s1 + $0x6c4] ss:$16 sps:$4 sm:$0xff]   ;;  %v2833_v52 = vld [vmem:[%s3775_s1 + $0x6cc] ss:$16 sps:$4 sm:$0xff]  }
  0xa3   :  { %1791 = vmatpush1.bf16.msra.mxu0 %v2744_v53  ;;  %2003 = vmatpush1.bf16.msra.mxu1 %v2747_v54  ;;  %v2828_v53 = vld [vmem:[%s3775_s1 + $0x6c0] ss:$16 sps:$4 sm:$0xff]   ;;  %v2831_v54 = vld [vmem:[%s3775_s1 + $0x6c8] ss:$16 sps:$4 sm:$0xff]  }
  0xa4   :  { %1792 = vmatprep.subr.bf16.mxu0 %v2752_v55  ;;  %2004 = vmatprep.subr.bf16.mxu1 %v2755_v56  ;;  %v2836_v55 = vld [vmem:[%s3775_s1 + $0x6e4] ss:$16 sps:$4 sm:$0xff]   ;;  %v2839_v56 = vld [vmem:[%s3775_s1 + $0x6ec] ss:$16 sps:$4 sm:$0xff]  }
  0xa7   :  { %1793 = vmatpush1.bf16.msra.mxu0 %v2750_v57  ;;  %2005 = vmatpush1.bf16.msra.mxu1 %v2753_v58  ;;  %v2834_v57 = vld [vmem:[%s3775_s1 + $0x6e0] ss:$16 sps:$4 sm:$0xff]   ;;  %v2837_v58 = vld [vmem:[%s3775_s1 + $0x6e8] ss:$16 sps:$4 sm:$0xff]  }
  0xa8   :  { %1794 = vmatprep.subr.bf16.mxu0 %v2758_v59  ;;  %2006 = vmatprep.subr.bf16.mxu1 %v2761_v60  ;;  %v2842_v59 = vld [vmem:[%s3775_s1 + $0x704] ss:$16 sps:$4 sm:$0xff]   ;;  %v2845_v60 = vld [vmem:[%s3775_s1 + $0x70c] ss:$16 sps:$4 sm:$0xff]  }
  0xab   :  { %1795 = vmatpush1.bf16.msra.mxu0 %v2756_v61  ;;  %2007 = vmatpush1.bf16.msra.mxu1 %v2759_v62  ;;  %v2840_v61 = vld [vmem:[%s3775_s1 + $0x700] ss:$16 sps:$4 sm:$0xff]   ;;  %v2843_v62 = vld [vmem:[%s3775_s1 + $0x708] ss:$16 sps:$4 sm:$0xff]  }
  0xac   :  { %1796 = vmatprep.subr.bf16.mxu0 %v2764_v63  ;;  %2008 = vmatprep.subr.bf16.mxu1 %v2767_v0  ;;  %v2848_v63 = vld [vmem:[%s3775_s1 + $0x724] ss:$16 sps:$4 sm:$0xff]   ;;  %v2851_v0 = vld [vmem:[%s3775_s1 + $0x72c] ss:$16 sps:$4 sm:$0xff]  }
  0xaf   :  { %1797 = vmatpush1.bf16.msra.mxu0 %v2762_v1  ;;  %2009 = vmatpush1.bf16.msra.mxu1 %v2765_v2  ;;  %v2846_v1 = vld [vmem:[%s3775_s1 + $0x720] ss:$16 sps:$4 sm:$0xff]   ;;  %v2849_v2 = vld [vmem:[%s3775_s1 + $0x728] ss:$16 sps:$4 sm:$0xff]  }
  0xb0   :  { %1798 = vmatprep.subr.bf16.mxu0 %v2770_v3  ;;  %2010 = vmatprep.subr.bf16.mxu1 %v2773_v4  ;;  %v2854_v3 = vld [vmem:[%s3775_s1 + $0x744] ss:$16 sps:$4 sm:$0xff]   ;;  %v2857_v4 = vld [vmem:[%s3775_s1 + $0x74c] ss:$16 sps:$4 sm:$0xff]  }
  0xb3   :  { %1799 = vmatpush1.bf16.msra.mxu0 %v2768_v5  ;;  %2011 = vmatpush1.bf16.msra.mxu1 %v2771_v6  ;;  %v2852_v5 = vld [vmem:[%s3775_s1 + $0x740] ss:$16 sps:$4 sm:$0xff]   ;;  %v2855_v6 = vld [vmem:[%s3775_s1 + $0x748] ss:$16 sps:$4 sm:$0xff]  }
  0xb4   :  { %1800 = vmatprep.subr.bf16.mxu0 %v2776_v7  ;;  %2012 = vmatprep.subr.bf16.mxu1 %v2779_v8  ;;  %v2860_v7 = vld [vmem:[%s3775_s1 + $0x764] ss:$16 sps:$4 sm:$0xff]   ;;  %v2863_v8 = vld [vmem:[%s3775_s1 + $0x76c] ss:$16 sps:$4 sm:$0xff]  }
  0xb7   :  { %1801 = vmatpush1.bf16.msra.mxu0 %v2774_v9  ;;  %2013 = vmatpush1.bf16.msra.mxu1 %v2777_v10  ;;  %v2858_v9 = vld [vmem:[%s3775_s1 + $0x760] ss:$16 sps:$4 sm:$0xff]   ;;  %v2861_v10 = vld [vmem:[%s3775_s1 + $0x768] ss:$16 sps:$4 sm:$0xff]  }
  0xb8   :  { %1802 = vmatprep.subr.bf16.mxu0 %v2782_v11  ;;  %2014 = vmatprep.subr.bf16.mxu1 %v2785_v12  ;;  %v2866_v11 = vld [vmem:[%s3775_s1 + $0x784] ss:$16 sps:$4 sm:$0xff]   ;;  %v2869_v12 = vld [vmem:[%s3775_s1 + $0x78c] ss:$16 sps:$4 sm:$0xff]  }
  0xbb   :  { %1803 = vmatpush1.bf16.msra.mxu0 %v2780_v13  ;;  %2015 = vmatpush1.bf16.msra.mxu1 %v2783_v14  ;;  %v2864_v13 = vld [vmem:[%s3775_s1 + $0x780] ss:$16 sps:$4 sm:$0xff]   ;;  %v2867_v14 = vld [vmem:[%s3775_s1 + $0x788] ss:$16 sps:$4 sm:$0xff]  }
  0xbc   :  { %1804 = vmatprep.subr.bf16.mxu0 %v2788_v15  ;;  %2016 = vmatprep.subr.bf16.mxu1 %v2791_v16  ;;  %v2872_v15 = vld [vmem:[%s3775_s1 + $0x7a4] ss:$16 sps:$4 sm:$0xff]   ;;  %v2875_v16 = vld [vmem:[%s3775_s1 + $0x7ac] ss:$16 sps:$4 sm:$0xff]  }
  0xbf   :  { %1805 = vmatpush1.bf16.msra.mxu0 %v2786_v17  ;;  %2017 = vmatpush1.bf16.msra.mxu1 %v2789_v18  ;;  %v2870_v17 = vld [vmem:[%s3775_s1 + $0x7a0] ss:$16 sps:$4 sm:$0xff]   ;;  %v2873_v18 = vld [vmem:[%s3775_s1 + $0x7a8] ss:$16 sps:$4 sm:$0xff]  }
  0xc0   :  { %1827 = vmatprep.subr.bf16.mxu0 %v2794_v19  ;;  %2039 = vmatprep.subr.bf16.mxu1 %v2797_v20  ;;  %v2878_v19 = vld [vmem:[%s3775_s1 + $0x7c4] ss:$16 sps:$4 sm:$0xff]   ;;  %v2881_v20 = vld [vmem:[%s3775_s1 + $0x7cc] ss:$16 sps:$4 sm:$0xff]  }
  0xc2   :  { %1807 = vmatmul.mubr.bf16.vlgmr.msra.gmra.mrb[0].mxu0 %v2156_v21  ;;  %2019 = vmatmul.mubr.bf16.vlgmr.msra.gmra.mrb[0].mxu1 %v2156_v21  ;;  %v2876_v21 = vld [vmem:[%s3775_s1 + $0x7c0] ss:$16 sps:$4 sm:$0xff]  }
  0xc3   :  { %1828 = vmatpush1.bf16.msra.mxu0 %v2792_v24  ;;  %2040 = vmatpush1.bf16.msra.mxu1 %v2795_v26  ;;  %v2887_v24 = vld [vmem:[%s3775_s1 + $0x7ec] ss:$16 sps:$4 sm:$0xff]   ;;  %v2882_v26 = vld [vmem:[%s3775_s1 + $0x7e0] ss:$16 sps:$4 sm:$0xff]  }
  0xc4   :  { %1829 = vmatprep.subr.bf16.mxu0 %v2800_v25  ;;  %2041 = vmatprep.subr.bf16.mxu1 %v2803_v27  ;;  %v2885_v25 = vld [vmem:[%s3775_s1 + $0x7e8] ss:$16 sps:$4 sm:$0xff]  }
  0xc5   :  { %1816 = vmatprep.mubr.bf16.mxu0 %v2165_v28  ;;  %2028 = vmatprep.mubr.bf16.mxu1 %v2165_v28  ;;  %v25_v27 = vld [vmem:[%s3776_s0 + $0x58] sm:$0xff] }
  0xc6   :  { %v29_v28 = vld [vmem:[%s3776_s0 + $0x78] sm:$0xff] }
  0xc7   :  { %1830 = vmatpush1.bf16.msra.mxu0 %v2798_v29  ;;  %2042 = vmatpush1.bf16.msra.mxu1 %v2801_v30  ;;  %v2158_v29 = vcombine.low %v3569_v34, %v3574_v35  ;;  %v2167_v30 = vcombine.high %v25_v27, %v29_v28 }
  0xc8   :  { %1831 = vmatprep.subr.bf16.mxu0 %v2806_v31  ;;  %2043 = vmatprep.subr.bf16.mxu1 %v2809_v32  ;;  %v2166_v31 = vcombine.low %v25_v27, %v29_v28  ;;  %v288_v32 = vlaneseq }
  0xca   :  { %1817 = vmatmul.mubr.bf16.gmra.mrb[4].mxu0 %v2164_v33  ;;  %2029 = vmatmul.mubr.bf16.gmra.mrb[4].mxu1 %v2164_v33  ;;  %v289_v33 = vshrl.u32 %v288_v32, 7 }
  0xcb   :  { %1832 = vmatpush1.bf16.msra.mxu0 %v2804_v36  ;;  %2044 = vmatpush1.bf16.msra.mxu1 %v2807_v37 }
  0xcc   :  { %1833 = vmatprep.subr.bf16.mxu0 %v2812_v38  ;;  %2045 = vmatprep.subr.bf16.mxu1 %v2815_v39  ;;  %v290_v36 = vsub.s32 0, %v289_v33  ;;  %v298_v37 = vsub.s32 2, %v289_v33  ;;  %v286_v38 = vld [vmem:[%s3777_s2] sm:$0xf]  ;;  %v294_v39 = vsub.s32 1, %v289_v33  ;;  %v302_v34 = vsub.s32 3, %v289_v33 }
  0xcd   :  { %1859 = vmatprep.mubr.bf16.mxu0 %v2159_v40  ;;  %2071 = vmatprep.mubr.bf16.mxu1 %v2159_v40 }
  0xce   :  { %v291_v35 = vrot.slane %v286_v38, %v290_v36  ;;  %v299_v40 = vrot.slane %v286_v38, %v298_v37 }
  0xcf   :  { %1834 = vmatpush1.bf16.msra.mxu0 %v2810_v41  ;;  %2046 = vmatpush1.bf16.msra.mxu1 %v2813_v42  ;;  %v295_v41 = vrot.slane %v286_v38, %v294_v39  ;;  %v303_v42 = vrot.slane %v286_v38, %v302_v34 }
  0xd0   :  { %1835 = vmatprep.subr.bf16.mxu0 %v2818_v43  ;;  %2047 = vmatprep.subr.bf16.mxu1 %v2821_v44 }
  0xd3   :  { %1836 = vmatpush1.bf16.msra.mxu0 %v2816_v45  ;;  %2048 = vmatpush1.bf16.msra.mxu1 %v2819_v46 }
  0xd4   :  { %1837 = vmatprep.subr.bf16.mxu0 %v2824_v47  ;;  %2049 = vmatprep.subr.bf16.mxu1 %v2827_v48 }
  0xd7   :  { %1838 = vmatpush1.bf16.msra.mxu0 %v2822_v49  ;;  %2050 = vmatpush1.bf16.msra.mxu1 %v2825_v50 }
  0xd8   :  { %1839 = vmatprep.subr.bf16.mxu0 %v2830_v51  ;;  %2051 = vmatprep.subr.bf16.mxu1 %v2833_v52 }
  0xdb   :  { %1840 = vmatpush1.bf16.msra.mxu0 %v2828_v53  ;;  %2052 = vmatpush1.bf16.msra.mxu1 %v2831_v54 }
  0xdc   :  { %1841 = vmatprep.subr.bf16.mxu0 %v2836_v55  ;;  %2053 = vmatprep.subr.bf16.mxu1 %v2839_v56 }
  0xdf   :  { %1842 = vmatpush1.bf16.msra.mxu0 %v2834_v57  ;;  %2054 = vmatpush1.bf16.msra.mxu1 %v2837_v58 }
  0xe0   :  { %1843 = vmatprep.subr.bf16.mxu0 %v2842_v59  ;;  %2055 = vmatprep.subr.bf16.mxu1 %v2845_v60 }
  0xe3   :  { %1844 = vmatpush1.bf16.msra.mxu0 %v2840_v61  ;;  %2056 = vmatpush1.bf16.msra.mxu1 %v2843_v62 }
  0xe4   :  { %1845 = vmatprep.subr.bf16.mxu0 %v2848_v63  ;;  %2057 = vmatprep.subr.bf16.mxu1 %v2851_v0 }
  0xe7   :  { %1846 = vmatpush1.bf16.msra.mxu0 %v2846_v1  ;;  %2058 = vmatpush1.bf16.msra.mxu1 %v2849_v2 }
  0xe8   :  { %1847 = vmatprep.subr.bf16.mxu0 %v2854_v3  ;;  %2059 = vmatprep.subr.bf16.mxu1 %v2857_v4 }
  0xeb   :  { %1848 = vmatpush1.bf16.msra.mxu0 %v2852_v5  ;;  %2060 = vmatpush1.bf16.msra.mxu1 %v2855_v6 }
  0xec   :  { %1849 = vmatprep.subr.bf16.mxu0 %v2860_v7  ;;  %2061 = vmatprep.subr.bf16.mxu1 %v2863_v8 }
  0xef   :  { %1850 = vmatpush1.bf16.msra.mxu0 %v2858_v9  ;;  %2062 = vmatpush1.bf16.msra.mxu1 %v2861_v10 }
  0xf0   :  { %1851 = vmatprep.subr.bf16.mxu0 %v2866_v11  ;;  %2063 = vmatprep.subr.bf16.mxu1 %v2869_v12 }
  0xf3   :  { %1852 = vmatpush1.bf16.msra.mxu0 %v2864_v13  ;;  %2064 = vmatpush1.bf16.msra.mxu1 %v2867_v14 }
  0xf4   :  { %1853 = vmatprep.subr.bf16.mxu0 %v2872_v15  ;;  %2065 = vmatprep.subr.bf16.mxu1 %v2875_v16 }
  0xf7   :  { %1854 = vmatpush1.bf16.msra.mxu0 %v2870_v17  ;;  %2066 = vmatpush1.bf16.msra.mxu1 %v2873_v18 }
  0xf8   :  { %1855 = vmatprep.subr.bf16.mxu0 %v2878_v19  ;;  %2067 = vmatprep.subr.bf16.mxu1 %v2881_v20 }
  0xfb   :  { %1856 = vmatpush1.bf16.msra.mxu0 %v2876_v21  ;;  %2068 = vmatpush1.bf16.msra.mxu1 %v2879_v22 }
  0xfc   :  { %1857 = vmatprep.subr.bf16.mxu0 %v2884_v23  ;;  %2069 = vmatprep.subr.bf16.mxu1 %v2887_v24 }
  0xff   :  { %1858 = vmatpush1.bf16.msra.mxu0 %v2882_v26  ;;  %2070 = vmatpush1.bf16.msra.mxu1 %v2885_v25 }
 0x102   :  { %1860 = vmatmul.mubr.bf16.vlgmr.msra.gmra.mrb[0].mxu0 %v2158_v29  ;;  %2072 = vmatmul.mubr.bf16.vlgmr.msra.gmra.mrb[0].mxu1 %v2158_v29 }
 0x103   :  { %1869 = vmatprep.mubr.bf16.mxu0 %v2167_v30  ;;  %2081 = vmatprep.mubr.bf16.mxu1 %v2167_v30 }
 0x10a   :  { %1870 = vmatmul.mubr.bf16.gmra.mrb[4].mxu0 %v2166_v31  ;;  %2082 = vmatmul.mubr.bf16.gmra.mrb[4].mxu1 %v2166_v31 }
 0x1d5   :  { %v1861_v43 = vpop.f32.mrb[0].mxu0  ;;  %v2073_v44 = vpop.f32.mrb[0].mxu1 }
 0x1d6   :  { %v2440_v45 = vadd.f32 %v1861_v43, %v291_v35  ;;  %v2448_v46 = vadd.f32 %v2073_v44, %v299_v40  ;;  %v1863_v47 = vpop.f32.mrb[1].mxu0  ;;  %v2075_v48 = vpop.f32.mrb[1].mxu1 }
 0x1d7   :  { %v2441_v49 = vadd.f32 %v1863_v47, %v295_v41  ;;  %v2449_v50 = vadd.f32 %v2075_v48, %v303_v42  ;;  %v1865_v51 = vpop.f32.mrb[2].mxu0  ;;  %v2077_v52 = vpop.f32.mrb[2].mxu1 }
 0x1d8   :  { %v2442_v53 = vadd.f32 %v1865_v51, %v291_v35  ;;  %v2450_v54 = vadd.f32 %v2077_v52, %v299_v40  ;;  %v1867_v55 = vpop.f32.mrb[3].mxu0  ;;  %v2079_v56 = vpop.f32.mrb[3].mxu1 }
 0x1d9   :  { %v2432_v57 = vpack.c.bf16 %v2441_v49, %v2440_v45  ;;  %v2433_v58 = vpack.c.bf16 %v2449_v50, %v2448_v46  ;;  %v2443_v59 = vadd.f32 %v1867_v55, %v295_v41  ;;  %v2451_v60 = vadd.f32 %v2079_v56, %v303_v42 }
 0x1db   :  { %2140 = vst [vmem:[%s3778_s3] sm:$0xff] %v2432_v57  ;;  %2141 = vst [vmem:[%s3778_s3 + $0x8] sm:$0xff] %v2433_v58  ;;  %v2434_v61 = vpack.c.bf16 %v2443_v59, %v2442_v53  ;;  %v2435_v62 = vpack.c.bf16 %v2451_v60, %v2450_v54 }
 0x1dd   :  { %2142 = vst [vmem:[%s3778_s3 + $0x10] sm:$0xff] %v2434_v61  ;;  %2143 = vst [vmem:[%s3778_s3 + $0x18] sm:$0xff] %v2435_v62  ;;  %v1871_v63 = vpop.f32.mrb[4].mxu0  ;;  %v2083_v0 = vpop.f32.mrb[4].mxu1 }
 0x1de   :  { %v2444_v1 = vadd.f32 %v1871_v63, %v291_v35  ;;  %v2452_v2 = vadd.f32 %v2083_v0, %v299_v40  ;;  %v1873_v3 = vpop.f32.mrb[5].mxu0  ;;  %v2085_v4 = vpop.f32.mrb[5].mxu1 }
 0x1df   :  { %v2445_v5 = vadd.f32 %v1873_v3, %v295_v41  ;;  %v2453_v6 = vadd.f32 %v2085_v4, %v303_v42  ;;  %v1875_v7 = vpop.f32.mrb[6].mxu0  ;;  %v2087_v8 = vpop.f32.mrb[6].mxu1 }
 0x1e0   :  { %v2446_v9 = vadd.f32 %v1875_v7, %v291_v35  ;;  %v2454_v10 = vadd.f32 %v2087_v8, %v299_v40  ;;  %v1877_v11 = vpop.f32.mrb[7].mxu0  ;;  %v2089_v12 = vpop.f32.mrb[7].mxu1 }
 0x1e1   :  { %v2436_v13 = vpack.c.bf16 %v2445_v5, %v2444_v1  ;;  %v2437_v14 = vpack.c.bf16 %v2453_v6, %v2452_v2  ;;  %v2447_v15 = vadd.f32 %v1877_v11, %v295_v41  ;;  %v2455_v16 = vadd.f32 %v2089_v12, %v303_v42 }
 0x1e3   :  { %2144 = vst [vmem:[%s3778_s3 + $0x20] sm:$0xff] %v2436_v13  ;;  %2145 = vst [vmem:[%s3778_s3 + $0x28] sm:$0xff] %v2437_v14  ;;  %v2438_v17 = vpack.c.bf16 %v2447_v15, %v2446_v9  ;;  %v2439_v18 = vpack.c.bf16 %v2455_v16, %v2454_v10 }
 0x1e5   :  { %2146 = vst [vmem:[%s3778_s3 + $0x30] sm:$0xff] %v2438_v17  ;;  %2147 = vst [vmem:[%s3778_s3 + $0x38] sm:$0xff] %v2439_v18 }

// kernel: detector_backbone_with_fpn_forward.9
= control target key start
LH: loop header
LB: loop body
LE: loop exit
PB: predicated region body
PF: predicated region fallthrough
CT: control target
= control target key end

     0   :  { %s2037_s18 = smov 0   ;;  %s2367_s0 = inlined_call_operand.vmem [shape: bf16[32,512], index: 0, kind: input, shape index: {}]   ;;  %s2368_s1 = inlined_call_operand.vmem [shape: bf16[512,64], index: 1, kind: input, shape index: {}]   ;;  %s2369_s2 = inlined_call_operand.vmem [shape: f32[1,64], index: 2, kind: input, shape index: {}]   ;;  %s2370_s3 = inlined_call_operand.vmem [shape: bf16[576,64], index: 3, kind: input, shape index: {}]   ;;  %s2371_s4 = inlined_call_operand.vmem [shape: f32[1,64], index: 4, kind: input, shape index: {}]   ;;  %s2372_s5 = inlined_call_operand.vmem [shape: f32[32,64], index: 5, kind: output, shape index: {}]  }
   0x1 LB: > { %s1616_s19 = sadd.s32 4294967295, %s2002_s18   ;;  %p1620_p0 = scmp.ge.s32.totalorder %s2002_s18, 1  ;;  %s2002_s18 = sphi %s2037_s18, %s15_s18  }
   0x2   : > { %p189_p1 = scmp.lt.s32.totalorder %s2002_s18, 3 }
   0x4   : > { %p190_p2 = pnand %p1620_p0, %p189_p1 }
   0x5   : > { %v1922_v0 = vld [vmem:[%s2368_s1 + $0x40] sm:$0xff] (!%p190_p2)   ;;  %v1926_v4 = vld [vmem:[%s2368_s1 + $0x48] sm:$0xff] (!%p190_p2)   ;;  %v1930_v8 = vld [vmem:[%s2368_s1 + $0x50] sm:$0xff] (!%p190_p2)   ;;  %s1621_s29 = sshll.u32 (!%p190_p2), %s1616_s19, 1  ;;  %vm603_vm0 = vcmask (!%p190_p2), 523264   ;;  %v2004_v37 = vmov (!%p190_p2), 0   ;;  %v614_v46 = vlaneseq (!%p190_p2) }
   0x6   : > { %193 = sbr.rel (%p190_p2) target bundleno = 559 (0x22f), region = 40  ;;  %v1923_v1 = vld [vmem:[%s2368_s1 + $0xc0] sm:$0xff] (!%p190_p2)   ;;  %1714 = vmatprep.subr.bf16.mxu0 (!%p190_p2), %v1922_v0  ;;  %v1927_v5 = vld [vmem:[%s2368_s1 + $0xc8] sm:$0xff] (!%p190_p2)   ;;  %v1931_v9 = vld [vmem:[%s2368_s1 + $0xd0] sm:$0xff] (!%p190_p2)   ;;  %p219_p3 = scmp.lt.s32.totalorder (!%p190_p2), %s1621_s29, 3  ;;  %604 = vst.msk [vmem:[#allocation2] sm:$0xff] (!%p190_p2), %vm603_vm0, %v2004_v37 }
   0x7   : > { %v1924_v2 = vld [vmem:[%s2368_s1] sm:$0xff] (!%p190_p2)   ;;  %1736 = vmatprep.subr.bf16.mxu1 (!%p190_p2), %v1923_v1  ;;  %v1928_v6 = vld [vmem:[%s2368_s1 + $0x8] sm:$0xff] (!%p190_p2)   ;;  %v1932_v10 = vld [vmem:[%s2368_s1 + $0x10] sm:$0xff] (!%p190_p2)   ;;  %605 = vst.msk [vmem:[#allocation2 + $0x8] sm:$0xff] (!%p190_p2), %vm603_vm0, %v2004_v37  ;;  %v2005_v38 = vmov (!%p190_p2), 0.0   ;;  %vm2006_vm1 = vmmov (!%p190_p2), 0  }
   0x8   : > { %v1925_v3 = vld [vmem:[%s2368_s1 + $0x80] sm:$0xff] (!%p190_p2)   ;;  %1715 = vmatpush3.bf16.msra.mxu0 (!%p190_p2), %v1924_v2  ;;  %v1929_v7 = vld [vmem:[%s2368_s1 + $0x88] sm:$0xff] (!%p190_p2)   ;;  %v1933_v11 = vld [vmem:[%s2368_s1 + $0x90] sm:$0xff] (!%p190_p2)   ;;  %v615_v47 = vshrl.u32 (!%p190_p2), %v614_v46, 7  ;;  %vm610_vm10 = vcmask (!%p190_p2), 523268   ;;  %vm612_vm11 = vcmask (!%p190_p2), 519168  }
   0x9   : > { %1737 = vmatpush3.bf16.msra.mxu1 (!%p190_p2), %v1925_v3  ;;  %1716 = vmatprep.subr.bf16.mxu0 (!%p190_p2), %v1926_v4  ;;  %v1934_v12 = vld [vmem:[%s2368_s1 + $0x58] sm:$0xff] (!%p190_p2)   ;;  %v1938_v16 = vld [vmem:[%s2368_s1 + $0x60] sm:$0xff] (!%p190_p2)   ;;  %v1942_v20 = vld [vmem:[%s2368_s1 + $0x68] sm:$0xff] (!%p190_p2)   ;;  %vm688_vm13 = vcmask (!%p190_p2), 1045504   ;;  %vm760_vm15 = vsmask.f32 (!%p190_p2), 6400 }
   0xa   : > { %1738 = vmatprep.subr.bf16.mxu1 (!%p190_p2), %v1927_v5  ;;  %v1935_v13 = vld [vmem:[%s2368_s1 + $0xd8] sm:$0xff] (!%p190_p2)   ;;  %v1939_v17 = vld [vmem:[%s2368_s1 + $0xe0] sm:$0xff] (!%p190_p2)   ;;  %v1943_v21 = vld [vmem:[%s2368_s1 + $0xe8] sm:$0xff] (!%p190_p2)   ;;  %v616_v48 = vadd.s32 (!%p190_p2), 8, %v615_v47  ;;  %v621_v49 = vand.u32 (!%p190_p2), 3, %v615_v47 }
   0xb   : > { %v1936_v14 = vld [vmem:[%s2368_s1 + $0x18] sm:$0xff] (!%p190_p2)   ;;  %v1940_v18 = vld [vmem:[%s2368_s1 + $0x20] sm:$0xff] (!%p190_p2)   ;;  %v1944_v22 = vld [vmem:[%s2368_s1 + $0x28] sm:$0xff] (!%p190_p2)  }
   0xc   : > { %1717 = vmatpush3.bf16.msra.mxu0 (!%p190_p2), %v1928_v6  ;;  %v1937_v15 = vld [vmem:[%s2368_s1 + $0x98] sm:$0xff] (!%p190_p2)   ;;  %v1941_v19 = vld [vmem:[%s2368_s1 + $0xa0] sm:$0xff] (!%p190_p2)   ;;  %v1945_v23 = vld [vmem:[%s2368_s1 + $0xa8] sm:$0xff] (!%p190_p2)   ;;  %v628_v50 = vand.u32 (!%p190_p2), 3, %v616_v48  ;;  %vm641_vm2 = vcmp.gt.s32.totalorder (!%p190_p2), %v621_v49, 0  ;;  %vm643_vm4 = vcmp.lt.s32.totalorder (!%p190_p2), %v621_v49, 3 }
   0xd   : > { %1739 = vmatpush3.bf16.msra.mxu1 %v1929_v7  ;;  %1718 = vmatprep.subr.bf16.mxu0 %v1930_v8  ;;  %s2374_s29 = smov (!%p219_p3, %s1621_s29), 3  ;;  %v1946_v24 = vld [vmem:[%s2368_s1 + $0x70] sm:$0xff]   ;;  %v1950_v28 = vld [vmem:[%s2368_s1 + $0x78] sm:$0xff]   ;;  %v1960_v36 = vld [vmem:[%s2370_s3 + $0x20] sm:$0xff]  }
   0xe   : > { %1740 = vmatprep.subr.bf16.mxu1 %v1931_v9  ;;  %v1947_v25 = vld [vmem:[%s2368_s1 + $0xf0] sm:$0xff]   ;;  %s1713_s28 = sshll.u32 %s2374_s29, 4  ;;  %v1951_v29 = vld [vmem:[%s2368_s1 + $0xf8] sm:$0xff]   ;;  %v1961_v39 = vld [vmem:[%s2370_s3 + $0x28] sm:$0xff]   ;;  %vm642_vm3 = vcmp.gt.s32.totalorder %v628_v50, 0  ;;  %vm644_vm5 = vcmp.lt.s32.totalorder %v628_v50, 3 }
   0xf   : > { %v1948_v26 = vld [vmem:[%s2368_s1 + $0x30] sm:$0xff]   ;;  %s223_s19 = scalar_lea.vmem %s2367_s0, %s1713_s28  ;;  %v1952_v30 = vld [vmem:[%s2368_s1 + $0x38] sm:$0xff]   ;;  %v1962_v40 = vld [vmem:[%s2370_s3] sm:$0xff]   ;;  %s1625_s24 = sshll.u32 %s2374_s29, 3 }
  0x10   : > { %1719 = vmatpush3.bf16.msra.mxu0 %v1932_v10  ;;  %v1949_v27 = vld [vmem:[%s2368_s1 + $0xb0] sm:$0xff]   ;;  %v1953_v31 = vld [vmem:[%s2368_s1 + $0xb8] sm:$0xff]   ;;  %v1964_v42 = vld [vmem:[%s2370_s3 + $0x8] sm:$0xff]   ;;  %s229_s30 = scalar_lea.vmem %s2372_s5, %s1625_s24 }
  0x11   : > { %1741 = vmatpush3.bf16.msra.mxu1 %v1933_v11  ;;  %1720 = vmatprep.subr.bf16.mxu0 %v1934_v12  ;;  %v1954_v32 = vld [vmem:[%s223_s19] ss:$16 sps:$4 sm:$0xff]   ;;  %v1956_v33 = vld [vmem:[%s223_s19 + $0x4] ss:$16 sps:$4 sm:$0xff]   ;;  %v1957_v34 = vld [vmem:[%s223_s19 + $0x8] ss:$16 sps:$4 sm:$0xff]  }
  0x12   : > { %1742 = vmatprep.subr.bf16.mxu1 %v1935_v13  ;;  %v1959_v35 = vld [vmem:[%s223_s19 + $0xc] ss:$16 sps:$4 sm:$0xff]   ;;  %553 = vmatprep.mubr.bf16.mxu0 %v1956_v33  ;;  %v1963_v41 = vld [vmem:[%s2370_s3 + $0x30] sm:$0xff]   ;;  %vm651_vm6 = vmpackc.low %vm641_vm2, %vm641_vm2 }
  0x13   : > { %594 = vmatprep.mubr.bf16.mxu1 %v1959_v35  ;;  %v1965_v43 = vld [vmem:[%s2370_s3 + $0x38] sm:$0xff]   ;;  %v1966_v44 = vld [vmem:[%s2370_s3 + $0x10] sm:$0xff]   ;;  %vm652_vm7 = vmpackc.low %vm642_vm3, %vm642_vm3  ;;  %v653_v52 = vsel %vm651_vm6, 65537, %v2004_v37  ;;  %vm877_vm3 = vsmask.f32 5376  ;;  %vm1080_vm6 = vcmask 1043456  }
  0x14   : > { %1721 = vmatpush3.bf16.msra.mxu0 %v1936_v14  ;;  %v1968_v45 = vld [vmem:[%s2370_s3 + $0x18] sm:$0xff]   ;;  %vm851_vm8 = vmpackc.low %vm643_vm4, %vm643_vm4  ;;  %v654_v53 = vsel %vm652_vm7, 65537, %v2004_v37  ;;  %v1626_v55 = vld [vmem:[%s2369_s2] ss:$0 sm:$0xff]  ;;  %vm981_vm4 = vsmask.f32 4352 }
  0x15   : > { %1743 = vmatpush3.bf16.msra.mxu1 %v1937_v15  ;;  %1722 = vmatprep.subr.bf16.mxu0 %v1938_v16  ;;  %vm852_vm9 = vmpackc.low %vm644_vm5, %vm644_vm5  ;;  %v853_v57 = vsel %vm851_vm8, 65537, %v2004_v37  ;;  %v1663_v1 = vcombine.low %v653_v52, %v654_v53  ;;  %vm1169_vm8 = vsmask.f32 3328 }
  0x16   : > { %1744 = vmatprep.subr.bf16.mxu1 %v1939_v17  ;;  %v854_v58 = vsel %vm852_vm9, 65537, %v2004_v37  ;;  %vm1273_vm9 = vsmask.f32 2304 }
  0x17   : > { %v1674_v5 = vcombine.low %v853_v57, %v854_v58  ;;  %v2192_v9 = vshrl.u32 %v1663_v1, 16  ;;  %v2194_v10 = vshll.u32 %v1663_v1, 16  ;;  %v1971_v57 = vld [vmem:[%s2370_s3 + $0x50] sm:$0xff]   ;;  %v1973_v1 = vld [vmem:[%s2370_s3 + $0x58] sm:$0xff]  }
  0x18   : > { %1723 = vmatpush3.bf16.msra.mxu0 %v1940_v18 }
  0x19   : > { %1745 = vmatpush3.bf16.msra.mxu1 %v1941_v19  ;;  %1724 = vmatprep.subr.bf16.mxu0 %v1942_v20  ;;  %v2196_v12 = vshrl.u32 %v1674_v5, 16  ;;  %v2198_v13 = vshll.u32 %v1674_v5, 16  ;;  %v661_v15 = vrot.slane %v2192_v9, 6  ;;  %v664_v16 = vrot.slane %v2194_v10, 7 }
  0x1a   : > { %1746 = vmatprep.subr.bf16.mxu1 %v1943_v21 }
  0x1b   : > { %v861_v18 = vrot.slane %v2196_v12, 5  ;;  %v864_v19 = vrot.slane %v2198_v13, 6  ;;  %v665_v20 = vor.u32 %v664_v16, %v661_v15  ;;  %v1975_v15 = vld [vmem:[%s2370_s3 + $0x80] sm:$0xff]  }
  0x1c   : > { %1725 = vmatpush3.bf16.msra.mxu0 %v1944_v22  ;;  %v967_v22 = vrot.slane %v2192_v9, 4 }
  0x1d   : > { %1747 = vmatpush3.bf16.msra.mxu1 %v1945_v23  ;;  %1726 = vmatprep.subr.bf16.mxu0 %v1946_v24  ;;  %v865_v21 = vor.u32 %v864_v19, %v861_v18  ;;  %vm666_vm12 = vcmp.ne.s16.totalorder %v665_v20, 0  ;;  %v968_v23 = vrot.slane %v2194_v10, 5 }
  0x1e   : > { %1748 = vmatprep.subr.bf16.mxu1 %v1947_v25 }
  0x1f   : > { %vm866_vm14 = vcmp.ne.s16.totalorder %v865_v21, 0  ;;  %v969_v35 = vor.u32 %v968_v23, %v967_v22  ;;  %v1976_v21 = vld [vmem:[%s2370_s3 + $0x78] sm:$0xff]  }
  0x20   : > { %1727 = vmatpush3.bf16.msra.mxu0 %v1948_v26 }
  0x21   : > { %1749 = vmatpush3.bf16.msra.mxu1 %v1949_v27  ;;  %1728 = vmatprep.subr.bf16.mxu0 %v1950_v28  ;;  %vm970_vm2 = vcmp.ne.s16.totalorder %v969_v35, 0  ;;  %v1980_v35 = vld [vmem:[%s2370_s3 + $0xa8] sm:$0xff]  }
  0x22   : > { %1750 = vmatprep.subr.bf16.mxu1 %v1951_v29 }
  0x24   : > { %1729 = vmatpush3.bf16.msra.mxu0 %v1952_v30  ;;  %v1967_v30 = vld [vmem:[%s2370_s3 + $0x40] sm:$0xff]  }
  0x25   : > { %1751 = vmatpush3.bf16.msra.mxu1 %v1953_v31  ;;  %1803 = vmatprep.subr.bf16.mxu0 %v2005_v38 }
  0x26   : > { %1815 = vmatprep.subr.bf16.mxu1 %v2005_v38 }
  0x27   : > { %554 = vmatmul.mubr.bf16.vlgmr.msra.gmra.mrb[0].mxu0 %v1954_v32 }
  0x28   : > { %595 = vmatmul.mubr.bf16.vlgmr.msra.gmra.mrb[0].mxu1 %v1957_v34  ;;  %1804 = vmatpush3.bf16.msra.mxu0 %v1960_v36 }
  0x29   : > { %1805 = vmatprep.subr.bf16.mxu0 %v2005_v38  ;;  %1816 = vmatpush3.bf16.msra.mxu1 %v1962_v40 }
  0x2a   : > { %1817 = vmatprep.subr.bf16.mxu1 %v2005_v38  ;;  %1811 = vmatprep.mubr.msk.bf16.mxu0 %vm2006_vm1, %v2005_v38 }
  0x2b   : > { %1823 = vmatprep.mubr.msk.bf16.mxu1 %vm2006_vm1, %v2005_v38 }
  0x2c   : > { %1806 = vmatpush3.bf16.msra.mxu0 %v1961_v39 }
  0x2d   : > { %1807 = vmatprep.subr.bf16.mxu0 %v2005_v38  ;;  %1818 = vmatpush3.bf16.msra.mxu1 %v1964_v42 }
  0x2e   : > { %1819 = vmatprep.subr.bf16.mxu1 %v2005_v38 }
  0x30   : > { %1808 = vmatpush3.bf16.msra.mxu0 %v1963_v41 }
  0x31   : > { %1809 = vmatprep.subr.bf16.mxu0 %v2005_v38  ;;  %1820 = vmatpush3.bf16.msra.mxu1 %v1966_v44  ;;  %v1969_v44 = vld [vmem:[%s2370_s3 + $0x48] sm:$0xff]  }
  0x32   : > { %1821 = vmatprep.subr.bf16.mxu1 %v2005_v38 }
  0x34   : > { %1810 = vmatpush3.bf16.msra.mxu0 %v1965_v43 }
  0x35   : > { %1827 = vmatprep.subr.bf16.mxu0 %v2005_v38  ;;  %1822 = vmatpush3.bf16.msra.mxu1 %v1968_v45 }
  0x36   : > { %1839 = vmatprep.subr.bf16.mxu1 %v2005_v38 }
  0xfa   : > { %v1730_v51 = vpop.f32.mrb[0].mxu0 }
  0xfb   : > { %v1752_v54 = vpop.f32.mrb[0].mxu1  ;;  %v1731_v56 = vpop.f32.mrb[1].mxu0 }
  0xfc   : > { %v1732_v59 = vadd.f32 %v1731_v56, %v1730_v51  ;;  %v1753_v60 = vpop.f32.mrb[1].mxu1  ;;  %v1733_v61 = vpop.f32.mrb[2].mxu0  ;;  %v1970_v51 = vld [vmem:[%s2370_s3 + $0x60] sm:$0xff]  }
  0xfd   : > { %v1754_v62 = vadd.f32 %v1753_v60, %v1752_v54  ;;  %v1755_v63 = vpop.f32.mrb[2].mxu1  ;;  %v1734_v0 = vpop.f32.mrb[3].mxu0  ;;  %v1972_v60 = vld [vmem:[%s2370_s3 + $0x68] sm:$0xff]  }
  0xfe   : > { %v556_v2 = vadd.f32 %v1732_v59, %v1626_v55  ;;  %v1735_v3 = vadd.f32 %v1734_v0, %v1733_v61  ;;  %v1756_v4 = vpop.f32.mrb[3].mxu1 }
  0xff   : > { %v1757_v6 = vadd.f32 %v1756_v4, %v1755_v63 }
 0x100   : > { %v597_v7 = vadd.f32 %v1754_v62, %v556_v2  ;;  %v559_v8 = vadd.f32 %v1735_v3, %v1626_v55 }
 0x102   : > { %v600_v11 = vadd.f32 %v1757_v6, %v559_v8  ;;  %v1974_v6 = vld [vmem:[%s2370_s3 + $0x70] sm:$0xff]  }
 0x104   : > { %v606_v14 = vpack.c.bf16 %v600_v11, %v597_v7  ;;  %v1155_v11 = vrot.slane %v2196_v12, 3 }
 0x106   : > { %v608_v17 = vrot.slane %v606_v14, 4  ;;  %v1156_v14 = vrot.slane %v2198_v13, 4 }
 0x108   : > { %611 = vst.msk [vmem:[#allocation2] sm:$0xf0] %vm610_vm10, %v608_v17  ;;  %v1157_v22 = vor.u32 %v1156_v14, %v1155_v11 }
 0x109   : > { %613 = vst.msk [vmem:[#allocation2 + $0x8] sm:$0xf] %vm612_vm11, %v608_v17  ;;  %vm1372_vm11 = vcmask 1041408  }
 0x10a   : > { %vm1158_vm5 = vcmp.ne.s16.totalorder %v1157_v22, 0 }
 0x10f   : > { %v677_v25 = vld [vmem:[#allocation2] sm:$0xfc] }
 0x110   : > { %v646_v24 = vld [vmem:[#allocation2 + $0x8] sm:$0x3]  ;;  %v645_v26 = vld [vmem:[#allocation2] sm:$0xfe]  ;;  %v689_v28 = vrot.slane %v677_v25, 2  ;;  %v867_v37 = vsel %vm866_vm14, %v677_v25, 0 }
 0x111   : > { %v668_v27 = vsel %vm666_vm12, %v646_v24, 0  ;;  %v690_v29 = vrot.slane %v646_v24, 2  ;;  %v846_v31 = vld [vmem:[#allocation2 + $0x8] sm:$0x7]  ;;  %v667_v32 = vsel %vm666_vm12, %v645_v26, 0  ;;  %v879_v48 = vshrl.u32 %v867_v37, 16 }
 0x112   : > { %v770_v33 = vshrl.u32 %v668_v27, 16  ;;  %v773_v34 = vshll.u32 %v668_v27, 16  ;;  %v762_v39 = vshrl.u32 %v667_v32, 16  ;;  %v765_v40 = vshll.u32 %v667_v32, 16  ;;  %v965_v49 = vld [vmem:[#allocation2] sm:$0xf8] }
 0x113   : > { %v691_v36 = vsel %vm688_vm13, %v689_v28, %v690_v29  ;;  %v868_v43 = vsel %vm866_vm14, %v846_v31, 0  ;;  %v882_v52 = vshll.u32 %v867_v37, 16  ;;  %v2221_v55 = vld [vmem:[#allocation2 + $0x8] sm:$0xf]  ;;  %v971_v58 = vsel %vm970_vm2, %v965_v49, 0  ;;  %v1978_v26 = vld [vmem:[%s2370_s3 + $0xa0] sm:$0xff]  }
 0x114   : > { %1812 = vmatmul.mubr.msk.bf16.vlgmr.msra.gmra.mrb[4].mxu0 %vm603_vm0, %v691_v36  ;;  %v772_v41 = vrot.slane %v770_v33, 1  ;;  %v775_v42 = vrot.slane %v773_v34, 2  ;;  %v764_v45 = vrot.slane %v762_v39, 1  ;;  %v767_v46 = vrot.slane %v765_v40, 2  ;;  %v1977_v25 = vld [vmem:[%s2370_s3 + $0x88] sm:$0xff]   ;;  %v1979_v32 = vld [vmem:[%s2370_s3 + $0x90] sm:$0xff]  }
 0x115   : > { %1828 = vmatpush3.bf16.msra.mxu0 %v1967_v30  ;;  %1835 = vmatprep.mubr.msk.bf16.mxu0 %vm2006_vm1, %v2005_v38  ;;  %v887_v53 = vshrl.u32 %v868_v43, 16  ;;  %v890_v54 = vshll.u32 %v868_v43, 16  ;;  %v972_v59 = vsel %vm970_vm2, %v2221_v55, 0  ;;  %v881_v61 = vrot.slane %v879_v48, 2  ;;  %v1069_v27 = vld [vmem:[#allocation2] sm:$0xf0] }
 0x116   : > { %1829 = vmatprep.subr.bf16.mxu0 %v2005_v38  ;;  %v776_v47 = vor.u32 %v775_v42, %v772_v41  ;;  %v768_v50 = vor.u32 %v767_v46, %v764_v45  ;;  %v884_v62 = vrot.slane %v882_v52, 3  ;;  %v983_v2 = vshrl.u32 %v971_v58, 16  ;;  %v1154_v28 = vld [vmem:[#allocation2 + $0x8] sm:$0x1f]  ;;  %v1982_v41 = vld [vmem:[%s2370_s3 + $0xb0] sm:$0xff]   ;;  %v1984_v52 = vld [vmem:[%s2370_s3 + $0xb8] sm:$0xff]  }
 0x117   : > { %v889_v63 = vrot.slane %v887_v53, 2  ;;  %v892_v0 = vrot.slane %v890_v54, 3  ;;  %v986_v3 = vshll.u32 %v971_v58, 16  ;;  %v991_v4 = vshrl.u32 %v972_v59, 16  ;;  %v1257_v45 = vld [vmem:[#allocation2] sm:$0xe0] }
 0x118   : > { %v777_v56 = vsel %vm760_vm15, %v768_v50, %v776_v47  ;;  %v994_v5 = vshll.u32 %v972_v59, 16  ;;  %v885_v7 = vor.u32 %v884_v62, %v881_v61  ;;  %v985_v16 = vrot.slane %v983_v2, 3  ;;  %v2289_v50 = vld [vmem:[#allocation2 + $0x8] sm:$0x3f]  ;;  %v1986_v58 = vld [vmem:[%s2370_s3 + $0xe0] sm:$0xff]  }
 0x119   : > { %1830 = vmatpush3.bf16.msra.mxu0 %v1969_v44  ;;  %1824 = vmatmul.mubr.msk.bf16.vlgmr.msra.gmra.mrb[4].mxu1 %vm603_vm0, %v777_v56  ;;  %v893_v8 = vor.u32 %v892_v0, %v889_v63  ;;  %v988_v17 = vrot.slane %v986_v3, 4  ;;  %v993_v18 = vrot.slane %v991_v4, 3  ;;  %v1259_v29 = vrot.slane %v2192_v9, 2  ;;  %v1983_v44 = vld [vmem:[%s2370_s3 + $0xc0] sm:$0xff]   ;;  %v1987_v0 = vld [vmem:[%s2370_s3 + $0xd0] sm:$0xff]   ;;  %v1988_v3 = vld [vmem:[%s2370_s3 + $0xe8] sm:$0xff]  }
 0x11a   : > { %1831 = vmatprep.subr.bf16.mxu0 %v2005_v38  ;;  %1840 = vmatpush3.bf16.msra.mxu1 %v1970_v51  ;;  %v996_v19 = vrot.slane %v994_v5, 4  ;;  %v1260_v30 = vrot.slane %v2194_v10, 3  ;;  %v1159_v33 = vsel %vm1158_vm5, %v1069_v27, 0  ;;  %v1160_v34 = vsel %vm1158_vm5, %v1154_v28, 0  ;;  %v1981_v10 = vld [vmem:[%s2370_s3 + $0x98] sm:$0xff]  }
 0x11b   : > { %1847 = vmatprep.mubr.msk.bf16.mxu1 %vm2006_vm1, %v2005_v38  ;;  %1841 = vmatprep.subr.bf16.mxu1 %v2005_v38  ;;  %v894_v20 = vsel %vm877_vm3, %v885_v7, %v893_v8  ;;  %v989_v23 = vor.u32 %v988_v17, %v985_v16  ;;  %v1171_v36 = vshrl.u32 %v1159_v33, 16  ;;  %v1174_v37 = vshll.u32 %v1159_v33, 16  ;;  %v1990_v8 = vld [vmem:[%s2370_s3 + $0xf0] sm:$0xff]   ;;  %v1361_v16 = vld [vmem:[#allocation2] sm:$0xc0] }
 0x11c   : > { %v997_v24 = vor.u32 %v996_v19, %v993_v18  ;;  %v1261_v9 = vor.u32 %v1260_v30, %v1259_v29  ;;  %v1179_v39 = vshrl.u32 %v1160_v34, 16  ;;  %v1182_v40 = vshll.u32 %v1160_v34, 16  ;;  %v1446_v17 = vld [vmem:[#allocation2 + $0x8] sm:$0x7f]  ;;  %v1992_v19 = vld [vmem:[%s2370_s3 + $0xf8] sm:$0xff]   ;;  %v1994_v30 = vld [vmem:[%s2370_s3 + $0x110] sm:$0xff]  }
 0x11d   : > { %1832 = vmatpush3.bf16.msra.mxu0 %v1971_v57  ;;  %v1081_v42 = vrot.slane %v1069_v27, 4  ;;  %v1082_v43 = vrot.slane %v2221_v55, 4  ;;  %v1173_v46 = vrot.slane %v1171_v36, 4  ;;  %v1176_v47 = vrot.slane %v1174_v37, 5  ;;  %v1985_v57 = vld [vmem:[%s2370_s3 + $0xc8] sm:$0xff]  }
 0x11e   : > { %1833 = vmatprep.subr.bf16.mxu0 %v2005_v38  ;;  %1842 = vmatpush3.bf16.msra.mxu1 %v1972_v60  ;;  %v998_v31 = vsel %vm981_vm4, %v989_v23, %v997_v24  ;;  %vm1262_vm7 = vcmp.ne.s16.totalorder %v1261_v9, 0  ;;  %v1181_v48 = vrot.slane %v1179_v39, 4  ;;  %v1184_v49 = vrot.slane %v1182_v40, 5  ;;  %v1993_v24 = vld [vmem:[%s2370_s3 + $0x108] sm:$0xff]  }
 0x11f   : > { %1843 = vmatprep.subr.bf16.mxu1 %v2005_v38  ;;  %v1083_v51 = vsel %vm1080_vm6, %v1081_v42, %v1082_v43  ;;  %v1263_v53 = vsel %vm1262_vm7, %v1257_v45, 0  ;;  %v1264_v54 = vsel %vm1262_vm7, %v2289_v50, 0  ;;  %v1177_v55 = vor.u32 %v1176_v47, %v1173_v46 }
 0x120   : > { %v1185_v56 = vor.u32 %v1184_v49, %v1181_v48  ;;  %v1275_v59 = vshrl.u32 %v1263_v53, 16  ;;  %v1278_v60 = vshll.u32 %v1263_v53, 16  ;;  %v1283_v61 = vshrl.u32 %v1264_v54, 16 }
 0x121   : > { %1834 = vmatpush3.bf16.msra.mxu0 %v1973_v1  ;;  %v1286_v62 = vshll.u32 %v1264_v54, 16  ;;  %v1447_v1 = vrot.slane %v2196_v12, 1  ;;  %v1448_v2 = vrot.slane %v2198_v13, 2  ;;  %v1989_v12 = vld [vmem:[%s2370_s3 + $0xd8] sm:$0xff]   ;;  %v1373_v22 = vrot.slane %v1361_v16, 6 }
 0x122   : > { %1851 = vmatprep.subr.bf16.mxu0 %v2005_v38  ;;  %1844 = vmatpush3.bf16.msra.mxu1 %v1974_v6  ;;  %v1186_v63 = vsel %vm1169_vm8, %v1177_v55, %v1185_v56  ;;  %v1277_v4 = vrot.slane %v1275_v59, 5  ;;  %v1280_v5 = vrot.slane %v1278_v60, 6  ;;  %v1285_v6 = vrot.slane %v1283_v61, 5 }
 0x123   : > { %1845 = vmatprep.subr.bf16.mxu1 %v2005_v38  ;;  %v1288_v7 = vrot.slane %v1286_v62, 6  ;;  %v1449_v13 = vor.u32 %v1448_v2, %v1447_v1  ;;  %v1374_v23 = vrot.slane %v2289_v50, 6 }
 0x124   : > { %1836 = vmatmul.mubr.msk.bf16.vlgmr.msra.gmra.mrb[8].mxu0 %vm603_vm0, %v894_v20  ;;  %v1281_v11 = vor.u32 %v1280_v5, %v1277_v4 }
 0x125   : > { %1852 = vmatpush3.bf16.msra.mxu0 %v1975_v15  ;;  %1859 = vmatprep.mubr.msk.bf16.mxu0 %vm2006_vm1, %v2005_v38  ;;  %v1289_v14 = vor.u32 %v1288_v7, %v1285_v6  ;;  %v1991_v15 = vld [vmem:[%s2370_s3 + $0x100] sm:$0xff]   ;;  %vm1450_vm10 = vcmp.ne.s16.totalorder %v1449_v13, 0  ;;  %v1375_v29 = vsel %vm1372_vm11, %v1373_v22, %v1374_v23 }
 0x126   : > { %1853 = vmatprep.subr.bf16.mxu0 %v2005_v38  ;;  %1846 = vmatpush3.bf16.msra.mxu1 %v1976_v21  ;;  %v1451_v20 = vsel %vm1450_vm10, %v1361_v16, 0  ;;  %v1452_v21 = vsel %vm1450_vm10, %v1446_v17, 0  ;;  %v1710_v22 = vld [vmem:[%s2371_s4] ss:$0 sm:$0xff] }
 0x127   : > { %1863 = vmatprep.subr.bf16.mxu1 %v2005_v38  ;;  %v1290_v18 = vsel %vm1273_vm9, %v1281_v11, %v1289_v14  ;;  %v1471_v27 = vshrl.u32 %v1452_v21, 16  ;;  %v1474_v28 = vshll.u32 %v1452_v21, 16 }
 0x129   : > { %1854 = vmatpush3.bf16.msra.mxu0 %v1977_v25  ;;  %1848 = vmatmul.mubr.msk.bf16.vlgmr.msra.gmra.mrb[8].mxu1 %vm603_vm0, %v998_v31  ;;  %v1463_v25 = vshrl.u32 %v1451_v20, 16  ;;  %v1473_v33 = vrot.slane %v1471_v27, 6  ;;  %v1476_v34 = vrot.slane %v1474_v28, 7 }
 0x12a   : > { %1855 = vmatprep.subr.bf16.mxu0 %v2005_v38  ;;  %1864 = vmatpush3.bf16.msra.mxu1 %v1978_v26  ;;  %v1466_v26 = vshll.u32 %v1451_v20, 16 }
 0x12b   : > { %1871 = vmatprep.mubr.msk.bf16.mxu1 %vm2006_vm1, %v2005_v38  ;;  %1865 = vmatprep.subr.bf16.mxu1 %v2005_v38  ;;  %v1465_v31 = vrot.slane %v1463_v25, 6 }
 0x12d   : > { %1856 = vmatpush3.bf16.msra.mxu0 %v1979_v32  ;;  %v1468_v32 = vrot.slane %v1466_v26, 7 }
 0x12e   : > { %1857 = vmatprep.subr.bf16.mxu0 %v2005_v38  ;;  %1866 = vmatpush3.bf16.msra.mxu1 %v1980_v35  ;;  %v1995_v35 = vld [vmem:[%s2370_s3 + $0x118] sm:$0xff]  }
 0x12f   : > { %1867 = vmatprep.subr.bf16.mxu1 %v2005_v38  ;;  %v1469_v9 = vor.u32 %v1468_v32, %v1465_v31 }
 0x131   : > { %1858 = vmatpush3.bf16.msra.mxu0 %v1981_v10  ;;  %v1477_v10 = vor.u32 %v1476_v34, %v1473_v33 }
 0x132   : > { %1875 = vmatprep.subr.bf16.mxu0 %v2005_v38  ;;  %1868 = vmatpush3.bf16.msra.mxu1 %v1982_v41 }
 0x133   : > { %1869 = vmatprep.subr.bf16.mxu1 %v2005_v38 }
 0x134   : > { %1860 = vmatmul.mubr.msk.bf16.vlgmr.msra.gmra.mrb[12].mxu0 %vm603_vm0, %v1083_v51 }
 0x135   : > { %1876 = vmatpush3.bf16.msra.mxu0 %v1983_v44  ;;  %1883 = vmatprep.mubr.msk.bf16.mxu0 %vm2006_vm1, %v2005_v38 }
 0x136   : > { %1877 = vmatprep.subr.bf16.mxu0 %v2005_v38  ;;  %1870 = vmatpush3.bf16.msra.mxu1 %v1984_v52 }
 0x137   : > { %1887 = vmatprep.subr.bf16.mxu1 %v2005_v38 }
 0x139   : > { %1878 = vmatpush3.bf16.msra.mxu0 %v1985_v57  ;;  %1872 = vmatmul.mubr.msk.bf16.vlgmr.msra.gmra.mrb[12].mxu1 %vm603_vm0, %v1186_v63 }
 0x13a   : > { %1879 = vmatprep.subr.bf16.mxu0 %v2005_v38  ;;  %1888 = vmatpush3.bf16.msra.mxu1 %v1986_v58 }
 0x13b   : > { %1895 = vmatprep.mubr.msk.bf16.mxu1 %vm2006_vm1, %v2005_v38  ;;  %1889 = vmatprep.subr.bf16.mxu1 %v2005_v38 }
 0x13d   : > { %1880 = vmatpush3.bf16.msra.mxu0 %v1987_v0 }
 0x13e   : > { %1881 = vmatprep.subr.bf16.mxu0 %v2005_v38  ;;  %1890 = vmatpush3.bf16.msra.mxu1 %v1988_v3 }
 0x13f   : > { %1891 = vmatprep.subr.bf16.mxu1 %v2005_v38 }
 0x141   : > { %1882 = vmatpush3.bf16.msra.mxu0 %v1989_v12 }
 0x142   : > { %1899 = vmatprep.subr.bf16.mxu0 %v2005_v38  ;;  %1892 = vmatpush3.bf16.msra.mxu1 %v1990_v8 }
 0x143   : > { %1893 = vmatprep.subr.bf16.mxu1 %v2005_v38 }
 0x144   : > { %1884 = vmatmul.mubr.msk.bf16.vlgmr.msra.gmra.mrb[16].mxu0 %vm603_vm0, %v1290_v18 }
 0x145   : > { %1900 = vmatpush3.bf16.msra.mxu0 %v1991_v15  ;;  %1907 = vmatprep.mubr.msk.bf16.mxu0 %vm2006_vm1, %v2005_v38  ;;  %vm1461_vm1 = vsmask.f32 1280 }
 0x146   : > { %1901 = vmatprep.subr.bf16.mxu0 %v2005_v38  ;;  %1894 = vmatpush3.bf16.msra.mxu1 %v1992_v19  ;;  %v1478_v36 = vsel %vm1461_vm1, %v1469_v9, %v1477_v10 }
 0x149   : > { %1902 = vmatpush3.bf16.msra.mxu0 %v1993_v24  ;;  %1896 = vmatmul.mubr.msk.bf16.vlgmr.msra.gmra.mrb[16].mxu1 %vm603_vm0, %v1375_v29 }
 0x14a   : > { %1903 = vmatprep.subr.bf16.mxu0 %v2005_v38 }
 0x14d   : > { %1904 = vmatpush3.bf16.msra.mxu0 %v1994_v30 }
 0x14e   : > { %1905 = vmatprep.subr.bf16.mxu0 %v2005_v38 }
 0x151   : > { %1906 = vmatpush3.bf16.msra.mxu0 %v1995_v35 }
 0x154   : > { %1908 = vmatmul.mubr.msk.bf16.vlgmr.msra.gmra.mrb[20].mxu0 %vm603_vm0, %v1478_v36 }
 0x1e7   : > { %v753_v37 = vpop.f32.mrb[4].mxu0 }
 0x1e8   : > { %v1813_v39 = vpop.f32.mrb[5].mxu0 }
 0x1e9   : > { %v756_v40 = vpop.f32.mrb[6].mxu0 }
 0x1ea   : > { %v1814_v41 = vpop.f32.mrb[7].mxu0 }
 0x1ec   : > { %v839_v42 = vpop.f32.mrb[4].mxu1 }
 0x1ed   : > { %v840_v43 = vadd.f32 %v839_v42, %v753_v37  ;;  %v1825_v44 = vpop.f32.mrb[5].mxu1 }
 0x1ee   : > { %v842_v45 = vpop.f32.mrb[6].mxu1 }
 0x1ef   : > { %v843_v46 = vadd.f32 %v842_v45, %v756_v40  ;;  %v1826_v47 = vpop.f32.mrb[7].mxu1 }
 0x1f7   : > { %v956_v48 = vpop.f32.mrb[8].mxu0 }
 0x1f8   : > { %v963_v49 = vadd.f32 %v956_v48, %v840_v43  ;;  %v1837_v38 = vpop.f32.mrb[9].mxu0 }
 0x1f9   : > { %v959_v50 = vpop.f32.mrb[10].mxu0 }
 0x1fa   : > { %v964_v51 = vadd.f32 %v959_v50, %v843_v46  ;;  %v1838_v52 = vpop.f32.mrb[11].mxu0 }
 0x1fc   : > { %v1060_v53 = vpop.f32.mrb[8].mxu1 }
 0x1fd   : > { %v1067_v54 = vadd.f32 %v1060_v53, %v963_v49  ;;  %v1849_v55 = vpop.f32.mrb[9].mxu1 }
 0x1fe   : > { %v1063_v56 = vpop.f32.mrb[10].mxu1 }
 0x1ff   : > { %v1068_v57 = vadd.f32 %v1063_v56, %v964_v51  ;;  %v1850_v58 = vpop.f32.mrb[11].mxu1 }
 0x207   : > { %v1145_v59 = vpop.f32.mrb[12].mxu0 }
 0x208   : > { %v1152_v60 = vadd.f32 %v1145_v59, %v1067_v54  ;;  %v1861_v61 = vpop.f32.mrb[13].mxu0 }
 0x209   : > { %v1148_v62 = vpop.f32.mrb[14].mxu0 }
 0x20a   : > { %v1153_v63 = vadd.f32 %v1148_v62, %v1068_v57  ;;  %v1862_v0 = vpop.f32.mrb[15].mxu0 }
 0x20c   : > { %v1248_v1 = vpop.f32.mrb[12].mxu1 }
 0x20d   : > { %v1255_v2 = vadd.f32 %v1248_v1, %v1152_v60  ;;  %v1873_v3 = vpop.f32.mrb[13].mxu1 }
 0x20e   : > { %v1251_v4 = vpop.f32.mrb[14].mxu1 }
 0x20f   : > { %v1256_v5 = vadd.f32 %v1251_v4, %v1153_v63  ;;  %v1874_v6 = vpop.f32.mrb[15].mxu1 }
 0x217   : > { %v1352_v7 = vpop.f32.mrb[16].mxu0 }
 0x218   : > { %v1359_v12 = vadd.f32 %v1352_v7, %v1255_v2  ;;  %v1885_v13 = vpop.f32.mrb[17].mxu0 }
 0x219   : > { %v1355_v8 = vpop.f32.mrb[18].mxu0 }
 0x21a   : > { %v1360_v11 = vadd.f32 %v1355_v8, %v1256_v5  ;;  %v1886_v14 = vpop.f32.mrb[19].mxu0 }
 0x21c   : > { %v1437_v15 = vpop.f32.mrb[16].mxu1 }
 0x21d   : > { %v1444_v16 = vadd.f32 %v1437_v15, %v1359_v12  ;;  %v1897_v17 = vpop.f32.mrb[17].mxu1 }
 0x21e   : > { %v1440_v18 = vpop.f32.mrb[18].mxu1 }
 0x21f   : > { %v1445_v19 = vadd.f32 %v1440_v18, %v1360_v11  ;;  %v1898_v20 = vpop.f32.mrb[19].mxu1 }
 0x227   : > { %v1540_v21 = vpop.f32.mrb[20].mxu0 }
 0x228   : > { %v1547_v23 = vadd.f32 %v1540_v21, %v1444_v16  ;;  %v1909_v24 = vpop.f32.mrb[21].mxu0 }
 0x229   : > { %v1543_v25 = vpop.f32.mrb[22].mxu0 }
 0x22a   : > { %v1556_v26 = vadd.f32 %v1710_v22, %v1547_v23  ;;  %v1548_v27 = vadd.f32 %v1543_v25, %v1445_v19  ;;  %v1910_v28 = vpop.f32.mrb[23].mxu0 }
 0x22c   : > { %1558 = vst.msk [vmem:[%s229_s30] sm:$0xff] %vm603_vm0, %v1556_v26  ;;  %v1557_v29 = vadd.f32 %v1710_v22, %v1548_v27 }
 0x22e   : > { %1559 = vst.msk [vmem:[%s229_s30 + $0x8] sm:$0xff] %vm603_vm0, %v1557_v29 }
 0x22f PF: > { %s15_s18 = sadd.s32 1, %s2002_s18  }
 0x230   : > { %p12_p4 = scmp.ge.s32.totalorder %s15_s18, 4  }
 0x232   :  { %14 = sbr.rel (!%p12_p4) target bundleno = 1 (0x1), region = 70 }

// kernel: detector_backbone_with_fpn_forward.10
= control target key start
LH: loop header
LB: loop body
LE: loop exit
PB: predicated region body
PF: predicated region fallthrough
CT: control target
= control target key end

     0   :  { %s2898_s21 = smov 0   ;;  %s3725_s0 = inlined_call_operand.vmem [shape: bf16[128,256], index: 0, kind: input, shape index: {}]   ;;  %s3726_s1 = inlined_call_operand.vmem [shape: bf16[256,64], index: 1, kind: input, shape index: {}]   ;;  %s3727_s2 = inlined_call_operand.vmem [shape: f32[1,64], index: 2, kind: input, shape index: {}]   ;;  %s3728_s3 = inlined_call_operand.vmem [shape: bf16[576,64], index: 3, kind: input, shape index: {}]   ;;  %s3729_s4 = inlined_call_operand.vmem [shape: f32[1,64], index: 4, kind: input, shape index: {}]   ;;  %s3730_s5 = inlined_call_operand.vmem [shape: f32[128,64], index: 5, kind: input, shape index: {}]   ;;  %s3731_s6 = inlined_call_operand.vmem [shape: f32[128,64], index: 6, kind: output, shape index: {}]  }
   0x1 LB: > { %s2340_s22 = sadd.s32 4294967295, %s2860_s21   ;;  %p2344_p0 = scmp.ge.s32.totalorder %s2860_s21, 1  ;;  %s2860_s21 = sphi %s2898_s21, %s16_s21  }
   0x2   : > { %p225_p1 = scmp.lt.s32.totalorder %s2860_s21, 3 }
   0x4   : > { %p226_p2 = pnand %p2344_p0, %p225_p1 }
   0x5   : > { %v2790_v0 = vld [vmem:[%s3726_s1 + $0x40] sm:$0xff] (!%p226_p2)   ;;  %s2345_s25 = sshll.u32 (!%p226_p2), %s2340_s22, 3  ;;  %v2792_v2 = vld [vmem:[%s3726_s1 + $0x48] sm:$0xff] (!%p226_p2)   ;;  %v2794_v4 = vld [vmem:[%s3726_s1 + $0x50] sm:$0xff] (!%p226_p2)   ;;  %vm547_vm0 = vcmask (!%p226_p2), 523264   ;;  %v2862_v24 = vmov (!%p226_p2), 0   ;;  %v562_v35 = vlaneseq (!%p226_p2) }
   0x6   : > { %229 = sbr.rel (%p226_p2) target bundleno = 602 (0x25a), region = 44  ;;  %v2791_v1 = vld [vmem:[%s3726_s1] sm:$0xff] (!%p226_p2)   ;;  %2461 = vmatprep.subr.bf16.mxu0 (!%p226_p2), %v2790_v0  ;;  %v2793_v3 = vld [vmem:[%s3726_s1 + $0x8] sm:$0xff] (!%p226_p2)   ;;  %p262_p3 = scmp.lt.s32.totalorder (!%p226_p2), %s2345_s25, 15  ;;  %v2795_v5 = vld [vmem:[%s3726_s1 + $0x10] sm:$0xff] (!%p226_p2)   ;;  %549 = vst.msk [vmem:[#allocation2 + $0x8] sm:$0xff] (!%p226_p2), %vm547_vm0, %v2862_v24 }
   0x7   : > { %2462 = vmatpush3.bf16.msra.mxu0 (!%p226_p2), %v2791_v1  ;;  %v2796_v6 = vld [vmem:[%s3726_s1 + $0x58] sm:$0xff] (!%p226_p2)   ;;  %v2798_v8 = vld [vmem:[%s3726_s1 + $0x60] sm:$0xff] (!%p226_p2)   ;;  %v2800_v10 = vld [vmem:[%s3726_s1 + $0x68] sm:$0xff] (!%p226_p2)   ;;  %548 = vst.msk [vmem:[#allocation2] sm:$0xff] (!%p226_p2), %vm547_vm0, %v2862_v24  ;;  %v563_v36 = vshrl.u32 (!%p226_p2), %v562_v35, 7 }
   0x8   : > { %2463 = vmatprep.subr.bf16.mxu0 (!%p226_p2), %v2792_v2  ;;  %v2797_v7 = vld [vmem:[%s3726_s1 + $0x18] sm:$0xff] (!%p226_p2)   ;;  %v2799_v9 = vld [vmem:[%s3726_s1 + $0x20] sm:$0xff] (!%p226_p2)   ;;  %v2801_v12 = vld [vmem:[%s3726_s1 + $0x28] sm:$0xff] (!%p226_p2)   ;;  %550 = vst.msk [vmem:[#allocation2 + $0x10] sm:$0xff] (!%p226_p2), %vm547_vm0, %v2862_v24 }
   0x9   : > { %v2802_v13 = vld [vmem:[%s3726_s1 + $0x70] sm:$0xff] (!%p226_p2)   ;;  %v2804_v15 = vld [vmem:[%s3726_s1 + $0x78] sm:$0xff] (!%p226_p2)   ;;  %551 = vst.msk [vmem:[#allocation2 + $0x18] sm:$0xff] (!%p226_p2), %vm547_vm0, %v2862_v24  ;;  %552 = vst.msk [vmem:[#allocation2 + $0x20] sm:$0xff] (!%p226_p2), %vm547_vm0, %v2862_v24  ;;  %v564_v37 = vadd.s32 (!%p226_p2), 8, %v563_v36  ;;  %v575_v38 = vand.u32 (!%p226_p2), 7, %v563_v36 }
   0xa   : > { %v2803_v14 = vld [vmem:[%s3726_s1 + $0x30] sm:$0xff] (!%p226_p2)   ;;  %v2805_v16 = vld [vmem:[%s3726_s1 + $0x38] sm:$0xff] (!%p226_p2)   ;;  %553 = vst.msk [vmem:[#allocation2 + $0x28] sm:$0xff] (!%p226_p2), %vm547_vm0, %v2862_v24  ;;  %v2818_v25 = vld [vmem:[%s3728_s3 + $0x20] sm:$0xff] (!%p226_p2)   ;;  %v565_v40 = vadd.s32 (!%p226_p2), 16, %v563_v36  ;;  %v3018_v41 = vadd.s32 (!%p226_p2), 24, %v563_v36 }
   0xb   : > { %2464 = vmatpush3.bf16.msra.mxu0 (!%p226_p2), %v2793_v3  ;;  %v2819_v26 = vld [vmem:[%s3728_s3 + $0x28] sm:$0xff] (!%p226_p2)   ;;  %v2820_v27 = vld [vmem:[%s3728_s3 + $0x60] sm:$0xff] (!%p226_p2)   ;;  %v2821_v28 = vld [vmem:[%s3728_s3 + $0x30] sm:$0xff] (!%p226_p2)   ;;  %v582_v39 = vand.u32 (!%p226_p2), 7, %v564_v37  ;;  %vm675_vm1 = vcmp.lt.s32.totalorder (!%p226_p2), %v575_v38, 7  ;;  %vm667_vm3 = vcmp.gt.s32.totalorder (!%p226_p2), %v575_v38, 0 }
   0xc   : > { %2465 = vmatprep.subr.bf16.mxu0 (!%p226_p2), %v2794_v4  ;;  %2621 = vmatprep.subr.bf16.mxu1 (!%p226_p2), %v2820_v27  ;;  %v2822_v29 = vld [vmem:[%s3728_s3 + $0x68] sm:$0xff] (!%p226_p2)   ;;  %v2823_v30 = vld [vmem:[%s3728_s3 + $0x38] sm:$0xff] (!%p226_p2)   ;;  %v2824_v31 = vld [vmem:[%s3728_s3 + $0x70] sm:$0xff] (!%p226_p2)   ;;  %v589_v42 = vand.u32 (!%p226_p2), 7, %v565_v40  ;;  %v3020_v43 = vadd.s32 (!%p226_p2), 32, %v563_v36  ;;  %v596_v46 = vand.u32 (!%p226_p2), 7, %v3018_v41 }
   0xd   : > { %s3757_s25 = smov (!%p262_p3, %s2345_s25), 15  ;;  %2622 = vmatpush3.bf16.msra.mxu1 %v2820_v27  ;;  %v2825_v32 = vld [vmem:[%s3728_s3 + $0x78] sm:$0xff]   ;;  %v3009_v33 = vld [vmem:[%s3728_s3] sm:$0xff]   ;;  %vm676_vm2 = vcmp.lt.s32.totalorder %v582_v39, 7  ;;  %vm1074_vm4 = vmpackc.low %vm675_vm1, %vm675_vm1  ;;  %vm668_vm5 = vcmp.gt.s32.totalorder %v582_v39, 0  ;;  %v3025_v47 = vadd.s32 40, %v563_v36 }
   0xe   : > { %s2930_s16 = sshll.u32 %s3757_s25, 3  ;;  %2623 = vmatprep.subr.bf16.mxu1 %v2822_v29  ;;  %v3015_v34 = vld [vmem:[%s3728_s3 + $0x80] sm:$0xff]   ;;  %vm1075_vm6 = vmpackc.low %vm676_vm2, %vm676_vm2  ;;  %v1082_v44 = vsel %vm1074_vm4, 65537, %v2862_v24  ;;  %vm669_vm9 = vcmp.gt.s32.totalorder %v589_v42, 0  ;;  %v603_v51 = vand.u32 7, %v3020_v43  ;;  %vm670_vm10 = vcmp.gt.s32.totalorder %v596_v46, 0 }
   0xf   : > { %2466 = vmatpush3.bf16.msra.mxu0 %v2795_v5  ;;  %s2939_s22 = scalar_lea.vmem %s3725_s0, %s2930_s16  ;;  %vm704_vm7 = vmpackc.low %vm667_vm3, %vm667_vm3  ;;  %v1083_v45 = vsel %vm1075_vm6, 65537, %v2862_v24  ;;  %v610_v52 = vand.u32 7, %v3025_v47  ;;  %v3055_v0 = vadd.s32 48, %v563_v36  ;;  %v3057_v1 = vadd.s32 56, %v563_v36  ;;  %s3074_s15 = scalar_lea.vmem %s3730_s5, %s2930_s16  ;;  %v683_v39 = vld [vmem:[#allocation2] sm:$0xf8] }
  0x10   : > { %2467 = vmatprep.subr.bf16.mxu0 %v2796_v6  ;;  %v2808_v11 = vld [vmem:[%s2939_s22 + $0x4] ss:$8 sps:$4 sm:$0xff]   ;;  %v2806_v17 = vld [vmem:[%s2939_s22] ss:$8 sps:$4 sm:$0xff]   ;;  %v2809_v18 = vld [vmem:[%s2939_s22 + $0x14] ss:$8 sps:$4 sm:$0xff]   ;;  %v3029_v50 = vcombine.low %v1082_v44, %v1083_v45  ;;  %s278_s30 = scalar_lea.vmem %s3731_s6, %s2930_s16 }
  0x11   : > { %498 = vmatprep.mubr.bf16.mxu0 %v2808_v11  ;;  %v2811_v19 = vld [vmem:[%s2939_s22 + $0x10] ss:$8 sps:$4 sm:$0xff]   ;;  %v2812_v20 = vld [vmem:[%s2939_s22 + $0x24] ss:$8 sps:$4 sm:$0xff]   ;;  %v2814_v21 = vld [vmem:[%s2939_s22 + $0x20] ss:$8 sps:$4 sm:$0xff]   ;;  %2624 = vmatpush3.bf16.msra.mxu1 %v2822_v29 }
  0x12   : > { %v2815_v22 = vld [vmem:[%s2939_s22 + $0x34] ss:$8 sps:$4 sm:$0xff]   ;;  %v2817_v23 = vld [vmem:[%s2939_s22 + $0x30] ss:$8 sps:$4 sm:$0xff]   ;;  %2625 = vmatprep.subr.bf16.mxu1 %v2824_v31  ;;  %vm705_vm8 = vmpackc.low %vm668_vm5, %vm668_vm5  ;;  %v712_v48 = vsel %vm704_vm7, 65537, %v2862_v24  ;;  %v1103_v54 = vshrl.u32 %v3029_v50, 16 }
  0x13   : > { %2468 = vmatpush3.bf16.msra.mxu0 %v2797_v7  ;;  %v713_v49 = vsel %vm705_vm8, 65537, %v2862_v24  ;;  %vm706_vm11 = vmpackc.low %vm669_vm9, %vm669_vm9  ;;  %v1106_v55 = vshll.u32 %v3029_v50, 16  ;;  %vm3035_vm13 = vcmp.gt.s32.totalorder %v603_v51, 0  ;;  %vm3039_vm14 = vcmp.gt.s32.totalorder %v610_v52, 0  ;;  %v3067_v11 = vld [vmem:[%s3727_s2] ss:$0 sm:$0xff] }
  0x14   : > { %2469 = vmatprep.subr.bf16.mxu0 %v2798_v8  ;;  %v2377_v53 = vcombine.low %v712_v48, %v713_v49  ;;  %vm707_vm12 = vmpackc.low %vm670_vm10, %vm670_vm10  ;;  %v714_v60 = vsel %vm706_vm11, 65537, %v2862_v24  ;;  %v1105_v62 = vrot.slane %v1103_v54, 3  ;;  %vm3080_vm3 = vcmp.lt.s32.totalorder %v589_v42, 7  ;;  %v2829_v50 = vld [vmem:[%s3728_s3 + $0x10] sm:$0xff]  }
  0x15   : > { %2626 = vmatpush3.bf16.msra.mxu1 %v2824_v31  ;;  %v715_v61 = vsel %vm707_vm12, 65537, %v2862_v24  ;;  %vm708_vm15 = vmpackc.low %vm3035_vm13, %vm3035_vm13  ;;  %v1108_v63 = vrot.slane %v1106_v55, 4  ;;  %vm1310_vm4 = vsmask.f32 7424  ;;  %v3094_v31 = vld [vmem:[#allocation2] sm:$0xf0] }
  0x16   : > { %2627 = vmatprep.subr.bf16.mxu1 %v2825_v32  ;;  %v734_v58 = vshrl.u32 %v2377_v53, 16  ;;  %v737_v59 = vshll.u32 %v2377_v53, 16  ;;  %vm709_vm1 = vmpackc.low %vm3039_vm14, %vm3039_vm14  ;;  %v2378_v2 = vcombine.low %v714_v60, %v715_v61  ;;  %v716_v5 = vsel %vm708_vm15, 65537, %v2862_v24 }
  0x17   : > { %2470 = vmatpush3.bf16.msra.mxu0 %v2799_v9  ;;  %v717_v6 = vsel %vm709_vm1, 65537, %v2862_v24  ;;  %v3061_v7 = vor.u32 %v1108_v63, %v1105_v62  ;;  %v617_v9 = vand.u32 7, %v3055_v0  ;;  %vm3103_vm8 = vcmp.lt.s32.totalorder %v596_v46, 7  ;;  %vm1076_vm9 = vmpackc.low %vm3080_vm3, %vm3080_vm3 }
  0x18   : > { %2471 = vmatprep.subr.bf16.mxu0 %v2800_v10  ;;  %v736_v3 = vrot.slane %v734_v58, 4  ;;  %v739_v4 = vrot.slane %v737_v59, 5  ;;  %v1311_v8 = vrot.slane %v737_v59, 1  ;;  %vm3114_vm11 = vcmp.lt.s32.totalorder %v603_v51, 7  ;;  %vm1077_vm15 = vmpackc.low %vm3103_vm8, %vm3103_vm8 }
  0x19   : > { %2628 = vmatpush3.bf16.msra.mxu1 %v2825_v32  ;;  %vm1137_vm5 = vcmp.ne.s16.totalorder %v3061_v7, 0  ;;  %vm3087_vm6 = vcmp.gt.s32.totalorder %v617_v9, 0  ;;  %vm3118_vm12 = vcmp.lt.s32.totalorder %v610_v52, 7  ;;  %v801_v44 = vrot.slane %v3094_v31, 4  ;;  %vm1078_vm1 = vmpackc.low %vm3114_vm11, %vm3114_vm11 }
  0x1a   : > { %2637 = vmatprep.subr.bf16.mxu1 %v3015_v34  ;;  %vm1322_vm2 = vcmp.ne.s16.totalorder %v1311_v8, 0  ;;  %vm710_vm13 = vmpackc.low %vm3087_vm6, %vm3087_vm6  ;;  %v3129_v45 = vsel %vm1137_vm5, %v3094_v31, 0  ;;  %vm732_vm3 = vsmask.f32 3328  ;;  %vm1340_vm8 = vsmask.f32 256 }
  0x1b   : > { %2472 = vmatpush3.bf16.msra.mxu0 %v2801_v12  ;;  %v624_v12 = vand.u32 7, %v3057_v1  ;;  %v1156_v43 = vshrl.u32 %v3129_v45, 16 }
  0x1c   : > { %2473 = vmatprep.subr.bf16.mxu0 %v2802_v13 }
  0x1d   : > { %vm3099_vm7 = vcmp.gt.s32.totalorder %v624_v12, 0 }
  0x1e   : > { %vm711_vm14 = vmpackc.low %vm3099_vm7, %vm3099_vm7  ;;  %vm3209_vm7 = vcmp.lt.s32.totalorder %v617_v9, 7 }
  0x1f   : > { %2474 = vmatpush3.bf16.msra.mxu0 %v2803_v14  ;;  %v745_v14 = vshll.u32 %v2378_v2, 16 }
  0x20   : > { %2475 = vmatprep.subr.bf16.mxu0 %v2804_v15  ;;  %v1308_v15 = vld [vmem:[#allocation2] sm:$0x80] }
  0x21   : > { %v1327_v32 = vsel %vm1322_vm2, %v1308_v15, 0  ;;  %v747_v41 = vrot.slane %v745_v14, 5  ;;  %vm1079_vm2 = vmpackc.low %vm3118_vm12, %vm3118_vm12  ;;  %v1086_v15 = vsel %vm1078_vm1, 65537, %v2862_v24 }
  0x22   : > { %v1342_v47 = vshrl.u32 %v1327_v32, 16  ;;  %vm1080_vm12 = vmpackc.low %vm3209_vm7, %vm3209_vm7 }
  0x23   : > { %2476 = vmatpush3.bf16.msra.mxu0 %v2805_v16  ;;  %v3076_v16 = vcombine.low %v716_v5, %v717_v6 }
  0x24   : > { %2573 = vmatprep.subr.bf16.mxu0 %v2818_v25 }
  0x25   : > { %v754_v37 = vshll.u32 %v3076_v16, 16  ;;  %v751_v38 = vshrl.u32 %v3076_v16, 16 }
  0x26   : > { %499 = vmatmul.mubr.bf16.vlgmr.msra.gmra.mrb[0].mxu0 %v2806_v17  ;;  %v3078_v17 = vor.u32 %v739_v4, %v736_v3  ;;  %v719_v3 = vsel %vm711_vm14, 65537, %v2862_v24 }
  0x27   : > { %506 = vmatprep.mubr.bf16.mxu0 %v2809_v18  ;;  %2574 = vmatpush3.bf16.msra.mxu0 %v2818_v25  ;;  %v1313_v25 = vrot.slane %v745_v14, 1  ;;  %v1316_v59 = vrot.slane %v754_v37, 1  ;;  %v753_v60 = vrot.slane %v751_v38, 4 }
  0x28   : > { %2575 = vmatprep.subr.bf16.mxu0 %v2819_v26  ;;  %vm3732_vm10 = vcmp.ne.s16.totalorder %v3078_v17, 0 }
  0x29   : > { %v773_v53 = vsel %vm3732_vm10, %v683_v39, 0  ;;  %vm800_vm10 = vcmask 1043456  }
  0x2a   : > { %v913_v5 = vshrl.u32 %v773_v53, 16  ;;  %v916_v6 = vshll.u32 %v773_v53, 16 }
  0x2b   : > { %2576 = vmatpush3.bf16.msra.mxu0 %v2819_v26 }
  0x2c   : > { %2577 = vmatprep.subr.bf16.mxu0 %v2821_v28 }
  0x2e   : > { %507 = vmatmul.mubr.bf16.gmra.mrb[4].mxu0 %v2811_v19 }
  0x2f   : > { %514 = vmatprep.mubr.bf16.mxu0 %v2812_v20  ;;  %2578 = vmatpush3.bf16.msra.mxu0 %v2821_v28  ;;  %v531_v28 = vld [vmem:[%s3074_s15] sm:$0xff]  ;;  %v534_v20 = vld [vmem:[%s3074_s15 + $0x18] sm:$0xff] }
  0x30   : > { %2579 = vmatprep.subr.bf16.mxu0 %v2823_v30 }
  0x33   : > { %2580 = vmatpush3.bf16.msra.mxu0 %v2823_v30  ;;  %v532_v30 = vld [vmem:[%s3074_s15 + $0x8] sm:$0xff] }
  0x34   : > { %2589 = vmatprep.subr.bf16.mxu0 %v3009_v33 }
  0x36   : > { %515 = vmatmul.mubr.bf16.gmra.mrb[8].mxu0 %v2814_v21  ;;  %v742_v21 = vshrl.u32 %v2378_v2, 16  ;;  %v718_v2 = vsel %vm710_vm13, 65537, %v2862_v24 }
  0x37   : > { %522 = vmatprep.mubr.bf16.mxu0 %v2815_v22 }
  0x38   : > { %v744_v52 = vrot.slane %v742_v21, 4  ;;  %v1315_v57 = vor.u32 %v1313_v25, %v742_v21  ;;  %v1087_v21 = vsel %vm1079_vm2, 65537, %v2862_v24 }
  0x3a   : > { %v3197_v26 = vsel %vm1310_vm4, %v1315_v57, %v1316_v59 }
  0x3b   : > { %vm1324_vm11 = vcmp.ne.s16.totalorder %v3197_v26, 0 }
  0x3e   : > { %523 = vmatmul.mubr.bf16.gmra.mrb[12].mxu0 %v2817_v23  ;;  %v1312_v23 = vor.u32 %v1311_v8, %v734_v58  ;;  %v756_v58 = vrot.slane %v754_v37, 5  ;;  %v1084_v8 = vsel %vm1076_vm9, 65537, %v2862_v24  ;;  %vm3219_vm9 = vcmp.lt.s32.totalorder %v624_v12, 7 }
  0x3f   : > { %v1318_v12 = vor.u32 %v1316_v59, %v751_v38  ;;  %v1159_v38 = vshll.u32 %v3129_v45, 16  ;;  %vm1081_vm14 = vmpackc.low %vm3219_vm9, %vm3219_vm9 }
  0x40   : > { %v3132_v46 = vsel %vm1310_vm4, %v1312_v23, %v1313_v25  ;;  %v3192_v23 = vor.u32 %v756_v58, %v753_v60 }
  0x41   : > { %vm1323_vm6 = vcmp.ne.s16.totalorder %v3132_v46, 0  ;;  %v1088_v46 = vsel %vm1080_vm12, 65537, %v2862_v24 }
  0xf9   : > { %v2477_v10 = vpop.f32.mrb[0].mxu0 }
  0xfa   : > { %v2478_v13 = vpop.f32.mrb[1].mxu0 }
  0xfb   : > { %v2479_v18 = vadd.f32 %v2478_v13, %v2477_v10  ;;  %v2480_v19 = vpop.f32.mrb[2].mxu0  ;;  %v1085_v10 = vsel %vm1077_vm15, 65537, %v2862_v24  ;;  %vm911_vm15 = vsmask.f32 4352 }
  0xfc   : > { %v2481_v22 = vpop.f32.mrb[3].mxu0 }
  0xfd   : > { %v501_v27 = vadd.f32 %v2479_v18, %v3067_v11  ;;  %v2482_v29 = vadd.f32 %v2481_v22, %v2480_v19  ;;  %v748_v18 = vor.u32 %v747_v41, %v744_v52  ;;  %v533_v19 = vld [vmem:[%s3074_s15 + $0x10] sm:$0xff]  ;;  %v3190_v22 = vcombine.low %v718_v2, %v719_v3 }
  0xfe   : > { %v3259_v3 = vcombine.low %v1086_v15, %v1087_v21 }
  0xff   : > { %v504_v40 = vadd.f32 %v2482_v29, %v3067_v11  ;;  %v539_v48 = vadd.f32 %v531_v28, %v501_v27  ;;  %v3199_v27 = vcombine.low %v1084_v8, %v1085_v10  ;;  %v3201_v28 = vrot.slane %v1342_v47, 7 }
 0x100   : > { %v3203_v29 = vrot.slane %v913_v5, 3  ;;  %v3215_v39 = vsel %vm732_vm3, %v3078_v17, %v748_v18  ;;  %v763_v0 = vshll.u32 %v3190_v22, 16  ;;  %v760_v9 = vshrl.u32 %v3190_v22, 16 }
 0x101   : > { %v540_v49 = vadd.f32 %v532_v30, %v504_v40  ;;  %v2483_v51 = vpop.f32.mrb[4].mxu0  ;;  %v3205_v30 = vrot.slane %v916_v6, 4  ;;  %v3228_v42 = vsel %vm732_vm3, %v748_v18, %v3192_v23  ;;  %vm769_vm13 = vcmp.ne.s16.totalorder %v3215_v39, 0 }
 0x102   : > { %v2484_v56 = vpop.f32.mrb[5].mxu0  ;;  %v3239_v53 = vrot.slane %v763_v0, 1  ;;  %v1114_v16 = vshll.u32 %v3199_v27, 16  ;;  %v762_v45 = vrot.slane %v760_v9, 4  ;;  %v765_v2 = vrot.slane %v763_v0, 5 }
 0x103   : > { %v554_v61 = vpack.c.bf16 %v540_v49, %v539_v48  ;;  %v2485_v62 = vadd.f32 %v2484_v56, %v2483_v51  ;;  %v2486_v63 = vpop.f32.mrb[6].mxu0  ;;  %v1111_v49 = vshrl.u32 %v3199_v27, 16  ;;  %v919_v56 = vor.u32 %v3205_v30, %v3203_v29  ;;  %v3470_v29 = vld [vmem:[%s3728_s3 + $0xa0] sm:$0xff]  }
 0x104   : > { %v2487_v4 = vpop.f32.mrb[7].mxu0  ;;  %v1089_v6 = vsel %vm1081_vm14, 65537, %v2862_v24  ;;  %v1116_v10 = vrot.slane %v1114_v16, 4  ;;  %v3282_v18 = vrot.slane %v1156_v43, 4  ;;  %v1120_v24 = vshrl.u32 %v3259_v3, 16 }
 0x105   : > { %558 = vst.msk [vmem:[#allocation2 + $0x8] sm:$0xff] %vm547_vm0, %v554_v61  ;;  %v509_v13 = vadd.f32 %v2485_v62, %v3067_v11  ;;  %v2488_v14 = vadd.f32 %v2487_v4, %v2486_v63  ;;  %v535_v61 = vld [vmem:[%s3074_s15 + $0x20] sm:$0xff]  ;;  %v536_v62 = vld [vmem:[%s3074_s15 + $0x28] sm:$0xff]  ;;  %v3289_v32 = vcombine.low %v1088_v46, %v1089_v6  ;;  %v1608_v40 = vrot.slane %v1103_v54, 7 }
 0x106   : > { %vm770_vm1 = vcmp.ne.s16.totalorder %v3228_v42, 0 }
 0x107   : > { %v512_v25 = vadd.f32 %v2488_v14, %v3067_v11  ;;  %v541_v35 = vadd.f32 %v533_v19, %v509_v13  ;;  %v3284_v19 = vrot.slane %v1159_v38, 5  ;;  %v537_v38 = vld [vmem:[%s3074_s15 + $0x30] sm:$0xff] }
 0x109   : > { %v542_v36 = vadd.f32 %v534_v20, %v512_v25  ;;  %v2489_v37 = vpop.f32.mrb[8].mxu0  ;;  %v1123_v25 = vshll.u32 %v3259_v3, 16 }
 0x10a   : > { %v2490_v41 = vpop.f32.mrb[9].mxu0 }
 0x10b   : > { %v555_v47 = vpack.c.bf16 %v542_v36, %v541_v35  ;;  %v2491_v48 = vadd.f32 %v2490_v41, %v2489_v37  ;;  %v2492_v1 = vpop.f32.mrb[10].mxu0  ;;  %v3293_v41 = vrot.slane %v1111_v49, 7 }
 0x10c   : > { %v2493_v51 = vpop.f32.mrb[11].mxu0  ;;  %v3237_v52 = vld [vmem:[#allocation2 + $0x8] sm:$0xff] }
 0x10d   : > { %559 = vst.msk [vmem:[#allocation2 + $0x10] sm:$0xff] %vm547_vm0, %v555_v47  ;;  %v517_v57 = vadd.f32 %v2491_v48, %v3067_v11  ;;  %v2494_v58 = vadd.f32 %v2493_v51, %v2492_v1  ;;  %v802_v59 = vrot.slane %v3237_v52, 4  ;;  %v1328_v60 = vsel %vm1323_vm6, %v3237_v52, 0 }
 0x10e   : > { %v1346_v63 = vshrl.u32 %v1328_v60, 16  ;;  %v1349_v31 = vshll.u32 %v1328_v60, 16  ;;  %v1320_v48 = vsel %vm1310_vm4, %v1318_v12, %v3239_v53  ;;  %v3301_v1 = vor.u32 %v765_v2, %v762_v45  ;;  %v538_v12 = vld [vmem:[%s3074_s15 + $0x38] sm:$0xff]  ;;  %v2827_v60 = vld [vmem:[%s3728_s3 + $0x8] sm:$0xff]  }
 0x10f   : > { %v520_v4 = vadd.f32 %v2494_v58, %v3067_v11  ;;  %v803_v5 = vsel %vm800_vm10, %v801_v44, %v802_v59  ;;  %v1113_v44 = vrot.slane %v1111_v49, 3  ;;  %v543_v13 = vadd.f32 %v535_v61, %v517_v57 }
 0x110   : > { %2581 = vmatprep.mubr.msk.bf16.mxu0 %vm547_vm0, %v803_v5  ;;  %v3278_v8 = vrot.slane %v1346_v63, 7  ;;  %v1122_v61 = vrot.slane %v1120_v24, 3  ;;  %v1129_v63 = vshrl.u32 %v3289_v32, 16  ;;  %v774_v2 = vsel %vm769_vm13, %v3237_v52, 0 }
 0x111   : > { %v544_v14 = vadd.f32 %v536_v62, %v520_v4  ;;  %v2495_v15 = vpop.f32.mrb[12].mxu0  ;;  %v3303_v51 = vor.u32 %v1116_v10, %v1113_v44  ;;  %v1125_v62 = vrot.slane %v1123_v25, 4  ;;  %v1132_v4 = vshll.u32 %v3289_v32, 16 }
 0x112   : > { %v2496_v20 = vpop.f32.mrb[13].mxu0  ;;  %v1351_v21 = vor.u32 %v1349_v31, %v3278_v8  ;;  %v3338_v6 = vsel %vm732_vm3, %v3192_v23, %v3301_v1  ;;  %v1611_v10 = vor.u32 %v3293_v41, %v1114_v16  ;;  %vm1325_vm2 = vcmp.ne.s16.totalorder %v1320_v48, 0 }
 0x113   : > { %v556_v35 = vpack.c.bf16 %v544_v14, %v543_v13  ;;  %v2497_v36 = vadd.f32 %v2496_v20, %v2495_v15  ;;  %v2498_v37 = vpop.f32.mrb[14].mxu0  ;;  %v3348_v44 = vsel %vm911_vm15, %v3061_v7, %v3303_v51  ;;  %v924_v13 = vshll.u32 %v774_v2, 16  ;;  %v2830_v14 = vld [vmem:[%s3728_s3 + $0x88] sm:$0xff]  }
 0x114   : > { %v2499_v0 = vpop.f32.mrb[15].mxu0  ;;  %v1352_v43 = vsel %vm1340_vm8, %v3201_v28, %v1351_v21  ;;  %v3297_v47 = vld [vmem:[#allocation2 + $0x10] sm:$0xff]  ;;  %v3360_v15 = vor.u32 %v1125_v62, %v1122_v61  ;;  %v1131_v27 = vrot.slane %v1129_v63, 3  ;;  %v1134_v16 = vrot.slane %v1132_v4, 4  ;;  %v3431_v61 = vld [vmem:[%s3728_s3 + $0x40] sm:$0xff]  }
 0x115   : > { %560 = vst.msk [vmem:[#allocation2 + $0x18] sm:$0xff] %vm547_vm0, %v556_v35  ;;  %v525_v54 = vadd.f32 %v2497_v36, %v3067_v11  ;;  %v2500_v49 = vadd.f32 %v2499_v0, %v2498_v37  ;;  %2629 = vmatprep.mubr.msk.bf16.mxu1 %vm547_vm0, %v1352_v43  ;;  %v3310_v57 = vrot.slane %v3297_v47, 4  ;;  %v1329_v28 = vsel %vm1324_vm11, %v3297_v47, 0 }
 0x116   : > { %v1354_v58 = vshrl.u32 %v1329_v28, 16  ;;  %v1357_v46 = vshll.u32 %v1329_v28, 16  ;;  %vm3733_vm6 = vcmp.ne.s16.totalorder %v3338_v6, 0  ;;  %vm1138_vm7 = vcmp.ne.s16.totalorder %v3348_v44, 0 }
 0x117   : > { %v528_v45 = vadd.f32 %v2500_v49, %v3067_v11  ;;  %v805_v26 = vsel %vm800_vm10, %v802_v59, %v3310_v57  ;;  %v3342_v11 = vor.u32 %v1608_v40, %v1106_v55  ;;  %v545_v59 = vadd.f32 %v537_v38, %v525_v54  ;;  %v2831_v38 = vld [vmem:[%s3728_s3 + $0x18] sm:$0xff]  }
 0x118   : > { %2582 = vmatmul.mubr.msk.bf16.vlgmr.msra.gmra.mrb[16].mxu0 %vm547_vm0, %v805_v26  ;;  %v3333_v5 = vrot.slane %v1354_v58, 7  ;;  %v921_v55 = vshrl.u32 %v774_v2, 16  ;;  %v3382_v37 = vsel %vm1340_vm8, %v1608_v40, %v1611_v10  ;;  %v926_v54 = vrot.slane %v924_v13, 4 }
 0x119   : > { %v546_v31 = vadd.f32 %v538_v12, %v528_v45  ;;  %2590 = vmatpush3.bf16.msra.mxu0 %v3009_v33  ;;  %vm1619_vm9 = vcmp.ne.s16.totalorder %v3342_v11, 0  ;;  %v3390_v48 = vrot.slane %v1120_v24, 7  ;;  %v3408_v24 = vor.u32 %v1134_v16, %v1131_v27  ;;  %v2082_v45 = vld [vmem:[#allocation2 + $0x28] sm:$0x1f] }
 0x11a   : > { %v1359_v23 = vor.u32 %v1357_v46, %v3333_v5  ;;  %2591 = vmatprep.subr.bf16.mxu0 %v2827_v60  ;;  %v923_v43 = vrot.slane %v921_v55, 3  ;;  %v775_v28 = vsel %vm770_vm1, %v3297_v47, 0  ;;  %vm1620_vm11 = vcmp.ne.s16.totalorder %v3382_v37, 0  ;;  %v2834_v46 = vld [vmem:[%s3728_s3 + $0x98] sm:$0xff]   ;;  %v2835_v37 = vld [vmem:[%s3728_s3 + $0x48] sm:$0xff]  }
 0x11b   : > { %v557_v33 = vpack.c.bf16 %v546_v31, %v545_v59  ;;  %v3418_v12 = vrot.slane %v1129_v63, 7  ;;  %vm772_vm12 = vcmp.ne.s16.totalorder %v3301_v1, 0  ;;  %v930_v26 = vshrl.u32 %v775_v28, 16 }
 0x11c   : > { %v1360_v20 = vsel %vm1340_vm8, %v3278_v8, %v1359_v23  ;;  %v3366_v21 = vld [vmem:[#allocation2 + $0x18] sm:$0xff]  ;;  %v1321_v8 = vor.u32 %v3239_v53, %v760_v9  ;;  %v1143_v9 = vsel %vm1138_vm7, %v3237_v52, 0  ;;  %v3406_v53 = vsel %vm911_vm15, %v3303_v51, %v3360_v15 }
 0x11d   : > { %561 = vst.msk [vmem:[#allocation2 + $0x20] sm:$0xff] %vm547_vm0, %v557_v33  ;;  %2630 = vmatmul.mubr.msk.bf16.vlgmr.msra.gmra.mrb[0].mxu1 %vm547_vm0, %v1360_v20  ;;  %v3374_v35 = vrot.slane %v3366_v21, 4  ;;  %2592 = vmatpush3.bf16.msra.mxu0 %v2827_v60  ;;  %v1330_v36 = vsel %vm1325_vm2, %v3366_v21, 0  ;;  %v776_v51 = vsel %vm3733_vm6, %v3366_v21, 0  ;;  %vm1141_vm2 = vcmp.ne.s16.totalorder %v3408_v24, 0 }
 0x11e   : > { %v1362_v0 = vshrl.u32 %v1330_v36, 16  ;;  %2638 = vmatpush3.bf16.msra.mxu1 %v3015_v34  ;;  %2593 = vmatprep.subr.bf16.mxu0 %v2829_v50  ;;  %v2832_v34 = vld [vmem:[%s3728_s3 + $0x90] sm:$0xff]   ;;  %v1365_v49 = vshll.u32 %v1330_v36, 16  ;;  %vm1326_vm14 = vcmp.ne.s16.totalorder %v1321_v8, 0  ;;  %v3426_v60 = vor.u32 %v926_v54, %v923_v43 }
 0x11f   : > { %v3395_v22 = vsel %vm800_vm10, %v3310_v57, %v3374_v35  ;;  %2639 = vmatprep.subr.bf16.mxu1 %v2830_v14  ;;  %v1164_v62 = vshrl.u32 %v1143_v9, 16  ;;  %v1167_v63 = vshll.u32 %v1143_v9, 16  ;;  %v933_v2 = vshll.u32 %v775_v28, 16 }
 0x120   : > { %2585 = vmatprep.mubr.msk.bf16.mxu0 %vm547_vm0, %v3395_v22  ;;  %v3412_v40 = vrot.slane %v1362_v0, 7  ;;  %vm1139_vm6 = vcmp.ne.s16.totalorder %v3406_v53, 0  ;;  %v1614_v59 = vor.u32 %v3390_v48, %v1123_v25  ;;  %v942_v55 = vshll.u32 %v776_v51, 16 }
 0x121   : > { %2594 = vmatpush3.bf16.msra.mxu0 %v2829_v50  ;;  %v939_v50 = vshrl.u32 %v776_v51, 16  ;;  %v1617_v13 = vor.u32 %v3418_v12, %v1132_v4  ;;  %v3453_v25 = vsel %vm1619_vm9, %v3237_v52, 0  ;;  %v928_v32 = vsel %vm911_vm15, %v919_v56, %v3426_v60 }
 0x122   : > { %v1367_v58 = vor.u32 %v1365_v49, %v3412_v40  ;;  %2640 = vmatpush3.bf16.msra.mxu1 %v2830_v14  ;;  %2595 = vmatprep.subr.bf16.mxu0 %v2831_v38  ;;  %v1166_v14 = vrot.slane %v1164_v62, 4  ;;  %v1169_v27 = vrot.slane %v1167_v63, 5  ;;  %v932_v20 = vrot.slane %v930_v26, 3 }
 0x123   : > { %2641 = vmatprep.subr.bf16.mxu1 %v2832_v34  ;;  %v935_v36 = vrot.slane %v933_v2, 4  ;;  %v941_v8 = vrot.slane %v939_v50, 3  ;;  %v944_v0 = vrot.slane %v942_v55, 4  ;;  %v1162_v43 = vor.u32 %v3284_v19, %v3282_v18 }
 0x124   : > { %v1368_v31 = vsel %vm1340_vm8, %v3333_v5, %v1367_v58  ;;  %v687_v10 = vld [vmem:[#allocation2 + $0x20] sm:$0xf]  ;;  %v2087_v5 = vsel %vm1141_vm2, %v2082_v45, 0  ;;  %v1640_v54 = vshll.u32 %v3453_v25, 16  ;;  %v1144_v51 = vsel %vm1139_vm6, %v3297_v47, 0 }
 0x125   : > { %v3442_v23 = vld [vmem:[#allocation2 + $0x20] sm:$0xff]  ;;  %2633 = vmatprep.mubr.msk.bf16.mxu1 %vm547_vm0, %v1368_v31  ;;  %v808_v33 = vrot.slane %v687_v10, 4  ;;  %2596 = vmatpush3.bf16.msra.mxu0 %v2831_v38  ;;  %v777_v11 = vsel %vm772_vm12, %v687_v10, 0  ;;  %v3480_v38 = vsel %vm911_vm15, %v3360_v15, %v3408_v24  ;;  %v936_v58 = vor.u32 %v935_v36, %v932_v20  ;;  %v1950_v31 = vld [vmem:[#allocation2 + $0x8] sm:$0xf0] }
 0x126   : > { %v1331_v3 = vsel %vm1326_vm14, %v3442_v23, 0  ;;  %2642 = vmatpush3.bf16.msra.mxu1 %v2832_v34  ;;  %2605 = vmatprep.subr.bf16.mxu0 %v3431_v61  ;;  %v1615_v34 = vsel %vm1340_vm8, %v3293_v41, %v1614_v59  ;;  %v948_v49 = vshrl.u32 %v777_v11, 16  ;;  %v951_v28 = vshll.u32 %v777_v11, 16  ;;  %v1057_v36 = vld [vmem:[#allocation2 + $0x20] sm:$0x1f] }
 0x127   : > { %v1370_v4 = vshrl.u32 %v1331_v3, 16  ;;  %v809_v16 = vsel %vm800_vm10, %v3374_v35, %v808_v33  ;;  %2643 = vmatprep.subr.bf16.mxu1 %v2834_v46  ;;  %v1373_v56 = vshll.u32 %v1331_v3, 16  ;;  %v3491_v18 = vsel %vm1620_vm11, %v3297_v47, 0 }
 0x128   : > { %2586 = vmatmul.mubr.msk.bf16.gmra.mrb[20].mxu0 %vm547_vm0, %v809_v16  ;;  %v2132_v19 = vshrl.u32 %v2087_v5, 16  ;;  %v2135_v15 = vshll.u32 %v2087_v5, 16  ;;  %v945_v62 = vor.u32 %v944_v0, %v941_v8  ;;  %v3495_v63 = vor.u32 %v1169_v27, %v1166_v14 }
 0x129   : > { %v1372_v30 = vrot.slane %v1370_v4, 7  ;;  %2597 = vmatprep.mubr.msk.bf16.mxu0 %vm547_vm0, %v928_v32  ;;  %v3499_v45 = vsel %vm1340_vm8, %v3390_v48, %v1617_v13  ;;  %v1173_v26 = vshrl.u32 %v1144_v51, 16  ;;  %v1176_v2 = vshll.u32 %v1144_v51, 16 }
 0x12a   : > { %2644 = vmatpush3.bf16.msra.mxu1 %v2834_v46  ;;  %vm1140_vm9 = vcmp.ne.s16.totalorder %v3480_v38, 0  ;;  %vm1621_vm11 = vcmp.ne.s16.totalorder %v1615_v34, 0  ;;  %v953_v46 = vrot.slane %v951_v28, 4  ;;  %v1642_v59 = vrot.slane %v1640_v54, 1 }
 0x12b   : > { %v1375_v9 = vor.u32 %v1373_v56, %v1372_v30  ;;  %2653 = vmatprep.subr.bf16.mxu1 %v3470_v29  ;;  %v1645_v48 = vshll.u32 %v3491_v18, 16  ;;  %v937_v10 = vsel %vm911_vm15, %v3426_v60, %v936_v58  ;;  %v3512_v50 = vrot.slane %v2132_v19, 4 }
 0x12c   : > { %v3514_v55 = vrot.slane %v2135_v15, 5  ;;  %v946_v13 = vsel %vm911_vm15, %v936_v58, %v945_v62  ;;  %v1638_v33 = vshrl.u32 %v3453_v25, 16  ;;  %v1145_v3 = vsel %vm1140_vm9, %v3366_v21, 0  ;;  %v2837_v25 = vld [vmem:[%s3728_s3 + $0x50] sm:$0xff]  }
 0x12d   : > { %v1376_v41 = vsel %vm1340_vm8, %v3412_v40, %v1375_v9  ;;  %v950_v40 = vrot.slane %v948_v49, 3  ;;  %vm1622_vm8 = vcmp.ne.s16.totalorder %v3499_v45, 0  ;;  %v1175_v60 = vrot.slane %v1173_v26, 4 }
 0x12e   : > { %2634 = vmatmul.mubr.msk.bf16.gmra.mrb[4].mxu1 %vm547_vm0, %v1376_v41  ;;  %v1178_v5 = vrot.slane %v1176_v2, 5  ;;  %v1964_v32 = vrot.slane %v1950_v31, 4  ;;  %v2083_v4 = vsel %vm1137_vm5, %v1950_v31, 0  ;;  %v3531_v27 = vor.u32 %v1642_v59, %v1638_v33 }
 0x12f   : > { %2645 = vmatprep.mubr.msk.bf16.mxu1 %vm547_vm0, %v3237_v52  ;;  %v1171_v52 = vsel %vm732_vm3, %v1162_v43, %v3495_v63  ;;  %v954_v14 = vor.u32 %v953_v46, %v950_v40  ;;  %v3533_v11 = vrot.slane %v1645_v48, 1  ;;  %v1969_v16 = vrot.slane %v3442_v23, 4 }
 0x130   : > { %2598 = vmatmul.mubr.msk.bf16.vlgmr.msra.gmra.mrb[16].mxu0 %vm547_vm0, %v937_v10  ;;  %v1182_v20 = vshrl.u32 %v1145_v3, 16  ;;  %vm1623_vm5 = vcmp.ne.s16.totalorder %v3418_v12, 0  ;;  %v3542_v7 = vsel %vm800_vm10, %v1964_v32, %v3310_v57  ;;  %v2084_v30 = vsel %vm1138_vm7, %v3297_v47, 0 }
 0x131   : > { %2601 = vmatprep.mubr.msk.bf16.mxu0 %vm547_vm0, %v946_v13  ;;  %2606 = vmatpush3.bf16.msra.mxu0 %v3431_v61  ;;  %v2838_v61 = vld [vmem:[%s3728_s3 + $0xa8] sm:$0xff]   ;;  %v2097_v56 = vshrl.u32 %v2083_v4, 16  ;;  %v1185_v8 = vshll.u32 %v1145_v3, 16  ;;  %v3549_v0 = vsel %vm1621_vm11, %v3366_v21, 0  ;;  %v3555_v43 = vsel %vm800_vm10, %v3374_v35, %v1969_v16  ;;  %v2839_v35 = vld [vmem:[%s3728_s3 + $0x58] sm:$0xff]  }
 0x132   : > { %2607 = vmatprep.subr.bf16.mxu0 %v2835_v37  ;;  %v2100_v54 = vshll.u32 %v2083_v4, 16  ;;  %v3559_v57 = vor.u32 %v1178_v5, %v1175_v60  ;;  %v2105_v9 = vshrl.u32 %v2084_v30, 16  ;;  %v2108_v49 = vshll.u32 %v2084_v30, 16  ;;  %v1607_v13 = vld [vmem:[#allocation2 + $0x28] sm:$0x1] }
 0x133   : > { %v2099_v44 = vrot.slane %v2097_v56, 4  ;;  %v955_v34 = vsel %vm911_vm15, %v945_v62, %v954_v14  ;;  %v1146_v28 = vsel %vm1141_vm2, %v1057_v36, 0  ;;  %v2085_v58 = vsel %vm1139_vm6, %v3366_v21, 0  ;;  %v1782_v3 = vld [vmem:[#allocation2 + $0x8] sm:$0xf8]  ;;  %v2842_v56 = vld [vmem:[%s3728_s3 + $0xc0] sm:$0xff]  }
 0x134   : > { %v2102_v51 = vrot.slane %v2100_v54, 5  ;;  %v2107_v19 = vrot.slane %v2105_v9, 4  ;;  %v2110_v15 = vrot.slane %v2108_v49, 5  ;;  %v2114_v41 = vshrl.u32 %v2085_v58, 16 }
 0x135   : > { %2608 = vmatpush3.bf16.msra.mxu0 %v2835_v37  ;;  %v2117_v62 = vshll.u32 %v2085_v58, 16  ;;  %v1184_v37 = vrot.slane %v1182_v20, 4  ;;  %v1187_v24 = vrot.slane %v1185_v8, 5  ;;  %v2086_v53 = vsel %vm1140_vm9, %v3442_v23, 0 }
 0x136   : > { %2646 = vmatmul.mubr.msk.bf16.vlgmr.msra.gmra.mrb[0].mxu1 %vm547_vm0, %v3297_v47  ;;  %2609 = vmatprep.subr.bf16.mxu0 %v2837_v25  ;;  %v2103_v26 = vor.u32 %v2102_v51, %v2099_v44  ;;  %v2111_v2 = vor.u32 %v2110_v15, %v2107_v19  ;;  %v2116_v40 = vrot.slane %v2114_v41, 4  ;;  %v2123_v59 = vshrl.u32 %v2086_v53, 16 }
 0x137   : > { %2654 = vmatpush3.bf16.msra.mxu1 %v3470_v29  ;;  %2649 = vmatprep.mubr.msk.bf16.mxu1 %vm547_vm0, %v3366_v21  ;;  %v2840_v29 = vld [vmem:[%s3728_s3 + $0xb0] sm:$0xff]   ;;  %v2119_v46 = vrot.slane %v2117_v62, 5  ;;  %v1653_v48 = vshll.u32 %v3549_v0, 16  ;;  %v3585_v31 = vsel %vm1622_vm8, %v3442_v23, 0  ;;  %v1191_v10 = vshrl.u32 %v1146_v28, 16 }
 0x138   : > { %2655 = vmatprep.subr.bf16.mxu1 %v2838_v61  ;;  %2602 = vmatmul.mubr.msk.bf16.gmra.mrb[20].mxu0 %vm547_vm0, %v955_v34  ;;  %v2126_v38 = vshll.u32 %v2086_v53, 16  ;;  %v1194_v33 = vshll.u32 %v1146_v28, 16  ;;  %v3591_v60 = vsel %vm732_vm3, %v2103_v26, %v2111_v2  ;;  %v2125_v32 = vrot.slane %v2123_v59, 4  ;;  %v2844_v26 = vld [vmem:[%s3728_s3 + $0xd0] sm:$0xff]  }
 0x139   : > { %2610 = vmatpush3.bf16.msra.mxu0 %v2837_v25  ;;  %2613 = vmatprep.mubr.msk.bf16.mxu0 %vm547_vm0, %v1171_v52  ;;  %v2841_v52 = vld [vmem:[%s3728_s3 + $0xb8] sm:$0xff]   ;;  %v2120_v5 = vor.u32 %v2119_v46, %v2116_v40  ;;  %v1188_v4 = vor.u32 %v1187_v24, %v1184_v37  ;;  %v2138_v45 = vor.u32 %v3514_v55, %v3512_v50  ;;  %v1628_v36 = vsel %vm1623_vm5, %v1607_v13, 0 }
 0x13a   : > { %2611 = vmatprep.subr.bf16.mxu0 %v2839_v35  ;;  %v2128_v14 = vrot.slane %v2126_v38, 5  ;;  %v1648_v25 = vsel %vm1310_vm4, %v3531_v27, %v3533_v11  ;;  %vm3754_vm6 = vcmp.ne.s16.totalorder %v3078_v17, 0  ;;  %v1785_v55 = vsel %vm769_vm13, %v3297_v47, 0  ;;  %v2845_v13 = vld [vmem:[%s3728_s3 + $0xd8] sm:$0xff]  }
 0x13b   : > { %2656 = vmatpush3.bf16.msra.mxu1 %v2838_v61  ;;  %v1661_v61 = vshll.u32 %v3585_v31, 16  ;;  %v3602_v20 = vsel %vm732_vm3, %v2111_v2, %v2120_v5  ;;  %v1784_v50 = vsel %vm3754_vm6, %v1782_v3, 0  ;;  %v1180_v27 = vsel %vm732_vm3, %v3495_v63, %v3559_v57 }
 0x13c   : > { %2657 = vmatprep.subr.bf16.mxu1 %v2840_v29  ;;  %v2129_v30 = vor.u32 %v2128_v14, %v2125_v32  ;;  %v1655_v8 = vrot.slane %v1653_v48, 1  ;;  %v1193_v12 = vrot.slane %v1191_v10, 4  ;;  %v1196_v54 = vrot.slane %v1194_v33, 5  ;;  %v2846_v14 = vld [vmem:[%s3728_s3 + $0xe0] sm:$0xff]  }
 0x13d   : > { %2612 = vmatpush3.bf16.msra.mxu0 %v2839_v35  ;;  %v1649_v17 = vshrl.u32 %v3491_v18, 16  ;;  %v1189_v39 = vsel %vm732_vm3, %v3559_v57, %v1188_v4  ;;  %v1657_v44 = vshrl.u32 %v3549_v0, 16  ;;  %v1663_v9 = vrot.slane %v1661_v61, 1  ;;  %v2843_v57 = vld [vmem:[%s3728_s3 + $0xc8] sm:$0xff]  }
 0x13e   : > { %2650 = vmatmul.mubr.msk.bf16.gmra.mrb[4].mxu1 %vm547_vm0, %v3442_v23  ;;  %v3623_v47 = vsel %vm732_vm3, %v2120_v5, %v2129_v30  ;;  %v3626_v63 = vsel %vm732_vm3, %v2129_v30, %v2138_v45  ;;  %v1806_v49 = vshrl.u32 %v1785_v55, 16  ;;  %v1809_v34 = vshll.u32 %v1785_v55, 16 }
 0x13f   : > { %2658 = vmatpush3.bf16.msra.mxu1 %v2840_v29  ;;  %2661 = vmatprep.mubr.msk.bf16.mxu1 %vm547_vm0, %v1648_v25  ;;  %v1651_v18 = vor.u32 %v1649_v17, %v3533_v11  ;;  %v1659_v35 = vor.u32 %v1657_v44, %v1655_v8  ;;  %v1197_v28 = vor.u32 %v1196_v54, %v1193_v12  ;;  %v1798_v51 = vshrl.u32 %v1784_v50, 16  ;;  %v2849_v12 = vld [vmem:[%s3728_s3 + $0xf8] sm:$0xff]   ;;  %v2850_v17 = vld [vmem:[%s3728_s3 + $0x100] sm:$0xff]  }
 0x140   : > { %2659 = vmatprep.subr.bf16.mxu1 %v2841_v52  ;;  %2614 = vmatmul.mubr.msk.bf16.vlgmr.msra.gmra.mrb[16].mxu0 %vm547_vm0, %v1180_v27  ;;  %v1801_v58 = vshll.u32 %v1784_v50, 16  ;;  %v1669_v19 = vshll.u32 %v1628_v36, 16  ;;  %v1808_v15 = vrot.slane %v1806_v49, 3  ;;  %v1811_v41 = vrot.slane %v1809_v34, 4  ;;  %v2847_v50 = vld [vmem:[%s3728_s3 + $0xe8] sm:$0xff]  }
 0x141   : > { %2617 = vmatprep.mubr.msk.bf16.mxu0 %vm547_vm0, %v1189_v39  ;;  %v1656_v29 = vsel %vm1310_vm4, %v1651_v18, %v1655_v8  ;;  %v1664_v0 = vsel %vm1310_vm4, %v1659_v35, %v1663_v9  ;;  %v1786_v11 = vsel %vm770_vm1, %v3366_v21, 0  ;;  %v1665_v62 = vshrl.u32 %v3585_v31, 16  ;;  %v2851_v39 = vld [vmem:[%s3728_s3 + $0x108] sm:$0xff]  }
 0x142   : > { %vm3755_vm13 = vcmp.ne.s16.totalorder %v3338_v6, 0  ;;  %v1198_v24 = vsel %vm732_vm3, %v1188_v4, %v1197_v28  ;;  %v1800_v53 = vrot.slane %v1798_v51, 3  ;;  %v1803_v2 = vrot.slane %v1801_v58, 4  ;;  %v1783_v6 = vld [vmem:[#allocation2 + $0x28] sm:$0xf] }
 0x143   : > { %2660 = vmatpush3.bf16.msra.mxu1 %v2841_v52  ;;  %v1787_v37 = vsel %vm3755_vm13, %v3442_v23, 0  ;;  %v1667_v42 = vor.u32 %v1665_v62, %v1663_v9  ;;  %v1671_v21 = vrot.slane %v1669_v19, 1  ;;  %v1815_v40 = vshrl.u32 %v1786_v11, 16  ;;  %v2853_v9 = vld [vmem:[%s3728_s3 + $0x118] sm:$0xff]  }
 0x144   : > { %2669 = vmatprep.subr.bf16.mxu1 %v2842_v56  ;;  %v1818_v46 = vshll.u32 %v1786_v11, 16  ;;  %v1812_v59 = vor.u32 %v1811_v41, %v1808_v15  ;;  %v1824_v48 = vshrl.u32 %v1787_v37, 16  ;;  %v1827_v31 = vshll.u32 %v1787_v37, 16 }
 0x145   : > { %v1804_v10 = vor.u32 %v1803_v2, %v1800_v53  ;;  %v1672_v38 = vsel %vm1310_vm4, %v1667_v42, %v1671_v21  ;;  %v1817_v52 = vrot.slane %v1815_v40, 3  ;;  %v1788_v4 = vsel %vm772_vm12, %v1783_v6, 0 }
 0x146   : > { %2662 = vmatmul.mubr.msk.bf16.vlgmr.msra.gmra.mrb[0].mxu1 %vm547_vm0, %v1656_v29  ;;  %v1820_v33 = vrot.slane %v1818_v46, 4  ;;  %v1826_v5 = vrot.slane %v1824_v48, 3  ;;  %v1829_v32 = vrot.slane %v1827_v31, 4  ;;  %v1833_v25 = vshrl.u32 %v1788_v4, 16 }
 0x147   : > { %2670 = vmatpush3.bf16.msra.mxu1 %v2842_v56  ;;  %2665 = vmatprep.mubr.msk.bf16.mxu1 %vm547_vm0, %v1664_v0  ;;  %v1813_v3 = vsel %vm911_vm15, %v1804_v10, %v1812_v59  ;;  %v1836_v61 = vshll.u32 %v1788_v4, 16  ;;  %v2848_v56 = vld [vmem:[%s3728_s3 + $0xf0] sm:$0xff]   ;;  %v1971_v44 = vrot.slane %v1783_v6, 4 }
 0x148   : > { %2671 = vmatprep.subr.bf16.mxu1 %v2843_v57  ;;  %2618 = vmatmul.mubr.msk.bf16.gmra.mrb[20].mxu0 %vm547_vm0, %v1198_v24  ;;  %v1821_v45 = vor.u32 %v1820_v33, %v1817_v52  ;;  %v1830_v36 = vor.u32 %v1829_v32, %v1826_v5  ;;  %v1835_v55 = vrot.slane %v1833_v25, 3 }
 0x149   : > { %v1838_v30 = vrot.slane %v1836_v61, 4 }
 0x14a   : > { %v1822_v1 = vsel %vm911_vm15, %v1812_v59, %v1821_v45  ;;  %v1831_v27 = vsel %vm911_vm15, %v1821_v45, %v1830_v36 }
 0x14b   : > { %2672 = vmatpush3.bf16.msra.mxu1 %v2843_v57  ;;  %v1839_v8 = vor.u32 %v1838_v30, %v1835_v55  ;;  %v2457_v57 = vld [vmem:[%s3729_s4] ss:$0 sm:$0xff] }
 0x14c   : > { %2673 = vmatprep.subr.bf16.mxu1 %v2844_v26 }
 0x14d   : > { %v1840_v54 = vsel %vm911_vm15, %v1830_v36, %v1839_v8 }
 0x14e   : > { %2666 = vmatmul.mubr.msk.bf16.gmra.mrb[4].mxu1 %vm547_vm0, %v1672_v38 }
 0x14f   : > { %2674 = vmatpush3.bf16.msra.mxu1 %v2844_v26  ;;  %2677 = vmatprep.mubr.msk.bf16.mxu1 %vm547_vm0, %v1813_v3 }
 0x150   : > { %2675 = vmatprep.subr.bf16.mxu1 %v2845_v13 }
 0x153   : > { %2676 = vmatpush3.bf16.msra.mxu1 %v2845_v13 }
 0x154   : > { %2685 = vmatprep.subr.bf16.mxu1 %v2846_v14 }
 0x156   : > { %2678 = vmatmul.mubr.msk.bf16.vlgmr.msra.gmra.mrb[0].mxu1 %vm547_vm0, %v1822_v1 }
 0x157   : > { %2686 = vmatpush3.bf16.msra.mxu1 %v2846_v14  ;;  %2681 = vmatprep.mubr.msk.bf16.mxu1 %vm547_vm0, %v1831_v27 }
 0x158   : > { %2687 = vmatprep.subr.bf16.mxu1 %v2847_v50 }
 0x15b   : > { %2688 = vmatpush3.bf16.msra.mxu1 %v2847_v50 }
 0x15c   : > { %2689 = vmatprep.subr.bf16.mxu1 %v2848_v56 }
 0x15e   : > { %2682 = vmatmul.mubr.msk.bf16.gmra.mrb[4].mxu1 %vm547_vm0, %v1840_v54 }
 0x15f   : > { %2690 = vmatpush3.bf16.msra.mxu1 %v2848_v56  ;;  %2693 = vmatprep.mubr.msk.bf16.mxu1 %vm547_vm0, %v3542_v7  ;;  %v2852_v7 = vld [vmem:[%s3728_s3 + $0x110] sm:$0xff]  }
 0x160   : > { %2691 = vmatprep.subr.bf16.mxu1 %v2849_v12 }
 0x163   : > { %2692 = vmatpush3.bf16.msra.mxu1 %v2849_v12 }
 0x164   : > { %2701 = vmatprep.subr.bf16.mxu1 %v2850_v17 }
 0x166   : > { %2694 = vmatmul.mubr.msk.bf16.vlgmr.msra.gmra.mrb[0].mxu1 %vm547_vm0, %v3395_v22  ;;  %v1972_v22 = vsel %vm800_vm10, %v1969_v16, %v1971_v44 }
 0x167   : > { %2702 = vmatpush3.bf16.msra.mxu1 %v2850_v17  ;;  %2697 = vmatprep.mubr.msk.bf16.mxu1 %vm547_vm0, %v3555_v43 }
 0x168   : > { %2703 = vmatprep.subr.bf16.mxu1 %v2851_v39 }
 0x16b   : > { %2704 = vmatpush3.bf16.msra.mxu1 %v2851_v39 }
 0x16c   : > { %2705 = vmatprep.subr.bf16.mxu1 %v2852_v7 }
 0x16e   : > { %2698 = vmatmul.mubr.msk.bf16.gmra.mrb[4].mxu1 %vm547_vm0, %v1972_v22 }
 0x16f   : > { %2706 = vmatpush3.bf16.msra.mxu1 %v2852_v7  ;;  %2709 = vmatprep.mubr.msk.bf16.mxu1 %vm547_vm0, %v3591_v60 }
 0x170   : > { %2707 = vmatprep.subr.bf16.mxu1 %v2853_v9 }
 0x173   : > { %2708 = vmatpush3.bf16.msra.mxu1 %v2853_v9 }
 0x176   : > { %2710 = vmatmul.mubr.msk.bf16.vlgmr.msra.gmra.mrb[0].mxu1 %vm547_vm0, %v3602_v20 }
 0x177   : > { %2713 = vmatprep.mubr.msk.bf16.mxu1 %vm547_vm0, %v3623_v47 }
 0x17e   : > { %2714 = vmatmul.mubr.msk.bf16.gmra.mrb[4].mxu1 %vm547_vm0, %v3626_v63 }
 0x213   : > { %v2615_v23 = vpop.f32.mrb[16].mxu0 }
 0x214   : > { %v1269_v16 = vpop.f32.mrb[17].mxu0 }
 0x215   : > { %v2616_v43 = vpop.f32.mrb[18].mxu0 }
 0x216   : > { %v1272_v49 = vpop.f32.mrb[19].mxu0 }
 0x21b   : > { %v2619_v34 = vpop.f32.mrb[20].mxu0 }
 0x21c   : > { %v1285_v18 = vpop.f32.mrb[21].mxu0 }
 0x21d   : > { %v2620_v35 = vpop.f32.mrb[22].mxu0 }
 0x21e   : > { %v1288_v60 = vpop.f32.mrb[23].mxu0 }
 0x249   : > { %v2711_v28 = vpop.f32.mrb[0].mxu1 }
 0x24a   : > { %v2717_v20 = vadd.f32 %v2711_v28, %v2615_v23  ;;  %v2210_v51 = vpop.f32.mrb[1].mxu1 }
 0x24b   : > { %v2718_v47 = vadd.f32 %v2210_v51, %v1269_v16  ;;  %v2712_v63 = vpop.f32.mrb[2].mxu1 }
 0x24c   : > { %v2258_v58 = vadd.f32 %v2717_v20, %v2457_v57  ;;  %v2719_v29 = vadd.f32 %v2712_v63, %v2616_v43  ;;  %v2213_v19 = vpop.f32.mrb[3].mxu1 }
 0x24d   : > { %v2256_v0 = vadd.f32 %v2718_v47, %v2457_v57  ;;  %v2720_v15 = vadd.f32 %v2213_v19, %v1272_v49 }
 0x24e   : > { %2266 = vst.msk [vmem:[%s278_s30 + $0x10] sm:$0xff] %vm547_vm0, %v2258_v58  ;;  %v2259_v41 = vadd.f32 %v2719_v29, %v2457_v57 }
 0x24f   : > { %2264 = vst.msk [vmem:[%s278_s30] sm:$0xff] %vm547_vm0, %v2256_v0  ;;  %v2257_v11 = vadd.f32 %v2720_v15, %v2457_v57 }
 0x250   : > { %2267 = vst.msk [vmem:[%s278_s30 + $0x18] sm:$0xff] %vm547_vm0, %v2259_v41 }
 0x251   : > { %2265 = vst.msk [vmem:[%s278_s30 + $0x8] sm:$0xff] %vm547_vm0, %v2257_v11  ;;  %v2715_v62 = vpop.f32.mrb[4].mxu1 }
 0x252   : > { %v2721_v37 = vadd.f32 %v2715_v62, %v2619_v34  ;;  %v2226_v24 = vpop.f32.mrb[5].mxu1 }
 0x253   : > { %v2722_v26 = vadd.f32 %v2226_v24, %v1285_v18  ;;  %v2716_v53 = vpop.f32.mrb[6].mxu1 }
 0x254   : > { %v2262_v2 = vadd.f32 %v2721_v37, %v2457_v57  ;;  %v2723_v42 = vadd.f32 %v2716_v53, %v2620_v35  ;;  %v2229_v21 = vpop.f32.mrb[7].mxu1 }
 0x255   : > { %v2260_v40 = vadd.f32 %v2722_v26, %v2457_v57  ;;  %v2724_v46 = vadd.f32 %v2229_v21, %v1288_v60 }
 0x256   : > { %2270 = vst.msk [vmem:[%s278_s30 + $0x30] sm:$0xff] %vm547_vm0, %v2262_v2  ;;  %v2263_v59 = vadd.f32 %v2723_v42, %v2457_v57 }
 0x257   : > { %2268 = vst.msk [vmem:[%s278_s30 + $0x20] sm:$0xff] %vm547_vm0, %v2260_v40  ;;  %v2261_v48 = vadd.f32 %v2724_v46, %v2457_v57 }
 0x258   : > { %2271 = vst.msk [vmem:[%s278_s30 + $0x38] sm:$0xff] %vm547_vm0, %v2263_v59 }
 0x259   : > { %2269 = vst.msk [vmem:[%s278_s30 + $0x28] sm:$0xff] %vm547_vm0, %v2261_v48 }
 0x25a PF: > { %s16_s21 = sadd.s32 1, %s2860_s21  }
 0x25b   : > { %p13_p4 = scmp.ge.s32.totalorder %s16_s21, 4  }
 0x25d   :  { %15 = sbr.rel (!%p13_p4) target bundleno = 1 (0x1), region = 77 }

// kernel: detector_backbone_with_fpn_forward.11
= control target key start
LH: loop header
LB: loop body
LE: loop exit
PB: predicated region body
PF: predicated region fallthrough
CT: control target
= control target key end

     0   :  { %11 = vsyncpa [#allocation4], 0  ;;  %s9416_s0 = inlined_call_operand.vmem [shape: bf16[512,128], index: 0, kind: input, shape index: {}]   ;;  %s9417_s1 = inlined_call_operand.vmem [shape: bf16[128,64], index: 1, kind: input, shape index: {}]   ;;  %s9418_s2 = inlined_call_operand.vmem [shape: f32[1,64], index: 2, kind: input, shape index: {}]   ;;  %s9419_s3 = inlined_call_operand.vmem [shape: bf16[576,64], index: 3, kind: input, shape index: {}]   ;;  %s9420_s4 = inlined_call_operand.vmem [shape: f32[1,64], index: 4, kind: input, shape index: {}]   ;;  %s9421_s5 = inlined_call_operand.vmem [shape: f32[512,64], index: 5, kind: input, shape index: {}]   ;;  %s9422_s6 = inlined_call_operand.hbm [shape: f32[512,64], index: 6, kind: output, shape index: {}]  }
   0x1   :  { %13 = vsyncpa [#allocation4 + $0x1], 0  ;;  %s7107_s21 = smov 0   ;;  %s7109_s22 = smov 0  }
   0x2   :  { %s7111_s23 = smov 0   ;;  %s7113_s24 = smov 0  }
   0x3 LB: > { %s7128_s25 = sadd.s32 4294967295, %s7065_s24   ;;  %s5750_s26 = sadd.s32 4294967294, %s7065_s24   ;;  %s7065_s24 = sphi %s7113_s24, %s9749_s24   ;;  %s7061_s23 = sphi %s7111_s23, %s9748_s23   ;;  %s7057_s22 = sphi %s7109_s22, %s9747_s22   ;;  %s7053_s21 = sphi %s7107_s21, %s9746_s21  }
   0x4   : > { %s7132_s27 = sadd.s32 1, %s7065_s24   ;;  %s162_s28 = sadd.s32 1, %s7061_s23 }
   0x5   : > { %s159_s29 = ssub.s32 %s7065_s24, %s7132_s27  ;;  %p172_p0 = scmp.ne.s32.totalorder %s7061_s23, %s7057_s22 }
   0x6   : > { %p160_p1 = scmp.eq.s32.totalorder %s159_s29, 0  ;;  %p173_p2 = scmp.eq.s32.totalorder %s7128_s25, 1 }
   0x7   : > { %p178_p3 = scmp.ne.s32.totalorder %s7057_s22, %s7053_s21  ;;  %p179_p4 = scmp.eq.s32.totalorder %s5750_s26, 1 }
   0x8   : > { %s7143_s30 = scalar_select %p160_p1, %s7061_s23, %s162_s28  }
   0x9   : > { %p7145_p5 = por %p173_p2, %p172_p0  ;;  %p7149_p6 = por %p179_p4, %p178_p3 }
   0xa   : > { %p5753_p7 = scmp.ge.s32.totalorder %s7065_s24, 1  ;;  %p227_p8 = scmp.lt.s32.totalorder %s7065_s24, 3 }
   0xc   : > { %p228_p9 = pnand %p5753_p7, %p227_p8 }
   0xe   : > { %231 = sbr.rel (%p228_p9) target bundleno = 871 (0x367), region = 44 }
  0x15   : > { %v6922_v0 = vld [vmem:[%s9417_s1] sm:$0xff]   ;;  %s5755_s11 = sshll.u32 %s7128_s25, 5  ;;  %v6923_v1 = vld [vmem:[%s9417_s1 + $0x8] sm:$0xff]   ;;  %v6924_v2 = vld [vmem:[%s9417_s1 + $0x10] sm:$0xff]   ;;  %vm702_vm0 = vcmask 523264   ;;  %v9423_v25 = vmov 0   ;;  %v822_v34 = vlaneseq }
  0x16   : > { %p263_p10 = scmp.lt.s32.totalorder %s5755_s11, 63  ;;  %6207 = vmatprep.subr.bf16.mxu0 %v6922_v0  ;;  %v6925_v3 = vld [vmem:[%s9417_s1 + $0x18] sm:$0xff]   ;;  %v6926_v5 = vld [vmem:[%s9417_s1 + $0x20] sm:$0xff]   ;;  %v6927_v6 = vld [vmem:[%s9417_s1 + $0x28] sm:$0xff]   ;;  %704 = vst.msk [vmem:[#allocation2 + $0x8] sm:$0xff] %vm702_vm0, %v9423_v25  ;;  %vm7068_vm3 = vmmov 1  }
  0x17   : > { %6208 = vmatpush3.bf16.msra.mxu0 %v6922_v0  ;;  %v6928_v7 = vld [vmem:[%s9417_s1 + $0x30] sm:$0xff]   ;;  %v6929_v8 = vld [vmem:[%s9417_s1 + $0x38] sm:$0xff]   ;;  %v6946_v24 = vld [vmem:[%s9419_s3 + $0x20] sm:$0xff]   ;;  %705 = vst.msk [vmem:[#allocation2 + $0x10] sm:$0xff] %vm702_vm0, %v9423_v25  ;;  %v7272_v35 = vshrl.u32 %v822_v34, 7  ;;  %s259_s14 = sand.u32 1, %s7057_s22  }
  0x18   : > { %s9751_s11 = smov (!%p263_p10, %s5755_s11), 63  ;;  %6209 = vmatprep.subr.bf16.mxu0 %v6923_v1  ;;  %703 = vst.msk [vmem:[#allocation2] sm:$0xff] %vm702_vm0, %v9423_v25  ;;  %706 = vst.msk [vmem:[#allocation2 + $0x18] sm:$0xff] %vm702_vm0, %v9423_v25  ;;  %v6947_v26 = vld [vmem:[%s9419_s3 + $0x28] sm:$0xff]   ;;  %v6948_v27 = vld [vmem:[%s9419_s3 + $0x30] sm:$0xff]   ;;  %s6002_s18 = sshll.u32 %s7128_s25, 12 }
  0x19   : > { %s5756_s16 = sshll.u32 %s9751_s11, 2  ;;  %707 = vst.msk [vmem:[#allocation2 + $0x20] sm:$0xff] %vm702_vm0, %v9423_v25  ;;  %708 = vst.msk [vmem:[#allocation2 + $0x28] sm:$0xff] %vm702_vm0, %v9423_v25  ;;  %v6949_v28 = vld [vmem:[%s9419_s3 + $0x38] sm:$0xff]   ;;  %v6950_v29 = vld [vmem:[%s9419_s3 + $0x60] sm:$0xff]   ;;  %v824_v36 = vadd.s32 8, %v7272_v35 }
  0x1a   : > { %s7171_s19 = scalar_lea.vmem %s9416_s0, %s5756_s16  ;;  %709 = vst.msk [vmem:[#allocation2 + $0x30] sm:$0xff] %vm702_vm0, %v9423_v25  ;;  %710 = vst.msk [vmem:[#allocation2 + $0x38] sm:$0xff] %vm702_vm0, %v9423_v25  ;;  %6375 = vmatprep.subr.bf16.mxu1 %v6950_v29  ;;  %v6951_v30 = vld [vmem:[%s9419_s3 + $0x68] sm:$0xff]   ;;  %v6952_v31 = vld [vmem:[%s9419_s3 + $0x70] sm:$0xff]   ;;  %v825_v37 = vadd.s32 16, %v7272_v35  ;;  %v859_v38 = vand.u32 15, %v7272_v35 }
  0x1b   : > { %6210 = vmatpush3.bf16.msra.mxu0 %v6923_v1  ;;  %v6930_v4 = vld [vmem:[%s7171_s19] sm:$0xff]   ;;  %v6931_v9 = vld [vmem:[%s7171_s19 + $0x8] sm:$0xff]   ;;  %v6932_v10 = vld [vmem:[%s7171_s19 + $0x10] sm:$0xff]   ;;  %711 = vst.msk [vmem:[#allocation2 + $0x40] sm:$0xff] %vm702_vm0, %v9423_v25  ;;  %6376 = vmatpush3.bf16.msra.mxu1 %v6950_v29  ;;  %v866_v39 = vand.u32 15, %v824_v36  ;;  %v827_v40 = vadd.s32 32, %v7272_v35 }
  0x1c   : > { %6211 = vmatprep.subr.bf16.mxu0 %v6924_v2  ;;  %6223 = vmatprep.mubr.bf16.mxu0 %v6930_v4  ;;  %v6933_v11 = vld [vmem:[%s7171_s19 + $0x18] sm:$0xff]   ;;  %v6934_v12 = vld [vmem:[%s7171_s19 + $0x20] sm:$0xff]   ;;  %v6935_v13 = vld [vmem:[%s7171_s19 + $0x28] sm:$0xff]   ;;  %712 = vst.msk [vmem:[#allocation2 + $0x48] sm:$0xff] %vm702_vm0, %v9423_v25  ;;  %v873_v41 = vand.u32 15, %v825_v37  ;;  %vm1239_vm1 = vcmp.gt.s32.totalorder %v859_v38, 0 }
  0x1d   : > { %v6936_v14 = vld [vmem:[%s7171_s19 + $0x30] sm:$0xff]   ;;  %v6937_v15 = vld [vmem:[%s7171_s19 + $0x38] sm:$0xff]   ;;  %v6938_v16 = vld [vmem:[%s7171_s19 + $0x40] sm:$0xff]   ;;  %713 = vst.msk [vmem:[#allocation2 + $0x50] sm:$0xff] %vm702_vm0, %v9423_v25  ;;  %6377 = vmatprep.subr.bf16.mxu1 %v6951_v30  ;;  %vm7278_vm2 = vcmp.lt.s32.totalorder %v866_v39, 15  ;;  %v826_v43 = vadd.s32 24, %v7272_v35 }
  0x1e   : > { %v6939_v17 = vld [vmem:[%s7171_s19 + $0x48] sm:$0xff]   ;;  %v6940_v18 = vld [vmem:[%s7171_s19 + $0x50] sm:$0xff]   ;;  %v6941_v19 = vld [vmem:[%s7171_s19 + $0x58] sm:$0xff]   ;;  %714 = vst.msk [vmem:[#allocation2 + $0x58] sm:$0xff] %vm702_vm0, %v9423_v25  ;;  %v828_v44 = vadd.s32 40, %v7272_v35  ;;  %v887_v45 = vand.u32 15, %v827_v40 }
  0x1f   : > { %6212 = vmatpush3.bf16.msra.mxu0 %v6924_v2  ;;  %v6942_v20 = vld [vmem:[%s7171_s19 + $0x60] sm:$0xff]   ;;  %v6943_v21 = vld [vmem:[%s7171_s19 + $0x68] sm:$0xff]   ;;  %v6944_v22 = vld [vmem:[%s7171_s19 + $0x70] sm:$0xff]   ;;  %715 = vst.msk [vmem:[#allocation2 + $0x60] sm:$0xff] %vm702_vm0, %v9423_v25  ;;  %6378 = vmatpush3.bf16.msra.mxu1 %v6951_v30  ;;  %vm1241_vm5 = vcmp.gt.s32.totalorder %v873_v41, 0  ;;  %v880_v46 = vand.u32 15, %v826_v43 }
  0x20   : > { %6213 = vmatprep.subr.bf16.mxu0 %v6925_v3  ;;  %v6945_v23 = vld [vmem:[%s7171_s19 + $0x78] sm:$0xff]   ;;  %716 = vst.msk [vmem:[#allocation2 + $0x68] sm:$0xff] %vm702_vm0, %v9423_v25  ;;  %717 = vst.msk [vmem:[#allocation2 + $0x70] sm:$0xff] %vm702_vm0, %v9423_v25  ;;  %6379 = vmatprep.subr.bf16.mxu1 %v6952_v31  ;;  %v7269_v33 = vld [vmem:[%s9419_s3 + $0x80] sm:$0xff]   ;;  %v894_v49 = vand.u32 15, %v828_v44  ;;  %vm1243_vm9 = vcmp.gt.s32.totalorder %v887_v45, 0 }
  0x21   : > { %718 = vst.msk [vmem:[#allocation2 + $0x78] sm:$0xff] %vm702_vm0, %v9423_v25  ;;  %719 = vst.msk [vmem:[#allocation2 + $0x80] sm:$0xff] %vm702_vm0, %v9423_v25  ;;  %v6953_v32 = vld [vmem:[%s9419_s3 + $0x78] sm:$0xff]   ;;  %v7295_v51 = vld [vmem:[%s9419_s3] sm:$0xff]   ;;  %vm7299_vm10 = vcmp.lt.s32.totalorder %v880_v46, 15  ;;  %v829_v59 = vadd.s32 48, %v7272_v35 }
  0x22   : > { %720 = vst.msk [vmem:[#allocation2 + $0x88] sm:$0xff] %vm702_vm0, %v9423_v25  ;;  %721 = vst.msk [vmem:[#allocation2 + $0x90] sm:$0xff] %vm702_vm0, %v9423_v25  ;;  %vm7304_vm12 = vcmp.lt.s32.totalorder %v894_v49, 15  ;;  %v831_v0 = vadd.s32 64, %v7272_v35  ;;  %v839_v37 = vadd.s32 128, %v7272_v35  ;;  %v841_v40 = vadd.s32 144, %v7272_v35 }
  0x23   : > { %6214 = vmatpush3.bf16.msra.mxu0 %v6925_v3  ;;  %6380 = vmatpush3.bf16.msra.mxu1 %v6952_v31  ;;  %vm1385_vm4 = vmpackc.low %vm7068_vm3, %vm7068_vm3  ;;  %v1303_v41 = vld [vmem:[#allocation2] sm:$0xf8]  ;;  %v843_v46 = vadd.s32 160, %v7272_v35  ;;  %v851_v39 = vadd.s32 224, %v7272_v35  ;;  %s5758_s28 = sshll.u32 %s9751_s11, 3  ;;  %s9375_s25 = scalar_lea.sflag [#allocation4], %s259_s14 }
  0x24   : > { %6215 = vmatprep.subr.bf16.mxu0 %v6926_v5  ;;  %6381 = vmatprep.subr.bf16.mxu1 %v6953_v32  ;;  %vm1384_vm6 = vmpackc.low %vm1239_vm1, %vm1239_vm1  ;;  %v7288_v47 = vsel %vm1385_vm4, 65537, %v9423_v25  ;;  %v7352_v42 = vld [vmem:[#allocation2] sm:$0xf0]  ;;  %v971_v54 = vand.u32 15, %v839_v37  ;;  %s7534_s11 = scalar_lea.vmem %s9421_s5, %s5758_s28  ;;  %s9362_s28 = scalar_lea.hbm %s9422_s6, %s6002_s18 }
  0x25   : > { %vm2426_vm7 = vmpackc.low %vm7278_vm2, %vm7278_vm2  ;;  %v1416_v48 = vsel %vm1384_vm6, 65537, %v9423_v25  ;;  %vm9446_vm2 = vsmask.f32 3328  ;;  %v1708_v56 = vrot.slane %v7352_v42, 4  ;;  %s7069_s9 = smov [#allocation3]  }
  0x26   : > { %vm1386_vm8 = vmpackc.low %vm1241_vm5, %vm1241_vm5  ;;  %v2458_v50 = vsel %vm2426_vm7, 65537, %v9423_v25  ;;  %v5784_v53 = vcombine.low %v1416_v48, %v7288_v47  ;;  %s7007_s10 = sshll.u32 %s7069_s9, 4  ;;  %s7008_s10 = int_to_ptr.vmem [resolvable:$false] %s7007_s10 }
  0x27   : > { %6216 = vmatpush3.bf16.msra.mxu0 %v6926_v5  ;;  %6382 = vmatpush3.bf16.msra.mxu1 %v6953_v32  ;;  %v1418_v52 = vsel %vm1386_vm8, 65537, %v9423_v25  ;;  %vm1388_vm11 = vmpackc.low %vm1243_vm9, %vm1243_vm9  ;;  %v5840_v55 = vcombine.low %v7288_v47, %v2458_v50  ;;  %s7009_s12 = scalar_lea.vmem %s7008_s10, 8192 }
  0x28   : > { %6217 = vmatprep.subr.bf16.mxu0 %v6927_v6  ;;  %6415 = vmatprep.subr.bf16.mxu1 %v7269_v33  ;;  %v5785_v57 = vcombine.low %v1418_v52, %v7288_v47  ;;  %v1420_v58 = vsel %vm1388_vm11, 65537, %v9423_v25  ;;  %vm2428_vm13 = vmpackc.low %vm7299_vm10, %vm7299_vm10  ;;  %v1498_v60 = vshrl.u32 %v5784_v53, 16  ;;  %v1501_v61 = vshll.u32 %v5784_v53, 16 }
  0x29   : > { %vm2430_vm14 = vmpackc.low %vm7304_vm12, %vm7304_vm12  ;;  %v2538_v62 = vshrl.u32 %v5840_v55, 16  ;;  %v2541_v63 = vshll.u32 %v5840_v55, 16  ;;  %v5786_v1 = vcombine.low %v1420_v58, %v7288_v47  ;;  %v2460_v2 = vsel %vm2428_vm13, 65537, %v9423_v25 }
  0x2a   : > { %v1506_v3 = vshrl.u32 %v5785_v57, 16  ;;  %v1509_v4 = vshll.u32 %v5785_v57, 16  ;;  %v2462_v5 = vsel %vm2430_vm14, 65537, %v9423_v25  ;;  %vm1974_vm11 = vsmask.f32 4352 }
  0x2b   : > { %6218 = vmatpush3.bf16.msra.mxu0 %v6927_v6  ;;  %v901_v6 = vand.u32 15, %v829_v59  ;;  %v985_v58 = vand.u32 15, %v841_v40  ;;  %vm7396_vm14 = vcmp.gt.s32.totalorder %v971_v54, 0 }
  0x2c   : > { %6219 = vmatprep.subr.bf16.mxu0 %v6928_v7 }
  0x2d   : > { %vm7326_vm15 = vcmp.gt.s32.totalorder %v901_v6, 0 }
  0x2e   : > { %vm1390_vm3 = vmpackc.low %vm7326_vm15, %vm7326_vm15  ;;  %vm7402_vm15 = vcmp.gt.s32.totalorder %v985_v58, 0  ;;  %v1055_v58 = vand.u32 15, %v851_v39 }
  0x2f   : > { %6220 = vmatpush3.bf16.msra.mxu0 %v6928_v7  ;;  %v1500_v7 = vrot.slane %v1498_v60, 4  ;;  %v1422_v45 = vsel %vm1390_vm3, 65537, %v9423_v25  ;;  %vm1400_vm3 = vmpackc.low %vm7396_vm14, %vm7396_vm14 }
  0x30   : > { %6221 = vmatprep.subr.bf16.mxu0 %v6929_v8  ;;  %v5787_v57 = vcombine.low %v1422_v45, %v7288_v47 }
  0x33   : > { %6222 = vmatpush3.bf16.msra.mxu0 %v6929_v8  ;;  %v1503_v8 = vrot.slane %v1501_v61, 5 }
  0x34   : > { %6255 = vmatprep.subr.bf16.mxu0 %v6946_v24 }
  0x36   : > { %6224 = vmatmul.mubr.bf16.vlgmr.msra.gmra.mrb[0].mxu0 %v6931_v9  ;;  %v833_v9 = vadd.s32 80, %v7272_v35 }
  0x37   : > { %6227 = vmatprep.mubr.bf16.mxu0 %v6932_v10  ;;  %6256 = vmatpush3.bf16.msra.mxu0 %v6946_v24  ;;  %v2540_v10 = vrot.slane %v2538_v62, 3  ;;  %v999_v62 = vand.u32 15, %v843_v46 }
  0x38   : > { %6257 = vmatprep.subr.bf16.mxu0 %v6947_v26 }
  0x3b   : > { %6258 = vmatpush3.bf16.msra.mxu0 %v6947_v26 }
  0x3c   : > { %6259 = vmatprep.subr.bf16.mxu0 %v6948_v27 }
  0x3e   : > { %6228 = vmatmul.mubr.bf16.gmra.mrb[4].mxu0 %v6933_v11  ;;  %v2543_v11 = vrot.slane %v2541_v63, 4 }
  0x3f   : > { %6231 = vmatprep.mubr.bf16.mxu0 %v6934_v12  ;;  %6260 = vmatpush3.bf16.msra.mxu0 %v6948_v27  ;;  %v5841_v12 = vcombine.low %v7288_v47, %v2460_v2 }
  0x40   : > { %6261 = vmatprep.subr.bf16.mxu0 %v6949_v28  ;;  %v7333_v24 = vor.u32 %v2543_v11, %v2540_v10 }
  0x41   : > { %v2546_v26 = vshrl.u32 %v5841_v12, 16  ;;  %v2549_v27 = vshll.u32 %v5841_v12, 16 }
  0x42   : > { %9506 = vst [vmem:[#allocation7_spill] sm:$0xff] %v7333_v24  ;;  %vm9452_vm7 = vcmp.ne.s16.totalorder %v7333_v24, 0 }
  0x43   : > { %6262 = vmatpush3.bf16.msra.mxu0 %v6949_v28  ;;  %v2548_v43 = vrot.slane %v2546_v26, 3  ;;  %v2551_v44 = vrot.slane %v2549_v27, 4  ;;  %v7376_v59 = vsel %vm9452_vm7, %v7352_v42, 0 }
  0x44   : > { %6295 = vmatprep.subr.bf16.mxu0 %v7295_v51 }
  0x45   : > { %v7380_v61 = vor.u32 %v2551_v44, %v2548_v43 }
  0x46   : > { %6232 = vmatmul.mubr.bf16.gmra.mrb[8].mxu0 %v6935_v13  ;;  %v915_v13 = vand.u32 15, %v831_v0 }
  0x47   : > { %6235 = vmatprep.mubr.bf16.mxu0 %v6936_v14  ;;  %v1515_v14 = vshrl.u32 %v5786_v1, 16 }
  0x48   : > { %vm7335_vm1 = vcmp.gt.s32.totalorder %v915_v13, 0 }
  0x49   : > { %v1517_v34 = vrot.slane %v1515_v14, 4  ;;  %vm1392_vm5 = vmpackc.low %vm7335_vm1, %vm7335_vm1  ;;  %vm7412_vm1 = vcmp.gt.s32.totalorder %v999_v62, 0  ;;  %v830_v62 = vadd.s32 56, %v7272_v35 }
  0x4a   : > { %v1424_v52 = vsel %vm1392_vm5, 65537, %v9423_v25  ;;  %vm1402_vm5 = vmpackc.low %vm7402_vm15, %vm7402_vm15  ;;  %vm7471_vm15 = vcmp.gt.s32.totalorder %v1055_v58, 0 }
  0x4b   : > { %v5788_v0 = vcombine.low %v1424_v52, %v7288_v47  ;;  %v1434_v37 = vsel %vm1402_vm5, 65537, %v9423_v25  ;;  %vm1412_vm5 = vmpackc.low %vm7471_vm15, %vm7471_vm15 }
  0x4c   : > { %v5793_v53 = vcombine.low %v1434_v37, %v7288_v47 }
  0x4e   : > { %6236 = vmatmul.mubr.bf16.gmra.mrb[12].mxu0 %v6937_v15  ;;  %v5842_v15 = vcombine.low %v7288_v47, %v2462_v5  ;;  %v845_v5 = vadd.s32 176, %v7272_v35  ;;  %v1578_v10 = vshrl.u32 %v5793_v53, 16  ;;  %v1581_v14 = vshll.u32 %v5793_v53, 16 }
  0x4f   : > { %6239 = vmatprep.mubr.bf16.mxu0 %v6938_v16  ;;  %v835_v16 = vadd.s32 96, %v7272_v35 }
  0x50   : > { %v2555_v29 = vshrl.u32 %v5842_v15, 16  ;;  %v2558_v30 = vshll.u32 %v5842_v15, 16 }
  0x51   : > { %v943_v31 = vand.u32 15, %v835_v16  ;;  %v1533_v16 = vshrl.u32 %v5788_v0, 16 }
  0x52   : > { %v2557_v48 = vrot.slane %v2555_v29, 3  ;;  %v2560_v49 = vrot.slane %v2558_v30, 4  ;;  %v849_v29 = vadd.s32 208, %v7272_v35 }
  0x53   : > { %vm7357_vm8 = vcmp.gt.s32.totalorder %v943_v31, 0 }
  0x54   : > { %vm1396_vm12 = vmpackc.low %vm7357_vm8, %vm7357_vm8  ;;  %v7385_v63 = vor.u32 %v2560_v49, %v2557_v48  ;;  %v1041_v49 = vand.u32 15, %v849_v29 }
  0x56   : > { %6240 = vmatmul.mubr.bf16.gmra.mrb[16].mxu0 %v6939_v17  ;;  %v1508_v17 = vrot.slane %v1506_v3, 4  ;;  %v7419_v15 = vsel %vm1974_vm11, %v7380_v61, %v7385_v63 }
  0x57   : > { %6243 = vmatprep.mubr.bf16.mxu0 %v6940_v18  ;;  %v1511_v18 = vrot.slane %v1509_v4, 5  ;;  %9523 = vst [vmem:[#allocation10_spill] sm:$0xff] %v7419_v15  ;;  %v832_v4 = vadd.s32 72, %v7272_v35 }
  0x59   : > { %v1512_v32 = vor.u32 %v1511_v18, %v1508_v17  ;;  %v847_v17 = vadd.s32 192, %v7272_v35  ;;  %v922_v29 = vand.u32 15, %v832_v4 }
  0x5e   : > { %6244 = vmatmul.mubr.bf16.gmra.mrb[20].mxu0 %v6941_v19  ;;  %v1536_v19 = vshll.u32 %v5788_v0, 16 }
  0x5f   : > { %6247 = vmatprep.mubr.bf16.mxu0 %v6942_v20  ;;  %v837_v20 = vadd.s32 112, %v7272_v35 }
  0x60   : > { %v1538_v50 = vrot.slane %v1536_v19, 5  ;;  %v908_v19 = vand.u32 15, %v830_v62 }
  0x61   : > { %v957_v36 = vand.u32 15, %v837_v20 }
  0x63   : > { %vm7365_vm10 = vcmp.gt.s32.totalorder %v957_v36, 0  ;;  %v1535_v36 = vrot.slane %v1533_v16, 4 }
  0x64   : > { %vm1398_vm13 = vmpackc.low %vm7365_vm10, %vm7365_vm10 }
  0x65   : > { %v1430_v13 = vsel %vm1398_vm13, 65537, %v9423_v25 }
  0x66   : > { %6248 = vmatmul.mubr.bf16.gmra.mrb[24].mxu0 %v6943_v21  ;;  %v7331_v21 = vor.u32 %v1503_v8, %v1500_v7  ;;  %v1524_v7 = vshrl.u32 %v5787_v57, 16  ;;  %v1527_v8 = vshll.u32 %v5787_v57, 16  ;;  %v5791_v28 = vcombine.low %v1430_v13, %v7288_v47 }
  0x67   : > { %6251 = vmatprep.mubr.bf16.mxu0 %v6944_v22  ;;  %v1518_v22 = vshll.u32 %v5786_v1, 16 }
  0x68   : > { %9505 = vst [vmem:[#allocation6_spill] sm:$0xff] %v7331_v21  ;;  %vm9445_vm4 = vcmp.ne.s16.totalorder %v7331_v21, 0  ;;  %v7394_v3 = vsel %vm9446_vm2, %v7331_v21, %v1512_v32  ;;  %v1526_v26 = vrot.slane %v1524_v7, 4  ;;  %v1529_v27 = vrot.slane %v1527_v8, 5 }
  0x69   : > { %v1520_v38 = vrot.slane %v1518_v22, 5  ;;  %v1657_v55 = vsel %vm9445_vm4, %v1303_v41, 0  ;;  %9515 = vst [vmem:[#allocation8_spill] sm:$0xff] %v7394_v3  ;;  %v1013_v22 = vand.u32 15, %v845_v5  ;;  %v1560_v45 = vshrl.u32 %v5791_v28, 16 }
  0x6a   : > { %v1976_v2 = vshrl.u32 %v1657_v55, 16  ;;  %v1979_v6 = vshll.u32 %v1657_v55, 16  ;;  %v1563_v46 = vshll.u32 %v5791_v28, 16 }
  0x6b   : > { %v7378_v60 = vor.u32 %v1520_v38, %v1517_v34  ;;  %v853_v34 = vadd.s32 240, %v7272_v35  ;;  %v1027_v38 = vand.u32 15, %v847_v17  ;;  %vm7443_vm8 = vcmp.gt.s32.totalorder %v1013_v22, 0 }
  0x6c   : > { %v7425_v18 = vrot.slane %v1976_v2, 3  ;;  %v1562_v5 = vrot.slane %v1560_v45, 4  ;;  %v1539_v22 = vor.u32 %v1538_v50, %v1535_v36  ;;  %v1583_v36 = vrot.slane %v1581_v14, 5 }
  0x6d   : > { %v7408_v11 = vsel %vm9446_vm2, %v1512_v32, %v7378_v60  ;;  %v1432_v32 = vsel %vm1400_vm3, 65537, %v9423_v25  ;;  %v1069_v54 = vand.u32 15, %v853_v34  ;;  %vm7453_vm10 = vcmp.gt.s32.totalorder %v1027_v38, 0 }
  0x6e   : > { %6252 = vmatmul.mubr.bf16.gmra.mrb[28].mxu0 %v6945_v23  ;;  %v929_v23 = vand.u32 15, %v833_v9  ;;  %v1428_v9 = vsel %vm1396_vm12, 65537, %v9423_v25  ;;  %9520 = vst [vmem:[#allocation9_spill] sm:$0xff] %v7408_v11  ;;  %v5792_v48 = vcombine.low %v1432_v32, %v7288_v47  ;;  %vm7459_vm12 = vcmp.gt.s32.totalorder %v1041_v49, 0  ;;  %vm1408_vm13 = vmpackc.low %vm7453_vm10, %vm7453_vm10 }
  0x6f   : > { %v5790_v20 = vcombine.low %v1428_v9, %v7288_v47  ;;  %vm7467_vm14 = vcmp.gt.s32.totalorder %v1069_v54, 0  ;;  %v1440_v34 = vsel %vm1408_vm13, 65537, %v9423_v25  ;;  %v834_v14 = vadd.s32 88, %v7272_v35 }
  0x70   : > { %vm7347_vm6 = vcmp.gt.s32.totalorder %v929_v23, 0  ;;  %v7431_v23 = vrot.slane %v1979_v6, 4  ;;  %v1565_v6 = vrot.slane %v1563_v46, 5  ;;  %v1569_v7 = vshrl.u32 %v5792_v48, 16  ;;  %vm1414_vm3 = vmpackc.low %vm7467_vm14, %vm7467_vm14 }
  0x71   : > { %vm1394_vm9 = vmpackc.low %vm7347_vm6, %vm7347_vm6  ;;  %v1551_v40 = vshrl.u32 %v5790_v20, 16  ;;  %v1554_v41 = vshll.u32 %v5790_v20, 16  ;;  %v1572_v9 = vshll.u32 %v5792_v48, 16  ;;  %v1530_v20 = vor.u32 %v1529_v27, %v1526_v26 }
  0x72   : > { %v1426_v1 = vsel %vm1394_vm9, 65537, %v9423_v25  ;;  %vm1404_vm6 = vmpackc.low %vm7412_vm1, %vm7412_vm1  ;;  %v1566_v37 = vor.u32 %v1565_v6, %v1562_v5  ;;  %v1571_v38 = vrot.slane %v1569_v7, 4  ;;  %v1580_v27 = vrot.slane %v1578_v10, 4 }
  0x73   : > { %v5789_v12 = vcombine.low %v1426_v1, %v7288_v47  ;;  %v1436_v43 = vsel %vm1404_vm6, 65537, %v9423_v25  ;;  %vm1406_vm9 = vmpackc.low %vm7443_vm8, %vm7443_vm8  ;;  %v1553_v1 = vrot.slane %v1551_v40, 4  ;;  %v1556_v2 = vrot.slane %v1554_v41, 5 }
  0x74   : > { %v5794_v55 = vcombine.low %v1436_v43, %v7288_v47  ;;  %vm1410_vm1 = vmpackc.low %vm7459_vm12, %vm7459_vm12  ;;  %v1574_v26 = vrot.slane %v1572_v9, 5  ;;  %vm7487_vm6 = vcmp.lt.s32.totalorder %v908_v19, 15  ;;  %v5796_v44 = vcombine.low %v1440_v34, %v7288_v47 }
  0x75   : > { %v1542_v30 = vshrl.u32 %v5789_v12, 16  ;;  %v1545_v31 = vshll.u32 %v5789_v12, 16  ;;  %v1438_v12 = vsel %vm1406_vm9, 65537, %v9423_v25  ;;  %v1442_v40 = vsel %vm1410_vm1, 65537, %v9423_v25  ;;  %vm2432_vm9 = vmpackc.low %vm7487_vm6, %vm7487_vm6 }
  0x76   : > { %v1587_v16 = vshrl.u32 %v5794_v55, 16  ;;  %v1590_v28 = vshll.u32 %v5794_v55, 16  ;;  %v5795_v32 = vcombine.low %v1438_v12, %v7288_v47  ;;  %v1446_v45 = vsel %vm1414_vm3, 65537, %v9423_v25 }
  0x77   : > { %v1544_v52 = vrot.slane %v1542_v30, 4  ;;  %v1547_v0 = vrot.slane %v1545_v31, 5  ;;  %v1557_v31 = vor.u32 %v1556_v2, %v1553_v1  ;;  %vm7493_vm8 = vcmp.lt.s32.totalorder %v922_v29, 15 }
  0x78   : > { %v1589_v39 = vrot.slane %v1587_v16, 4  ;;  %v1592_v43 = vrot.slane %v1590_v28, 5  ;;  %v7499_v48 = vsel %vm9446_vm2, %v7378_v60, %v1530_v20  ;;  %v1596_v49 = vshrl.u32 %v5795_v32, 16  ;;  %vm2434_vm10 = vmpackc.low %vm7493_vm8, %vm7493_vm8 }
  0x79   : > { %v1548_v30 = vor.u32 %v1547_v0, %v1544_v52  ;;  %9538 = vst [vmem:[#allocation11_spill] sm:$0xff] %v7499_v48  ;;  %v1599_v50 = vshll.u32 %v5795_v32, 16  ;;  %v1444_v52 = vsel %vm1412_vm5, 65537, %v9423_v25  ;;  %v7503_v53 = vsel %vm9446_vm2, %v1530_v20, %v1539_v22 }
  0x7a   : > { %9539 = vst [vmem:[#allocation12_spill] sm:$0xff] %v7503_v53  ;;  %v5797_v55 = vcombine.low %v1442_v40, %v7288_v47  ;;  %v7518_v58 = vsel %vm9446_vm2, %v1557_v31, %v1566_v37  ;;  %v1575_v62 = vor.u32 %v1574_v26, %v1571_v38  ;;  %v5799_v0 = vcombine.low %v1446_v45, %v7288_v47  ;;  %v638_v45 = vld [vmem:[%s7534_s11] sm:$0xff] }
  0x7b   : > { %v7506_v54 = vsel %vm9446_vm2, %v1539_v22, %v1548_v30  ;;  %v7515_v60 = vsel %vm9446_vm2, %v1548_v30, %v1557_v31  ;;  %9542 = vst [vmem:[#allocation15_spill] sm:$0xff] %v7518_v58  ;;  %v1584_v1 = vor.u32 %v1583_v36, %v1580_v27  ;;  %v7525_v2 = vor.u32 %v1592_v43, %v1589_v39  ;;  %v7543_v22 = vld [vmem:[%s9418_s2] ss:$0 sm:$0xff]  ;;  %v640_v27 = vld [vmem:[%s7534_s11 + $0x10] sm:$0xff] }
  0x7c   : > { %9540 = vst [vmem:[#allocation13_spill] sm:$0xff] %v7506_v54  ;;  %9541 = vst [vmem:[#allocation14_spill] sm:$0xff] %v7515_v60  ;;  %v1605_v4 = vshrl.u32 %v5796_v44, 16  ;;  %v5798_v5 = vcombine.low %v1444_v52, %v7288_v47  ;;  %v1598_v6 = vrot.slane %v1596_v49, 4  ;;  %v1601_v7 = vrot.slane %v1599_v50, 5 }
  0x7d   : > { %v1608_v8 = vshll.u32 %v5796_v44, 16  ;;  %v2464_v9 = vsel %vm2432_vm9, 65537, %v9423_v25  ;;  %v1614_v10 = vshrl.u32 %v5797_v55, 16  ;;  %v1617_v12 = vshll.u32 %v5797_v55, 16 }
  0x7e   : > { %v2466_v13 = vsel %vm2434_vm10, 65537, %v9423_v25  ;;  %v7537_v16 = vsel %vm9446_vm2, %v1566_v37, %v1575_v62  ;;  %v1632_v17 = vshrl.u32 %v5799_v0, 16  ;;  %v1635_v19 = vshll.u32 %v5799_v0, 16 }
  0x7f   : > { %9543 = vst [vmem:[#allocation16_spill] sm:$0xff] %v7537_v16  ;;  %v836_v20 = vadd.s32 104, %v7272_v35  ;;  %v7546_v28 = vsel %vm9446_vm2, %v1575_v62, %v1584_v1  ;;  %v7550_v29 = vsel %vm9446_vm2, %v1584_v1, %v7525_v2  ;;  %v1623_v30 = vshrl.u32 %v5798_v5, 16  ;;  %v641_v62 = vld [vmem:[%s7534_s11 + $0x18] sm:$0xff] }
  0x80   : > { %9544 = vst [vmem:[#allocation17_spill] sm:$0xff] %v7546_v28  ;;  %9545 = vst [vmem:[#allocation18_spill] sm:$0xff] %v7550_v29  ;;  %v5843_v31 = vcombine.low %v7288_v47, %v2464_v9  ;;  %v1607_v32 = vrot.slane %v1605_v4, 4  ;;  %v1610_v34 = vrot.slane %v1608_v8, 5  ;;  %v1626_v37 = vshll.u32 %v5798_v5, 16  ;;  %v639_v8 = vld [vmem:[%s7534_s11 + $0x8] sm:$0xff] }
  0x81   : > { %v5844_v38 = vcombine.low %v7288_v47, %v2466_v13  ;;  %v7555_v36 = vor.u32 %v1601_v7, %v1598_v6  ;;  %v1616_v39 = vrot.slane %v1614_v10, 4  ;;  %v1619_v40 = vrot.slane %v1617_v12, 5 }
  0x82   : > { %v936_v41 = vand.u32 15, %v834_v14  ;;  %vm9492_vm12 = vcmask 1043456   ;;  %vm803_vm13 = vcmask 523268   ;;  %v1634_v46 = vrot.slane %v1632_v17, 4 }
  0x83   : > { %v1637_v49 = vrot.slane %v1635_v19, 5  ;;  %v950_v50 = vand.u32 15, %v836_v20  ;;  %v1625_v0 = vrot.slane %v1623_v30, 4  ;;  %v2564_v1 = vshrl.u32 %v5843_v31, 16 }
  0x84   : > { %v2567_v4 = vshll.u32 %v5843_v31, 16  ;;  %v1628_v9 = vrot.slane %v1626_v37, 5  ;;  %v2573_v10 = vshrl.u32 %v5844_v38, 16  ;;  %v2576_v14 = vshll.u32 %v5844_v38, 16 }
  0x85   : > { %vm7564_vm14 = vcmp.lt.s32.totalorder %v936_v41, 15  ;;  %v2723_v20 = vshrl.u32 %v7376_v59, 16  ;;  %v2726_v30 = vshll.u32 %v7376_v59, 16  ;;  %vm7570_vm15 = vcmp.lt.s32.totalorder %v950_v50, 15 }
  0x86   : > { %v7577_v41 = vsel %vm9446_vm2, %v7525_v2, %v7555_v36  ;;  %vm2436_vm1 = vmpackc.low %vm7564_vm14, %vm7564_vm14  ;;  %vm9444_vm5 = vcmp.ne.s16.totalorder %v7394_v3, 0  ;;  %vm1642_vm8 = vcmp.ne.s16.totalorder %v7408_v11, 0  ;;  %vm9468_vm9 = vcmp.ne.s16.totalorder %v7499_v48, 0 }
  0x87   : > { %9550 = vst [vmem:[#allocation19_spill] sm:$0xff] %v7577_v41  ;;  %vm2438_vm3 = vmpackc.low %vm7570_vm15, %vm7570_vm15  ;;  %vm9466_vm14 = vcmp.ne.s16.totalorder %v7503_v53, 0  ;;  %vm9469_vm15 = vcmp.ne.s16.totalorder %v7518_v58, 0 }
 0x109   : > { %v6225_v26 = vpop.f32.mrb[0].mxu0 }
 0x10a   : > { %v520_v43 = vadd.f32 %v6225_v26, %v7543_v22  ;;  %v511_v44 = vpop.f32.mrb[1].mxu0  ;;  %v1611_v26 = vor.u32 %v1610_v34, %v1607_v32  ;;  %v644_v32 = vld [vmem:[%s7534_s11 + $0x30] sm:$0xff]  ;;  %v1629_v34 = vor.u32 %v1628_v9, %v1625_v0 }
 0x10b   : > { %v512_v52 = vadd.f32 %v7543_v22, %v511_v44  ;;  %v6226_v55 = vpop.f32.mrb[2].mxu0  ;;  %v1620_v44 = vor.u32 %v1619_v40, %v1616_v39 }
 0x10c   : > { %v672_v5 = vadd.f32 %v640_v27, %v520_v43  ;;  %v523_v6 = vadd.f32 %v6226_v55, %v7543_v22  ;;  %v514_v7 = vpop.f32.mrb[3].mxu0  ;;  %v2566_v27 = vrot.slane %v2564_v1, 3  ;;  %v2569_v43 = vrot.slane %v2567_v4, 4 }
 0x10d   : > { %v670_v12 = vadd.f32 %v638_v45, %v512_v52  ;;  %v515_v13 = vadd.f32 %v7543_v22, %v514_v7  ;;  %v7579_v45 = vor.u32 %v1637_v49, %v1634_v46  ;;  %v2575_v52 = vrot.slane %v2573_v10, 3  ;;  %v642_v46 = vld [vmem:[%s7534_s11 + $0x20] sm:$0xff] }
 0x10e   : > { %v673_v19 = vadd.f32 %v641_v62, %v523_v6  ;;  %v2578_v55 = vrot.slane %v2576_v14, 4  ;;  %v7592_v49 = vrot.slane %v2723_v20, 4  ;;  %v7594_v62 = vrot.slane %v2726_v30, 5 }
 0x10f   : > { %v671_v37 = vadd.f32 %v639_v8, %v515_v13  ;;  %9551 = vst [vmem:[#allocation20_spill] sm:$0xff] %v7579_v45  ;;  %v2570_v6 = vor.u32 %v2569_v43, %v2566_v27  ;;  %v2468_v7 = vsel %vm2436_vm1, 65537, %v9423_v25  ;;  %v2470_v13 = vsel %vm2438_vm3, 65537, %v9423_v25 }
 0x110   : > { %v723_v38 = vpack.c.bf16 %v673_v19, %v672_v5  ;;  %9552 = vst [vmem:[#allocation21_spill] sm:$0xff] %v7592_v49  ;;  %9553 = vst [vmem:[#allocation22_spill] sm:$0xff] %v7594_v62  ;;  %v645_v5 = vld [vmem:[%s7534_s11 + $0x38] sm:$0xff]  ;;  %v838_v14 = vadd.s32 120, %v7272_v35  ;;  %v7618_v30 = vor.u32 %v2578_v55, %v2575_v52  ;;  %v7623_v31 = vsel %vm9446_vm2, %v7555_v36, %v1611_v26 }
 0x111   : > { %v722_v59 = vpack.c.bf16 %v671_v37, %v670_v12  ;;  %v6229_v50 = vpop.f32.mrb[4].mxu0  ;;  %v643_v12 = vld [vmem:[%s7534_s11 + $0x28] sm:$0xff]  ;;  %9554 = vst [vmem:[#allocation23_spill] sm:$0xff] %v7623_v31  ;;  %v7626_v27 = vsel %vm9446_vm2, %v1611_v26, %v1620_v44  ;;  %v7629_v43 = vcombine.low %v7288_v47, %v2468_v7  ;;  %v7644_v26 = vsel %vm9446_vm2, %v1629_v34, %v7579_v45 }
 0x112   : > { %v7588_v2 = vrot.slane %v723_v38, 4  ;;  %v536_v39 = vadd.f32 %v6229_v50, %v7543_v22  ;;  %v527_v40 = vpop.f32.mrb[5].mxu0  ;;  %9555 = vst [vmem:[#allocation24_spill] sm:$0xff] %v7626_v27  ;;  %v7637_v50 = vsel %vm1974_vm11, %v7333_v24, %v7380_v61  ;;  %9558 = vst [vmem:[#allocation27_spill] sm:$0xff] %v7644_v26  ;;  %v964_v52 = vand.u32 15, %v838_v14  ;;  %v655_v24 = vld [vmem:[%s7534_s11 + $0x88] sm:$0xff] }
 0x113   : > { %v755_v1 = vrot.slane %v722_v59, 4  ;;  %v528_v0 = vadd.f32 %v7543_v22, %v527_v40  ;;  %v6230_v4 = vpop.f32.mrb[6].mxu0  ;;  %v7632_v59 = vsel %vm9446_vm2, %v1620_v44, %v1629_v34  ;;  %9557 = vst [vmem:[#allocation26_spill] sm:$0xff] %v7637_v50  ;;  %v7647_v55 = vadd.s32 136, %v7272_v35  ;;  %v648_v40 = vld [vmem:[%s7534_s11 + $0x50] sm:$0xff] }
 0x114   : > { %v676_v8 = vadd.f32 %v644_v32, %v536_v39  ;;  %v539_v9 = vadd.f32 %v6230_v4, %v7543_v22  ;;  %v530_v10 = vpop.f32.mrb[7].mxu0  ;;  %9556 = vst [vmem:[#allocation25_spill] sm:$0xff] %v7632_v59  ;;  %v7640_v32 = vcombine.low %v7288_v47, %v2470_v13  ;;  %v7658_v34 = vsel %vm1974_vm11, %v2570_v6, %v7618_v30  ;;  %v647_v13 = vld [vmem:[%s7534_s11 + $0x48] sm:$0xff] }
 0x115   : > { %v757_v17 = vsel %vm9492_vm12, %v755_v1, %v7588_v2  ;;  %804 = vst.msk [vmem:[#allocation2 + $0x8] sm:$0xf0] %vm803_vm13, %v755_v1  ;;  %v674_v19 = vadd.f32 %v642_v46, %v528_v0  ;;  %v531_v20 = vadd.f32 %v7543_v22, %v530_v10  ;;  %v7654_v46 = vsel %vm1974_vm11, %v7385_v63, %v2570_v6  ;;  %v649_v63 = vld [vmem:[%s7534_s11 + $0x58] sm:$0xff] }
 0x116   : > { %805 = vst.msk [vmem:[#allocation2 + $0x10] sm:$0xff] %vm702_vm0, %v757_v17  ;;  %v677_v37 = vadd.f32 %v645_v5, %v539_v9  ;;  %9559 = vst [vmem:[#allocation28_spill] sm:$0xff] %v7654_v46  ;;  %v646_v5 = vld [vmem:[%s7534_s11 + $0x40] sm:$0xff]  ;;  %v2582_v7 = vshrl.u32 %v7629_v43, 16  ;;  %vm7674_vm6 = vcmp.lt.s32.totalorder %v964_v52, 15  ;;  %vm9467_vm13 = vcmp.ne.s16.totalorder %v7506_v54, 0 }
 0x117   : > { %v675_v38 = vadd.f32 %v643_v12, %v531_v20  ;;  %9560 = vst [vmem:[#allocation29_spill] sm:$0xff] %v7658_v34  ;;  %vm2440_vm10 = vmpackc.low %vm7674_vm6, %vm7674_vm6  ;;  %vm9470_vm1 = vcmp.ne.s16.totalorder %v7515_v60, 0  ;;  %vm9454_vm3 = vcmp.ne.s16.totalorder %v7546_v28, 0  ;;  %vm9455_vm6 = vcmp.ne.s16.totalorder %v7537_v16, 0 }
 0x118   : > { %v725_v36 = vpack.c.bf16 %v677_v37, %v676_v8  ;;  %v2585_v8 = vshll.u32 %v7629_v43, 16  ;;  %v7717_v57 = vrot.slane %v2582_v7, 3  ;;  %v6959_v7 = vld [vmem:[%s9419_s3 + $0x10] sm:$0xff]   ;;  %vm820_vm2 = vcmask 519168  }
 0x119   : > { %v724_v44 = vpack.c.bf16 %v675_v38, %v674_v19  ;;  %v6233_v39 = vpop.f32.mrb[8].mxu0  ;;  %vm9479_vm7 = vcmp.ne.s16.totalorder %v7626_v27, 0 }
 0x11a   : > { %v7660_v1 = vrot.slane %v725_v36, 4  ;;  %v552_v0 = vadd.f32 %v6233_v39, %v7543_v22  ;;  %v543_v4 = vpop.f32.mrb[9].mxu0 }
 0x11b   : > { %v758_v9 = vrot.slane %v724_v44, 4  ;;  %v544_v10 = vadd.f32 %v7543_v22, %v543_v4  ;;  %v6234_v12 = vpop.f32.mrb[10].mxu0 }
 0x11c   : > { %v680_v17 = vadd.f32 %v648_v40, %v552_v0  ;;  %v555_v19 = vadd.f32 %v6234_v12, %v7543_v22  ;;  %v546_v20 = vpop.f32.mrb[11].mxu0  ;;  %v7672_v37 = vld [vmem:[#allocation2 + $0x8] sm:$0xff] }
 0x11d   : > { %v3139_v38 = vld [vmem:[#allocation2 + $0x8] sm:$0xf8]  ;;  %v759_v44 = vsel %vm9492_vm12, %v7588_v2, %v758_v9  ;;  %v761_v39 = vsel %vm9492_vm12, %v758_v9, %v7660_v1  ;;  %v678_v4 = vadd.f32 %v646_v5, %v544_v10  ;;  %v547_v40 = vadd.f32 %v7543_v22, %v546_v20  ;;  %v7684_v0 = vld [vmem:[#allocation2 + $0x10] sm:$0xff] }
 0x11e   : > { %806 = vst.msk [vmem:[#allocation2 + $0x18] sm:$0xff] %vm702_vm0, %v759_v44  ;;  %807 = vst.msk [vmem:[#allocation2 + $0x20] sm:$0xff] %vm702_vm0, %v761_v39  ;;  %v681_v52 = vadd.f32 %v649_v63, %v555_v19  ;;  %v1709_v12 = vrot.slane %v7672_v37, 4  ;;  %v7690_v61 = vrot.slane %v7684_v0, 4  ;;  %v3156_v2 = vsel %vm9445_vm4, %v3139_v38, 0 }
 0x11f   : > { %v679_v5 = vadd.f32 %v647_v13, %v547_v40  ;;  %v3157_v9 = vsel %vm9444_vm5, %v7684_v0, 0  ;;  %v3182_v10 = vshrl.u32 %v3156_v2, 16  ;;  %v3185_v63 = vshll.u32 %v3156_v2, 16  ;;  %v6958_v13 = vld [vmem:[%s9419_s3 + $0x8] sm:$0xff]   ;;  %v652_v2 = vld [vmem:[%s7534_s11 + $0x70] sm:$0xff] }
 0x120   : > { %v727_v19 = vpack.c.bf16 %v681_v52, %v680_v17  ;;  %v1710_v20 = vsel %vm9492_vm12, %v1708_v56, %v1709_v12  ;;  %v1712_v38 = vsel %vm9492_vm12, %v1709_v12, %v7690_v61  ;;  %v3190_v44 = vshrl.u32 %v3157_v9, 16 }
 0x121   : > { %v726_v39 = vpack.c.bf16 %v679_v5, %v678_v4  ;;  %6263 = vmatprep.mubr.msk.bf16.mxu0 %vm702_vm0, %v1710_v20  ;;  %v6237_v40 = vpop.f32.mrb[12].mxu0  ;;  %v3184_v17 = vrot.slane %v3182_v10, 3  ;;  %v3187_v52 = vrot.slane %v3185_v63, 4  ;;  %v3193_v42 = vshll.u32 %v3157_v9, 16  ;;  %v650_v5 = vld [vmem:[%s7534_s11 + $0x60] sm:$0xff]  ;;  %v653_v63 = vld [vmem:[%s7534_s11 + $0x78] sm:$0xff] }
 0x122   : > { %v7712_v56 = vrot.slane %v727_v19, 4  ;;  %v568_v12 = vadd.f32 %v6237_v40, %v7543_v22  ;;  %6264 = vmatmul.mubr.msk.bf16.vlgmr.msra.gmra.mrb[32].mxu0 %vm702_vm0, %v1712_v38  ;;  %v559_v4 = vpop.f32.mrb[13].mxu0  ;;  %v3192_v20 = vrot.slane %v3190_v44, 3  ;;  %v7722_v19 = vrot.slane %v2585_v8, 4  ;;  %v651_v38 = vld [vmem:[%s7534_s11 + $0x68] sm:$0xff] }
 0x123   : > { %v762_v6 = vrot.slane %v726_v39, 4  ;;  %v560_v10 = vadd.f32 %v7543_v22, %v559_v4  ;;  %v6238_v9 = vpop.f32.mrb[14].mxu0  ;;  %v3195_v14 = vrot.slane %v3193_v42, 4  ;;  %6296 = vmatpush3.bf16.msra.mxu0 %v7295_v51  ;;  %v3188_v21 = vor.u32 %v3187_v52, %v3184_v17 }
 0x124   : > { %v684_v43 = vadd.f32 %v652_v2, %v568_v12  ;;  %v571_v40 = vadd.f32 %v6238_v9, %v7543_v22  ;;  %v562_v25 = vpop.f32.mrb[15].mxu0  ;;  %6297 = vmatprep.subr.bf16.mxu0 %v6958_v13  ;;  %v9563_v44 = vmov 0   ;;  %vm9491_vm4 = vcmp.ne.s16.totalorder %v7550_v29, 0 }
 0x125   : > { %v2472_v51 = vsel %vm2440_vm10, 65537, %v9563_v44  ;;  %v763_v8 = vsel %vm9492_vm12, %v7660_v1, %v762_v6  ;;  %v765_v39 = vsel %vm9492_vm12, %v762_v6, %v7712_v56  ;;  %v682_v2 = vadd.f32 %v650_v5, %v560_v10  ;;  %v7741_v52 = vld [vmem:[#allocation2 + $0x18] sm:$0xff]  ;;  %v7743_v42 = vld [vmem:[#allocation2 + $0x20] sm:$0xff] }
 0x126   : > { %v563_v17 = vadd.f32 %v7543_v22, %v562_v25  ;;  %808 = vst.msk [vmem:[#allocation2 + $0x28] sm:$0xff] %vm702_vm0, %v763_v8  ;;  %809 = vst.msk [vmem:[#allocation2 + $0x30] sm:$0xff] %vm702_vm0, %v765_v39  ;;  %v685_v36 = vadd.f32 %v653_v63, %v571_v40  ;;  %v7747_v12 = vor.u32 %v3195_v14, %v3192_v20  ;;  %v1713_v4 = vrot.slane %v7741_v52, 4 }
 0x127   : > { %v9426_v1 = vrot.slane %v7743_v42, 4  ;;  %v3158_v25 = vsel %vm1642_vm8, %v7741_v52, 0  ;;  %6298 = vmatpush3.bf16.msra.mxu0 %v6958_v13  ;;  %v7758_v5 = vsel %vm9444_vm5, %v7672_v37, 0  ;;  %v7761_v14 = vcombine.low %v7288_v47, %v2472_v51  ;;  %v6961_v37 = vld [vmem:[%s9419_s3 + $0x18] sm:$0xff]  }
 0x128   : > { %v683_v6 = vadd.f32 %v651_v38, %v563_v17  ;;  %v729_v20 = vpack.c.bf16 %v685_v36, %v684_v43  ;;  %v3197_v10 = vsel %vm1974_vm11, %v3188_v21, %v7747_v12  ;;  %v7767_v9 = vsel %vm9492_vm12, %v7690_v61, %v1713_v4  ;;  %6299 = vmatprep.subr.bf16.mxu0 %v6959_v7  ;;  %v656_v21 = vld [vmem:[%s7534_s11 + $0x90] sm:$0xff]  ;;  %v654_v17 = vld [vmem:[%s7534_s11 + $0x80] sm:$0xff] }
 0x129   : > { %9564 = vst [vmem:[#allocation30_spill] sm:$0xff] %v7767_v9  ;;  %v7772_v13 = vsel %vm9492_vm12, %v1713_v4, %v9426_v1  ;;  %6383 = vmatprep.mubr.msk.bf16.mxu1 %vm702_vm0, %v3197_v10  ;;  %v6241_v43 = vpop.f32.mrb[16].mxu0  ;;  %6267 = vmatprep.mubr.msk.bf16.mxu0 %vm702_vm0, %v7767_v9  ;;  %v3199_v40 = vshrl.u32 %v3158_v25, 16  ;;  %v3202_v38 = vshll.u32 %v3158_v25, 16  ;;  %v3159_v51 = vsel %vm9468_vm9, %v7743_v42, 0  ;;  %v657_v1 = vld [vmem:[%s7534_s11 + $0x98] sm:$0xff] }
 0x12a   : > { %9565 = vst [vmem:[#allocation31_spill] sm:$0xff] %v7772_v13  ;;  %v728_v63 = vpack.c.bf16 %v683_v6, %v682_v2  ;;  %v7784_v8 = vrot.slane %v729_v20, 4  ;;  %v584_v39 = vadd.f32 %v6241_v43, %v7543_v22  ;;  %v575_v2 = vpop.f32.mrb[17].mxu0  ;;  %6268 = vmatmul.mubr.msk.bf16.gmra.mrb[36].mxu0 %vm702_vm0, %v7772_v13  ;;  %v3208_v36 = vshrl.u32 %v3159_v51, 16 }
 0x12b   : > { %v3211_v4 = vshll.u32 %v3159_v51, 16  ;;  %v576_v10 = vadd.f32 %v7543_v22, %v575_v2  ;;  %v6242_v25 = vpop.f32.mrb[18].mxu0  ;;  %v3201_v3 = vrot.slane %v3199_v40, 3  ;;  %v3204_v49 = vrot.slane %v3202_v38, 4  ;;  %6300 = vmatpush3.bf16.msra.mxu0 %v6959_v7 }
 0x12c   : > { %v766_v6 = vrot.slane %v728_v63, 4  ;;  %v688_v20 = vadd.f32 %v656_v21, %v584_v39  ;;  %v587_v62 = vadd.f32 %v6242_v25, %v7543_v22  ;;  %v578_v43 = vpop.f32.mrb[19].mxu0  ;;  %v3210_v34 = vrot.slane %v3208_v36, 3  ;;  %6301 = vmatprep.subr.bf16.mxu0 %v6961_v37  ;;  %v7798_v63 = vld [vmem:[%s9419_s3 + $0x40] sm:$0xff]  }
 0x12d   : > { %v3213_v46 = vrot.slane %v3211_v4, 4  ;;  %v686_v21 = vadd.f32 %v654_v17, %v576_v10  ;;  %v579_v38 = vadd.f32 %v7543_v22, %v578_v43  ;;  %v7805_v51 = vld [vmem:[#allocation2 + $0x28] sm:$0xff]  ;;  %v7807_v39 = vld [vmem:[#allocation2 + $0x30] sm:$0xff]  ;;  %v3205_v36 = vor.u32 %v3204_v49, %v3201_v3 }
 0x12e   : > { %v767_v40 = vsel %vm9492_vm12, %v7712_v56, %v766_v6  ;;  %v769_v7 = vsel %vm9492_vm12, %v766_v6, %v7784_v8  ;;  %v689_v2 = vadd.f32 %v657_v1, %v587_v62  ;;  %v1717_v56 = vrot.slane %v7805_v51, 4  ;;  %v6955_v3 = vld [vmem:[%s9419_s3 + $0x88] sm:$0xff]  }
 0x12f   : > { %810 = vst.msk [vmem:[#allocation2 + $0x38] sm:$0xff] %vm702_vm0, %v767_v40  ;;  %811 = vst.msk [vmem:[#allocation2 + $0x40] sm:$0xff] %vm702_vm0, %v769_v7  ;;  %v7811_v4 = vor.u32 %v3213_v46, %v3210_v34  ;;  %v687_v17 = vadd.f32 %v655_v24, %v579_v38  ;;  %v9434_v6 = vrot.slane %v7807_v39, 4  ;;  %v3160_v10 = vsel %vm9466_vm14, %v7805_v51, 0  ;;  %6302 = vmatpush3.bf16.msra.mxu0 %v6961_v37  ;;  %v660_v37 = vld [vmem:[%s7534_s11 + $0xb0] sm:$0xff] }
 0x130   : > { %v3161_v25 = vsel %vm9467_vm13, %v7807_v39, 0  ;;  %v731_v49 = vpack.c.bf16 %v689_v2, %v688_v20  ;;  %v3206_v62 = vsel %vm1974_vm11, %v7747_v12, %v3205_v36  ;;  %v9566_v46 = vrot.slane %v7743_v42, 4  ;;  %6335 = vmatprep.subr.bf16.mxu0 %v7798_v63  ;;  %v658_v2 = vld [vmem:[%s7534_s11 + $0xa0] sm:$0xff] }
 0x131   : > { %v3215_v24 = vsel %vm1974_vm11, %v3205_v36, %v7811_v4  ;;  %v730_v1 = vpack.c.bf16 %v687_v17, %v686_v21  ;;  %6384 = vmatmul.mubr.msk.bf16.vlgmr.msra.gmra.mrb[0].mxu1 %vm702_vm0, %v3206_v62  ;;  %v6245_v43 = vpop.f32.mrb[20].mxu0  ;;  %v7842_v12 = vsel %vm9492_vm12, %v1717_v56, %v9434_v6  ;;  %v3217_v20 = vshrl.u32 %v3160_v10, 16 }
 0x132   : > { %v7832_v34 = vsel %vm9492_vm12, %v9566_v46, %v1717_v56  ;;  %9568 = vst [vmem:[#allocation33_spill] sm:$0xff] %v7842_v12  ;;  %v3220_v40 = vshll.u32 %v3160_v10, 16  ;;  %v7844_v7 = vrot.slane %v731_v49, 4  ;;  %6416 = vmatpush3.bf16.msra.mxu1 %v7269_v33  ;;  %6387 = vmatprep.mubr.msk.bf16.mxu1 %vm702_vm0, %v3215_v24  ;;  %v600_v21 = vadd.f32 %v6245_v43, %v7543_v22  ;;  %v591_v38 = vpop.f32.mrb[21].mxu0  ;;  %v661_v10 = vld [vmem:[%s7534_s11 + $0xb8] sm:$0xff]  ;;  %v6956_v33 = vld [vmem:[%s9419_s3 + $0x90] sm:$0xff]  }
 0x133   : > { %9567 = vst [vmem:[#allocation32_spill] sm:$0xff] %v7832_v34  ;;  %6271 = vmatprep.mubr.msk.bf16.mxu0 %vm702_vm0, %v7832_v34  ;;  %v3226_v36 = vshrl.u32 %v3161_v25, 16  ;;  %v3229_v17 = vshll.u32 %v3161_v25, 16  ;;  %v770_v62 = vrot.slane %v730_v1, 4  ;;  %v592_v46 = vadd.f32 %v7543_v22, %v591_v38  ;;  %v6246_v56 = vpop.f32.mrb[22].mxu0  ;;  %6417 = vmatprep.subr.bf16.mxu1 %v6955_v3  ;;  %v659_v25 = vld [vmem:[%s7534_s11 + $0xa8] sm:$0xff] }
 0x134   : > { %6272 = vmatmul.mubr.msk.bf16.gmra.mrb[40].mxu0 %vm702_vm0, %v7842_v12  ;;  %v3219_v49 = vrot.slane %v3217_v20, 3  ;;  %v3222_v6 = vrot.slane %v3220_v40, 4  ;;  %v692_v24 = vadd.f32 %v660_v37, %v600_v21  ;;  %v603_v43 = vadd.f32 %v6246_v56, %v7543_v22  ;;  %v594_v34 = vpop.f32.mrb[23].mxu0 }
 0x135   : > { %v3228_v1 = vrot.slane %v3226_v36, 3  ;;  %v3231_v13 = vrot.slane %v3229_v17, 4  ;;  %v771_v38 = vsel %vm9492_vm12, %v7784_v8, %v770_v62  ;;  %v773_v20 = vsel %vm9492_vm12, %v770_v62, %v7844_v7 }
 0x136   : > { %v690_v40 = vadd.f32 %v658_v2, %v592_v46  ;;  %v595_v12 = vadd.f32 %v7543_v22, %v594_v34  ;;  %v7865_v9 = vld [vmem:[#allocation2 + $0x38] sm:$0xff]  ;;  %v7867_v37 = vld [vmem:[#allocation2 + $0x40] sm:$0xff]  ;;  %812 = vst.msk [vmem:[#allocation2 + $0x48] sm:$0xff] %vm702_vm0, %v771_v38  ;;  %813 = vst.msk [vmem:[#allocation2 + $0x50] sm:$0xff] %vm702_vm0, %v773_v20  ;;  %v693_v21 = vadd.f32 %v661_v10, %v603_v43  ;;  %6418 = vmatpush3.bf16.msra.mxu1 %v6955_v3 }
 0x137   : > { %v3223_v36 = vor.u32 %v3222_v6, %v3219_v49  ;;  %v7871_v17 = vor.u32 %v3231_v13, %v3228_v1  ;;  %v1721_v8 = vrot.slane %v7865_v9, 4  ;;  %v9439_v34 = vrot.slane %v7867_v37, 4  ;;  %6419 = vmatprep.subr.bf16.mxu1 %v6956_v33  ;;  %v6960_v13 = vld [vmem:[%s9419_s3 + $0x98] sm:$0xff]  }
 0x138   : > { %v691_v2 = vadd.f32 %v659_v25, %v595_v12  ;;  %v3162_v62 = vsel %vm9470_vm1, %v7865_v9, 0  ;;  %v3163_v46 = vsel %vm9469_vm15, %v7867_v37, 0  ;;  %v733_v6 = vpack.c.bf16 %v693_v21, %v692_v24  ;;  %v664_v25 = vld [vmem:[%s7534_s11 + $0xd0] sm:$0xff]  ;;  %v662_v21 = vld [vmem:[%s7534_s11 + $0xc0] sm:$0xff] }
 0x139   : > { %v3224_v3 = vsel %vm1974_vm11, %v7811_v4, %v3223_v36  ;;  %v3233_v12 = vsel %vm1974_vm11, %v3223_v36, %v7871_v17  ;;  %v9569_v56 = vrot.slane %v7807_v39, 4  ;;  %v6249_v43 = vpop.f32.mrb[24].mxu0  ;;  %v7901_v4 = vsel %vm9492_vm12, %v1721_v8, %v9439_v34 }
 0x13a   : > { %v732_v49 = vpack.c.bf16 %v691_v2, %v690_v40  ;;  %6388 = vmatmul.mubr.msk.bf16.gmra.mrb[4].mxu1 %vm702_vm0, %v3224_v3  ;;  %9571 = vst [vmem:[#allocation35_spill] sm:$0xff] %v7901_v4  ;;  %v3235_v24 = vshrl.u32 %v3162_v62, 16  ;;  %v3238_v1 = vshll.u32 %v3162_v62, 16  ;;  %v7903_v38 = vrot.slane %v733_v6, 4  ;;  %v607_v40 = vpop.f32.mrb[25].mxu0  ;;  %v665_v62 = vld [vmem:[%s7534_s11 + $0xd8] sm:$0xff] }
 0x13b   : > { %v7892_v10 = vsel %vm9492_vm12, %v9569_v56, %v1721_v8  ;;  %6391 = vmatprep.mubr.msk.bf16.mxu1 %vm702_vm0, %v3233_v12  ;;  %v616_v20 = vadd.f32 %v6249_v43, %v7543_v22  ;;  %v3244_v36 = vshrl.u32 %v3163_v46, 16  ;;  %v3247_v2 = vshll.u32 %v3163_v46, 16  ;;  %6420 = vmatpush3.bf16.msra.mxu1 %v6956_v33  ;;  %v6250_v8 = vpop.f32.mrb[26].mxu0  ;;  %v7915_v12 = vld [vmem:[%s9419_s3 + $0xa0] sm:$0xff]  }
 0x13c   : > { %9570 = vst [vmem:[#allocation34_spill] sm:$0xff] %v7892_v10  ;;  %6275 = vmatprep.mubr.msk.bf16.mxu0 %vm702_vm0, %v7892_v10  ;;  %v774_v3 = vrot.slane %v732_v49, 4  ;;  %v608_v56 = vadd.f32 %v7543_v22, %v607_v40  ;;  %v3237_v6 = vrot.slane %v3235_v24, 3  ;;  %v3240_v34 = vrot.slane %v3238_v1, 4  ;;  %6421 = vmatprep.subr.bf16.mxu1 %v6960_v13  ;;  %9572 = vst [vmem:[#allocation36_spill] sm:$0xff] %v7915_v12  ;;  %v610_v33 = vpop.f32.mrb[27].mxu0 }
 0x13d   : > { %6276 = vmatmul.mubr.msk.bf16.gmra.mrb[44].mxu0 %vm702_vm0, %v7901_v4  ;;  %v696_v43 = vadd.f32 %v664_v25, %v616_v20  ;;  %v619_v46 = vadd.f32 %v6250_v8, %v7543_v22  ;;  %v663_v49 = vld [vmem:[%s7534_s11 + $0xc8] sm:$0xff]  ;;  %v3246_v10 = vrot.slane %v3244_v36, 3  ;;  %v3249_v40 = vrot.slane %v3247_v2, 4  ;;  %v7927_v25 = vld [vmem:[#allocation2 + $0x50] sm:$0xff] }
 0x13e   : > { %vm9490_vm10 = vcmp.ne.s16.totalorder %v7577_v41, 0  ;;  %v775_v4 = vsel %vm9492_vm12, %v7844_v7, %v774_v3  ;;  %v777_v24 = vsel %vm9492_vm12, %v774_v3, %v7903_v38  ;;  %v694_v1 = vadd.f32 %v662_v21, %v608_v56  ;;  %v7925_v50 = vld [vmem:[#allocation2 + $0x48] sm:$0xff]  ;;  %9573 = vst [vmem:[#allocation37_spill] sm:$0xff] %v7927_v25 }
 0x13f   : > { %v611_v15 = vadd.f32 %v7543_v22, %v610_v33  ;;  %v9574_v20 = vand.u32 15, %v7647_v55  ;;  %814 = vst.msk [vmem:[#allocation2 + $0x58] sm:$0xff] %vm702_vm0, %v775_v4  ;;  %815 = vst.msk [vmem:[#allocation2 + $0x60] sm:$0xff] %vm702_vm0, %v777_v24  ;;  %v697_v7 = vadd.f32 %v665_v62, %v619_v46  ;;  %v3241_v2 = vor.u32 %v3240_v34, %v3237_v6  ;;  %v668_v33 = vld [vmem:[%s7534_s11 + $0xf0] sm:$0xff] }
 0x140   : > { %v3250_v3 = vor.u32 %v3249_v40, %v3246_v10  ;;  %v1725_v21 = vrot.slane %v7925_v50, 4  ;;  %6422 = vmatpush3.bf16.msra.mxu1 %v6960_v13  ;;  %v1727_v55 = vrot.slane %v7927_v25, 4  ;;  %v3164_v8 = vsel %vm9455_vm6, %v7925_v50, 0 }
 0x141   : > { %vm7931_vm5 = vcmp.lt.s32.totalorder %v9574_v20, 15  ;;  %v695_v56 = vadd.f32 %v663_v49, %v611_v15  ;;  %v3165_v4 = vsel %vm9454_vm3, %v7927_v25, 0  ;;  %6455 = vmatprep.subr.bf16.mxu1 %v7915_v12  ;;  %v735_v34 = vpack.c.bf16 %v697_v7, %v696_v43  ;;  %v6253_v46 = vpop.f32.mrb[28].mxu0  ;;  %v666_v20 = vld [vmem:[%s7534_s11 + $0xe0] sm:$0xff]  ;;  %v667_v25 = vld [vmem:[%s7534_s11 + $0xe8] sm:$0xff] }
 0x142   : > { %v3242_v10 = vsel %vm1974_vm11, %v7871_v17, %v3241_v2  ;;  %v3251_v13 = vsel %vm1974_vm11, %v3241_v2, %v3250_v3  ;;  %v9577_v15 = vrot.slane %v7867_v37, 4  ;;  %v7960_v43 = vsel %vm9492_vm12, %v1725_v21, %v1727_v55  ;;  %vm2442_vm6 = vmpackc.low %vm7931_vm5, %vm7931_vm5 }
 0x143   : > { %v734_v6 = vpack.c.bf16 %v695_v56, %v694_v1  ;;  %6392 = vmatmul.mubr.msk.bf16.gmra.mrb[8].mxu1 %vm702_vm0, %v3242_v10  ;;  %9579 = vst [vmem:[#allocation39_spill] sm:$0xff] %v7960_v43  ;;  %v3253_v17 = vshrl.u32 %v3164_v8, 16  ;;  %v3256_v49 = vshll.u32 %v3164_v8, 16  ;;  %v7962_v40 = vrot.slane %v735_v34, 4  ;;  %v623_v1 = vpop.f32.mrb[29].mxu0 }
 0x144   : > { %v7953_v62 = vsel %vm9492_vm12, %v9577_v15, %v1725_v21  ;;  %6395 = vmatprep.mubr.msk.bf16.mxu1 %vm702_vm0, %v3251_v13  ;;  %v632_v24 = vadd.f32 %v6253_v46, %v7543_v22  ;;  %v3262_v7 = vshrl.u32 %v3165_v4, 16  ;;  %v3265_v2 = vshll.u32 %v3165_v4, 16  ;;  %v6254_v21 = vpop.f32.mrb[30].mxu0  ;;  %v669_v15 = vld [vmem:[%s7534_s11 + $0xf8] sm:$0xff]  ;;  %s5754_s11 = sshll.u32 %s259_s14, 8 }
 0x145   : > { %9578 = vst [vmem:[#allocation38_spill] sm:$0xff] %v7953_v62  ;;  %6279 = vmatprep.mubr.msk.bf16.mxu0 %vm702_vm0, %v7953_v62  ;;  %v778_v56 = vrot.slane %v734_v6, 4  ;;  %v624_v10 = vadd.f32 %v7543_v22, %v623_v1  ;;  %v3255_v8 = vrot.slane %v3253_v17, 3  ;;  %v3258_v34 = vrot.slane %v3256_v49, 4  ;;  %v626_v12 = vpop.f32.mrb[31].mxu0  ;;  %s9220_s17 = scalar_lea.vmem [#allocation3], %s5754_s11 }
 0x146   : > { %6280 = vmatmul.mubr.msk.bf16.gmra.mrb[48].mxu0 %vm702_vm0, %v7960_v43  ;;  %v700_v62 = vadd.f32 %v668_v33, %v632_v24  ;;  %v635_v13 = vadd.f32 %v6254_v21, %v7543_v22  ;;  %v3264_v46 = vrot.slane %v3262_v7, 3  ;;  %v3267_v28 = vrot.slane %v3265_v2, 4  ;;  %v7979_v17 = vld [vmem:[#allocation2 + $0x58] sm:$0xff]  ;;  %v7981_v33 = vld [vmem:[#allocation2 + $0x60] sm:$0xff]  ;;  %s5676_s19 = sshll.u32 %s9220_s17, 4  ;;  %s9364_s19 = int_to_ptr.vmem [resolvable:$true] %s5676_s19 }
 0x147   : > { %v779_v4 = vsel %vm9492_vm12, %v7903_v38, %v778_v56  ;;  %v781_v6 = vsel %vm9492_vm12, %v778_v56, %v7962_v40  ;;  %v698_v1 = vadd.f32 %v666_v20, %v624_v10  ;;  %v627_v43 = vadd.f32 %v7543_v22, %v626_v12  ;;  %s7003_s29 = scalar_lea.vmem %s9364_s19, 4096  ;;  %p7010_p0 = scmp.lt.s32.totalorder %s9364_s19, %s7008_s10 }
 0x148   : > { %vm9489_vm3 = vcmp.ne.s16.totalorder %v7623_v31, 0  ;;  %816 = vst.msk [vmem:[#allocation2 + $0x68] sm:$0xff] %vm702_vm0, %v779_v4  ;;  %817 = vst.msk [vmem:[#allocation2 + $0x70] sm:$0xff] %vm702_vm0, %v781_v6  ;;  %v701_v49 = vadd.f32 %v669_v15, %v635_v13  ;;  %v3259_v24 = vor.u32 %v3258_v34, %v3255_v8  ;;  %v3268_v7 = vor.u32 %v3267_v28, %v3264_v46  ;;  %p7004_p11 = scmp.ne.s32.totalorder %s9364_s19, %s7003_s29  ;;  %p7011_p1 = scmp.lt.s32.totalorder %s7009_s12, %s7003_s29 }
 0x149   : > { %v1729_v38 = vrot.slane %v7979_v17, 4  ;;  %v699_v2 = vadd.f32 %v667_v25, %v627_v43  ;;  %v1731_v20 = vrot.slane %v7981_v33, 4  ;;  %v3166_v22 = vsel %vm9491_vm4, %v7979_v17, 0 }
 0x14a   : > { %v3167_v12 = vsel %vm9490_vm10, %v7981_v33, 0  ;;  %v737_v56 = vpack.c.bf16 %v701_v49, %v700_v62  ;;  %v3260_v10 = vsel %vm1974_vm11, %v3250_v3, %v3259_v24  ;;  %v3269_v21 = vsel %vm1974_vm11, %v3259_v24, %v3268_v7  ;;  %p7005_p12 = pnand %p7004_p11, %p7145_p5  ;;  %p7012_p2 = por %p7011_p1, %p7010_p0 }
 0x14b   : > { %v7997_v28 = vsel %vm9492_vm12, %v1727_v55, %v1729_v38  ;;  %v736_v25 = vpack.c.bf16 %v699_v2, %v698_v1  ;;  %6396 = vmatmul.mubr.msk.bf16.gmra.mrb[12].mxu1 %vm702_vm0, %v3260_v10  ;;  %v8006_v43 = vsel %vm9492_vm12, %v1729_v38, %v1731_v20  ;;  %v3271_v62 = vshrl.u32 %v3166_v22, 16 }
 0x14c   : > { %9580 = vst [vmem:[#allocation40_spill] sm:$0xff] %v7997_v28  ;;  %6283 = vmatprep.mubr.msk.bf16.mxu0 %vm702_vm0, %v7997_v28  ;;  %9581 = vst [vmem:[#allocation41_spill] sm:$0xff] %v8006_v43  ;;  %v3274_v3 = vshll.u32 %v3166_v22, 16  ;;  %v784_v15 = vrot.slane %v737_v56, 4  ;;  %6399 = vmatprep.mubr.msk.bf16.mxu1 %vm702_vm0, %v3269_v21  ;;  %v3280_v55 = vshrl.u32 %v3167_v12, 16  ;;  %v3283_v8 = vshll.u32 %v3167_v12, 16  ;;  %p7006_p13 = pneg %p7005_p12 }
 0x14d   : > { %v1984_v34 = vshrl.u32 %v7758_v5, 16  ;;  %v782_v13 = vrot.slane %v736_v25, 4  ;;  %v3273_v46 = vrot.slane %v3271_v62, 3  ;;  %v2474_v6 = vsel %vm2442_vm6, 65537, %v9563_v44 }
 0x14e   : > { %6284 = vmatmul.mubr.msk.bf16.gmra.mrb[52].mxu0 %vm702_vm0, %v8006_v43  ;;  %v3276_v4 = vrot.slane %v3274_v3, 4  ;;  %v8021_v1 = vsel %vm1642_vm8, %v7684_v0, 0  ;;  %821 = vst.msk [vmem:[#allocation2 + $0x88] sm:$0xf] %vm820_vm2, %v784_v15  ;;  %v3282_v49 = vrot.slane %v3280_v55, 3  ;;  %v3285_v24 = vrot.slane %v3283_v8, 4  ;;  %p7013_p3 = pnand %p7012_p2, %p7006_p13 }
 0x14f   : > { %v1987_v38 = vshll.u32 %v7758_v5, 16  ;;  %v783_v2 = vsel %vm9492_vm12, %v7962_v40, %v782_v13  ;;  %v785_v22 = vsel %vm9492_vm12, %v782_v13, %v784_v15  ;;  %v8028_v36 = vld [vmem:[#allocation2 + $0x68] sm:$0xff]  ;;  %v8030_v56 = vld [vmem:[#allocation2 + $0x70] sm:$0xff]  ;;  %v1986_v10 = vrot.slane %v1984_v34, 3 }
 0x150   : > { %v3277_v12 = vor.u32 %v3276_v4, %v3273_v46  ;;  %vm9478_vm5 = vcmp.ne.s16.totalorder %v7632_v59, 0  ;;  %818 = vst.msk [vmem:[#allocation2 + $0x78] sm:$0xff] %vm702_vm0, %v783_v2  ;;  %819 = vst.msk [vmem:[#allocation2 + $0x80] sm:$0xff] %vm702_vm0, %v785_v22  ;;  %v3286_v0 = vor.u32 %v3285_v24, %v3282_v49  ;;  %v1733_v5 = vrot.slane %v8028_v36, 4 }
 0x151   : > { %v1735_v21 = vrot.slane %v8030_v56, 4  ;;  %v3168_v40 = vsel %vm9489_vm3, %v8028_v36, 0  ;;  %vm9477_vm2 = vcmp.ne.s16.totalorder %v7644_v26, 0  ;;  %v3169_v15 = vsel %vm9479_vm7, %v8030_v56, 0 }
 0x152   : > { %v3278_v25 = vsel %vm1974_vm11, %v3268_v7, %v3277_v12  ;;  %v3289_v62 = vshrl.u32 %v3168_v40, 16  ;;  %v3292_v3 = vshll.u32 %v3168_v40, 16  ;;  %vm9476_vm6 = vcmp.ne.s16.totalorder %v7579_v45, 0 }
 0x153   : > { %v3287_v55 = vsel %vm1974_vm11, %v3277_v12, %v3286_v0  ;;  %v8048_v8 = vsel %vm9492_vm12, %v1731_v20, %v1733_v5  ;;  %v8051_v34 = vsel %vm9492_vm12, %v1733_v5, %v1735_v21  ;;  %v3298_v13 = vshrl.u32 %v3169_v15, 16  ;;  %6400 = vmatmul.mubr.msk.bf16.gmra.mrb[16].mxu1 %vm702_vm0, %v3278_v25 }
 0x154   : > { %9582 = vst [vmem:[#allocation42_spill] sm:$0xff] %v8048_v8  ;;  %9583 = vst [vmem:[#allocation43_spill] sm:$0xff] %v8051_v34  ;;  %6287 = vmatprep.mubr.msk.bf16.mxu0 %vm702_vm0, %v8048_v8  ;;  %v3291_v7 = vrot.slane %v3289_v62, 3  ;;  %v3294_v46 = vrot.slane %v3292_v3, 4  ;;  %v3301_v4 = vshll.u32 %v3169_v15, 16  ;;  %v1989_v49 = vrot.slane %v1987_v38, 4  ;;  %6403 = vmatprep.mubr.msk.bf16.mxu1 %vm702_vm0, %v3287_v55 }
 0x155   : > { %v3300_v24 = vrot.slane %v3298_v13, 3  ;;  %v1660_v20 = vsel %vm9468_vm9, %v7741_v52, 0  ;;  %v9584_v2 = vshrl.u32 %v7640_v32, 16  ;;  %v9585_v12 = vshll.u32 %v7640_v32, 16 }
 0x156   : > { %6288 = vmatmul.mubr.msk.bf16.gmra.mrb[56].mxu0 %vm702_vm0, %v8051_v34  ;;  %v3295_v40 = vor.u32 %v3294_v46, %v3291_v7  ;;  %v3303_v38 = vrot.slane %v3301_v4, 4  ;;  %v8072_v25 = vor.u32 %v7722_v19, %v7717_v57  ;;  %v8075_v62 = vcombine.low %v7288_v47, %v2474_v6 }
 0x157   : > { %v8062_v22 = vrot.slane %v9584_v2, 3  ;;  %v8066_v5 = vrot.slane %v9585_v12, 4  ;;  %v1993_v52 = vshrl.u32 %v8021_v1, 16  ;;  %v1996_v3 = vshll.u32 %v8021_v1, 16  ;;  %v8081_v13 = vld [vmem:[#allocation2 + $0x78] sm:$0xff]  ;;  %v8085_v4 = vld [vmem:[#allocation2 + $0x80] sm:$0xff] }
 0x158   : > { %v2600_v32 = vshrl.u32 %v7761_v14, 16  ;;  %v842_v15 = vadd.s32 152, %v7272_v35  ;;  %v3304_v55 = vor.u32 %v3303_v38, %v3300_v24  ;;  %v8083_v7 = vld [vmem:[#allocation2 + $0x80] sm:$0xf]  ;;  %v1990_v46 = vor.u32 %v1989_v49, %v1986_v10  ;;  %9586 = vst [vmem:[#allocation44_spill] sm:$0xff] %v8085_v4 }
 0x159   : > { %v2002_v57 = vshrl.u32 %v1660_v20, 16  ;;  %v2005_v19 = vshll.u32 %v1660_v20, 16  ;;  %v3296_v6 = vsel %vm1974_vm11, %v3286_v0, %v3295_v40  ;;  %v8089_v2 = vrot.slane %v8081_v13, 4  ;;  %v8099_v49 = vld [vmem:[#allocation2 + $0x88] sm:$0xf] }
 0x15a   : > { %v1739_v1 = vrot.slane %v8083_v7, 4  ;;  %v3170_v24 = vsel %vm9478_vm5, %v8081_v13, 0  ;;  %v3305_v12 = vsel %vm1974_vm11, %v3295_v40, %v3304_v55  ;;  %v3171_v10 = vsel %vm9477_vm2, %v8085_v4, 0  ;;  %9588 = vst [vmem:[#allocation46_spill] sm:$0xff] %v8099_v49 }
 0x15b   : > { %9587 = vst [vmem:[#allocation45_spill] sm:$0xff] %v8089_v2  ;;  %v3307_v38 = vshrl.u32 %v3170_v24, 16  ;;  %v3310_v48 = vshll.u32 %v3170_v24, 16  ;;  %v8103_v0 = vsel %vm9492_vm12, %v1735_v21, %v8089_v2  ;;  %v3316_v34 = vshrl.u32 %v3171_v10, 16  ;;  %6404 = vmatmul.mubr.msk.bf16.gmra.mrb[20].mxu1 %vm702_vm0, %v3296_v6 }
 0x15c   : > { %9589 = vst [vmem:[#allocation47_spill] sm:$0xff] %v8103_v0  ;;  %v1740_v20 = vsel %vm9492_vm12, %v8089_v2, %v1739_v1  ;;  %v3319_v8 = vshll.u32 %v3171_v10, 16  ;;  %6291 = vmatprep.mubr.msk.bf16.mxu0 %vm702_vm0, %v8103_v0  ;;  %v1995_v43 = vrot.slane %v1993_v52, 3  ;;  %v844_v28 = vadd.s32 168, %v7272_v35  ;;  %6407 = vmatprep.mubr.msk.bf16.mxu1 %vm702_vm0, %v3305_v12 }
 0x15d   : > { %v3309_v40 = vrot.slane %v3307_v38, 3  ;;  %v3312_v24 = vrot.slane %v3310_v48, 4  ;;  %v3318_v4 = vrot.slane %v3316_v34, 3  ;;  %v1998_v11 = vrot.slane %v1996_v3, 4 }
 0x15e   : > { %v3321_v21 = vrot.slane %v3319_v8, 4  ;;  %v3172_v1 = vsel %vm9476_vm6, %v8099_v49, 0  ;;  %6292 = vmatmul.mubr.msk.bf16.gmra.mrb[60].mxu0 %vm702_vm0, %v1740_v20  ;;  %v9590_v6 = vor.u32 %v7431_v23, %v7425_v18  ;;  %v2004_v52 = vrot.slane %v2002_v57, 3 }
 0x15f   : > { %v3313_v48 = vor.u32 %v3312_v24, %v3309_v40  ;;  %v2007_v10 = vrot.slane %v2005_v19, 4  ;;  %v1661_v8 = vsel %vm9466_vm14, %v7743_v42, 0  ;;  %v2603_v34 = vshll.u32 %v7761_v14, 16 }
 0x160   : > { %v1991_v38 = vsel %vm1974_vm11, %v9590_v6, %v1990_v46  ;;  %v3322_v12 = vor.u32 %v3321_v21, %v3318_v4  ;;  %v992_v3 = vand.u32 15, %v842_v15  ;;  %v3325_v0 = vshrl.u32 %v3172_v1, 16 }
 0x161   : > { %6303 = vmatprep.mubr.msk.bf16.mxu0 %vm702_vm0, %v1991_v38  ;;  %v2011_v20 = vshrl.u32 %v1661_v8, 16  ;;  %v2014_v49 = vshll.u32 %v1661_v8, 16  ;;  %v1006_v2 = vand.u32 15, %v844_v28  ;;  %v3314_v18 = vsel %vm1974_vm11, %v3304_v55, %v3313_v48  ;;  %v8146_v38 = vld [vmem:[#allocation2 + $0x8] sm:$0xf0] }
 0x162   : > { %v1999_v23 = vor.u32 %v1998_v11, %v1995_v43  ;;  %v3328_v40 = vshll.u32 %v3172_v1, 16  ;;  %v1662_v57 = vsel %vm9467_vm13, %v7805_v51, 0  ;;  %v3323_v4 = vsel %vm1974_vm11, %v3313_v48, %v3322_v12  ;;  %v6966_v51 = vld [vmem:[%s9419_s3 + $0x48] sm:$0xff]   ;;  %v9596_v1 = vld [vmem:[#allocation17_spill] sm:$0xff] }
 0x163   : > { %v2008_v19 = vor.u32 %v2007_v10, %v2004_v52  ;;  %v2020_v24 = vshrl.u32 %v1662_v57, 16  ;;  %v2023_v42 = vshll.u32 %v1662_v57, 16  ;;  %v2602_v21 = vrot.slane %v2600_v32, 3  ;;  %6408 = vmatmul.mubr.msk.bf16.gmra.mrb[24].mxu1 %vm702_vm0, %v3314_v18 }
 0x164   : > { %v2609_v14 = vshrl.u32 %v8075_v62, 16  ;;  %v2612_v15 = vshll.u32 %v8075_v62, 16  ;;  %vm8132_vm14 = vcmp.lt.s32.totalorder %v992_v3, 15  ;;  %v2013_v11 = vrot.slane %v2011_v20, 3  ;;  %6411 = vmatprep.mubr.msk.bf16.mxu1 %vm702_vm0, %v3323_v4  ;;  %v6967_v3 = vld [vmem:[%s9419_s3 + $0x50] sm:$0xff]  }
 0x165   : > { %v2016_v43 = vrot.slane %v2014_v49, 4  ;;  %v2605_v55 = vrot.slane %v2603_v34, 4  ;;  %vm8140_vm13 = vcmp.lt.s32.totalorder %v1006_v2, 15  ;;  %v2000_v62 = vsel %vm1974_vm11, %v1990_v46, %v1999_v23  ;;  %vm2444_vm9 = vmpackc.low %vm8132_vm14, %vm8132_vm14 }
 0x166   : > { %v3327_v32 = vrot.slane %v3325_v0, 3  ;;  %v3330_v6 = vrot.slane %v3328_v40, 4  ;;  %v1663_v49 = vsel %vm9470_vm1, %v7807_v39, 0  ;;  %6304 = vmatmul.mubr.msk.bf16.vlgmr.msra.gmra.mrb[32].mxu0 %vm702_vm0, %v2000_v62  ;;  %v2009_v48 = vsel %vm1974_vm11, %v1999_v23, %v2008_v19 }
 0x167   : > { %v2022_v2 = vrot.slane %v2020_v24, 3  ;;  %v2025_v52 = vrot.slane %v2023_v42, 4  ;;  %v2597_v10 = vor.u32 %v8066_v5, %v8062_v22  ;;  %6307 = vmatprep.mubr.msk.bf16.mxu0 %vm702_vm0, %v2009_v48  ;;  %v1664_v46 = vsel %vm9469_vm15, %v7865_v9, 0  ;;  %6336 = vmatpush3.bf16.msra.mxu0 %v7798_v63  ;;  %vm2446_vm15 = vmpackc.low %vm8140_vm13, %vm8140_vm13 }
 0x168   : > { %v8166_v39 = vsel %vm1974_vm11, %v7618_v30, %v8072_v25  ;;  %v2611_v0 = vrot.slane %v2609_v14, 3  ;;  %v2614_v8 = vrot.slane %v2612_v15, 4  ;;  %v3624_v22 = vrot.slane %v8146_v38, 4  ;;  %6337 = vmatprep.subr.bf16.mxu0 %v6966_v51 }
 0x169   : > { %v2017_v5 = vor.u32 %v2016_v43, %v2013_v11  ;;  %v2029_v34 = vshrl.u32 %v1663_v49, 16  ;;  %v3331_v63 = vor.u32 %v3330_v6, %v3327_v32  ;;  %v2032_v20 = vshll.u32 %v1663_v49, 16 }
 0x16a   : > { %v2606_v18 = vor.u32 %v2605_v55, %v2602_v21  ;;  %v2476_v30 = vsel %vm2444_vm9, 65537, %v9563_v44  ;;  %v2026_v23 = vor.u32 %v2025_v52, %v2022_v2  ;;  %v2038_v40 = vshrl.u32 %v1664_v46, 16 }
 0x16b   : > { %v2041_v57 = vshll.u32 %v1664_v46, 16  ;;  %vm9595_vm1 = vcmp.ne.s16.totalorder %v7537_v16, 0  ;;  %v3332_v24 = vsel %vm1974_vm11, %v3322_v12, %v3331_v63  ;;  %6338 = vmatpush3.bf16.msra.mxu0 %v6966_v51  ;;  %v8185_v42 = vor.u32 %v2614_v8, %v2611_v0  ;;  %v9598_v0 = vld [vmem:[#allocation26_spill] sm:$0xff]  ;;  %v6963_v63 = vld [vmem:[%s9419_s3 + $0xa8] sm:$0xff]  }
 0x16c   : > { %v1665_v4 = vsel %vm9595_vm1, %v7867_v37, 0  ;;  %v2478_v21 = vsel %vm2446_vm15, 65537, %v9563_v44  ;;  %v8189_v14 = vadd.s32 184, %v7272_v35  ;;  %6412 = vmatmul.mubr.msk.bf16.gmra.mrb[28].mxu1 %vm702_vm0, %v3332_v24  ;;  %v3626_v15 = vsel %vm9492_vm12, %v3624_v22, %v7690_v61  ;;  %6339 = vmatprep.subr.bf16.mxu0 %v6967_v3  ;;  %v6969_v37 = vld [vmem:[%s9419_s3 + $0x58] sm:$0xff]   ;;  %v8221_v22 = vld [vmem:[%s9419_s3 + $0x100] sm:$0xff]  }
 0x16d   : > { %v2018_v28 = vsel %vm1974_vm11, %v2008_v19, %v2017_v5  ;;  %v2031_v11 = vrot.slane %v2029_v34, 3  ;;  %v5849_v12 = vcombine.low %v7288_v47, %v2476_v30  ;;  %6423 = vmatprep.mubr.msk.bf16.mxu1 %vm702_vm0, %v3626_v15  ;;  %v2034_v43 = vrot.slane %v2032_v20, 4 }
 0x16e   : > { %v2047_v51 = vshrl.u32 %v1665_v4, 16  ;;  %v2050_v55 = vshll.u32 %v1665_v4, 16  ;;  %vm9597_vm9 = vcmp.ne.s16.totalorder %v9596_v1, 0  ;;  %6308 = vmatmul.mubr.msk.bf16.gmra.mrb[36].mxu0 %vm702_vm0, %v2018_v28  ;;  %v2027_v61 = vsel %vm1974_vm11, %v2017_v5, %v2026_v23  ;;  %v9600_v4 = vld [vmem:[#allocation37_spill] sm:$0xff]  ;;  %v9601_v28 = vld [vmem:[#allocation30_spill] sm:$0xff] }
 0x16f   : > { %v1666_v62 = vsel %vm9597_vm9, %v7925_v50, 0  ;;  %v2040_v19 = vrot.slane %v2038_v40, 3  ;;  %v2043_v32 = vrot.slane %v2041_v57, 4  ;;  %v5850_v6 = vcombine.low %v7288_v47, %v2478_v21  ;;  %6311 = vmatprep.mubr.msk.bf16.mxu0 %vm702_vm0, %v2027_v61  ;;  %6340 = vmatpush3.bf16.msra.mxu0 %v6967_v3  ;;  %v9599_v57 = vld [vmem:[#allocation10_spill] sm:$0xff] }
 0x170   : > { %v8209_v49 = vsel %vm1974_vm11, %v8072_v25, %v2597_v10  ;;  %v8212_v48 = vsel %vm1974_vm11, %v2597_v10, %v2606_v18  ;;  %v8215_v2 = vadd.s32 200, %v7272_v35  ;;  %v2056_v52 = vshrl.u32 %v1666_v62, 16  ;;  %6341 = vmatprep.subr.bf16.mxu0 %v6969_v37 }
 0x171   : > { %v2059_v46 = vshll.u32 %v1666_v62, 16  ;;  %vm2681_vm13 = vcmp.ne.s16.totalorder %v9598_v0, 0  ;;  %v2618_v8 = vshrl.u32 %v5849_v12, 16  ;;  %v2035_v5 = vor.u32 %v2034_v43, %v2031_v11  ;;  %v9602_v43 = vld [vmem:[#allocation36_spill] sm:$0xff] }
 0x172   : > { %v2049_v25 = vrot.slane %v2047_v51, 3  ;;  %v2052_v34 = vrot.slane %v2050_v55, 4  ;;  %v2621_v3 = vshll.u32 %v5849_v12, 16  ;;  %v2044_v10 = vor.u32 %v2043_v32, %v2040_v19  ;;  %v9603_v51 = vld [vmem:[#allocation31_spill] sm:$0xff] }
 0x173   : > { %v8228_v20 = vsel %vm1974_vm11, %v2606_v18, %v8185_v42  ;;  %v2627_v30 = vshrl.u32 %v5850_v6, 16  ;;  %vm2682_vm14 = vcmp.ne.s16.totalorder %v9599_v57, 0  ;;  %v1667_v24 = vsel %vm9491_vm4, %v9600_v4, 0  ;;  %6342 = vmatpush3.bf16.msra.mxu0 %v6969_v37 }
 0x174   : > { %v2630_v21 = vshll.u32 %v5850_v6, 16  ;;  %6424 = vmatmul.mubr.msk.bf16.vlgmr.msra.gmra.mrb[0].mxu1 %vm702_vm0, %v9601_v28  ;;  %v2058_v11 = vrot.slane %v2056_v52, 3  ;;  %v2061_v12 = vrot.slane %v2059_v46, 4  ;;  %v8238_v18 = vrot.slane %v2618_v8, 3  ;;  %6575 = vmatprep.subr.bf16.mxu0 %v8221_v22 }
 0x175   : > { %6456 = vmatpush3.bf16.msra.mxu1 %v9602_v43  ;;  %6427 = vmatprep.mubr.msk.bf16.mxu1 %vm702_vm0, %v9603_v51  ;;  %v2036_v55 = vsel %vm1974_vm11, %v2026_v23, %v2035_v5  ;;  %v2053_v37 = vor.u32 %v2052_v34, %v2049_v25  ;;  %v1668_v62 = vsel %vm9490_vm10, %v7979_v17, 0  ;;  %v2623_v61 = vrot.slane %v2621_v3, 4  ;;  %v6964_v23 = vld [vmem:[%s9419_s3 + $0xb0] sm:$0xff]   ;;  %v9604_v3 = vld [vmem:[#allocation28_spill] sm:$0xff] }
 0x176   : > { %6312 = vmatmul.mubr.msk.bf16.gmra.mrb[40].mxu0 %vm702_vm0, %v2036_v55  ;;  %v2045_v19 = vsel %vm1974_vm11, %v2035_v5, %v2044_v10  ;;  %6457 = vmatprep.subr.bf16.mxu1 %v6963_v63  ;;  %v2065_v32 = vshrl.u32 %v1667_v24, 16  ;;  %v2068_v6 = vshll.u32 %v1667_v24, 16  ;;  %v1669_v52 = vsel %vm9489_vm3, %v7981_v33, 0  ;;  %v9605_v55 = vld [vmem:[#allocation32_spill] sm:$0xff] }
 0x177   : > { %v1673_v17 = vsel %vm9476_vm6, %v8083_v7, 0  ;;  %6315 = vmatprep.mubr.msk.bf16.mxu0 %vm702_vm0, %v2045_v19  ;;  %v1670_v46 = vsel %vm9479_vm7, %v8028_v36, 0  ;;  %v8263_v8 = vrot.slane %v2627_v30, 3  ;;  %v8265_v5 = vrot.slane %v2630_v21, 4 }
 0x178   : > { %v8267_v25 = vor.u32 %v2061_v12, %v2058_v11  ;;  %v2074_v33 = vshrl.u32 %v1668_v62, 16  ;;  %v1671_v34 = vsel %vm9478_vm5, %v8030_v56, 0  ;;  %vm2683_vm15 = vcmp.ne.s16.totalorder %v9604_v3, 0  ;;  %v6968_v56 = vld [vmem:[%s9419_s3 + $0xb8] sm:$0xff]  }
 0x179   : > { %v2054_v7 = vsel %vm1974_vm11, %v2044_v10, %v2053_v37  ;;  %6458 = vmatpush3.bf16.msra.mxu1 %v6963_v63  ;;  %v2077_v4 = vshll.u32 %v1668_v62, 16  ;;  %v2083_v24 = vshrl.u32 %v1669_v52, 16  ;;  %v1672_v36 = vsel %vm9477_vm2, %v8081_v13, 0  ;;  %v6982_v10 = vld [vmem:[#allocation2 + $0x8] sm:$0xff] }
 0x17a   : > { %v2067_v30 = vrot.slane %v2065_v32, 3  ;;  %v2070_v21 = vrot.slane %v2068_v6, 4  ;;  %v2086_v28 = vshll.u32 %v1669_v52, 16  ;;  %v2092_v11 = vshrl.u32 %v1670_v46, 16  ;;  %6459 = vmatprep.subr.bf16.mxu1 %v6964_v23  ;;  %v9606_v6 = vld [vmem:[#allocation33_spill] sm:$0xff] }
 0x17b   : > { %v2095_v12 = vshll.u32 %v1670_v46, 16  ;;  %v2101_v43 = vshrl.u32 %v1671_v34, 16  ;;  %v2104_v51 = vshll.u32 %v1671_v34, 16  ;;  %v2698_v63 = vsel %vm2681_vm13, %v6982_v10, 0 }
 0x17c   : > { %6428 = vmatmul.mubr.msk.bf16.gmra.mrb[4].mxu1 %vm702_vm0, %v9605_v55  ;;  %v2063_v13 = vsel %vm1974_vm11, %v2053_v37, %v8267_v25  ;;  %v2076_v62 = vrot.slane %v2074_v33, 3  ;;  %v2110_v19 = vshrl.u32 %v1672_v36, 16  ;;  %v2113_v32 = vshll.u32 %v1672_v36, 16  ;;  %v6983_v55 = vld [vmem:[#allocation2 + $0x10] sm:$0xff] }
 0x17d   : > { %6431 = vmatprep.mubr.msk.bf16.mxu1 %vm702_vm0, %v9606_v6  ;;  %v2079_v52 = vrot.slane %v2077_v4, 4  ;;  %v2085_v46 = vrot.slane %v2083_v24, 3  ;;  %6460 = vmatpush3.bf16.msra.mxu1 %v6964_v23  ;;  %v2119_v34 = vshrl.u32 %v1673_v17, 16  ;;  %v2122_v15 = vshll.u32 %v1673_v17, 16  ;;  %v9607_v33 = vld [vmem:[#allocation29_spill] sm:$0xff]  ;;  %v8295_v4 = vld [vmem:[%s9419_s3 + $0xc0] sm:$0xff]  }
 0x17e   : > { %6316 = vmatmul.mubr.msk.bf16.gmra.mrb[44].mxu0 %vm702_vm0, %v2054_v7  ;;  %v2088_v10 = vrot.slane %v2086_v28, 4  ;;  %v2731_v40 = vshrl.u32 %v2698_v63, 16  ;;  %v2734_v45 = vshll.u32 %v2698_v63, 16  ;;  %6461 = vmatprep.subr.bf16.mxu1 %v6968_v56  ;;  %v2699_v37 = vsel %vm2682_vm14, %v6983_v55, 0 }
 0x17f   : > { %vm2684_vm1 = vcmp.ne.s16.totalorder %v9607_v33, 0  ;;  %6319 = vmatprep.mubr.msk.bf16.mxu0 %vm702_vm0, %v2063_v13  ;;  %v2094_v23 = vrot.slane %v2092_v11, 3  ;;  %v2097_v17 = vrot.slane %v2095_v12, 4  ;;  %v2103_v7 = vrot.slane %v2101_v43, 3 }
 0x180   : > { %v2106_v24 = vrot.slane %v2104_v51, 4  ;;  %vm2685_vm9 = vcmp.ne.s16.totalorder %v8166_v39, 0  ;;  %v2071_v36 = vor.u32 %v2070_v21, %v2067_v30  ;;  %v2112_v28 = vrot.slane %v2110_v19, 3  ;;  %v6984_v51 = vld [vmem:[#allocation2 + $0x18] sm:$0xff]  ;;  %v8311_v21 = vld [vmem:[#allocation2 + $0x20] sm:$0xff] }
 0x181   : > { %v2115_v63 = vrot.slane %v2113_v32, 4  ;;  %v8300_v6 = vor.u32 %v2623_v61, %v8238_v18  ;;  %v2121_v26 = vrot.slane %v2119_v34, 3  ;;  %v2124_v59 = vrot.slane %v2122_v15, 4  ;;  %6462 = vmatpush3.bf16.msra.mxu1 %v6968_v56  ;;  %v9612_v19 = vld [vmem:[#allocation34_spill] sm:$0xff]  ;;  %v9614_v34 = vld [vmem:[#allocation35_spill] sm:$0xff] }
 0x182   : > { %v2740_v27 = vshrl.u32 %v2699_v37, 16  ;;  %v2743_v31 = vshll.u32 %v2699_v37, 16  ;;  %vm2686_vm6 = vcmp.ne.s16.totalorder %v8209_v49, 0  ;;  %v2080_v13 = vor.u32 %v2079_v52, %v2076_v62  ;;  %6495 = vmatprep.subr.bf16.mxu1 %v8295_v4  ;;  %v9613_v52 = vld [vmem:[#allocation44_spill] sm:$0xff] }
 0x183   : > { %v2089_v11 = vor.u32 %v2088_v10, %v2085_v46  ;;  %v2733_v12 = vrot.slane %v2731_v40, 4  ;;  %v2736_v43 = vrot.slane %v2734_v45, 5  ;;  %v8306_v30 = vsel %vm2682_vm14, %v6984_v51, 0  ;;  %v9610_v40 = vld [vmem:[#allocation7_spill] sm:$0xff] }
 0x184   : > { %v2098_v18 = vor.u32 %v2097_v17, %v2094_v23  ;;  %v2107_v61 = vor.u32 %v2106_v24, %v2103_v7  ;;  %v2700_v15 = vsel %vm2683_vm15, %v6984_v51, 0  ;;  %vm2687_vm2 = vcmp.ne.s16.totalorder %v8212_v48, 0  ;;  %6432 = vmatmul.mubr.msk.bf16.gmra.mrb[8].mxu1 %vm702_vm0, %v9612_v19  ;;  %v9620_v19 = vld [vmem:[#allocation22_spill] sm:$0xff] }
 0x185   : > { %v8316_v45 = vsel %vm1642_vm8, %v8311_v21, 0  ;;  %vm9611_vm5 = vcmp.ne.s16.totalorder %v9610_v40, 0  ;;  %v2116_v32 = vor.u32 %v2115_v63, %v2112_v28  ;;  %v3653_v46 = vrot.slane %v9613_v52, 4  ;;  %6435 = vmatprep.mubr.msk.bf16.mxu1 %vm702_vm0, %v9614_v34  ;;  %v9621_v52 = vld [vmem:[#allocation21_spill] sm:$0xff] }
 0x186   : > { %9609 = vst [vmem:[#allocation26_spill] sm:$0xff] %v8316_v45  ;;  %v3923_v62 = vsel %vm9611_vm5, %v8146_v38, 0  ;;  %v2072_v10 = vsel %vm1974_vm11, %v8267_v25, %v2071_v36  ;;  %v2125_v37 = vor.u32 %v2124_v59, %v2121_v26  ;;  %v2742_v23 = vrot.slane %v2740_v27, 4  ;;  %v9616_v26 = vld [vmem:[#allocation46_spill] sm:$0xff] }
 0x187   : > { %v2745_v17 = vrot.slane %v2743_v31, 5  ;;  %6320 = vmatmul.mubr.msk.bf16.gmra.mrb[48].mxu0 %vm702_vm0, %v2072_v10  ;;  %v2081_v7 = vsel %vm1974_vm11, %v2071_v36, %v2080_v13  ;;  %v2090_v38 = vsel %vm1974_vm11, %v2080_v13, %v2089_v11  ;;  %v2737_v24 = vor.u32 %v2736_v43, %v2733_v12  ;;  %v9615_v31 = vld [vmem:[#allocation45_spill] sm:$0xff] }
 0x188   : > { %v2749_v51 = vshrl.u32 %v2700_v15, 16  ;;  %6323 = vmatprep.mubr.msk.bf16.mxu0 %vm702_vm0, %v2081_v7  ;;  %v2099_v28 = vsel %vm1974_vm11, %v2089_v11, %v2098_v18  ;;  %v8334_v63 = vsel %vm1974_vm11, %v2098_v18, %v2107_v61  ;;  %v2752_v56 = vshll.u32 %v2700_v15, 16 }
 0x189   : > { %v3949_v25 = vshrl.u32 %v3923_v62, 16  ;;  %v8337_v27 = vsel %vm1974_vm11, %v2107_v61, %v2116_v32  ;;  %v8341_v59 = vsel %vm9492_vm12, %v9615_v31, %v3653_v46  ;;  %v3655_v36 = vrot.slane %v9616_v26, 4  ;;  %v9624_v31 = vld [vmem:[#allocation38_spill] sm:$0xff] }
 0x18a   : > { %v3924_v13 = vsel %vm2681_vm13, %v6983_v55, 0  ;;  %v8347_v12 = vsel %vm1974_vm11, %v2116_v32, %v2125_v37  ;;  %v8349_v11 = vor.u32 %v2745_v17, %v2742_v23  ;;  %v3952_v43 = vshll.u32 %v3923_v62, 16  ;;  %v6986_v62 = vld [vmem:[#allocation2 + $0x28] sm:$0xff] }
 0x18b   : > { %v2701_v18 = vsel %vm2684_vm1, %v8311_v21, 0  ;;  %v9617_v61 = vand.u32 15, %v8189_v14  ;;  %v9622_v34 = vor.u32 %v9620_v19, %v9621_v52  ;;  %vm9623_vm5 = vsmask.f32 3328 }
 0x18c   : > { %v2751_v32 = vrot.slane %v2749_v51, 4  ;;  %v8367_v10 = vsel %vm9492_vm12, %v3653_v46, %v3655_v36  ;;  %v2702_v37 = vsel %vm2685_vm9, %v6986_v62, 0  ;;  %v2754_v23 = vrot.slane %v2752_v56, 5  ;;  %6436 = vmatmul.mubr.msk.bf16.gmra.mrb[12].mxu1 %vm702_vm0, %v9624_v31  ;;  %v6987_v36 = vld [vmem:[#allocation2 + $0x30] sm:$0xff]  ;;  %v9625_v56 = vld [vmem:[#allocation39_spill] sm:$0xff] }
 0x18d   : > { %vm8356_vm8 = vcmp.lt.s32.totalorder %v9617_v61, 15  ;;  %v8364_v55 = vsel %vm9623_vm5, %v9622_v34, %v2737_v24  ;;  %v8371_v14 = vrot.slane %v3949_v25, 4  ;;  %v3957_v17 = vshrl.u32 %v3924_v13, 16  ;;  %6439 = vmatprep.mubr.msk.bf16.mxu1 %vm702_vm0, %v9625_v56 }
 0x18e   : > { %v3926_v7 = vsel %vm2683_vm15, %v8311_v21, 0  ;;  %vm2688_vm7 = vcmp.ne.s16.totalorder %v8228_v20, 0  ;;  %v3960_v51 = vshll.u32 %v3924_v13, 16  ;;  %v2758_v46 = vshrl.u32 %v2701_v18, 16 }
 0x18f   : > { %v2761_v26 = vshll.u32 %v2701_v18, 16  ;;  %v2703_v61 = vsel %vm2686_vm6, %v6987_v36, 0  ;;  %v8385_v25 = vsel %vm9623_vm5, %v2737_v24, %v8349_v11  ;;  %v3954_v19 = vrot.slane %v3952_v43, 5  ;;  %6324 = vmatmul.mubr.msk.bf16.gmra.mrb[52].mxu0 %vm702_vm0, %v2090_v38  ;;  %vm2448_vm5 = vmpackc.low %vm8356_vm8, %vm8356_vm8 }
 0x190   : > { %v2767_v52 = vshrl.u32 %v2702_v37, 16  ;;  %v2770_v34 = vshll.u32 %v2702_v37, 16  ;;  %v3966_v13 = vshrl.u32 %v8306_v30, 16  ;;  %v3969_v18 = vshll.u32 %v8306_v30, 16  ;;  %6327 = vmatprep.mubr.msk.bf16.mxu0 %vm702_vm0, %v2099_v28 }
 0x191   : > { %v3975_v31 = vshrl.u32 %v3926_v7, 16  ;;  %v2704_v41 = vsel %vm2687_vm2, %v7865_v9, 0  ;;  %v3959_v56 = vrot.slane %v3957_v17, 4  ;;  %v3978_v29 = vshll.u32 %v3926_v7, 16 }
 0x192   : > { %v2776_v24 = vshrl.u32 %v2703_v61, 16  ;;  %v2779_v1 = vshll.u32 %v2703_v61, 16  ;;  %v3962_v43 = vrot.slane %v3960_v51, 5  ;;  %v2760_v16 = vrot.slane %v2758_v46, 4  ;;  %v9626_v51 = vld [vmem:[#allocation40_spill] sm:$0xff] }
 0x193   : > { %v2763_v37 = vrot.slane %v2761_v26, 5  ;;  %v3927_v38 = vsel %vm2684_vm1, %v6986_v62, 0  ;;  %v2769_v58 = vrot.slane %v2767_v52, 4  ;;  %v2785_v60 = vshrl.u32 %v2704_v41, 16 }
 0x194   : > { %v2788_v30 = vshll.u32 %v2704_v41, 16  ;;  %v3928_v54 = vsel %vm2685_vm9, %v6987_v36, 0  ;;  %v2772_v53 = vrot.slane %v2770_v34, 5  ;;  %v3968_v9 = vrot.slane %v3966_v13, 4  ;;  %6440 = vmatmul.mubr.msk.bf16.gmra.mrb[16].mxu1 %vm702_vm0, %v9626_v51  ;;  %v9627_v41 = vld [vmem:[#allocation41_spill] sm:$0xff] }
 0x195   : > { %v3971_v45 = vrot.slane %v3969_v18, 5  ;;  %v3977_v28 = vrot.slane %v3975_v31, 4  ;;  %v3980_v17 = vrot.slane %v3978_v29, 5  ;;  %v2778_v7 = vrot.slane %v2776_v24, 4  ;;  %6443 = vmatprep.mubr.msk.bf16.mxu1 %vm702_vm0, %v9627_v41  ;;  %v6988_v18 = vld [vmem:[#allocation2 + $0x40] sm:$0xff] }
 0x196   : > { %v2781_v3 = vrot.slane %v2779_v1, 5  ;;  %v3984_v61 = vshrl.u32 %v3927_v38, 16  ;;  %v2755_v46 = vor.u32 %v2754_v23, %v2751_v32  ;;  %v3987_v26 = vshll.u32 %v3927_v38, 16 }
 0x197   : > { %v3993_v62 = vshrl.u32 %v3928_v54, 16  ;;  %v3996_v52 = vshll.u32 %v3928_v54, 16  ;;  %v3955_v36 = vor.u32 %v3954_v19, %v8371_v14  ;;  %v3963_v29 = vor.u32 %v3962_v43, %v3959_v56  ;;  %6328 = vmatmul.mubr.msk.bf16.gmra.mrb[56].mxu0 %vm702_vm0, %v8334_v63 }
 0x198   : > { %v2787_v34 = vrot.slane %v2785_v60, 4  ;;  %v2790_v1 = vrot.slane %v2788_v30, 5  ;;  %v2764_v13 = vor.u32 %v2763_v37, %v2760_v16  ;;  %v2773_v32 = vor.u32 %v2772_v53, %v2769_v58  ;;  %6331 = vmatprep.mubr.msk.bf16.mxu0 %vm702_vm0, %v8337_v27  ;;  %v9634_v30 = vld [vmem:[#allocation42_spill] sm:$0xff] }
 0x199   : > { %v3972_v23 = vor.u32 %v3971_v45, %v3968_v9  ;;  %v2705_v54 = vsel %vm2688_vm7, %v6988_v18, 0  ;;  %v3981_v31 = vor.u32 %v3980_v17, %v3977_v28  ;;  %v2782_v24 = vor.u32 %v2781_v3, %v2778_v7 }
 0x19a   : > { %v3986_v38 = vrot.slane %v3984_v61, 4  ;;  %v2480_v60 = vsel %vm2448_vm5, 65537, %v9563_v44  ;;  %v3989_v16 = vrot.slane %v3987_v26, 5  ;;  %v3995_v53 = vrot.slane %v3993_v62, 4  ;;  %v9637_v61 = vld [vmem:[#allocation43_spill] sm:$0xff] }
 0x19b   : > { %v3998_v58 = vrot.slane %v3996_v52, 5  ;;  %v8421_v45 = vsel %vm1974_vm11, %v8185_v42, %v8300_v6  ;;  %vm9628_vm3 = vsmask.f32 3328  ;;  %v8430_v27 = vor.u32 %v2790_v1, %v2787_v34 }
 0x19c   : > { %v8425_v63 = vsel %vm9628_vm3, %v8349_v11, %v2755_v46  ;;  %vm9629_vm10 = vmmov %vm9628_vm3  ;;  %v2794_v15 = vshrl.u32 %v2705_v54, 16  ;;  %v5851_v42 = vcombine.low %v7288_v47, %v2480_v60  ;;  %v2797_v43 = vshll.u32 %v2705_v54, 16  ;;  %6444 = vmatmul.mubr.msk.bf16.gmra.mrb[20].mxu1 %vm702_vm0, %v9634_v30 }
 0x19d   : > { %v8428_v3 = vsel %vm9629_vm10, %v3955_v36, %v3963_v29  ;;  %vm9630_vm8 = vmmov %vm9628_vm3  ;;  %v8448_v37 = vor.u32 %v8265_v5, %v8263_v8  ;;  %v3990_v28 = vor.u32 %v3989_v16, %v3986_v38  ;;  %v8455_v17 = vor.u32 %v3998_v58, %v3995_v53  ;;  %6447 = vmatprep.mubr.msk.bf16.mxu1 %vm702_vm0, %v9637_v61  ;;  %v6989_v5 = vld [vmem:[#allocation2 + $0x38] sm:$0xff]  ;;  %v6990_v38 = vld [vmem:[#allocation2 + $0x48] sm:$0xff] }
 0x19e   : > { %v8433_v14 = vsel %vm9630_vm8, %v2755_v46, %v2764_v13  ;;  %vm9631_vm5 = vmmov %vm9628_vm3  ;;  %v9636_v7 = vand.u32 15, %v8215_v2  ;;  %v2796_v8 = vrot.slane %v2794_v15, 4  ;;  %v3929_v46 = vsel %vm2686_vm6, %v6989_v5, 0  ;;  %v9640_v15 = vld [vmem:[#allocation47_spill] sm:$0xff]  ;;  %v6991_v61 = vld [vmem:[#allocation2 + $0x50] sm:$0xff] }
 0x19f   : > { %v8436_v19 = vsel %vm9631_vm5, %v2764_v13, %v2773_v32  ;;  %vm9632_vm4 = vmmov %vm9628_vm3  ;;  %v850_v26 = vadd.s32 216, %v7272_v35  ;;  %6332 = vmatmul.mubr.msk.bf16.gmra.mrb[60].mxu0 %vm702_vm0, %v8347_v12  ;;  %v2636_v62 = vshrl.u32 %v5851_v42, 16  ;;  %v2639_v52 = vshll.u32 %v5851_v42, 16 }
 0x1a0   : > { %v8439_v56 = vsel %vm9632_vm4, %v3963_v29, %v3972_v23  ;;  %vm9633_vm12 = vmmov %vm9628_vm3  ;;  %vm9494_vm3 = vcmp.ne.s16.totalorder %v8421_v45, 0  ;;  %6343 = vmatprep.mubr.msk.bf16.mxu0 %vm702_vm0, %v8364_v55  ;;  %v2799_v36 = vrot.slane %v2797_v43, 5  ;;  %v8479_v29 = vsel %vm1974_vm11, %v8300_v6, %v8448_v37 }
 0x1a1   : > { %v8443_v11 = vsel %vm9633_vm12, %v3972_v23, %v3981_v31  ;;  %vm9635_vm10 = vmmov %vm9632_vm4  ;;  %vm1296_vm4 = vcmp.lt.s32.totalorder %v9636_v7, 15  ;;  %v2706_v2 = vsel %vm9494_vm3, %v7925_v50, 0  ;;  %v1048_v12 = vand.u32 15, %v850_v26 }
 0x1a2   : > { %v8453_v9 = vsel %vm9635_vm10, %v2773_v32, %v2782_v24  ;;  %vm9638_vm12 = vmmov %vm9631_vm5  ;;  %v8483_v1 = vsel %vm9631_vm5, %v3981_v31, %v3990_v28  ;;  %v4002_v13 = vshrl.u32 %v3929_v46, 16  ;;  %v4005_v32 = vshll.u32 %v3929_v46, 16 }
 0x1a3   : > { %v8463_v51 = vsel %vm9638_vm12, %v2782_v24, %v8430_v27  ;;  %vm2450_vm8 = vmpackc.low %vm1296_vm4, %vm1296_vm4  ;;  %v2803_v23 = vshrl.u32 %v2706_v2, 16  ;;  %v2806_v55 = vshll.u32 %v2706_v2, 16  ;;  %v3930_v54 = vsel %vm2687_vm2, %v6988_v18, 0 }
 0x1a4   : > { %v2482_v41 = vsel %vm2450_vm8, 65537, %v9563_v44  ;;  %vm9639_vm10 = vmmov %vm9631_vm5  ;;  %vm1298_vm4 = vcmp.lt.s32.totalorder %v1048_v12, 15  ;;  %vm9493_vm12 = vcmp.ne.s16.totalorder %v8479_v29, 0  ;;  %v2638_v6 = vrot.slane %v2636_v62, 3  ;;  %6448 = vmatmul.mubr.msk.bf16.gmra.mrb[24].mxu1 %vm702_vm0, %v9640_v15 }
 0x1a5   : > { %v5852_v34 = vcombine.low %v7288_v47, %v2482_v41  ;;  %v8487_v50 = vsel %vm9639_vm10, %v3990_v28, %v8455_v17  ;;  %v2641_v24 = vrot.slane %v2639_v52, 4  ;;  %v3931_v31 = vsel %vm2688_vm7, %v6990_v38, 0  ;;  %vm2452_vm8 = vmpackc.low %vm1298_vm4, %vm1298_vm4  ;;  %v6974_v28 = vld [vmem:[%s9419_s3 + $0x108] sm:$0xff]   ;;  %6451 = vmatprep.mubr.msk.bf16.mxu1 %vm702_vm0, %v8341_v59 }
 0x1a6   : > { %v8494_v60 = vor.u32 %v2799_v36, %v2796_v8  ;;  %v2484_v58 = vsel %vm2452_vm8, 65537, %v9563_v44  ;;  %v4004_v18 = vrot.slane %v4002_v13, 4  ;;  %v4011_v42 = vshrl.u32 %v3930_v54, 16 }
 0x1a7   : > { %v2645_v16 = vshrl.u32 %v5852_v34, 16  ;;  %v2648_v53 = vshll.u32 %v5852_v34, 16  ;;  %v4014_v43 = vshll.u32 %v3930_v54, 16  ;;  %v5853_v30 = vcombine.low %v7288_v47, %v2484_v58  ;;  %6344 = vmatmul.mubr.msk.bf16.vlgmr.msra.gmra.mrb[32].mxu0 %vm702_vm0, %v8385_v25 }
 0x1a8   : > { %v4007_v7 = vrot.slane %v4005_v32, 5  ;;  %v2707_v8 = vsel %vm9493_vm12, %v6991_v61, 0  ;;  %v4020_v5 = vshrl.u32 %v3931_v31, 16  ;;  %v4023_v46 = vshll.u32 %v3931_v31, 16  ;;  %6347 = vmatprep.mubr.msk.bf16.mxu0 %vm702_vm0, %v8425_v63  ;;  %6576 = vmatpush3.bf16.msra.mxu0 %v8221_v22 }
 0x1a9   : > { %v2805_v26 = vrot.slane %v2803_v23, 4  ;;  %v2642_v2 = vor.u32 %v2641_v24, %v2638_v6  ;;  %v3932_v62 = vsel %vm9494_vm3, %v6991_v61, 0  ;;  %v852_v52 = vadd.s32 232, %v7272_v35  ;;  %6577 = vmatprep.subr.bf16.mxu0 %v6974_v28  ;;  %v6975_v23 = vld [vmem:[%s9419_s3 + $0x110] sm:$0xff]  }
 0x1aa   : > { %v2647_v59 = vrot.slane %v2645_v16, 3  ;;  %v2650_v41 = vrot.slane %v2648_v53, 4  ;;  %v2654_v36 = vshrl.u32 %v5853_v30, 16  ;;  %v2657_v34 = vshll.u32 %v5853_v30, 16  ;;  %v6977_v30 = vld [vmem:[%s9419_s3 + $0x118] sm:$0xff]  }
 0x1ab   : > { %v2808_v12 = vrot.slane %v2806_v55, 5  ;;  %v4013_v13 = vrot.slane %v4011_v42, 4  ;;  %v4016_v32 = vrot.slane %v4014_v43, 5  ;;  %v2812_v25 = vshrl.u32 %v2707_v8, 16 }
 0x1ac   : > { %v2815_v54 = vshll.u32 %v2707_v8, 16  ;;  %v4022_v6 = vrot.slane %v4020_v5, 4  ;;  %v4025_v24 = vrot.slane %v4023_v46, 5  ;;  %v1062_v38 = vand.u32 15, %v852_v52  ;;  %6578 = vmatpush3.bf16.msra.mxu0 %v6974_v28  ;;  %6452 = vmatmul.mubr.msk.bf16.gmra.mrb[28].mxu1 %vm702_vm0, %v8367_v10  ;;  %v6992_v10 = vld [vmem:[#allocation2 + $0x58] sm:$0xff] }
 0x1ad   : > { %v8520_v63 = vsel %vm1974_vm11, %v8448_v37, %v2642_v2  ;;  %v4029_v31 = vshrl.u32 %v3932_v62, 16  ;;  %v4032_v16 = vshll.u32 %v3932_v62, 16  ;;  %v854_v22 = vadd.s32 248, %v7272_v35  ;;  %6579 = vmatprep.subr.bf16.mxu0 %v6975_v23  ;;  %6463 = vmatprep.mubr.msk.bf16.mxu1 %vm702_vm0, %v8428_v3 }
 0x1ae   : > { %v2651_v55 = vor.u32 %v2650_v41, %v2647_v59  ;;  %v2656_v53 = vrot.slane %v2654_v36, 3  ;;  %v2659_v58 = vrot.slane %v2657_v34, 4  ;;  %vm8523_vm5 = vcmp.lt.s32.totalorder %v1062_v38, 15  ;;  %v8575_v34 = vld [vmem:[#allocation2 + $0x10] sm:$0xf0] }
 0x1af   : > { %v8529_v42 = vor.u32 %v2808_v12, %v2805_v26  ;;  %v4008_v43 = vor.u32 %v4007_v7, %v4004_v18  ;;  %v4017_v37 = vor.u32 %v4016_v32, %v4013_v13  ;;  %vm2454_vm10 = vmpackc.low %vm8523_vm5, %vm8523_vm5  ;;  %v1076_v35 = vand.u32 15, %v854_v22  ;;  %6348 = vmatmul.mubr.msk.bf16.gmra.mrb[36].mxu0 %vm702_vm0, %v8433_v14 }
 0x1b0   : > { %v2814_v28 = vrot.slane %v2812_v25, 4  ;;  %v2817_v61 = vrot.slane %v2815_v54, 5  ;;  %v8541_v18 = vsel %vm9493_vm12, %v6992_v10, 0  ;;  %v2486_v7 = vsel %vm2454_vm10, 65537, %v9563_v44  ;;  %6351 = vmatprep.mubr.msk.bf16.mxu0 %vm702_vm0, %v8436_v19  ;;  %6580 = vmatpush3.bf16.msra.mxu0 %v6975_v23  ;;  %v6993_v25 = vld [vmem:[#allocation2 + $0x60] sm:$0xff] }
 0x1b1   : > { %vm2691_vm4 = vcmp.ne.s16.totalorder %v8520_v63, 0  ;;  %v8547_v8 = vor.u32 %v4025_v24, %v4022_v6  ;;  %v5854_v5 = vcombine.low %v7288_v47, %v2486_v7  ;;  %vm1302_vm8 = vcmp.lt.s32.totalorder %v1076_v35, 15  ;;  %6581 = vmatprep.subr.bf16.mxu0 %v6977_v30  ;;  %v8599_v6 = vld [vmem:[#allocation2 + $0x18] sm:$0xff] }
 0x1b2   : > { %v4031_v3 = vrot.slane %v4029_v31, 4  ;;  %v4034_v46 = vrot.slane %v4032_v16, 5  ;;  %v8553_v26 = vsel %vm1974_vm11, %v2642_v2, %v2651_v55  ;;  %v8555_v62 = vor.u32 %v2659_v58, %v2656_v53  ;;  %vm2456_vm5 = vmpackc.low %vm1302_vm8, %vm1302_vm8  ;;  %v9674_v63 = vld [vmem:[#allocation26_spill] sm:$0xff] }
 0x1b3   : > { %vm9643_vm10 = vsmask.f32 3328  ;;  %v4038_v19 = vshrl.u32 %v8541_v18, 16  ;;  %v2488_v59 = vsel %vm2456_vm5, 65537, %v9563_v44  ;;  %v2708_v41 = vsel %vm2691_vm4, %v6992_v10, 0  ;;  %v6994_v10 = vld [vmem:[#allocation2 + $0x68] sm:$0xff] }
 0x1b4   : > { %v8560_v14 = vsel %vm9643_vm10, %v8430_v27, %v8494_v60  ;;  %vm9644_vm12 = vmmov %vm9643_vm10  ;;  %v2663_v36 = vshrl.u32 %v5854_v5, 16  ;;  %v2666_v27 = vshll.u32 %v5854_v5, 16  ;;  %v8583_v44 = vor.u32 %v2817_v61, %v2814_v28  ;;  %6582 = vmatpush3.bf16.msra.mxu0 %v6977_v30  ;;  %6464 = vmatmul.mubr.msk.bf16.vlgmr.msra.gmra.mrb[0].mxu1 %vm702_vm0, %v8439_v56 }
 0x1b5   : > { %v8564_v52 = vsel %vm9644_vm12, %v8455_v17, %v4008_v43  ;;  %vm9645_vm3 = vmmov %vm9643_vm10  ;;  %v6971_v17 = vld [vmem:[%s9419_s3 + $0xc8] sm:$0xff]   ;;  %v8590_v13 = vor.u32 %v4034_v46, %v4031_v3  ;;  %v8594_v32 = vsel %vm1974_vm11, %v2651_v55, %v8555_v62  ;;  %v3934_v23 = vsel %vm2691_vm4, %v6993_v25, 0  ;;  %6496 = vmatpush3.bf16.msra.mxu1 %v8295_v4  ;;  %6467 = vmatprep.mubr.msk.bf16.mxu1 %vm702_vm0, %v8443_v11  ;;  %v6972_v4 = vld [vmem:[%s9419_s3 + $0xd0] sm:$0xff]  }
 0x1b6   : > { %v8571_v2 = vsel %vm9645_vm3, %v8494_v60, %v8529_v42  ;;  %vm9646_vm12 = vmmov %vm9645_vm3  ;;  %v5855_v54 = vcombine.low %v7288_v47, %v2488_v59  ;;  %v2821_v24 = vshrl.u32 %v2708_v41, 16  ;;  %v2824_v38 = vshll.u32 %v2708_v41, 16  ;;  %6497 = vmatprep.subr.bf16.mxu1 %v6971_v17 }
 0x1b7   : > { %v8581_v12 = vsel %vm9646_vm12, %v4008_v43, %v4017_v37  ;;  %vm9647_vm8 = vmmov %vm9645_vm3  ;;  %vm2692_vm3 = vcmp.ne.s16.totalorder %v8553_v26, 0  ;;  %v4040_v31 = vrot.slane %v4038_v19, 4  ;;  %vm9648_vm5 = vcmp.ne.s16.totalorder %v9610_v40, 0  ;;  %6352 = vmatmul.mubr.msk.bf16.gmra.mrb[40].mxu0 %vm702_vm0, %v8453_v9  ;;  %v6976_v19 = vld [vmem:[%s9419_s3 + $0xd8] sm:$0xff]  }
 0x1b8   : > { %v8587_v60 = vsel %vm9647_vm8, %v4017_v37, %v8547_v8  ;;  %v5149_v16 = vsel %vm9648_vm5, %v8575_v34, 0  ;;  %v2709_v47 = vsel %vm2692_vm3, %v6993_v25, 0  ;;  %v4041_v22 = vshll.u32 %v8541_v18, 16  ;;  %6355 = vmatprep.mubr.msk.bf16.mxu0 %vm702_vm0, %v8463_v51  ;;  %vm9650_vm12 = vmmov %vm9647_vm8 }
 0x1b9   : > { %v2665_v55 = vrot.slane %v2663_v36, 3  ;;  %v2668_v53 = vrot.slane %v2666_v27, 4  ;;  %vm2693_vm10 = vcmp.ne.s16.totalorder %v8594_v32, 0  ;;  %v4047_v40 = vshrl.u32 %v3934_v23, 16  ;;  %6498 = vmatpush3.bf16.msra.mxu1 %v6971_v17  ;;  %v9685_v32 = vld [vmem:[#allocation14_spill] sm:$0xff] }
 0x1ba   : > { %v4050_v56 = vshll.u32 %v3934_v23, 16  ;;  %v5150_v11 = vsel %vm2681_vm13, %v8599_v6, 0  ;;  %v2672_v58 = vshrl.u32 %v5855_v54, 16  ;;  %v2675_v15 = vshll.u32 %v5855_v54, 16  ;;  %6499 = vmatprep.subr.bf16.mxu1 %v6972_v4  ;;  %vm9649_vm13 = vmmov %vm9647_vm8 }
 0x1bb   : > { %v5175_v43 = vshrl.u32 %v5149_v16, 16  ;;  %v5178_v9 = vshll.u32 %v5149_v16, 16  ;;  %v2823_v37 = vrot.slane %v2821_v24, 4  ;;  %v2826_v35 = vrot.slane %v2824_v38, 5 }
 0x1bc   : > { %v2830_v30 = vshrl.u32 %v2709_v47, 16  ;;  %v2833_v28 = vshll.u32 %v2709_v47, 16  ;;  %v2669_v61 = vor.u32 %v2668_v53, %v2665_v55  ;;  %v3935_v18 = vsel %vm2692_vm3, %v6994_v10, 0  ;;  %6468 = vmatmul.mubr.msk.bf16.gmra.mrb[4].mxu1 %vm702_vm0, %v8483_v1 }
 0x1bd   : > { %v5183_v7 = vshrl.u32 %v5150_v11, 16  ;;  %v5186_v0 = vshll.u32 %v5150_v11, 16  ;;  %v2710_v5 = vsel %vm2693_vm10, %v6994_v10, 0  ;;  %v4043_v51 = vrot.slane %v4041_v22, 5  ;;  %6471 = vmatprep.mubr.msk.bf16.mxu1 %vm702_vm0, %v8487_v50  ;;  %6500 = vmatpush3.bf16.msra.mxu1 %v6972_v4  ;;  %v8646_v50 = vld [vmem:[%s9419_s3 + $0xe0] sm:$0xff]   ;;  %v8660_v11 = vld [vmem:[#allocation2 + $0x28] sm:$0xff] }
 0x1be   : > { %v4049_v3 = vrot.slane %v4047_v40, 4  ;;  %v4052_v46 = vrot.slane %v4050_v56, 5  ;;  %v2674_v59 = vrot.slane %v2672_v58, 3  ;;  %v2677_v41 = vrot.slane %v2675_v15, 4  ;;  %6501 = vmatprep.subr.bf16.mxu1 %v6976_v19 }
 0x1bf   : > { %v5177_v36 = vrot.slane %v5175_v43, 4  ;;  %v5180_v27 = vrot.slane %v5178_v9, 5  ;;  %v2827_v17 = vor.u32 %v2826_v35, %v2823_v37  ;;  %v2832_v25 = vrot.slane %v2830_v30, 4  ;;  %6356 = vmatmul.mubr.msk.bf16.gmra.mrb[44].mxu0 %vm702_vm0, %v8560_v14  ;;  %v6995_v35 = vld [vmem:[#allocation2 + $0x70] sm:$0xff] }
 0x1c0   : > { %v2835_v23 = vrot.slane %v2833_v28, 5  ;;  %v4056_v54 = vshrl.u32 %v3935_v18, 16  ;;  %v8636_v24 = vsel %vm1974_vm11, %v8555_v62, %v2669_v61  ;;  %v4059_v38 = vshll.u32 %v3935_v18, 16  ;;  %6359 = vmatprep.mubr.msk.bf16.mxu0 %vm702_vm0, %v8571_v2 }
 0x1c1   : > { %v5185_v16 = vrot.slane %v5183_v7, 4  ;;  %v5188_v47 = vrot.slane %v5186_v0, 5  ;;  %v2819_v1 = vsel %vm9649_vm13, %v8529_v42, %v8583_v44  ;;  %v2839_v22 = vshrl.u32 %v2710_v5, 16  ;;  %vm9651_vm13 = vmmov %vm9647_vm8  ;;  %6502 = vmatpush3.bf16.msra.mxu1 %v6976_v19 }
 0x1c2   : > { %v4044_v55 = vor.u32 %v4043_v51, %v4040_v31  ;;  %v4053_v53 = vor.u32 %v4052_v46, %v4049_v3  ;;  %v8653_v62 = vsel %vm9650_vm12, %v8547_v8, %v8590_v13  ;;  %v8655_v14 = vor.u32 %v2677_v41, %v2674_v59  ;;  %vm9652_vm12 = vmmov %vm9647_vm8  ;;  %6535 = vmatprep.subr.bf16.mxu1 %v8646_v50  ;;  %v2360_v3 = vld [vmem:[#allocation2 + $0x80] sm:$0x1f]  ;;  %v8696_v41 = vld [vmem:[#allocation2 + $0x30] sm:$0xff] }
 0x1c3   : > { %v5181_v42 = vor.u32 %v5180_v27, %v5177_v36  ;;  %v5189_v4 = vor.u32 %v5188_v47, %v5185_v16  ;;  %v2828_v31 = vsel %vm9647_vm8, %v8583_v44, %v2827_v17  ;;  %v2836_v40 = vor.u32 %v2835_v23, %v2832_v25  ;;  %v6996_v36 = vld [vmem:[#allocation2 + $0x78] sm:$0xff] }
 0x1c4   : > { %v2842_v56 = vshll.u32 %v2710_v5, 16  ;;  %vm2694_vm5 = vcmp.ne.s16.totalorder %v8636_v24, 0  ;;  %v4058_v58 = vrot.slane %v4056_v54, 4  ;;  %v4061_v2 = vrot.slane %v4059_v38, 5  ;;  %6472 = vmatmul.mubr.msk.bf16.gmra.mrb[8].mxu1 %vm702_vm0, %v8564_v52 }
 0x1c5   : > { %v8663_v15 = vsel %vm9651_vm13, %v5181_v42, %v5189_v4  ;;  %v5151_v8 = vsel %vm2682_vm14, %v8311_v21, 0  ;;  %v2841_v43 = vrot.slane %v2839_v22, 4  ;;  %v8670_v44 = vsel %vm9652_vm12, %v8590_v13, %v4044_v55  ;;  %6475 = vmatprep.mubr.msk.bf16.mxu1 %vm702_vm0, %v8581_v12  ;;  %vm9654_vm14 = vmmov %vm9647_vm8 }
 0x1c6   : > { %v8673_v9 = vsel %vm9647_vm8, %v4044_v55, %v4053_v53  ;;  %v5192_v37 = vshrl.u32 %v5151_v8, 16  ;;  %v2711_v30 = vsel %vm2694_vm5, %v6995_v35, 0  ;;  %v8680_v28 = vsel %vm1974_vm11, %v2669_v61, %v8655_v14  ;;  %vm9655_vm12 = vmmov %vm9647_vm8  ;;  %v8714_v55 = vld [vmem:[#allocation2 + $0x38] sm:$0xff] }
 0x1c7   : > { %v5195_v57 = vshll.u32 %v5151_v8, 16  ;;  %v5152_v13 = vsel %vm2683_vm15, %v8660_v11, 0  ;;  %v2844_v10 = vrot.slane %v2842_v56, 5  ;;  %v2837_v5 = vsel %vm9654_vm14, %v2827_v17, %v2836_v40  ;;  %6360 = vmatmul.mubr.msk.bf16.gmra.mrb[48].mxu0 %vm702_vm0, %v2819_v1  ;;  %vm9656_vm14 = vmmov %vm9647_vm8 }
 0x1c8   : > { %v5194_v18 = vrot.slane %v5192_v37, 4  ;;  %v5201_v7 = vshrl.u32 %v5152_v13, 16  ;;  %v5204_v0 = vshll.u32 %v5152_v13, 16  ;;  %v8690_v51 = vor.u32 %v4061_v2, %v4058_v58  ;;  %6363 = vmatprep.mubr.msk.bf16.mxu0 %vm702_vm0, %v2828_v31 }
 0x1c9   : > { %v3936_v61 = vsel %vm2693_vm10, %v6995_v35, 0  ;;  %v5197_v46 = vrot.slane %v5195_v57, 5  ;;  %v2848_v19 = vshrl.u32 %v2711_v30, 16  ;;  %vm2695_vm15 = vcmp.ne.s16.totalorder %v8680_v28, 0 }
 0x1ca   : > { %v5203_v52 = vrot.slane %v5201_v7, 4  ;;  %v5206_v59 = vrot.slane %v5204_v0, 5  ;;  %v2851_v12 = vshll.u32 %v2711_v30, 16  ;;  %v2712_v27 = vsel %vm2695_vm15, %v6996_v36, 0 }
 0x1cb   : > { %vm2696_vm13 = vcmp.ne.s16.totalorder %v8655_v14, 0  ;;  %v5198_v17 = vor.u32 %v5197_v46, %v5194_v18  ;;  %v2845_v25 = vor.u32 %v2844_v10, %v2841_v43  ;;  %v4065_v23 = vshrl.u32 %v3936_v61, 16  ;;  %v8729_v10 = vld [vmem:[#allocation2 + $0x40] sm:$0xff] }
 0x1cc   : > { %v2713_v54 = vsel %vm2696_vm13, %v2360_v3, 0  ;;  %v5207_v38 = vor.u32 %v5206_v59, %v5203_v52  ;;  %v8706_v16 = vsel %vm9655_vm12, %v4053_v53, %v8690_v51  ;;  %v4068_v47 = vshll.u32 %v3936_v61, 16  ;;  %6476 = vmatmul.mubr.msk.bf16.gmra.mrb[12].mxu1 %vm702_vm0, %v8587_v60  ;;  %vm9657_vm12 = vmmov %vm9647_vm8  ;;  %v8735_v3 = vld [vmem:[#allocation2 + $0x48] sm:$0xff]  ;;  %v6997_v59 = vld [vmem:[#allocation2 + $0x80] sm:$0xff] }
 0x1cd   : > { %v8709_v1 = vsel %vm9647_vm8, %v5189_v4, %v5198_v17  ;;  %v5153_v22 = vsel %vm2684_vm1, %v8696_v41, 0  ;;  %v2850_v42 = vrot.slane %v2848_v19, 4  ;;  %v2857_v31 = vshrl.u32 %v2712_v27, 16  ;;  %6479 = vmatprep.mubr.msk.bf16.mxu1 %vm702_vm0, %v8653_v62  ;;  %vm9658_vm1 = vmmov %vm9647_vm8 }
 0x1ce   : > { %v2860_v56 = vshll.u32 %v2712_v27, 16  ;;  %v8717_v58 = vsel %vm9656_vm14, %v5198_v17, %v5207_v38  ;;  %v2853_v2 = vrot.slane %v2851_v12, 5  ;;  %v2866_v8 = vshrl.u32 %v2713_v54, 16  ;;  %vm9662_vm8 = vmmov %vm9658_vm1 }
 0x1cf   : > { %v5210_v53 = vshrl.u32 %v5153_v22, 16  ;;  %v5213_v43 = vshll.u32 %v5153_v22, 16  ;;  %v2846_v4 = vsel %vm9657_vm12, %v2836_v40, %v2845_v25  ;;  %v4067_v37 = vrot.slane %v4065_v23, 4  ;;  %6364 = vmatmul.mubr.msk.bf16.gmra.mrb[52].mxu0 %vm702_vm0, %v2837_v5  ;;  %vm9667_vm12 = vmmov %vm9658_vm1 }
 0x1d0   : > { %v2869_v33 = vshll.u32 %v2713_v54, 16  ;;  %v5154_v35 = vsel %vm2685_vm9, %v8714_v55, 0  ;;  %v3937_v30 = vsel %vm2694_vm5, %v6996_v36, 0  ;;  %v2859_v60 = vrot.slane %v2857_v31, 4  ;;  %6367 = vmatprep.mubr.msk.bf16.mxu0 %vm702_vm0, %v2846_v4  ;;  %vm9660_vm9 = vmmov %vm9658_vm1 }
 0x1d1   : > { %v5212_v57 = vrot.slane %v5210_v53, 4  ;;  %v5215_v21 = vrot.slane %v5213_v43, 5  ;;  %v5219_v13 = vshrl.u32 %v5154_v35, 16  ;;  %v2862_v40 = vrot.slane %v2860_v56, 5  ;;  %v3922_v43 = vld [vmem:[#allocation2 + $0x88] sm:$0x1f] }
 0x1d2   : > { %v4070_v18 = vrot.slane %v4068_v47, 5  ;;  %v5222_v7 = vshll.u32 %v5154_v35, 16  ;;  %v2854_v39 = vor.u32 %v2853_v2, %v2850_v42  ;;  %v8733_v0 = vrot.slane %v2866_v8, 4  ;;  %v8748_v2 = vld [vmem:[#allocation2 + $0x50] sm:$0xff] }
 0x1d3   : > { %v5216_v62 = vor.u32 %v5215_v21, %v5212_v57  ;;  %v5221_v61 = vrot.slane %v5219_v13, 4  ;;  %v2871_v46 = vrot.slane %v2869_v33, 5  ;;  %v4074_v19 = vshrl.u32 %v3937_v30, 16  ;;  %v4365_v33 = vld [vmem:[#allocation2 + $0x10] sm:$0xf8]  ;;  %v8766_v13 = vld [vmem:[#allocation2 + $0x58] sm:$0xff] }
 0x1d4   : > { %v5224_v52 = vrot.slane %v5222_v7, 5  ;;  %v5155_v5 = vsel %vm2686_vm6, %v8729_v10, 0  ;;  %v3938_v12 = vsel %vm2695_vm15, %v6997_v59, 0  ;;  %v2863_v23 = vor.u32 %v2862_v40, %v2859_v60  ;;  %6480 = vmatmul.mubr.msk.bf16.gmra.mrb[16].mxu1 %vm702_vm0, %v8670_v44  ;;  %vm9659_vm6 = vmmov %vm9658_vm1 }
 0x1d5   : > { %v8743_v36 = vsel %vm9658_vm1, %v5207_v38, %v5216_v62  ;;  %v5228_v27 = vshrl.u32 %v5155_v5, 16  ;;  %v5231_v17 = vshll.u32 %v5155_v5, 16  ;;  %v4077_v54 = vshll.u32 %v3937_v30, 16  ;;  %6483 = vmatprep.mubr.msk.bf16.mxu1 %vm702_vm0, %v8673_v9 }
 0x1d6   : > { %v5225_v47 = vor.u32 %v5224_v52, %v5221_v61  ;;  %v5156_v22 = vsel %vm2687_vm2, %v8735_v3, 0  ;;  %v2855_v38 = vsel %vm9659_vm6, %v2845_v25, %v2854_v39  ;;  %v8753_v8 = vor.u32 %v4070_v18, %v4067_v37  ;;  %vm9661_vm2 = vmmov %vm9658_vm1 }
 0x1d7   : > { %v5230_v42 = vrot.slane %v5228_v27, 4  ;;  %v5233_v31 = vrot.slane %v5231_v17, 5  ;;  %v5237_v49 = vshrl.u32 %v5156_v22, 16  ;;  %v5240_v56 = vshll.u32 %v5156_v22, 16  ;;  %6368 = vmatmul.mubr.msk.bf16.gmra.mrb[56].mxu0 %vm702_vm0, %v2855_v38  ;;  %vm9669_vm6 = vmmov %vm9661_vm2  ;;  %v8791_v38 = vld [vmem:[#allocation2 + $0x60] sm:$0xff] }
 0x1d8   : > { %v4083_v53 = vshrl.u32 %v3938_v12, 16  ;;  %v8756_v4 = vsel %vm9660_vm9, %v5216_v62, %v5225_v47  ;;  %v4086_v48 = vshll.u32 %v3938_v12, 16  ;;  %v2864_v44 = vsel %vm9661_vm2, %v2854_v39, %v2863_v23  ;;  %v9663_v39 = vld [vmem:[#allocation6_spill] sm:$0xff]  ;;  %vm9670_vm9 = vmmov %vm9661_vm2 }
 0x1d9   : > { %v5234_v35 = vor.u32 %v5233_v31, %v5230_v42  ;;  %v5239_v30 = vrot.slane %v5237_v49, 4  ;;  %v5242_v57 = vrot.slane %v5240_v56, 5  ;;  %v2872_v25 = vor.u32 %v2871_v46, %v8733_v0  ;;  %6371 = vmatprep.mubr.msk.bf16.mxu0 %vm702_vm0, %v2864_v44  ;;  %v9665_v46 = vld [vmem:[#allocation8_spill] sm:$0xff] }
 0x1da   : > { %v4076_v37 = vrot.slane %v4074_v19, 4  ;;  %v5157_v21 = vsel %vm2688_vm7, %v8748_v2, 0  ;;  %v4079_v9 = vrot.slane %v4077_v54, 5  ;;  %v3939_v60 = vsel %vm2696_vm13, %v3922_v43, 0 }
 0x1db   : > { %v8772_v40 = vsel %vm9662_vm8, %v5225_v47, %v5234_v35  ;;  %v5243_v18 = vor.u32 %v5242_v57, %v5239_v30  ;;  %v4085_v7 = vrot.slane %v4083_v53, 4  ;;  %vm9664_vm14 = vcmp.ne.s16.totalorder %v9663_v39, 0  ;;  %v8793_v53 = vld [vmem:[#allocation2 + $0x68] sm:$0xff] }
 0x1dc   : > { %v4382_v0 = vsel %vm9664_vm14, %v4365_v33, 0  ;;  %v5246_v62 = vshrl.u32 %v5157_v21, 16  ;;  %v5249_v61 = vshll.u32 %v5157_v21, 16  ;;  %v4088_v20 = vrot.slane %v4086_v48, 5  ;;  %6484 = vmatmul.mubr.msk.bf16.gmra.mrb[20].mxu1 %vm702_vm0, %v8706_v16  ;;  %vm9672_vm14 = vmmov %vm9661_vm2 }
 0x1dd   : > { %vm9666_vm7 = vcmp.ne.s16.totalorder %v9665_v46, 0  ;;  %v8780_v52 = vsel %vm9667_vm12, %v5234_v35, %v5243_v18  ;;  %vm9668_vm1 = vcmp.ne.s16.totalorder %v8421_v45, 0  ;;  %v4092_v59 = vshrl.u32 %v3939_v60, 16  ;;  %vm9677_vm12 = vmmov %vm9661_vm2 }
 0x1de   : > { %v4383_v19 = vsel %vm9666_vm7, %v8599_v6, 0  ;;  %v5158_v5 = vsel %vm9668_vm1, %v8766_v13, 0  ;;  %v4095_v12 = vshll.u32 %v3939_v60, 16  ;;  %v5248_v27 = vrot.slane %v5246_v62, 4  ;;  %v8811_v62 = vld [vmem:[#allocation2 + $0x70] sm:$0xff]  ;;  %vm9673_vm7 = vmmov %vm9661_vm2 }
 0x1df   : > { %v5251_v17 = vrot.slane %v5249_v61, 5  ;;  %v4072_v54 = vsel %vm9669_vm6, %v8690_v51, %v8753_v8  ;;  %v4408_v47 = vshrl.u32 %v4382_v0, 16  ;;  %v5255_v22 = vshrl.u32 %v5158_v5, 16  ;;  %vm9678_vm1 = vmmov %vm9661_vm2 }
 0x1e0   : > { %v5258_v42 = vshll.u32 %v5158_v5, 16  ;;  %v2873_v31 = vsel %vm9670_vm9, %v2863_v23, %v2872_v25  ;;  %v4411_v49 = vshll.u32 %v4382_v0, 16  ;;  %v4416_v56 = vshrl.u32 %v4383_v19, 16  ;;  %6487 = vmatprep.mubr.msk.bf16.mxu1 %vm702_vm0, %v4072_v54  ;;  %v9675_v5 = vld [vmem:[#allocation11_spill] sm:$0xff]  ;;  %vm9679_vm6 = vmmov %vm9678_vm1 }
 0x1e1   : > { %v5252_v45 = vor.u32 %v5251_v17, %v5248_v27  ;;  %v4080_v43 = vor.u32 %v4079_v9, %v4076_v37  ;;  %v4419_v48 = vshll.u32 %v4383_v19, 16  ;;  %v5257_v51 = vrot.slane %v5255_v22, 4  ;;  %6372 = vmatmul.mubr.msk.bf16.gmra.mrb[60].mxu0 %vm702_vm0, %v2873_v31  ;;  %v8825_v22 = vld [vmem:[#allocation2 + $0x78] sm:$0xff] }
 0x1e2   : > { %v5260_v33 = vrot.slane %v5258_v42, 5  ;;  %v4089_v35 = vor.u32 %v4088_v20, %v4085_v7  ;;  %v4094_v30 = vrot.slane %v4092_v59, 4  ;;  %v4097_v16 = vrot.slane %v4095_v12, 5  ;;  %6583 = vmatprep.mubr.msk.bf16.mxu0 %vm702_vm0, %v8663_v15 }
 0x1e3   : > { %v8798_v23 = vsel %vm9661_vm2, %v5243_v18, %v5252_v45  ;;  %v4410_v57 = vrot.slane %v4408_v47, 3  ;;  %vm9671_vm8 = vcmp.ne.s16.totalorder %v8479_v29, 0  ;;  %v5160_v37 = vsel %vm2691_vm4, %v8793_v53, 0 }
 0x1e4   : > { %v5261_v44 = vor.u32 %v5260_v33, %v5257_v51  ;;  %v5159_v25 = vsel %vm9671_vm8, %v8791_v38, 0  ;;  %v4413_v21 = vrot.slane %v4411_v49, 4  ;;  %v4418_v9 = vrot.slane %v4416_v56, 3 }
 0x1e5   : > { %v5264_v60 = vshrl.u32 %v5159_v25, 16  ;;  %v5267_v7 = vshll.u32 %v5159_v25, 16  ;;  %v4421_v39 = vrot.slane %v4419_v48, 4  ;;  %v5273_v0 = vshrl.u32 %v5160_v37, 16 }
 0x1e6   : > { %v8809_v18 = vsel %vm9672_vm14, %v5252_v45, %v5261_v44  ;;  %v5276_v15 = vshll.u32 %v5160_v37, 16  ;;  %v4081_v29 = vsel %vm9673_vm7, %v8753_v8, %v4080_v43  ;;  %v4098_v61 = vor.u32 %v4097_v16, %v4094_v30  ;;  %vm9689_vm14 = vmmov %vm9678_vm1 }
 0x1e7   : > { %v5266_v20 = vrot.slane %v5264_v60, 4  ;;  %v5269_v46 = vrot.slane %v5267_v7, 5  ;;  %v4425_v19 = vshrl.u32 %v9674_v63, 16  ;;  %vm9676_vm4 = vcmp.ne.s16.totalorder %v9675_v5, 0  ;;  %6488 = vmatmul.mubr.msk.bf16.gmra.mrb[24].mxu1 %vm702_vm0, %v4081_v29  ;;  %v8849_v7 = vld [vmem:[#allocation2 + $0x80] sm:$0xff]  ;;  %vm9690_vm7 = vmmov %vm9678_vm1 }
 0x1e8   : > { %v4385_v59 = vsel %vm9676_vm4, %v8660_v11, 0  ;;  %v5275_v12 = vrot.slane %v5273_v0, 4  ;;  %v5278_v27 = vrot.slane %v5276_v15, 5  ;;  %v4090_v17 = vsel %vm9677_vm12, %v4080_v43, %v4089_v35  ;;  %vm9693_vm4 = vmmov %vm9678_vm1 }
 0x1e9   : > { %v4099_v54 = vsel %vm9678_vm1, %v4089_v35, %v4098_v61  ;;  %v5270_v47 = vor.u32 %v5269_v46, %v5266_v20  ;;  %v5161_v8 = vsel %vm2692_vm3, %v8811_v62, 0  ;;  %6491 = vmatprep.mubr.msk.bf16.mxu1 %vm702_vm0, %v4090_v17  ;;  %v4414_v42 = vor.u32 %v4413_v21, %v4410_v57  ;;  %6584 = vmatmul.mubr.msk.bf16.vlgmr.msra.gmra.mrb[64].mxu0 %vm702_vm0, %v8709_v1  ;;  %vm9680_vm3 = vmmov %vm9678_vm1  ;;  %v9681_v1 = vld [vmem:[#allocation12_spill] sm:$0xff]  ;;  %v9687_v46 = vld [vmem:[#allocation15_spill] sm:$0xff] }
 0x1ea   : > { %v4422_v31 = vor.u32 %v4421_v39, %v4418_v9  ;;  %v4428_v49 = vshll.u32 %v9674_v63, 16  ;;  %v5279_v56 = vor.u32 %v5278_v27, %v5275_v12  ;;  %v4434_v45 = vshrl.u32 %v4385_v59, 16  ;;  %6587 = vmatprep.mubr.msk.bf16.mxu0 %vm702_vm0, %v8717_v58  ;;  %v9683_v58 = vld [vmem:[#allocation13_spill] sm:$0xff] }
 0x1eb   : > { %v8832_v43 = vsel %vm9679_vm6, %v5261_v44, %v5270_v47  ;;  %v5282_v48 = vshrl.u32 %v5161_v8, 16  ;;  %v5285_v51 = vshll.u32 %v5161_v8, 16  ;;  %v4427_v26 = vrot.slane %v4425_v19, 3 }
 0x1ec   : > { %v4437_v33 = vshll.u32 %v4385_v59, 16  ;;  %v8837_v35 = vsel %vm9680_vm3, %v5270_v47, %v5279_v56  ;;  %v5162_v30 = vsel %vm2693_vm10, %v8825_v22, 0  ;;  %vm9682_vm9 = vcmp.ne.s16.totalorder %v9681_v1, 0 }
 0x1ed   : > { %v4386_v16 = vsel %vm9682_vm9, %v8696_v41, 0  ;;  %v5284_v57 = vrot.slane %v5282_v48, 4  ;;  %v5287_v44 = vrot.slane %v5285_v51, 5  ;;  %v5291_v25 = vshrl.u32 %v5162_v30, 16 }
 0x1ee   : > { %v4423_v37 = vsel %vm1974_vm11, %v4414_v42, %v4422_v31  ;;  %v4430_v21 = vrot.slane %v4428_v49, 4  ;;  %vm9684_vm2 = vcmp.ne.s16.totalorder %v9683_v58, 0  ;;  %v5294_v60 = vshll.u32 %v5162_v30, 16 }
 0x1ef   : > { %v4387_v9 = vsel %vm9684_vm2, %v8714_v55, 0  ;;  %v4436_v39 = vrot.slane %v4434_v45, 3  ;;  %vm9686_vm10 = vcmp.ne.s16.totalorder %v9685_v32, 0  ;;  %v5288_v15 = vor.u32 %v5287_v44, %v5284_v57  ;;  %6492 = vmatmul.mubr.msk.bf16.gmra.mrb[28].mxu1 %vm702_vm0, %v4099_v54 }
 0x1f0   : > { %v4388_v0 = vsel %vm9686_vm10, %v8729_v10, 0  ;;  %v5293_v29 = vrot.slane %v5291_v25, 4  ;;  %v4439_v61 = vrot.slane %v4437_v33, 4  ;;  %v4443_v20 = vshrl.u32 %v4386_v16, 16  ;;  %6503 = vmatprep.mubr.msk.bf16.mxu1 %vm702_vm0, %v4423_v37 }
 0x1f1   : > { %vm9688_vm8 = vcmp.ne.s16.totalorder %v9687_v46, 0  ;;  %v5296_v19 = vrot.slane %v5294_v60, 5  ;;  %v4446_v5 = vshll.u32 %v4386_v16, 16  ;;  %v4452_v59 = vshrl.u32 %v4387_v9, 16  ;;  %6588 = vmatmul.mubr.msk.bf16.gmra.mrb[68].mxu0 %vm702_vm0, %v8743_v36  ;;  %v6979_v36 = vld [vmem:[%s9419_s3 + $0xe8] sm:$0xff]  }
 0x1f2   : > { %v4389_v63 = vsel %vm9688_vm8, %v8735_v3, 0  ;;  %v8859_v12 = vsel %vm9689_vm14, %v5279_v56, %v5288_v15  ;;  %v5163_v27 = vsel %vm2694_vm5, %v8849_v7, 0  ;;  %v4455_v17 = vshll.u32 %v4387_v9, 16  ;;  %6591 = vmatprep.mubr.msk.bf16.mxu0 %vm702_vm0, %v8756_v4  ;;  %v9691_v60 = vld [vmem:[#allocation16_spill] sm:$0xff] }
 0x1f3   : > { %v4461_v47 = vshrl.u32 %v4388_v0, 16  ;;  %v4464_v8 = vshll.u32 %v4388_v0, 16  ;;  %v5297_v42 = vor.u32 %v5296_v19, %v5293_v29  ;;  %v4470_v49 = vshrl.u32 %v4389_v63, 16  ;;  %v5148_v0 = vld [vmem:[#allocation2 + $0x90] sm:$0x1f] }
 0x1f4   : > { %v4473_v54 = vshll.u32 %v4389_v63, 16  ;;  %v5300_v45 = vshrl.u32 %v5163_v27, 16  ;;  %v5303_v48 = vshll.u32 %v5163_v27, 16  ;;  %v4431_v56 = vor.u32 %v4430_v21, %v4427_v26  ;;  %v9694_v63 = vld [vmem:[#allocation17_spill] sm:$0xff] }
 0x1f5   : > { %v8870_v24 = vsel %vm9690_vm7, %v5288_v15, %v5297_v42  ;;  %v4440_v51 = vor.u32 %v4439_v61, %v4436_v39  ;;  %v4445_v33 = vrot.slane %v4443_v20, 3  ;;  %v4448_v16 = vrot.slane %v4446_v5, 4  ;;  %v6980_v20 = vld [vmem:[%s9419_s3 + $0xf0] sm:$0xff]  }
 0x1f6   : > { %v5302_v30 = vrot.slane %v5300_v45, 4  ;;  %v5305_v1 = vrot.slane %v5303_v48, 5  ;;  %v4454_v57 = vrot.slane %v4452_v59, 3  ;;  %v4457_v44 = vrot.slane %v4455_v17, 4 }
 0x1f7   : > { %v4463_v25 = vrot.slane %v4461_v47, 3  ;;  %v4466_v37 = vrot.slane %v4464_v8, 4  ;;  %v4472_v58 = vrot.slane %v4470_v49, 3  ;;  %v4475_v9 = vrot.slane %v4473_v54, 4  ;;  %v6981_v47 = vld [vmem:[%s9419_s3 + $0xf8] sm:$0xff]  }
 0x1f8   : > { %v8875_v4 = vor.u32 %v5305_v1, %v5302_v30  ;;  %v4432_v26 = vsel %vm1974_vm11, %v4422_v31, %v4431_v56  ;;  %v4441_v21 = vsel %vm1974_vm11, %v4431_v56, %v4440_v51  ;;  %vm9692_vm5 = vcmp.ne.s16.totalorder %v9691_v60, 0  ;;  %v8936_v30 = vld [vmem:[#allocation2 + $0x90] sm:$0xf] }
 0x1f9   : > { %6504 = vmatmul.mubr.msk.bf16.vlgmr.msra.gmra.mrb[0].mxu1 %vm702_vm0, %v4432_v26  ;;  %v8883_v39 = vsel %vm9692_vm5, %v8748_v2, 0  ;;  %v4449_v15 = vor.u32 %v4448_v16, %v4445_v33  ;;  %v4458_v31 = vor.u32 %v4457_v44, %v4454_v57  ;;  %6592 = vmatmul.mubr.msk.bf16.gmra.mrb[72].mxu0 %vm702_vm0, %v8772_v40  ;;  %v4467_v29 = vor.u32 %v4466_v37, %v4463_v25  ;;  %v8934_v33 = vld [vmem:[#allocation2 + $0x88] sm:$0xff] }
 0x1fa   : > { %v8887_v32 = vsel %vm9693_vm4, %v5297_v42, %v8875_v4  ;;  %6536 = vmatpush3.bf16.msra.mxu1 %v8646_v50  ;;  %6507 = vmatprep.mubr.msk.bf16.mxu1 %vm702_vm0, %v4441_v21  ;;  %v8893_v61 = vor.u32 %v4475_v9, %v4472_v58  ;;  %v4479_v50 = vshrl.u32 %v8883_v39, 16  ;;  %v8903_v46 = vsel %vm2696_vm13, %v5148_v0, 0  ;;  %v8982_v0 = vld [vmem:[%s9419_s3 + $0x100] sm:$0xff]  }
 0x1fb   : > { %6537 = vmatprep.subr.bf16.mxu1 %v6979_v36  ;;  %6595 = vmatprep.mubr.msk.bf16.mxu0 %vm702_vm0, %v8780_v52  ;;  %vm9695_vm12 = vcmp.ne.s16.totalorder %v9694_v63, 0  ;;  %v4450_v19 = vsel %vm1974_vm11, %v4440_v51, %v4449_v15  ;;  %v4459_v5 = vsel %vm1974_vm11, %v4449_v15, %v4458_v31  ;;  %v4855_v59 = vrot.slane %v8660_v11, 4  ;;  %v7002_v11 = vld [vmem:[%s9419_s3 + $0x118] sm:$0xff]  }
 0x1fc   : > { %v4391_v40 = vsel %vm9695_vm12, %v8766_v13, 0  ;;  %v4857_v27 = vrot.slane %v8696_v41, 4  ;;  %v4468_v52 = vsel %vm1974_vm11, %v4458_v31, %v4467_v29  ;;  %v4477_v14 = vsel %vm1974_vm11, %v4467_v29, %v8893_v61 }
 0x1fd   : > { %v4482_v17 = vshll.u32 %v8883_v39, 16  ;;  %v4859_v8 = vrot.slane %v8714_v55, 4  ;;  %v4481_v42 = vrot.slane %v4479_v50, 3  ;;  %v4488_v49 = vshrl.u32 %v4391_v40, 16 }
 0x1fe   : > { %6538 = vmatpush3.bf16.msra.mxu1 %v6979_v36  ;;  %vm9696_vm13 = vcmask 1043456   ;;  %v4861_v54 = vrot.slane %v8729_v10, 4  ;;  %v4863_v48 = vrot.slane %v8735_v3, 4  ;;  %v4865_v56 = vrot.slane %v8748_v2, 4 }
 0x1ff   : > { %6539 = vmatprep.subr.bf16.mxu1 %v6980_v20  ;;  %v8923_v41 = vsel %vm9696_vm13, %v4855_v59, %v4857_v27  ;;  %vm9697_vm1 = vmmov %vm9696_vm13  ;;  %v4867_v55 = vrot.slane %v8766_v13, 4  ;;  %v4491_v51 = vshll.u32 %v4391_v40, 16  ;;  %v4869_v1 = vrot.slane %v8791_v38, 4 }
 0x200   : > { %v8928_v45 = vsel %vm9697_vm1, %v4857_v27, %v4859_v8  ;;  %vm9698_vm6 = vmmov %vm9697_vm1  ;;  %v4871_v16 = vrot.slane %v8793_v53, 4  ;;  %v4873_v57 = vrot.slane %v8811_v62, 4  ;;  %v4875_v25 = vrot.slane %v8825_v22, 4 }
 0x201   : > { %6508 = vmatmul.mubr.msk.bf16.gmra.mrb[4].mxu1 %vm702_vm0, %v4450_v19  ;;  %v8939_v10 = vsel %vm9698_vm6, %v4859_v8, %v4861_v54  ;;  %6596 = vmatmul.mubr.msk.bf16.gmra.mrb[76].mxu0 %vm702_vm0, %v8798_v23  ;;  %vm9699_vm3 = vmmov %vm9697_vm1  ;;  %v4877_v36 = vrot.slane %v8849_v7, 4  ;;  %v4879_v58 = vrot.slane %v8934_v33, 4  ;;  %v4881_v9 = vrot.slane %v8936_v30, 4 }
 0x202   : > { %6511 = vmatprep.mubr.msk.bf16.mxu1 %vm702_vm0, %v4459_v5  ;;  %6540 = vmatpush3.bf16.msra.mxu1 %v6980_v20  ;;  %v8946_v3 = vsel %vm9699_vm3, %v4861_v54, %v4863_v48  ;;  %vm9700_vm9 = vmmov %vm9697_vm1  ;;  %v5318_v31 = vshrl.u32 %v8903_v46, 16  ;;  %v5321_v29 = vshll.u32 %v8903_v46, 16  ;;  %v4484_v20 = vrot.slane %v4482_v17, 4  ;;  %v9709_v5 = vld [vmem:[#allocation18_spill] sm:$0xff]  ;;  %v9711_v54 = vld [vmem:[#allocation19_spill] sm:$0xff] }
 0x203   : > { %6541 = vmatprep.subr.bf16.mxu1 %v6981_v47  ;;  %v8949_v2 = vsel %vm9700_vm9, %v4863_v48, %v4865_v56  ;;  %vm9701_vm2 = vmmov %vm9697_vm1  ;;  %6599 = vmatprep.mubr.msk.bf16.mxu0 %vm702_vm0, %v8809_v18  ;;  %v5164_v18 = vsel %vm2695_vm15, %v8934_v33, 0  ;;  %v4490_v50 = vrot.slane %v4488_v49, 3  ;;  %v4493_v19 = vrot.slane %v4491_v51, 4 }
 0x204   : > { %v8952_v13 = vsel %vm9701_vm2, %v4865_v56, %v4867_v55  ;;  %vm9702_vm10 = vmmov %vm9697_vm1  ;;  %v5309_v60 = vshrl.u32 %v5164_v18, 16  ;;  %v5312_v39 = vshll.u32 %v5164_v18, 16  ;;  %vm9710_vm12 = vcmp.ne.s16.totalorder %v9709_v5, 0 }
 0x205   : > { %v8958_v44 = vsel %vm9702_vm10, %v4867_v55, %v4869_v1  ;;  %vm9703_vm8 = vmmov %vm9697_vm1  ;;  %v4392_v27 = vsel %vm9710_vm12, %v8791_v38, 0  ;;  %v5323_v8 = vrot.slane %v5321_v29, 5  ;;  %vm9712_vm13 = vcmp.ne.s16.totalorder %v9711_v54, 0 }
 0x206   : > { %v8961_v23 = vsel %vm9703_vm8, %v4869_v1, %v4871_v16  ;;  %vm9704_vm14 = vmmov %vm9697_vm1  ;;  %6542 = vmatpush3.bf16.msra.mxu1 %v6981_v47  ;;  %v5311_v63 = vrot.slane %v5309_v60, 4  ;;  %v5314_v40 = vrot.slane %v5312_v39, 5  ;;  %v5320_v47 = vrot.slane %v5318_v31, 4 }
 0x207   : > { %v8966_v37 = vsel %vm9704_vm14, %v4871_v16, %v4873_v57  ;;  %vm9705_vm7 = vmmov %vm9697_vm1  ;;  %6615 = vmatprep.subr.bf16.mxu1 %v8982_v0  ;;  %v4393_v48 = vsel %vm9712_vm13, %v8793_v53, 0  ;;  %v4497_v49 = vshrl.u32 %v4392_v27, 16  ;;  %v4500_v56 = vshll.u32 %v4392_v27, 16  ;;  %v9721_v27 = vld [vmem:[#allocation27_spill] sm:$0xff] }
 0x208   : > { %v8974_v26 = vsel %vm9705_vm7, %v4873_v57, %v4875_v25  ;;  %vm9706_vm5 = vmmov %vm9697_vm1  ;;  %v5315_v46 = vor.u32 %v5314_v40, %v5311_v63  ;;  %v5324_v17 = vor.u32 %v5323_v8, %v5320_v47  ;;  %v4506_v55 = vshrl.u32 %v4393_v48, 16 }
 0x209   : > { %v8977_v21 = vsel %vm9706_vm5, %v4875_v25, %v4877_v36  ;;  %vm9707_vm4 = vmmov %vm9697_vm1  ;;  %6512 = vmatmul.mubr.msk.bf16.gmra.mrb[8].mxu1 %vm702_vm0, %v4468_v52  ;;  %6600 = vmatmul.mubr.msk.bf16.gmra.mrb[80].mxu0 %vm702_vm0, %v8832_v43  ;;  %v4485_v52 = vor.u32 %v4484_v20, %v4481_v42  ;;  %v4509_v51 = vshll.u32 %v4393_v48, 16  ;;  %v4499_v1 = vrot.slane %v4497_v49, 3 }
 0x20a   : > { %v8986_v15 = vsel %vm9707_vm4, %v4877_v36, %v4879_v58  ;;  %vm9708_vm15 = vmmov %vm9697_vm1  ;;  %6515 = vmatprep.mubr.msk.bf16.mxu1 %vm702_vm0, %v4477_v14  ;;  %6603 = vmatprep.mubr.msk.bf16.mxu0 %vm702_vm0, %v8837_v35  ;;  %vm9713_vm1 = vsmask.f32 3328  ;;  %v4494_v14 = vor.u32 %v4493_v19, %v4490_v50  ;;  %v4502_v16 = vrot.slane %v4500_v56, 4  ;;  %v9717_v36 = vld [vmem:[#allocation24_spill] sm:$0xff] }
 0x20b   : > { %v8989_v28 = vsel %vm9708_vm15, %v4879_v58, %v4881_v9  ;;  %v9007_v38 = vsel %vm9713_vm1, %v8875_v4, %v5315_v46  ;;  %vm9714_vm6 = vmmov %vm9713_vm1  ;;  %v4486_v43 = vsel %vm1974_vm11, %v8893_v61, %v4485_v52  ;;  %v4508_v42 = vrot.slane %v4506_v55, 3  ;;  %v9715_v4 = vld [vmem:[#allocation23_spill] sm:$0xff] }
 0x20c   : > { %v9010_v53 = vsel %vm9714_vm6, %v5315_v46, %v5324_v17  ;;  %v4495_v35 = vsel %vm1974_vm11, %v4485_v52, %v4494_v14  ;;  %v4511_v57 = vrot.slane %v4509_v51, 4  ;;  %vm9716_vm3 = vcmp.ne.s16.totalorder %v9715_v4, 0  ;;  %vm9725_vm14 = vmmov %vm9707_vm4 }
 0x20d   : > { %v4394_v25 = vsel %vm9716_vm3, %v8811_v62, 0  ;;  %vm9718_vm9 = vcmp.ne.s16.totalorder %v9717_v36, 0  ;;  %v4503_v61 = vor.u32 %v4502_v16, %v4499_v1  ;;  %vm9722_vm10 = vcmp.ne.s16.totalorder %v9721_v27, 0  ;;  %vm9726_vm7 = vmmov %vm9707_vm4 }
 0x20e   : > { %v4395_v58 = vsel %vm9718_vm9, %v8825_v22, 0  ;;  %v4515_v9 = vshrl.u32 %v4394_v25, 16  ;;  %v4518_v18 = vshll.u32 %v4394_v25, 16  ;;  %v4512_v60 = vor.u32 %v4511_v57, %v4508_v42  ;;  %vm9727_vm5 = vmmov %vm9707_vm4 }
 0x20f   : > { %v4524_v39 = vshrl.u32 %v4395_v58, 16  ;;  %v4527_v31 = vshll.u32 %v4395_v58, 16  ;;  %v4504_v62 = vsel %vm1974_vm11, %v4494_v14, %v4503_v61  ;;  %v4397_v47 = vsel %vm9722_vm10, %v8934_v33, 0  ;;  %v6999_v58 = vld [vmem:[#allocation2 + $0x20] sm:$0xff] }
 0x210   : > { %v4517_v29 = vrot.slane %v4515_v9, 3  ;;  %v4520_v20 = vrot.slane %v4518_v18, 4  ;;  %v4513_v22 = vsel %vm1974_vm11, %v4503_v61, %v4512_v60  ;;  %v4542_v54 = vshrl.u32 %v4397_v47, 16  ;;  %v7001_v18 = vld [vmem:[%s9419_s3 + $0x110] sm:$0xff]  }
 0x211   : > { %6516 = vmatmul.mubr.msk.bf16.gmra.mrb[12].mxu1 %vm702_vm0, %v4486_v43  ;;  %6604 = vmatmul.mubr.msk.bf16.gmra.mrb[84].mxu0 %vm702_vm0, %v8859_v12  ;;  %v4526_v50 = vrot.slane %v4524_v39, 3  ;;  %v4529_v63 = vrot.slane %v4527_v31, 4  ;;  %v9719_v12 = vld [vmem:[#allocation25_spill] sm:$0xff]  ;;  %v4545_v48 = vshll.u32 %v4397_v47, 16  ;;  %v4850_v4 = vrot.slane %v8575_v34, 4  ;;  %v7000_v34 = vld [vmem:[%s9419_s3 + $0x108] sm:$0xff]  }
 0x212   : > { %6519 = vmatprep.mubr.msk.bf16.mxu1 %vm702_vm0, %v4495_v35  ;;  %6607 = vmatprep.mubr.msk.bf16.mxu0 %vm702_vm0, %v8870_v24  ;;  %vm9720_vm2 = vcmp.ne.s16.totalorder %v9719_v12, 0  ;;  %v4521_v40 = vor.u32 %v4520_v20, %v4517_v29  ;;  %v4544_v56 = vrot.slane %v4542_v54, 3  ;;  %v4853_v61 = vrot.slane %v6999_v58, 4 }
 0x213   : > { %v4396_v24 = vsel %vm9720_vm2, %v8849_v7, 0  ;;  %v4530_v8 = vor.u32 %v4529_v63, %v4526_v50  ;;  %v4547_v14 = vrot.slane %v4545_v48, 4 }
 0x214   : > { %v4533_v19 = vshrl.u32 %v4396_v24, 16  ;;  %v4536_v5 = vshll.u32 %v4396_v24, 16  ;;  %v4522_v46 = vsel %vm1974_vm11, %v4512_v60, %v4521_v40 }
 0x215   : > { %v4531_v7 = vsel %vm1974_vm11, %v4521_v40, %v4530_v8  ;;  %v4548_v43 = vor.u32 %v4547_v14, %v4544_v56 }
 0x216   : > { %v4535_v17 = vrot.slane %v4533_v19, 3  ;;  %v4538_v52 = vrot.slane %v4536_v5, 4 }
 0x218   : > { %v4539_v33 = vor.u32 %v4538_v52, %v4535_v17 }
 0x219   : > { %6520 = vmatmul.mubr.msk.bf16.gmra.mrb[16].mxu1 %vm702_vm0, %v4504_v62  ;;  %6608 = vmatmul.mubr.msk.bf16.gmra.mrb[88].mxu0 %vm702_vm0, %v8887_v32  ;;  %v9723_v32 = vld [vmem:[#allocation20_spill] sm:$0xff] }
 0x21a   : > { %6523 = vmatprep.mubr.msk.bf16.mxu1 %vm702_vm0, %v4513_v22  ;;  %vm9724_vm8 = vcmp.ne.s16.totalorder %v9723_v32, 0  ;;  %v4540_v1 = vsel %vm1974_vm11, %v4530_v8, %v4539_v33  ;;  %v4549_v42 = vsel %vm1974_vm11, %v4539_v33, %v4548_v43 }
 0x21b   : > { %v4398_v49 = vsel %vm9724_vm8, %v8936_v30, 0  ;;  %v4851_v30 = vrot.slane %v8599_v6, 4  ;;  %v4856_v6 = vsel %vm9727_vm5, %v4853_v61, %v4855_v59 }
 0x21c   : > { %v4551_v55 = vshrl.u32 %v4398_v49, 16  ;;  %v4554_v51 = vshll.u32 %v4398_v49, 16 }
 0x21d   : > { %v4852_v36 = vsel %vm9725_vm14, %v4850_v4, %v4851_v30  ;;  %v4854_v9 = vsel %vm9726_vm7, %v4851_v30, %v4853_v61 }
 0x21e   : > { %v4553_v16 = vrot.slane %v4551_v55, 3  ;;  %v4556_v35 = vrot.slane %v4554_v51, 4 }
 0x220   : > { %v4557_v57 = vor.u32 %v4556_v35, %v4553_v16 }
 0x221   : > { %6524 = vmatmul.mubr.msk.bf16.gmra.mrb[20].mxu1 %vm702_vm0, %v4522_v46 }
 0x222   : > { %6527 = vmatprep.mubr.msk.bf16.mxu1 %vm702_vm0, %v4531_v7  ;;  %v4558_v25 = vsel %vm1974_vm11, %v4548_v43, %v4557_v57 }
 0x229   : > { %6528 = vmatmul.mubr.msk.bf16.gmra.mrb[24].mxu1 %vm702_vm0, %v4540_v1 }
 0x22a   : > { %6531 = vmatprep.mubr.msk.bf16.mxu1 %vm702_vm0, %v4549_v42 }
 0x231   : > { %6532 = vmatmul.mubr.msk.bf16.gmra.mrb[28].mxu1 %vm702_vm0, %v4558_v25 }
 0x232   : > { %6543 = vmatprep.mubr.msk.bf16.mxu1 %vm702_vm0, %v4852_v36 }
 0x239   : > { %6544 = vmatmul.mubr.msk.bf16.vlgmr.msra.gmra.mrb[0].mxu1 %vm702_vm0, %v4854_v9 }
 0x23a   : > { %6619 = vmatpush3.bf16.msra.mxu1 %v8982_v0  ;;  %6547 = vmatprep.mubr.msk.bf16.mxu1 %vm702_vm0, %v4856_v6 }
 0x23b   : > { %6616 = vmatprep.subr.bf16.mxu1 %v7000_v34 }
 0x23e   : > { %6620 = vmatpush3.bf16.msra.mxu1 %v7000_v34 }
 0x23f   : > { %6617 = vmatprep.subr.bf16.mxu1 %v7001_v18 }
 0x241   : > { %6548 = vmatmul.mubr.msk.bf16.gmra.mrb[4].mxu1 %vm702_vm0, %v8923_v41 }
 0x242   : > { %6551 = vmatprep.mubr.msk.bf16.mxu1 %vm702_vm0, %v8928_v45  ;;  %6621 = vmatpush3.bf16.msra.mxu1 %v7001_v18 }
 0x243   : > { %6618 = vmatprep.subr.bf16.mxu1 %v7002_v11 }
 0x246   : > { %6622 = vmatpush3.bf16.msra.mxu1 %v7002_v11  ;;  %v9213_v11 = vld [vmem:[%s9420_s4] ss:$0 sm:$0xff] }
 0x249   : > { %6552 = vmatmul.mubr.msk.bf16.gmra.mrb[8].mxu1 %vm702_vm0, %v8939_v10 }
 0x24a   : > { %6555 = vmatprep.mubr.msk.bf16.mxu1 %vm702_vm0, %v8946_v3 }
 0x251   : > { %6556 = vmatmul.mubr.msk.bf16.gmra.mrb[12].mxu1 %vm702_vm0, %v8949_v2 }
 0x252   : > { %6559 = vmatprep.mubr.msk.bf16.mxu1 %vm702_vm0, %v8952_v13 }
 0x259   : > { %6560 = vmatmul.mubr.msk.bf16.gmra.mrb[16].mxu1 %vm702_vm0, %v8958_v44 }
 0x25a   : > { %6563 = vmatprep.mubr.msk.bf16.mxu1 %vm702_vm0, %v8961_v23 }
 0x261   : > { %6564 = vmatmul.mubr.msk.bf16.gmra.mrb[20].mxu1 %vm702_vm0, %v8966_v37 }
 0x262   : > { %6567 = vmatprep.mubr.msk.bf16.mxu1 %vm702_vm0, %v8974_v26 }
 0x269   : > { %6568 = vmatmul.mubr.msk.bf16.gmra.mrb[24].mxu1 %vm702_vm0, %v8977_v21 }
 0x26a   : > { %6571 = vmatprep.mubr.msk.bf16.mxu1 %vm702_vm0, %v8986_v15 }
 0x271   : > { %6572 = vmatmul.mubr.msk.bf16.gmra.mrb[28].mxu1 %vm702_vm0, %v8989_v28 }
 0x272   : > { %6611 = vmatprep.mubr.msk.bf16.mxu1 %vm702_vm0, %v9007_v38 }
 0x27a   : > { %v9102_v59 = vpop.f32.mrb[32].mxu0 }
 0x27b   : > { %v9104_v41 = vpop.f32.mrb[33].mxu0 }
 0x27c   : > { %v9106_v45 = vpop.f32.mrb[34].mxu0 }
 0x27d   : > { %6612 = vmatmul.mubr.msk.bf16.vlgmr.msra.gmra.mrb[28].mxu1 %vm702_vm0, %v9010_v53  ;;  %v9108_v10 = vpop.f32.mrb[35].mxu0 }
 0x282   : > { %v9110_v3 = vpop.f32.mrb[36].mxu0 }
 0x283   : > { %v9112_v2 = vpop.f32.mrb[37].mxu0 }
 0x284   : > { %v9114_v13 = vpop.f32.mrb[38].mxu0 }
 0x285   : > { %v9116_v44 = vpop.f32.mrb[39].mxu0 }
 0x28a   : > { %v9118_v23 = vpop.f32.mrb[40].mxu0 }
 0x28b   : > { %v9120_v37 = vpop.f32.mrb[41].mxu0 }
 0x28c   : > { %v9122_v26 = vpop.f32.mrb[42].mxu0 }
 0x28d   : > { %v9124_v21 = vpop.f32.mrb[43].mxu0 }
 0x292   : > { %v9126_v0 = vpop.f32.mrb[44].mxu0 }
 0x293   : > { %v9128_v15 = vpop.f32.mrb[45].mxu0 }
 0x294   : > { %v9130_v28 = vpop.f32.mrb[46].mxu0 }
 0x295   : > { %v9132_v38 = vpop.f32.mrb[47].mxu0 }
 0x29a   : > { %v9134_v53 = vpop.f32.mrb[48].mxu0 }
 0x29b   : > { %v9136_v60 = vpop.f32.mrb[49].mxu0 }
 0x29c   : > { %v9138_v39 = vpop.f32.mrb[50].mxu0 }
 0x29d   : > { %v9140_v31 = vpop.f32.mrb[51].mxu0 }
 0x2a2   : > { %v9142_v62 = vpop.f32.mrb[52].mxu0 }
 0x2a3   : > { %v9144_v29 = vpop.f32.mrb[53].mxu0 }
 0x2a4   : > { %v9146_v20 = vpop.f32.mrb[54].mxu0 }
 0x2a5   : > { %v9148_v22 = vpop.f32.mrb[55].mxu0 }
 0x2aa   : > { %v9150_v50 = vpop.f32.mrb[56].mxu0 }
 0x2ab   : > { %v9152_v63 = vpop.f32.mrb[57].mxu0 }
 0x2ac   : > { %v9154_v12 = vpop.f32.mrb[58].mxu0 }
 0x2ad   : > { %9728 = vst [vmem:[#allocation10_spill] sm:$0xff] %v9154_v12  ;;  %v9156_v24 = vpop.f32.mrb[59].mxu0 }
 0x2ae   : > { %9729 = vst [vmem:[#allocation37_spill] sm:$0xff] %v9156_v24 }
 0x2b4   : > { %v9158_v40 = vpop.f32.mrb[60].mxu0 }
 0x2b5   : > { %9730 = vst [vmem:[#allocation30_spill] sm:$0xff] %v9158_v40  ;;  %v9160_v19 = vpop.f32.mrb[61].mxu0 }
 0x2b6   : > { %9731 = vst [vmem:[#allocation36_spill] sm:$0xff] %v9160_v19  ;;  %v9162_v5 = vpop.f32.mrb[62].mxu0 }
 0x2b7   : > { %9732 = vst [vmem:[#allocation31_spill] sm:$0xff] %v9162_v5  ;;  %v9164_v27 = vpop.f32.mrb[63].mxu0 }
 0x2b8   : > { %9733 = vst [vmem:[#allocation32_spill] sm:$0xff] %v9164_v27 }
 0x2bc   : > { %v6585_v47 = vpop.f32.mrb[64].mxu0 }
 0x2bd   : > { %v5432_v8 = vpop.f32.mrb[65].mxu0 }
 0x2be   : > { %v6586_v54 = vpop.f32.mrb[66].mxu0 }
 0x2bf   : > { %v5435_v48 = vpop.f32.mrb[67].mxu0 }
 0x2c4   : > { %v6589_v46 = vpop.f32.mrb[68].mxu0 }
 0x2c5   : > { %v5448_v17 = vpop.f32.mrb[69].mxu0 }
 0x2c6   : > { %v6590_v52 = vpop.f32.mrb[70].mxu0 }
 0x2c7   : > { %v5451_v7 = vpop.f32.mrb[71].mxu0 }
 0x2cc   : > { %v9166_v32 = vpop.f32.mrb[72].mxu0 }
 0x2cd   : > { %v9168_v49 = vpop.f32.mrb[73].mxu0 }
 0x2ce   : > { %v9170_v56 = vpop.f32.mrb[74].mxu0 }
 0x2cf   : > { %v9172_v14 = vpop.f32.mrb[75].mxu0 }
 0x2d4   : > { %v9174_v33 = vpop.f32.mrb[76].mxu0 }
 0x2d5   : > { %v9176_v55 = vpop.f32.mrb[77].mxu0 }
 0x2d6   : > { %v9178_v51 = vpop.f32.mrb[78].mxu0 }
 0x2d7   : > { %v9180_v43 = vpop.f32.mrb[79].mxu0 }
 0x2dc   : > { %v9182_v1 = vpop.f32.mrb[80].mxu0 }
 0x2dd   : > { %v9184_v16 = vpop.f32.mrb[81].mxu0 }
 0x2de   : > { %v9186_v35 = vpop.f32.mrb[82].mxu0 }
 0x2df   : > { %v9188_v42 = vpop.f32.mrb[83].mxu0 }
 0x2e4   : > { %v9190_v57 = vpop.f32.mrb[84].mxu0 }
 0x2e5   : > { %v9192_v30 = vpop.f32.mrb[85].mxu0 }
 0x2e6   : > { %v9194_v4 = vpop.f32.mrb[86].mxu0 }
 0x2e7   : > { %v9196_v25 = vpop.f32.mrb[87].mxu0 }
 0x2ec   : > { %v9198_v36 = vpop.f32.mrb[88].mxu0 }
 0x2ed   : > { %v9200_v58 = vpop.f32.mrb[89].mxu0 }
 0x2ee   : > { %9734 = vst [vmem:[#allocation33_spill] sm:$0xff] %v9200_v58  ;;  %v9202_v61 = vpop.f32.mrb[90].mxu0 }
 0x2ef   : > { %9735 = vst [vmem:[#allocation29_spill] sm:$0xff] %v9202_v61  ;;  %v9204_v9 = vpop.f32.mrb[91].mxu0 }
 0x2f0   : > { %9736 = vst [vmem:[#allocation9_spill] sm:$0xff] %v9204_v9 }
 0x30c   : > { %v6545_v6 = vpop.f32.mrb[0].mxu1 }
 0x30d   : > { %v6623_v34 = vadd.f32 %v6545_v6, %v9102_v59  ;;  %v4989_v18 = vpop.f32.mrb[1].mxu1 }
 0x30e   : > { %v6625_v27 = vadd.f32 %v4989_v18, %v9104_v41  ;;  %v6546_v5 = vpop.f32.mrb[2].mxu1 }
 0x30f   : > { %v6624_v19 = vadd.f32 %v6623_v34, %v6585_v47  ;;  %v6627_v40 = vadd.f32 %v6546_v5, %v9106_v45  ;;  %v4992_v61 = vpop.f32.mrb[3].mxu1 }
 0x310   : > { %v6626_v9 = vadd.f32 %v6625_v27, %v5432_v8  ;;  %v6629_v24 = vadd.f32 %v4992_v61, %v9108_v10 }
 0x311   : > { %v5600_v58 = vadd.f32 %v6624_v19, %v9213_v11  ;;  %v6628_v12 = vadd.f32 %v6627_v40, %v6586_v54 }
 0x312   : > { %v5598_v59 = vadd.f32 %v6626_v9, %v9213_v11  ;;  %v6630_v6 = vadd.f32 %v6629_v24, %v5435_v48 }
 0x313   : > { %5632 = vst.msk [vmem:[%s9220_s17 + $0x10] sm:$0xff] %vm702_vm0, %v5600_v58  ;;  %v5601_v41 = vadd.f32 %v6628_v12, %v9213_v11 }
 0x314   : > { %5630 = vst.msk [vmem:[%s9220_s17] sm:$0xff] %vm702_vm0, %v5598_v59  ;;  %v5599_v45 = vadd.f32 %v6630_v6, %v9213_v11  ;;  %v6549_v10 = vpop.f32.mrb[4].mxu1 }
 0x315   : > { %5633 = vst.msk [vmem:[%s9220_s17 + $0x18] sm:$0xff] %vm702_vm0, %v5601_v41  ;;  %v6631_v24 = vadd.f32 %v6549_v10, %v9110_v3  ;;  %v5005_v40 = vpop.f32.mrb[5].mxu1 }
 0x316   : > { %5631 = vst.msk [vmem:[%s9220_s17 + $0x8] sm:$0xff] %vm702_vm0, %v5599_v45  ;;  %v6633_v19 = vadd.f32 %v5005_v40, %v9112_v2  ;;  %v6550_v5 = vpop.f32.mrb[6].mxu1 }
 0x317   : > { %v6632_v27 = vadd.f32 %v6631_v24, %v6589_v46  ;;  %v6635_v12 = vadd.f32 %v6550_v5, %v9114_v13  ;;  %v5008_v47 = vpop.f32.mrb[7].mxu1 }
 0x318   : > { %v6634_v8 = vadd.f32 %v6633_v19, %v5448_v17  ;;  %v6637_v54 = vadd.f32 %v5008_v47, %v9116_v44 }
 0x319   : > { %v5604_v48 = vadd.f32 %v6632_v27, %v9213_v11  ;;  %v6636_v58 = vadd.f32 %v6635_v12, %v6590_v52 }
 0x31a   : > { %v5602_v3 = vadd.f32 %v6634_v8, %v9213_v11  ;;  %v6638_v61 = vadd.f32 %v6637_v54, %v5451_v7 }
 0x31b   : > { %5636 = vst.msk [vmem:[%s9220_s17 + $0x30] sm:$0xff] %vm702_vm0, %v5604_v48  ;;  %v5605_v2 = vadd.f32 %v6636_v58, %v9213_v11 }
 0x31c   : > { %5634 = vst.msk [vmem:[%s9220_s17 + $0x20] sm:$0xff] %vm702_vm0, %v5602_v3  ;;  %v5603_v46 = vadd.f32 %v6638_v61, %v9213_v11  ;;  %v6553_v13 = vpop.f32.mrb[8].mxu1 }
 0x31d   : > { %5637 = vst.msk [vmem:[%s9220_s17 + $0x38] sm:$0xff] %vm702_vm0, %v5605_v2  ;;  %v6639_v44 = vadd.f32 %v6553_v13, %v9118_v23  ;;  %v5021_v17 = vpop.f32.mrb[9].mxu1 }
 0x31e   : > { %5635 = vst.msk [vmem:[%s9220_s17 + $0x28] sm:$0xff] %vm702_vm0, %v5603_v46  ;;  %v6641_v52 = vadd.f32 %v5021_v17, %v9120_v37  ;;  %v6554_v7 = vpop.f32.mrb[10].mxu1 }
 0x31f   : > { %v6640_v9 = vadd.f32 %v6639_v44, %v9166_v32  ;;  %v6643_v34 = vadd.f32 %v6554_v7, %v9122_v26  ;;  %v5024_v18 = vpop.f32.mrb[11].mxu1 }
 0x320   : > { %v6642_v59 = vadd.f32 %v6641_v52, %v9168_v49  ;;  %v6645_v6 = vadd.f32 %v5024_v18, %v9124_v21 }
 0x321   : > { %v5608_v23 = vadd.f32 %v6640_v9, %v9213_v11  ;;  %v6644_v41 = vadd.f32 %v6643_v34, %v9170_v56 }
 0x322   : > { %v5606_v45 = vadd.f32 %v6642_v59, %v9213_v11  ;;  %v6646_v37 = vadd.f32 %v6645_v6, %v9172_v14 }
 0x323   : > { %5640 = vst.msk [vmem:[%s9220_s17 + $0x50] sm:$0xff] %vm702_vm0, %v5608_v23  ;;  %v5609_v32 = vadd.f32 %v6644_v41, %v9213_v11  ;;  %v9737_v23 = vld [vmem:[#allocation10_spill] sm:$0xff] }
 0x324   : > { %5638 = vst.msk [vmem:[%s9220_s17 + $0x40] sm:$0xff] %vm702_vm0, %v5606_v45  ;;  %v5607_v26 = vadd.f32 %v6646_v37, %v9213_v11  ;;  %v6557_v10 = vpop.f32.mrb[12].mxu1  ;;  %v9738_v37 = vld [vmem:[#allocation33_spill] sm:$0xff] }
 0x325   : > { %5641 = vst.msk [vmem:[%s9220_s17 + $0x58] sm:$0xff] %vm702_vm0, %v5609_v32  ;;  %v6647_v21 = vadd.f32 %v6557_v10, %v9126_v0  ;;  %v5037_v49 = vpop.f32.mrb[13].mxu1 }
 0x326   : > { %5639 = vst.msk [vmem:[%s9220_s17 + $0x48] sm:$0xff] %vm702_vm0, %v5607_v26  ;;  %v6649_v56 = vadd.f32 %v5037_v49, %v9128_v15  ;;  %v6558_v14 = vpop.f32.mrb[14].mxu1  ;;  %v9739_v26 = vld [vmem:[#allocation37_spill] sm:$0xff] }
 0x327   : > { %v6648_v24 = vadd.f32 %v6647_v21, %v9174_v33  ;;  %v6651_v40 = vadd.f32 %v6558_v14, %v9130_v28  ;;  %v5040_v19 = vpop.f32.mrb[15].mxu1  ;;  %v9740_v21 = vld [vmem:[#allocation29_spill] sm:$0xff] }
 0x328   : > { %v6650_v5 = vadd.f32 %v6649_v56, %v9176_v55  ;;  %v6653_v27 = vadd.f32 %v5040_v19, %v9132_v38  ;;  %v9742_v19 = vld [vmem:[#allocation30_spill] sm:$0xff] }
 0x329   : > { %v5612_v0 = vadd.f32 %v6648_v24, %v9213_v11  ;;  %v6652_v12 = vadd.f32 %v6651_v40, %v9178_v51 }
 0x32a   : > { %v5610_v47 = vadd.f32 %v6650_v5, %v9213_v11  ;;  %v6654_v15 = vadd.f32 %v6653_v27, %v9180_v43 }
 0x32b   : > { %5644 = vst.msk [vmem:[%s9220_s17 + $0x70] sm:$0xff] %vm702_vm0, %v5612_v0  ;;  %v5613_v33 = vadd.f32 %v6652_v12, %v9213_v11  ;;  %v9743_v0 = vld [vmem:[#allocation36_spill] sm:$0xff] }
 0x32c   : > { %5642 = vst.msk [vmem:[%s9220_s17 + $0x60] sm:$0xff] %vm702_vm0, %v5610_v47  ;;  %v5611_v28 = vadd.f32 %v6654_v15, %v9213_v11  ;;  %v6561_v8 = vpop.f32.mrb[16].mxu1 }
 0x32d   : > { %5645 = vst.msk [vmem:[%s9220_s17 + $0x78] sm:$0xff] %vm702_vm0, %v5613_v33  ;;  %v6655_v38 = vadd.f32 %v6561_v8, %v9134_v53  ;;  %v5053_v55 = vpop.f32.mrb[17].mxu1  ;;  %v9744_v33 = vld [vmem:[#allocation31_spill] sm:$0xff] }
 0x32e   : > { %5643 = vst.msk [vmem:[%s9220_s17 + $0x68] sm:$0xff] %vm702_vm0, %v5611_v28  ;;  %v6657_v51 = vadd.f32 %v5053_v55, %v9136_v60  ;;  %v6562_v43 = vpop.f32.mrb[18].mxu1  ;;  %v9745_v55 = vld [vmem:[#allocation32_spill] sm:$0xff] }
 0x32f   : > { %v6656_v54 = vadd.f32 %v6655_v38, %v9182_v1  ;;  %v6659_v48 = vadd.f32 %v6562_v43, %v9138_v39  ;;  %v5056_v58 = vpop.f32.mrb[19].mxu1 }
 0x330   : > { %v6658_v3 = vadd.f32 %v6657_v51, %v9184_v16  ;;  %v6661_v61 = vadd.f32 %v5056_v58, %v9140_v31 }
 0x331   : > { %v5616_v53 = vadd.f32 %v6656_v54, %v9213_v11  ;;  %v6660_v2 = vadd.f32 %v6659_v48, %v9186_v35 }
 0x332   : > { %v5614_v46 = vadd.f32 %v6658_v3, %v9213_v11  ;;  %v6662_v60 = vadd.f32 %v6661_v61, %v9188_v42 }
 0x333   : > { %5648 = vst.msk [vmem:[%s9220_s17 + $0x90] sm:$0xff] %vm702_vm0, %v5616_v53  ;;  %v5617_v1 = vadd.f32 %v6660_v2, %v9213_v11 }
 0x334   : > { %5646 = vst.msk [vmem:[%s9220_s17 + $0x80] sm:$0xff] %vm702_vm0, %v5614_v46  ;;  %v5615_v39 = vadd.f32 %v6662_v60, %v9213_v11  ;;  %v6565_v13 = vpop.f32.mrb[20].mxu1 }
 0x335   : > { %5649 = vst.msk [vmem:[%s9220_s17 + $0x98] sm:$0xff] %vm702_vm0, %v5617_v1  ;;  %v6663_v31 = vadd.f32 %v6565_v13, %v9142_v62  ;;  %v5069_v16 = vpop.f32.mrb[21].mxu1 }
 0x336   : > { %5647 = vst.msk [vmem:[%s9220_s17 + $0x88] sm:$0xff] %vm702_vm0, %v5615_v39  ;;  %v6665_v35 = vadd.f32 %v5069_v16, %v9144_v29  ;;  %v6566_v42 = vpop.f32.mrb[22].mxu1 }
 0x337   : > { %v6664_v44 = vadd.f32 %v6663_v31, %v9190_v57  ;;  %v6667_v17 = vadd.f32 %v6566_v42, %v9146_v20  ;;  %v5072_v52 = vpop.f32.mrb[23].mxu1 }
 0x338   : > { %v6666_v7 = vadd.f32 %v6665_v35, %v9192_v30  ;;  %v6669_v9 = vadd.f32 %v5072_v52, %v9148_v22 }
 0x339   : > { %v5620_v62 = vadd.f32 %v6664_v44, %v9213_v11  ;;  %v6668_v34 = vadd.f32 %v6667_v17, %v9194_v4 }
 0x33a   : > { %v5618_v18 = vadd.f32 %v6666_v7, %v9213_v11  ;;  %v6670_v29 = vadd.f32 %v6669_v9, %v9196_v25 }
 0x33b   : > { %5652 = vst.msk [vmem:[%s9220_s17 + $0xb0] sm:$0xff] %vm702_vm0, %v5620_v62  ;;  %v5621_v57 = vadd.f32 %v6668_v34, %v9213_v11 }
 0x33c   : > { %5650 = vst.msk [vmem:[%s9220_s17 + $0xa0] sm:$0xff] %vm702_vm0, %v5618_v18  ;;  %v5619_v20 = vadd.f32 %v6670_v29, %v9213_v11  ;;  %v6569_v59 = vpop.f32.mrb[24].mxu1 }
 0x33d   : > { %5653 = vst.msk [vmem:[%s9220_s17 + $0xb8] sm:$0xff] %vm702_vm0, %v5621_v57  ;;  %v6671_v22 = vadd.f32 %v6569_v59, %v9150_v50  ;;  %v5085_v30 = vpop.f32.mrb[25].mxu1 }
 0x33e   : > { %5651 = vst.msk [vmem:[%s9220_s17 + $0xa8] sm:$0xff] %vm702_vm0, %v5619_v20  ;;  %v6673_v4 = vadd.f32 %v5085_v30, %v9152_v63  ;;  %v6570_v25 = vpop.f32.mrb[26].mxu1  ;;  %v9741_v63 = vld [vmem:[#allocation9_spill] sm:$0xff] }
 0x33f   : > { %v6672_v6 = vadd.f32 %v6671_v22, %v9198_v36  ;;  %v6675_v41 = vadd.f32 %v6570_v25, %v9737_v23  ;;  %v5088_v45 = vpop.f32.mrb[27].mxu1 }
 0x340   : > { %v6674_v32 = vadd.f32 %v6673_v4, %v9738_v37  ;;  %v6677_v10 = vadd.f32 %v5088_v45, %v9739_v26 }
 0x341   : > { %v5624_v50 = vadd.f32 %v6672_v6, %v9213_v11  ;;  %v6676_v49 = vadd.f32 %v6675_v41, %v9740_v21 }
 0x342   : > { %v5622_v56 = vadd.f32 %v6674_v32, %v9213_v11  ;;  %v6678_v14 = vadd.f32 %v6677_v10, %v9741_v63 }
 0x343   : > { %5656 = vst.msk [vmem:[%s9220_s17 + $0xd0] sm:$0xff] %vm702_vm0, %v5624_v50  ;;  %v5625_v36 = vadd.f32 %v6676_v49, %v9213_v11 }
 0x344   : > { %5654 = vst.msk [vmem:[%s9220_s17 + $0xc0] sm:$0xff] %vm702_vm0, %v5622_v56  ;;  %v5623_v24 = vadd.f32 %v6678_v14, %v9213_v11 }
 0x345   : > { %5657 = vst.msk [vmem:[%s9220_s17 + $0xd8] sm:$0xff] %vm702_vm0, %v5625_v36 }
 0x346   : > { %5655 = vst.msk [vmem:[%s9220_s17 + $0xc8] sm:$0xff] %vm702_vm0, %v5623_v24 }
 0x350   : > { %v6613_v40 = vpop.f32.mrb[28].mxu1 }
 0x351   : > { %v6679_v5 = vadd.f32 %v6613_v40, %v9742_v19  ;;  %v5544_v27 = vpop.f32.mrb[29].mxu1 }
 0x352   : > { %v6680_v12 = vadd.f32 %v5544_v27, %v9743_v0  ;;  %v6614_v47 = vpop.f32.mrb[30].mxu1 }
 0x353   : > { %v5628_v15 = vadd.f32 %v6679_v5, %v9213_v11  ;;  %v6681_v28 = vadd.f32 %v6614_v47, %v9744_v33  ;;  %v5547_v8 = vpop.f32.mrb[31].mxu1 }
 0x354   : > { %v5626_v38 = vadd.f32 %v6680_v12, %v9213_v11  ;;  %v6682_v51 = vadd.f32 %v5547_v8, %v9745_v55 }
 0x355   : > { %5660 = vst.msk [vmem:[%s9220_s17 + $0xf0] sm:$0xff] %vm702_vm0, %v5628_v15  ;;  %v5629_v43 = vadd.f32 %v6681_v28, %v9213_v11 }
 0x356   : > { %5658 = vst.msk [vmem:[%s9220_s17 + $0xe0] sm:$0xff] %vm702_vm0, %v5626_v38  ;;  %v5627_v54 = vadd.f32 %v6682_v51, %v9213_v11 }
 0x357   : > { %5661 = vst.msk [vmem:[%s9220_s17 + $0xf8] sm:$0xff] %vm702_vm0, %v5629_v43 }
 0x358   : > { %5659 = vst.msk [vmem:[%s9220_s17 + $0xe8] sm:$0xff] %vm702_vm0, %v5627_v54 }
 0x359   : > { %7016 = shalt.err (!%p7013_p3)
}
 0x35a   : > { %s7017_s13 = scalar_lea.hbm %s9362_s28, 4096  ;;  %s7021_s15 = scalar_lea.hbm %s9422_s6, 8192 }
 0x35b   : > { %p7018_p4 = scmp.ne.s32.totalorder %s9362_s28, %s7017_s13  ;;  %p7022_p9 = scmp.lt.u32.totalorder %s9362_s28, %s9422_s6 }
 0x35c   : > { %p7023_p10 = scmp.lt.u32.totalorder %s7021_s15, %s7017_s13  ;;  %p7025_p12 = scmp.lt.u32.totalorder %s7017_s13, %s9362_s28 }
 0x35d   : > { %p7019_p7 = pnand %p7018_p4, %p7145_p5 }
 0x35e   : > { %p7024_p11 = por %p7023_p10, %p7022_p9 }
 0x35f   : > { %p7020_p8 = pneg %p7019_p7 }
 0x360   : > { %p7026_p13 = por %p7025_p12, %p7024_p11 }
 0x362   : > { %p7027_p0 = pnand %p7026_p13, %p7020_p8 }
 0x364   : > { %7030 = shalt.err (!%p7027_p0)
}
 0x365   : > { %s7070_s18 = smov 128   ;;  %s7071_s20 = smov 8  }
 0x366   : > { %6879 = dma.vmem_to_hbm [thread:$0]  (%p7145_p5), %s9364_s19, 4096, %s9362_s28, %s9375_s25, %s7070_s18, %s7070_s18, %s7071_s20  }
 0x367 PF: > { %p6885_p1 = scmp.ge.s32.totalorder %s7065_s24, 2  ;;  %s5691_s26 = sand.u32 1, %s7053_s21  }
 0x368   : > { %s5692_s29 = scalar_lea.sflag [#allocation4], %s5691_s26 }
 0x369   : > { %p6882_p2 = pnand %p6885_p1, %p7149_p6 }
 0x36b   : > { %7048 = dma.done.wait (!%p6882_p2), %s5692_s29, 4096  }
 0x36c   : > { %7050 = vsyncadd (!%p6882_p2), %s5692_s29, 4294963200  ;;  %p16_p3 = scmp.ge.s32.totalorder %s7132_s27, 4   ;;  %s9746_s21 = smov %s7057_s22 }
 0x36d   : > { %s9747_s22 = smov %s7061_s23  ;;  %s9748_s23 = smov %s7143_s30 }
 0x36e   : > { %s9749_s24 = smov %s7132_s27  ;;  %18 = sbr.rel (!%p16_p3) target bundleno = 3 (0x3), region = 82 }
 0x375   :  { %5697 = vsyncpa [#allocation4], 1 }
 0x376   :  { %5699 = vsyncpa [#allocation4 + $0x1], 1 }

</bundles_post_ra>
